<compile_context>
chip_gen: v7x
topology: tpu7x:2x2x1
jax: 0.10.0
libtpu: 0.0.40
codegen_flags: <defaults>
</compile_context>

<pallas_src>
import functools

import numpy as np
import jax
import jax.numpy as jnp
from jax import lax
from jax.experimental import pallas as pl
from jax.experimental.pallas import tpu as pltpu


# ------------------------------ fused kernel --------------------------------
def _fused_kernel(B, xp_ref, t1_ref, b1_ref, t2_ref, b2_ref, t3_ref, b3_ref,
                  wl1_ref, bl1_ref, wl2_ref, bl2_ref, o_ref,
                  p1_ref, p2_ref, feats_ref):
    f32 = jnp.float32

    # Zero only the 2-row 'same'-padding borders of the inter-stage scratch buffers.
    # Interiors (rows 2:18 / 2:10) are fully overwritten for every image, so this
    # per-step border zeroing is sufficient and megacore-safe (no program_id gating).
    p1_ref[0:2, :] = jnp.zeros((2, 512), f32)
    p1_ref[18:20, :] = jnp.zeros((2, 512), f32)
    p2_ref[0:2, :] = jnp.zeros((2, 256), f32)
    p2_ref[10:12, :] = jnp.zeros((2, 256), f32)

    for b in range(B):                      # statically unrolled: B images per grid step
        x = xp_ref[b]                       # (36, 108) padded image, lanes = w*3 + ci

        # ---- conv1: 5 banded matmuls, K=108 -> N=1024 (one per kernel row) ----
        acc = jnp.dot(x[0:32, :], t1_ref[0], preferred_element_type=f32)
        for kh in range(1, 5):
            acc = acc + jnp.dot(x[kh:kh + 32, :], t1_ref[kh], preferred_element_type=f32)
        y = acc + b1_ref[...]               # (32, 1024), lanes = swizzled (w, co)
        y = y.reshape(16, 2, 1024)
        y = jnp.maximum(y[:, 0, :], y[:, 1, :])                   # 2x pool over h -> (16, 1024)
        p1_ref[2:18, :] = jnp.maximum(y[:, :512], y[:, 512:])     # 2x pool over w -> (16, 512)

        # ---- conv2: 5 banded matmuls, K=512 -> N=512 ----
        acc = jnp.dot(p1_ref[0:16, :], t2_ref[0], preferred_element_type=f32)
        for kh in range(1, 5):
            acc = acc + jnp.dot(p1_ref[kh:kh + 16, :], t2_ref[kh],
                                preferred_element_type=f32)
        y = acc + b2_ref[...]               # (16, 512)
        y = y.reshape(8, 2, 512)
        y = jnp.maximum(y[:, 0, :], y[:, 1, :])                   # (8, 512)
        p2_ref[2:10, :] = jnp.maximum(y[:, :256], y[:, 256:])     # (8, 256)

        # ---- conv3: 5 banded matmuls, K=256 -> N=512 ----
        acc = jnp.dot(p2_ref[0:8, :], t3_ref[0], preferred_element_type=f32)
        for kh in range(1, 5):
            acc = acc + jnp.dot(p2_ref[kh:kh + 8, :], t3_ref[kh],
                                preferred_element_type=f32)
        y = acc + b3_ref[...]               # (8, 512)
        y = y.reshape(4, 2, 512)
        y = jnp.maximum(y[:, 0, :], y[:, 1, :])                   # (4, 512)
        feat = jnp.maximum(y[:, :256], y[:, 256:])                # (4, 256): rows=h, lanes=w*64+co

        # Flatten (h, w, co) into row b of the block-wide feature buffer (4 tiny stores).
        for h in range(4):
            feats_ref[b:b + 1, h * 256:(h + 1) * 256] = feat[h:h + 1, :]

    # ---- linear1 + linear2 as two dense matmuls over the whole image block ----
    h1 = jnp.dot(feats_ref[...], wl1_ref[...], preferred_element_type=f32) + bl1_ref[...]
    out = jnp.dot(h1, wl2_ref[...], preferred_element_type=f32) + bl2_ref[...]
    o_ref[0] = out                           # (B, 10)


# ------------------- one-time weight-side transforms ------------------------
def _banded(w_hwio, in_w, out_w, pad):
    """Toeplitz/banded matrix for one kernel row of a width-5 'same' conv.

    Returns T of shape (5, in_w*ci, out_w*co) so that, for kernel row kh,
        y[h, n(w, co)] = sum_j x[h + kh, j] * T[kh, j, n(w, co)]
    with input lanes  j = w_in*ci + ci_idx  and output lanes
        n(w, co) = ((w % 2) * (out_w // 2) + w // 2) * co + co_idx .
    The even/odd-w output swizzle makes the following 2x2 max-pool a plain
    lane-slice max (no roll / compaction).  Out-of-range taps stay zero, which
    implements the 'same' padding along W with no physical padding.
    """
    kh_n, kw_n, ci, co = w_hwio.shape
    half = out_w // 2
    w_np = np.asarray(w_hwio, np.float32)
    T = np.zeros((kh_n, in_w * ci, out_w * co), np.float32)
    for kw in range(kw_n):
        for w in range(out_w):
            src = w + kw - pad
            if 0 <= src < in_w:
                n0 = ((w % 2) * half + (w // 2)) * co
                T[:, src * ci:(src + 1) * ci, n0:n0 + co] = w_np[:, kw]
    return jnp.asarray(T)


def prepare_params(params):
    """One-time transforms: banded conv weights, tiled biases, permuted w_l1."""
    t1 = _banded(params["w_c1"], 36, 32, 0)      # (5, 108, 1024)  (input is pre-padded in W)
    t2 = _banded(params["w_c2"], 16, 16, 2)      # (5, 512, 512)
    t3 = _banded(params["w_c3"], 8, 8, 2)        # (5, 256, 512)
    b1 = jnp.tile(params["b_c1"], 32).reshape(1, 1024)
    b2 = jnp.tile(params["b_c2"], 16).reshape(1, 512)
    b3 = jnp.tile(params["b_c3"], 8).reshape(1, 512)
    # torch flattens CHW; the kernel produces (h, w, c) features -> permute w_l1 rows once.
    wl1 = params["w_l1"].reshape(64, 4, 4, 64).transpose(1, 2, 0, 3).reshape(1024, 64)
    return dict(t1=t1, b1=b1, t2=t2, b2=b2, t3=t3, b3=b3,
                wl1=wl1, bl1=params["b_l1"].reshape(1, 64),
                wl2=params["w_l2"], bl2=params["b_l2"].reshape(1, 10))


# ------------------------------ full forward --------------------------------
def forward(x_nchw, prep, max_block=8):
    N = x_nchw.shape[0]
    # images per grid step; keep >= 2 grid steps when possible (v7x has 2 TensorCores)
    B = max(1, min(max_block, N // 2)) if N > 1 else 1
    n_blk = (N + B - 1) // B
    n_pad = n_blk * B

    # NCHW -> NHWC, 2-pixel 'same' pad, fold (w, ci) onto lanes: (N_pad, 36, 108).
    x = jnp.transpose(x_nchw, (0, 2, 3, 1)).astype(jnp.float32)
    xp = jnp.pad(x, ((0, n_pad - N), (2, 2), (2, 2), (0, 0)))
    xp = xp.reshape(n_pad, 36, 36 * 3)

    out = pl.pallas_call(
        functools.partial(_fused_kernel, B),
        out_shape=jax.ShapeDtypeStruct((n_blk, B, 10), jnp.float32),
        grid=(n_blk,),
        in_specs=[
            pl.BlockSpec((B, 36, 108), lambda i: (i, 0, 0)),        # padded images
            pl.BlockSpec((5, 108, 1024), lambda i: (0, 0, 0)),      # banded conv1 weights
            pl.BlockSpec((1, 1024), lambda i: (0, 0)),              # conv1 bias (tiled)
            pl.BlockSpec((5, 512, 512), lambda i: (0, 0, 0)),       # banded conv2 weights
            pl.BlockSpec((1, 512), lambda i: (0, 0)),               # conv2 bias
            pl.BlockSpec((5, 256, 512), lambda i: (0, 0, 0)),       # banded conv3 weights
            pl.BlockSpec((1, 512), lambda i: (0, 0)),               # conv3 bias
            pl.BlockSpec((1024, 64), lambda i: (0, 0)),             # linear1 (row-permuted)
            pl.BlockSpec((1, 64), lambda i: (0, 0)),                # linear1 bias
            pl.BlockSpec((64, 10), lambda i: (0, 0)),               # linear2
            pl.BlockSpec((1, 10), lambda i: (0, 0)),                # linear2 bias
        ],
        out_specs=pl.BlockSpec((1, B, 10), lambda i: (i, 0, 0)),
        scratch_shapes=[
            pltpu.VMEM((20, 512), jnp.float32),     # h-padded pool1 output
            pltpu.VMEM((12, 256), jnp.float32),     # h-padded pool2 output
            pltpu.VMEM((B, 1024), jnp.float32),     # flattened features for the block
        ],
        compiler_params=pltpu.CompilerParams(
            dimension_semantics=("parallel",),
            vmem_limit_bytes=48 * 1024 * 1024),
    )(xp, prep["t1"], prep["b1"], prep["t2"], prep["b2"], prep["t3"], prep["b3"],
      prep["wl1"], prep["bl1"], prep["wl2"], prep["bl2"])

    return out.reshape(n_pad, 10)[:N]


# --------------------------- pure-JAX reference ------------------------------
def ref_forward(x_nchw, params):
    def conv(x, w_hwio, b):
        w = jnp.transpose(w_hwio, (3, 2, 0, 1))                # HWIO -> OIHW
        y = lax.conv_general_dilated(x, w, window_strides=(1, 1),
                                     padding=((2, 2), (2, 2)),
                                     dimension_numbers=("NCHW", "OIHW", "NCHW"))
        return y + b.reshape(1, -1, 1, 1)

    def pool(x):
        return lax.reduce_window(x, -jnp.inf, lax.max,
                                 (1, 1, 2, 2), (1, 1, 2, 2), "VALID")

    x = pool(conv(x_nchw, params["w_c1"], params["b_c1"]))
    x = pool(conv(x, params["w_c2"], params["b_c2"]))
    x = pool(conv(x, params["w_c3"], params["b_c3"]))
    feat = x.reshape(x.shape[0], -1)                           # CHW flatten (torch order)
    h = feat @ params["w_l1"] + params["b_l1"]
    return h @ params["w_l2"] + params["b_l2"]


# ------------------------------- params --------------------------------------
def init_params(key):
    ks = jax.random.split(key, 10)

    def w(k, shape, scale=0.05):
        return (scale * jax.random.normal(k, shape)).astype(jnp.float32)

    return {
        "w_c1": w(ks[0], (5, 5, 3, 32)),    "b_c1": w(ks[1], (32,)),
        "w_c2": w(ks[2], (5, 5, 32, 32)),   "b_c2": w(ks[3], (32,)),
        "w_c3": w(ks[4], (5, 5, 32, 64)),   "b_c3": w(ks[5], (64,)),
        "w_l1": w(ks[6], (64 * 4 * 4, 64)), "b_l1": w(ks[7], (64,)),
        "w_l2": w(ks[8], (64, 10)),          "b_l2": w(ks[9], (10,)),
    }


if __name__ == "__main__":
    key = jax.random.PRNGKey(0)
    kx, kp = jax.random.split(key)
    # batch=2, 3x32x32 input (spatial size implied by Linear(64*4*4, 64))
    x = jax.random.normal(kx, (2, 3, 32, 32), dtype=jnp.float32)
    params = init_params(kp)
    prep = prepare_params(params)          # one-time weight-side transforms (outside jit)

    out = jax.jit(forward)(x, prep)
    out = jax.block_until_ready(out)
    assert out.shape == (2, 10), out.shape

    ref = jax.block_until_ready(ref_forward(x, params))
    assert jnp.allclose(out, ref, rtol=1e-3, atol=1e-3), (
        f"max abs err {jnp.max(jnp.abs(out - ref))}")

    print("KERNEL_OK")
</pallas_src>

<mosaic_0001>
module attributes {stable_mosaic.version = 11 : i64} {
  func.func @_fused_kernel(%arg0: i32, %arg1: memref<1x36x108xf32, #tpu.memory_space<vmem>>, %arg2: memref<5x108x1024xf32, #tpu.memory_space<vmem>>, %arg3: memref<1x1024xf32, #tpu.memory_space<vmem>>, %arg4: memref<5x512x512xf32, #tpu.memory_space<vmem>>, %arg5: memref<1x512xf32, #tpu.memory_space<vmem>>, %arg6: memref<5x256x512xf32, #tpu.memory_space<vmem>>, %arg7: memref<1x512xf32, #tpu.memory_space<vmem>>, %arg8: memref<1024x64xf32, #tpu.memory_space<vmem>>, %arg9: memref<1x64xf32, #tpu.memory_space<vmem>>, %arg10: memref<64x10xf32, #tpu.memory_space<vmem>>, %arg11: memref<1x10xf32, #tpu.memory_space<vmem>>, %arg12: memref<1x1x10xf32, #tpu.memory_space<vmem>>, %arg13: memref<20x512xf32, #tpu.memory_space<vmem>>, %arg14: memref<12x256xf32, #tpu.memory_space<vmem>>, %arg15: memref<1x1024xf32, #tpu.memory_space<vmem>>) attributes {dimension_semantics = [#tpu.dimension_semantics<parallel>], iteration_bounds = array<i64: 2>, scalar_prefetch = 0 : i64, scratch_operands = 3 : i64, tpu.core_type = #tpu.core_type<tc>, window_params = [{transform_indices = @transform_0, window_bounds = array<i64: 1, 36, 108>}, {pipeline_mode = #tpu.pipeline_mode<synchronous>, transform_indices = @transform_1, window_bounds = array<i64: 5, 108, 1024>}, {pipeline_mode = #tpu.pipeline_mode<synchronous>, transform_indices = @transform_2, window_bounds = array<i64: 1, 1024>}, {pipeline_mode = #tpu.pipeline_mode<synchronous>, transform_indices = @transform_3, window_bounds = array<i64: 5, 512, 512>}, {pipeline_mode = #tpu.pipeline_mode<synchronous>, transform_indices = @transform_4, window_bounds = array<i64: 1, 512>}, {pipeline_mode = #tpu.pipeline_mode<synchronous>, transform_indices = @transform_5, window_bounds = array<i64: 5, 256, 512>}, {pipeline_mode = #tpu.pipeline_mode<synchronous>, transform_indices = @transform_6, window_bounds = array<i64: 1, 512>}, {pipeline_mode = #tpu.pipeline_mode<synchronous>, transform_indices = @transform_7, window_bounds = array<i64: 1024, 64>}, {pipeline_mode = #tpu.pipeline_mode<synchronous>, transform_indices = @transform_8, window_bounds = array<i64: 1, 64>}, {pipeline_mode = #tpu.pipeline_mode<synchronous>, transform_indices = @transform_9, window_bounds = array<i64: 64, 10>}, {pipeline_mode = #tpu.pipeline_mode<synchronous>, transform_indices = @transform_10, window_bounds = array<i64: 1, 10>}, {transform_indices = @transform_11, window_bounds = array<i64: 1, 1, 10>}]} {
    %cst = arith.constant 0.000000e+00 : f32
    %0 = vector.broadcast %cst : f32 to vector<2x512xf32>
    %c0 = arith.constant 0 : index
    %c0_0 = arith.constant 0 : index
    %1 = vector.load %arg13[%c0, %c0_0] : memref<20x512xf32, #tpu.memory_space<vmem>>, vector<2x512xf32>
    tpu.vector_store %arg13[%c0, %c0_0], %0 {strides = array<i32>} : memref<20x512xf32, #tpu.memory_space<vmem>>, vector<2x512xf32>,
    %cst_1 = arith.constant 0.000000e+00 : f32
    %2 = vector.broadcast %cst_1 : f32 to vector<2x512xf32>
    %c18 = arith.constant 18 : index
    %c0_2 = arith.constant 0 : index
    %3 = vector.load %arg13[%c18, %c0_2] : memref<20x512xf32, #tpu.memory_space<vmem>>, vector<2x512xf32>
    tpu.vector_store %arg13[%c18, %c0_2], %2 {strides = array<i32>} : memref<20x512xf32, #tpu.memory_space<vmem>>, vector<2x512xf32>,
    %cst_3 = arith.constant 0.000000e+00 : f32
    %4 = vector.broadcast %cst_3 : f32 to vector<2x256xf32>
    %c0_4 = arith.constant 0 : index
    %c0_5 = arith.constant 0 : index
    %5 = vector.load %arg14[%c0_4, %c0_5] : memref<12x256xf32, #tpu.memory_space<vmem>>, vector<2x256xf32>
    tpu.vector_store %arg14[%c0_4, %c0_5], %4 {strides = array<i32>} : memref<12x256xf32, #tpu.memory_space<vmem>>, vector<2x256xf32>,
    %cst_6 = arith.constant 0.000000e+00 : f32
    %6 = vector.broadcast %cst_6 : f32 to vector<2x256xf32>
    %c10 = arith.constant 10 : index
    %c0_7 = arith.constant 0 : index
    %7 = vector.load %arg14[%c10, %c0_7] : memref<12x256xf32, #tpu.memory_space<vmem>>, vector<2x256xf32>
    tpu.vector_store %arg14[%c10, %c0_7], %6 {strides = array<i32>} : memref<12x256xf32, #tpu.memory_space<vmem>>, vector<2x256xf32>,
    %c0_8 = arith.constant 0 : index
    %c0_9 = arith.constant 0 : index
    %c0_10 = arith.constant 0 : index
    %8 = vector.load %arg1[%c0_8, %c0_9, %c0_10] : memref<1x36x108xf32, #tpu.memory_space<vmem>>, vector<1x36x108xf32>
    %9 = vector.shape_cast %8 : vector<1x36x108xf32> to vector<36x108xf32>
    %10 = vector.extract_strided_slice %9 {offsets = [0, 0], sizes = [32, 108], strides = [1, 1]} : vector<36x108xf32> to vector<32x108xf32>
    %c0_11 = arith.constant 0 : index
    %c0_12 = arith.constant 0 : index
    %c0_13 = arith.constant 0 : index
    %11 = vector.load %arg2[%c0_11, %c0_12, %c0_13] : memref<5x108x1024xf32, #tpu.memory_space<vmem>>, vector<1x108x1024xf32>
    %12 = vector.shape_cast %11 : vector<1x108x1024xf32> to vector<108x1024xf32>
    %cst_14 = arith.constant dense<0.000000e+00> : vector<32x1024xf32>
    %13 = tpu.matmul %10, %12, %cst_14 {dimension_numbers = #tpu.dot_dimension_numbers<[1], [0], [0], [1], [0, 0, 1, 1], [], []>} : vector<32x108xf32>, vector<108x1024xf32>, vector<32x1024xf32> -> vector<32x1024xf32>
    %14 = vector.extract_strided_slice %9 {offsets = [1, 0], sizes = [32, 108], strides = [1, 1]} : vector<36x108xf32> to vector<32x108xf32>
    %c1 = arith.constant 1 : index
    %c0_15 = arith.constant 0 : index
    %c0_16 = arith.constant 0 : index
    %15 = vector.load %arg2[%c1, %c0_15, %c0_16] : memref<5x108x1024xf32, #tpu.memory_space<vmem>>, vector<1x108x1024xf32>
    %16 = vector.shape_cast %15 : vector<1x108x1024xf32> to vector<108x1024xf32>
    %cst_17 = arith.constant dense<0.000000e+00> : vector<32x1024xf32>
    %17 = tpu.matmul %14, %16, %cst_17 {dimension_numbers = #tpu.dot_dimension_numbers<[1], [0], [0], [1], [0, 0, 1, 1], [], []>} : vector<32x108xf32>, vector<108x1024xf32>, vector<32x1024xf32> -> vector<32x1024xf32>
    %18 = arith.addf %13, %17 : vector<32x1024xf32>
    %19 = vector.extract_strided_slice %9 {offsets = [2, 0], sizes = [32, 108], strides = [1, 1]} : vector<36x108xf32> to vector<32x108xf32>
    %c2 = arith.constant 2 : index
    %c0_18 = arith.constant 0 : index
    %c0_19 = arith.constant 0 : index
    %20 = vector.load %arg2[%c2, %c0_18, %c0_19] : memref<5x108x1024xf32, #tpu.memory_space<vmem>>, vector<1x108x1024xf32>
    %21 = vector.shape_cast %20 : vector<1x108x1024xf32> to vector<108x1024xf32>
    %cst_20 = arith.constant dense<0.000000e+00> : vector<32x1024xf32>
    %22 = tpu.matmul %19, %21, %cst_20 {dimension_numbers = #tpu.dot_dimension_numbers<[1], [0], [0], [1], [0, 0, 1, 1], [], []>} : vector<32x108xf32>, vector<108x1024xf32>, vector<32x1024xf32> -> vector<32x1024xf32>
    %23 = arith.addf %18, %22 : vector<32x1024xf32>
    %24 = vector.extract_strided_slice %9 {offsets = [3, 0], sizes = [32, 108], strides = [1, 1]} : vector<36x108xf32> to vector<32x108xf32>
    %c3 = arith.constant 3 : index
    %c0_21 = arith.constant 0 : index
    %c0_22 = arith.constant 0 : index
    %25 = vector.load %arg2[%c3, %c0_21, %c0_22] : memref<5x108x1024xf32, #tpu.memory_space<vmem>>, vector<1x108x1024xf32>
    %26 = vector.shape_cast %25 : vector<1x108x1024xf32> to vector<108x1024xf32>
    %cst_23 = arith.constant dense<0.000000e+00> : vector<32x1024xf32>
    %27 = tpu.matmul %24, %26, %cst_23 {dimension_numbers = #tpu.dot_dimension_numbers<[1], [0], [0], [1], [0, 0, 1, 1], [], []>} : vector<32x108xf32>, vector<108x1024xf32>, vector<32x1024xf32> -> vector<32x1024xf32>
    %28 = arith.addf %23, %27 : vector<32x1024xf32>
    %29 = vector.extract_strided_slice %9 {offsets = [4, 0], sizes = [32, 108], strides = [1, 1]} : vector<36x108xf32> to vector<32x108xf32>
    %c4 = arith.constant 4 : index
    %c0_24 = arith.constant 0 : index
    %c0_25 = arith.constant 0 : index
    %30 = vector.load %arg2[%c4, %c0_24, %c0_25] : memref<5x108x1024xf32, #tpu.memory_space<vmem>>, vector<1x108x1024xf32>
    %31 = vector.shape_cast %30 : vector<1x108x1024xf32> to vector<108x1024xf32>
    %cst_26 = arith.constant dense<0.000000e+00> : vector<32x1024xf32>
    %32 = tpu.matmul %29, %31, %cst_26 {dimension_numbers = #tpu.dot_dimension_numbers<[1], [0], [0], [1], [0, 0, 1, 1], [], []>} : vector<32x108xf32>, vector<108x1024xf32>, vector<32x1024xf32> -> vector<32x1024xf32>
    %33 = arith.addf %28, %32 : vector<32x1024xf32>
    %c0_27 = arith.constant 0 : index
    %c0_28 = arith.constant 0 : index
    %34 = vector.load %arg3[%c0_27, %c0_28] : memref<1x1024xf32, #tpu.memory_space<vmem>>, vector<1x1024xf32>
    %35 = vector.broadcast %34 : vector<1x1024xf32> to vector<32x1024xf32>
    %36 = arith.addf %33, %35 : vector<32x1024xf32>
    %37 = vector.shape_cast %36 : vector<32x1024xf32> to vector<16x2x1024xf32>
    %38 = vector.extract_strided_slice %37 {offsets = [0, 0, 0], sizes = [16, 1, 1024], strides = [1, 1, 1]} : vector<16x2x1024xf32> to vector<16x1x1024xf32>
    %39 = vector.shape_cast %38 : vector<16x1x1024xf32> to vector<16x1024xf32>
    %40 = vector.extract_strided_slice %37 {offsets = [0, 1, 0], sizes = [16, 1, 1024], strides = [1, 1, 1]} : vector<16x2x1024xf32> to vector<16x1x1024xf32>
    %41 = vector.shape_cast %40 : vector<16x1x1024xf32> to vector<16x1024xf32>
    %42 = arith.maximumf %39, %41 : vector<16x1024xf32>
    %43 = vector.extract_strided_slice %42 {offsets = [0, 0], sizes = [16, 512], strides = [1, 1]} : vector<16x1024xf32> to vector<16x512xf32>
    %44 = vector.extract_strided_slice %42 {offsets = [0, 512], sizes = [16, 512], strides = [1, 1]} : vector<16x1024xf32> to vector<16x512xf32>
    %45 = arith.maximumf %43, %44 : vector<16x512xf32>
    %c2_29 = arith.constant 2 : index
    %c0_30 = arith.constant 0 : index
    %46 = vector.load %arg13[%c2_29, %c0_30] : memref<20x512xf32, #tpu.memory_space<vmem>>, vector<16x512xf32>
    tpu.vector_store %arg13[%c2_29, %c0_30], %45 {strides = array<i32>} : memref<20x512xf32, #tpu.memory_space<vmem>>, vector<16x512xf32>,
    %c0_31 = arith.constant 0 : index
    %c0_32 = arith.constant 0 : index
    %47 = vector.load %arg13[%c0_31, %c0_32] : memref<20x512xf32, #tpu.memory_space<vmem>>, vector<16x512xf32>
    %c0_33 = arith.constant 0 : index
    %c0_34 = arith.constant 0 : index
    %c0_35 = arith.constant 0 : index
    %48 = vector.load %arg4[%c0_33, %c0_34, %c0_35] : memref<5x512x512xf32, #tpu.memory_space<vmem>>, vector<1x512x512xf32>
    %49 = vector.shape_cast %48 : vector<1x512x512xf32> to vector<512x512xf32>
    %cst_36 = arith.constant dense<0.000000e+00> : vector<16x512xf32>
    %50 = tpu.matmul %47, %49, %cst_36 {dimension_numbers = #tpu.dot_dimension_numbers<[1], [0], [0], [1], [0, 0, 1, 1], [], []>} : vector<16x512xf32>, vector<512x512xf32>, vector<16x512xf32> -> vector<16x512xf32>
    %c1_37 = arith.constant 1 : index
    %c0_38 = arith.constant 0 : index
    %51 = vector.load %arg13[%c1_37, %c0_38] : memref<20x512xf32, #tpu.memory_space<vmem>>, vector<16x512xf32>
    %c1_39 = arith.constant 1 : index
    %c0_40 = arith.constant 0 : index
    %c0_41 = arith.constant 0 : index
    %52 = vector.load %arg4[%c1_39, %c0_40, %c0_41] : memref<5x512x512xf32, #tpu.memory_space<vmem>>, vector<1x512x512xf32>
    %53 = vector.shape_cast %52 : vector<1x512x512xf32> to vector<512x512xf32>
    %cst_42 = arith.constant dense<0.000000e+00> : vector<16x512xf32>
    %54 = tpu.matmul %51, %53, %cst_42 {dimension_numbers = #tpu.dot_dimension_numbers<[1], [0], [0], [1], [0, 0, 1, 1], [], []>} : vector<16x512xf32>, vector<512x512xf32>, vector<16x512xf32> -> vector<16x512xf32>
    %55 = arith.addf %50, %54 : vector<16x512xf32>
    %c2_43 = arith.constant 2 : index
    %c0_44 = arith.constant 0 : index
    %56 = vector.load %arg13[%c2_43, %c0_44] : memref<20x512xf32, #tpu.memory_space<vmem>>, vector<16x512xf32>
    %c2_45 = arith.constant 2 : index
    %c0_46 = arith.constant 0 : index
    %c0_47 = arith.constant 0 : index
    %57 = vector.load %arg4[%c2_45, %c0_46, %c0_47] : memref<5x512x512xf32, #tpu.memory_space<vmem>>, vector<1x512x512xf32>
    %58 = vector.shape_cast %57 : vector<1x512x512xf32> to vector<512x512xf32>
    %cst_48 = arith.constant dense<0.000000e+00> : vector<16x512xf32>
    %59 = tpu.matmul %56, %58, %cst_48 {dimension_numbers = #tpu.dot_dimension_numbers<[1], [0], [0], [1], [0, 0, 1, 1], [], []>} : vector<16x512xf32>, vector<512x512xf32>, vector<16x512xf32> -> vector<16x512xf32>
    %60 = arith.addf %55, %59 : vector<16x512xf32>
    %c3_49 = arith.constant 3 : index
    %c0_50 = arith.constant 0 : index
    %61 = vector.load %arg13[%c3_49, %c0_50] : memref<20x512xf32, #tpu.memory_space<vmem>>, vector<16x512xf32>
    %c3_51 = arith.constant 3 : index
    %c0_52 = arith.constant 0 : index
    %c0_53 = arith.constant 0 : index
    %62 = vector.load %arg4[%c3_51, %c0_52, %c0_53] : memref<5x512x512xf32, #tpu.memory_space<vmem>>, vector<1x512x512xf32>
    %63 = vector.shape_cast %62 : vector<1x512x512xf32> to vector<512x512xf32>
    %cst_54 = arith.constant dense<0.000000e+00> : vector<16x512xf32>
    %64 = tpu.matmul %61, %63, %cst_54 {dimension_numbers = #tpu.dot_dimension_numbers<[1], [0], [0], [1], [0, 0, 1, 1], [], []>} : vector<16x512xf32>, vector<512x512xf32>, vector<16x512xf32> -> vector<16x512xf32>
    %65 = arith.addf %60, %64 : vector<16x512xf32>
    %c4_55 = arith.constant 4 : index
    %c0_56 = arith.constant 0 : index
    %66 = vector.load %arg13[%c4_55, %c0_56] : memref<20x512xf32, #tpu.memory_space<vmem>>, vector<16x512xf32>
    %c4_57 = arith.constant 4 : index
    %c0_58 = arith.constant 0 : index
    %c0_59 = arith.constant 0 : index
    %67 = vector.load %arg4[%c4_57, %c0_58, %c0_59] : memref<5x512x512xf32, #tpu.memory_space<vmem>>, vector<1x512x512xf32>
    %68 = vector.shape_cast %67 : vector<1x512x512xf32> to vector<512x512xf32>
    %cst_60 = arith.constant dense<0.000000e+00> : vector<16x512xf32>
    %69 = tpu.matmul %66, %68, %cst_60 {dimension_numbers = #tpu.dot_dimension_numbers<[1], [0], [0], [1], [0, 0, 1, 1], [], []>} : vector<16x512xf32>, vector<512x512xf32>, vector<16x512xf32> -> vector<16x512xf32>
    %70 = arith.addf %65, %69 : vector<16x512xf32>
    %c0_61 = arith.constant 0 : index
    %c0_62 = arith.constant 0 : index
    %71 = vector.load %arg5[%c0_61, %c0_62] : memref<1x512xf32, #tpu.memory_space<vmem>>, vector<1x512xf32>
    %72 = vector.broadcast %71 : vector<1x512xf32> to vector<16x512xf32>
    %73 = arith.addf %70, %72 : vector<16x512xf32>
    %74 = vector.shape_cast %73 : vector<16x512xf32> to vector<8x2x512xf32>
    %75 = vector.extract_strided_slice %74 {offsets = [0, 0, 0], sizes = [8, 1, 512], strides = [1, 1, 1]} : vector<8x2x512xf32> to vector<8x1x512xf32>
    %76 = vector.shape_cast %75 : vector<8x1x512xf32> to vector<8x512xf32>
    %77 = vector.extract_strided_slice %74 {offsets = [0, 1, 0], sizes = [8, 1, 512], strides = [1, 1, 1]} : vector<8x2x512xf32> to vector<8x1x512xf32>
    %78 = vector.shape_cast %77 : vector<8x1x512xf32> to vector<8x512xf32>
    %79 = arith.maximumf %76, %78 : vector<8x512xf32>
    %80 = vector.extract_strided_slice %79 {offsets = [0, 0], sizes = [8, 256], strides = [1, 1]} : vector<8x512xf32> to vector<8x256xf32>
    %81 = vector.extract_strided_slice %79 {offsets = [0, 256], sizes = [8, 256], strides = [1, 1]} : vector<8x512xf32> to vector<8x256xf32>
    %82 = arith.maximumf %80, %81 : vector<8x256xf32>
    %c2_63 = arith.constant 2 : index
    %c0_64 = arith.constant 0 : index
    %83 = vector.load %arg14[%c2_63, %c0_64] : memref<12x256xf32, #tpu.memory_space<vmem>>, vector<8x256xf32>
    tpu.vector_store %arg14[%c2_63, %c0_64], %82 {strides = array<i32>} : memref<12x256xf32, #tpu.memory_space<vmem>>, vector<8x256xf32>,
    %c0_65 = arith.constant 0 : index
    %c0_66 = arith.constant 0 : index
    %84 = vector.load %arg14[%c0_65, %c0_66] : memref<12x256xf32, #tpu.memory_space<vmem>>, vector<8x256xf32>
    %c0_67 = arith.constant 0 : index
    %c0_68 = arith.constant 0 : index
    %c0_69 = arith.constant 0 : index
    %85 = vector.load %arg6[%c0_67, %c0_68, %c0_69] : memref<5x256x512xf32, #tpu.memory_space<vmem>>, vector<1x256x512xf32>
    %86 = vector.shape_cast %85 : vector<1x256x512xf32> to vector<256x512xf32>
    %cst_70 = arith.constant dense<0.000000e+00> : vector<8x512xf32>
    %87 = tpu.matmul %84, %86, %cst_70 {dimension_numbers = #tpu.dot_dimension_numbers<[1], [0], [0], [1], [0, 0, 1, 1], [], []>} : vector<8x256xf32>, vector<256x512xf32>, vector<8x512xf32> -> vector<8x512xf32>
    %c1_71 = arith.constant 1 : index
    %c0_72 = arith.constant 0 : index
    %88 = vector.load %arg14[%c1_71, %c0_72] : memref<12x256xf32, #tpu.memory_space<vmem>>, vector<8x256xf32>
    %c1_73 = arith.constant 1 : index
    %c0_74 = arith.constant 0 : index
    %c0_75 = arith.constant 0 : index
    %89 = vector.load %arg6[%c1_73, %c0_74, %c0_75] : memref<5x256x512xf32, #tpu.memory_space<vmem>>, vector<1x256x512xf32>
    %90 = vector.shape_cast %89 : vector<1x256x512xf32> to vector<256x512xf32>
    %cst_76 = arith.constant dense<0.000000e+00> : vector<8x512xf32>
    %91 = tpu.matmul %88, %90, %cst_76 {dimension_numbers = #tpu.dot_dimension_numbers<[1], [0], [0], [1], [0, 0, 1, 1], [], []>} : vector<8x256xf32>, vector<256x512xf32>, vector<8x512xf32> -> vector<8x512xf32>
    %92 = arith.addf %87, %91 : vector<8x512xf32>
    %c2_77 = arith.constant 2 : index
    %c0_78 = arith.constant 0 : index
    %93 = vector.load %arg14[%c2_77, %c0_78] : memref<12x256xf32, #tpu.memory_space<vmem>>, vector<8x256xf32>
    %c2_79 = arith.constant 2 : index
    %c0_80 = arith.constant 0 : index
    %c0_81 = arith.constant 0 : index
    %94 = vector.load %arg6[%c2_79, %c0_80, %c0_81] : memref<5x256x512xf32, #tpu.memory_space<vmem>>, vector<1x256x512xf32>
    %95 = vector.shape_cast %94 : vector<1x256x512xf32> to vector<256x512xf32>
    %cst_82 = arith.constant dense<0.000000e+00> : vector<8x512xf32>
    %96 = tpu.matmul %93, %95, %cst_82 {dimension_numbers = #tpu.dot_dimension_numbers<[1], [0], [0], [1], [0, 0, 1, 1], [], []>} : vector<8x256xf32>, vector<256x512xf32>, vector<8x512xf32> -> vector<8x512xf32>
    %97 = arith.addf %92, %96 : vector<8x512xf32>
    %c3_83 = arith.constant 3 : index
    %c0_84 = arith.constant 0 : index
    %98 = vector.load %arg14[%c3_83, %c0_84] : memref<12x256xf32, #tpu.memory_space<vmem>>, vector<8x256xf32>
    %c3_85 = arith.constant 3 : index
    %c0_86 = arith.constant 0 : index
    %c0_87 = arith.constant 0 : index
    %99 = vector.load %arg6[%c3_85, %c0_86, %c0_87] : memref<5x256x512xf32, #tpu.memory_space<vmem>>, vector<1x256x512xf32>
    %100 = vector.shape_cast %99 : vector<1x256x512xf32> to vector<256x512xf32>
    %cst_88 = arith.constant dense<0.000000e+00> : vector<8x512xf32>
    %101 = tpu.matmul %98, %100, %cst_88 {dimension_numbers = #tpu.dot_dimension_numbers<[1], [0], [0], [1], [0, 0, 1, 1], [], []>} : vector<8x256xf32>, vector<256x512xf32>, vector<8x512xf32> -> vector<8x512xf32>
    %102 = arith.addf %97, %101 : vector<8x512xf32>
    %c4_89 = arith.constant 4 : index
    %c0_90 = arith.constant 0 : index
    %103 = vector.load %arg14[%c4_89, %c0_90] : memref<12x256xf32, #tpu.memory_space<vmem>>, vector<8x256xf32>
    %c4_91 = arith.constant 4 : index
    %c0_92 = arith.constant 0 : index
    %c0_93 = arith.constant 0 : index
    %104 = vector.load %arg6[%c4_91, %c0_92, %c0_93] : memref<5x256x512xf32, #tpu.memory_space<vmem>>, vector<1x256x512xf32>
    %105 = vector.shape_cast %104 : vector<1x256x512xf32> to vector<256x512xf32>
    %cst_94 = arith.constant dense<0.000000e+00> : vector<8x512xf32>
    %106 = tpu.matmul %103, %105, %cst_94 {dimension_numbers = #tpu.dot_dimension_numbers<[1], [0], [0], [1], [0, 0, 1, 1], [], []>} : vector<8x256xf32>, vector<256x512xf32>, vector<8x512xf32> -> vector<8x512xf32>
    %107 = arith.addf %102, %106 : vector<8x512xf32>
    %c0_95 = arith.constant 0 : index
    %c0_96 = arith.constant 0 : index
    %108 = vector.load %arg7[%c0_95, %c0_96] : memref<1x512xf32, #tpu.memory_space<vmem>>, vector<1x512xf32>
    %109 = vector.broadcast %108 : vector<1x512xf32> to vector<8x512xf32>
    %110 = arith.addf %107, %109 : vector<8x512xf32>
    %111 = vector.shape_cast %110 : vector<8x512xf32> to vector<4x2x512xf32>
    %112 = vector.extract_strided_slice %111 {offsets = [0, 0, 0], sizes = [4, 1, 512], strides = [1, 1, 1]} : vector<4x2x512xf32> to vector<4x1x512xf32>
    %113 = vector.shape_cast %112 : vector<4x1x512xf32> to vector<4x512xf32>
    %114 = vector.extract_strided_slice %111 {offsets = [0, 1, 0], sizes = [4, 1, 512], strides = [1, 1, 1]} : vector<4x2x512xf32> to vector<4x1x512xf32>
    %115 = vector.shape_cast %114 : vector<4x1x512xf32> to vector<4x512xf32>
    %116 = arith.maximumf %113, %115 : vector<4x512xf32>
    %117 = vector.extract_strided_slice %116 {offsets = [0, 0], sizes = [4, 256], strides = [1, 1]} : vector<4x512xf32> to vector<4x256xf32>
    %118 = vector.extract_strided_slice %116 {offsets = [0, 256], sizes = [4, 256], strides = [1, 1]} : vector<4x512xf32> to vector<4x256xf32>
    %119 = arith.maximumf %117, %118 : vector<4x256xf32>
    %120 = vector.extract_strided_slice %119 {offsets = [0, 0], sizes = [1, 256], strides = [1, 1]} : vector<4x256xf32> to vector<1x256xf32>
    %c0_97 = arith.constant 0 : index
    %c0_98 = arith.constant 0 : index
    %121 = vector.load %arg15[%c0_97, %c0_98] : memref<1x1024xf32, #tpu.memory_space<vmem>>, vector<1x256xf32>
    tpu.vector_store %arg15[%c0_97, %c0_98], %120 {strides = array<i32>} : memref<1x1024xf32, #tpu.memory_space<vmem>>, vector<1x256xf32>,
    %122 = vector.extract_strided_slice %119 {offsets = [1, 0], sizes = [1, 256], strides = [1, 1]} : vector<4x256xf32> to vector<1x256xf32>
    %c0_99 = arith.constant 0 : index
    %c256 = arith.constant 256 : index
    %123 = vector.load %arg15[%c0_99, %c256] : memref<1x1024xf32, #tpu.memory_space<vmem>>, vector<1x256xf32>
    tpu.vector_store %arg15[%c0_99, %c256], %122 {strides = array<i32>} : memref<1x1024xf32, #tpu.memory_space<vmem>>, vector<1x256xf32>,
    %124 = vector.extract_strided_slice %119 {offsets = [2, 0], sizes = [1, 256], strides = [1, 1]} : vector<4x256xf32> to vector<1x256xf32>
    %c0_100 = arith.constant 0 : index
    %c512 = arith.constant 512 : index
    %125 = vector.load %arg15[%c0_100, %c512] : memref<1x1024xf32, #tpu.memory_space<vmem>>, vector<1x256xf32>
    tpu.vector_store %arg15[%c0_100, %c512], %124 {strides = array<i32>} : memref<1x1024xf32, #tpu.memory_space<vmem>>, vector<1x256xf32>,
    %126 = vector.extract_strided_slice %119 {offsets = [3, 0], sizes = [1, 256], strides = [1, 1]} : vector<4x256xf32> to vector<1x256xf32>
    %c0_101 = arith.constant 0 : index
    %c768 = arith.constant 768 : index
    %127 = vector.load %arg15[%c0_101, %c768] : memref<1x1024xf32, #tpu.memory_space<vmem>>, vector<1x256xf32>
    tpu.vector_store %arg15[%c0_101, %c768], %126 {strides = array<i32>} : memref<1x1024xf32, #tpu.memory_space<vmem>>, vector<1x256xf32>,
    %c0_102 = arith.constant 0 : index
    %c0_103 = arith.constant 0 : index
    %128 = vector.load %arg15[%c0_102, %c0_103] : memref<1x1024xf32, #tpu.memory_space<vmem>>, vector<1x1024xf32>
    %c0_104 = arith.constant 0 : index
    %c0_105 = arith.constant 0 : index
    %129 = vector.load %arg8[%c0_104, %c0_105] : memref<1024x64xf32, #tpu.memory_space<vmem>>, vector<1024x64xf32>
    %cst_106 = arith.constant dense<0.000000e+00> : vector<1x64xf32>
    %130 = tpu.matmul %128, %129, %cst_106 {dimension_numbers = #tpu.dot_dimension_numbers<[1], [0], [0], [1], [0, 0, 1, 1], [], []>} : vector<1x1024xf32>, vector<1024x64xf32>, vector<1x64xf32> -> vector<1x64xf32>
    %c0_107 = arith.constant 0 : index
    %c0_108 = arith.constant 0 : index
    %131 = vector.load %arg9[%c0_107, %c0_108] : memref<1x64xf32, #tpu.memory_space<vmem>>, vector<1x64xf32>
    %132 = arith.addf %130, %131 : vector<1x64xf32>
    %c0_109 = arith.constant 0 : index
    %c0_110 = arith.constant 0 : index
    %133 = vector.load %arg10[%c0_109, %c0_110] : memref<64x10xf32, #tpu.memory_space<vmem>>, vector<64x10xf32>
    %cst_111 = arith.constant dense<0.000000e+00> : vector<1x10xf32>
    %134 = tpu.matmul %132, %133, %cst_111 {dimension_numbers = #tpu.dot_dimension_numbers<[1], [0], [0], [1], [0, 0, 1, 1], [], []>} : vector<1x64xf32>, vector<64x10xf32>, vector<1x10xf32> -> vector<1x10xf32>
    %c0_112 = arith.constant 0 : index
    %c0_113 = arith.constant 0 : index
    %135 = vector.load %arg11[%c0_112, %c0_113] : memref<1x10xf32, #tpu.memory_space<vmem>>, vector<1x10xf32>
    %136 = arith.addf %134, %135 : vector<1x10xf32>
    %c0_114 = arith.constant 0 : index
    %c0_115 = arith.constant 0 : index
    %c0_116 = arith.constant 0 : index
    %137 = vector.load %arg12[%c0_114, %c0_115, %c0_116] : memref<1x1x10xf32, #tpu.memory_space<vmem>>, vector<1x1x10xf32>
    %138 = vector.shape_cast %137 : vector<1x1x10xf32> to vector<1x10xf32>
    %139 = vector.shape_cast %136 : vector<1x10xf32> to vector<1x1x10xf32>
    tpu.vector_store %arg12[%c0_114, %c0_115, %c0_116], %139 {strides = array<i32>} : memref<1x1x10xf32, #tpu.memory_space<vmem>>, vector<1x1x10xf32>,
    return
  }
  func.func @transform_0(%arg0: i32) -> (i32, i32, i32) {
    %c0_i32 = arith.constant 0 : i32
    %c0_i32_0 = arith.constant 0 : i32
    %c0_i32_1 = arith.constant 0 : i32
    return %arg0, %c0_i32, %c0_i32_0 : i32, i32, i32
  }
  func.func @transform_1(%arg0: i32) -> (i32, i32, i32) {
    %c0_i32 = arith.constant 0 : i32
    %c0_i32_0 = arith.constant 0 : i32
    %c0_i32_1 = arith.constant 0 : i32
    %c0_i32_2 = arith.constant 0 : i32
    return %c0_i32, %c0_i32_0, %c0_i32_1 : i32, i32, i32
  }
  func.func @transform_2(%arg0: i32) -> (i32, i32) {
    %c0_i32 = arith.constant 0 : i32
    %c0_i32_0 = arith.constant 0 : i32
    %c0_i32_1 = arith.constant 0 : i32
    return %c0_i32, %c0_i32_0 : i32, i32
  }
  func.func @transform_3(%arg0: i32) -> (i32, i32, i32) {
    %c0_i32 = arith.constant 0 : i32
    %c0_i32_0 = arith.constant 0 : i32
    %c0_i32_1 = arith.constant 0 : i32
    %c0_i32_2 = arith.constant 0 : i32
    return %c0_i32, %c0_i32_0, %c0_i32_1 : i32, i32, i32
  }
  func.func @transform_4(%arg0: i32) -> (i32, i32) {
    %c0_i32 = arith.constant 0 : i32
    %c0_i32_0 = arith.constant 0 : i32
    %c0_i32_1 = arith.constant 0 : i32
    return %c0_i32, %c0_i32_0 : i32, i32
  }
  func.func @transform_5(%arg0: i32) -> (i32, i32, i32) {
    %c0_i32 = arith.constant 0 : i32
    %c0_i32_0 = arith.constant 0 : i32
    %c0_i32_1 = arith.constant 0 : i32
    %c0_i32_2 = arith.constant 0 : i32
    return %c0_i32, %c0_i32_0, %c0_i32_1 : i32, i32, i32
  }
  func.func @transform_6(%arg0: i32) -> (i32, i32) {
    %c0_i32 = arith.constant 0 : i32
    %c0_i32_0 = arith.constant 0 : i32
    %c0_i32_1 = arith.constant 0 : i32
    return %c0_i32, %c0_i32_0 : i32, i32
  }
  func.func @transform_7(%arg0: i32) -> (i32, i32) {
    %c0_i32 = arith.constant 0 : i32
    %c0_i32_0 = arith.constant 0 : i32
    %c0_i32_1 = arith.constant 0 : i32
    return %c0_i32, %c0_i32_0 : i32, i32
  }
  func.func @transform_8(%arg0: i32) -> (i32, i32) {
    %c0_i32 = arith.constant 0 : i32
    %c0_i32_0 = arith.constant 0 : i32
    %c0_i32_1 = arith.constant 0 : i32
    return %c0_i32, %c0_i32_0 : i32, i32
  }
  func.func @transform_9(%arg0: i32) -> (i32, i32) {
    %c0_i32 = arith.constant 0 : i32
    %c0_i32_0 = arith.constant 0 : i32
    %c0_i32_1 = arith.constant 0 : i32
    return %c0_i32, %c0_i32_0 : i32, i32
  }
  func.func @transform_10(%arg0: i32) -> (i32, i32) {
    %c0_i32 = arith.constant 0 : i32
    %c0_i32_0 = arith.constant 0 : i32
    %c0_i32_1 = arith.constant 0 : i32
    return %c0_i32, %c0_i32_0 : i32, i32
  }
  func.func @transform_11(%arg0: i32) -> (i32, i32, i32) {
    %c0_i32 = arith.constant 0 : i32
    %c0_i32_0 = arith.constant 0 : i32
    %c0_i32_1 = arith.constant 0 : i32
    return %arg0, %c0_i32, %c0_i32_0 : i32, i32, i32
  }
}

</mosaic_0001>

<bundles_post_ra>
// kernel: forward.1
= control target key start
LH: loop header
LB: loop body
LE: loop exit
PB: predicated region body
PF: predicated region fallthrough
CT: control target
= control target key end

     0   :  { %s15112_s0 = inlined_call_operand.vmem [shape: f32[2,36,108], index: 0, kind: input, shape index: {}]   ;;  %s15113_s1 = inlined_call_operand.hbm [shape: f32[5,108,1024], index: 1, kind: input, shape index: {}]   ;;  %s15114_s2 = inlined_call_operand.hbm [shape: f32[1,1024], index: 2, kind: input, shape index: {}]   ;;  %s15115_s3 = inlined_call_operand.hbm [shape: f32[5,512,512], index: 3, kind: input, shape index: {}]   ;;  %s15116_s4 = inlined_call_operand.hbm [shape: f32[1,512], index: 4, kind: input, shape index: {}]   ;;  %s15117_s5 = inlined_call_operand.hbm [shape: f32[5,256,512], index: 5, kind: input, shape index: {}]   ;;  %s15118_s6 = inlined_call_operand.hbm [shape: f32[1,512], index: 6, kind: input, shape index: {}]   ;;  %s15119_s7 = inlined_call_operand.vmem [shape: f32[1024,64], index: 7, kind: input, shape index: {}]   ;;  %s15120_s8 = inlined_call_operand.hbm [shape: f32[1,64], index: 8, kind: input, shape index: {}]   ;;  %s15121_s9 = inlined_call_operand.vmem [shape: f32[64,10], index: 9, kind: input, shape index: {}]   ;;  %s15122_s10 = inlined_call_operand.hbm [shape: f32[1,10], index: 10, kind: input, shape index: {}]   ;;  %s15123_s11 = inlined_call_operand.hbm [shape: f32[2,1,10], index: 11, kind: output, shape index: {}]  }
   0x1   :  { %15138 = sst [smem:[#allocation32_spill]] %s15113_s1 }
   0x2   :  { %15139 = sst [smem:[#allocation33_spill]] %s15114_s2 }
   0x3   :  { %15140 = sst [smem:[#allocation34_spill]] %s15116_s4 }
   0x4   :  { %15141 = sst [smem:[#allocation35_spill]] %s15118_s6 }
   0x5   :  { %16 = vsyncpa [#allocation6], 0 }
   0x6   :  { %17 = vsyncpa [#allocation9], 0 }
   0x7   :  { %18 = vsyncpa [#allocation12], 0 }
   0x8   :  { %19 = vsyncpa [#allocation15], 0 }
   0x9   :  { %20 = vsyncpa [#allocation18], 0 }
   0xa   :  { %21 = vsyncpa [#allocation7], 0 }
   0xb   :  { %23 = vsyncpa [#allocation7 + $0x1], 0  ;;  %s13421_s17 = smov 0   ;;  %s13423_s18 = smov 0  }
   0xc   :  { %s13425_s19 = smov 0   ;;  %s13427_s20 = smov 0  }
   0xd LB: > { %15142 = sst [smem:[#allocation26_spill]] %s13328_s17  ;;  %s13442_s21 = sadd.s32 4294967295, %s13340_s20   ;;  %s13340_s20 = sphi %s13427_s20, %s15181_s20   ;;  %s13336_s19 = sphi %s13425_s19, %s15183_s19   ;;  %s13332_s18 = sphi %s13423_s18, %s15185_s18   ;;  %s13328_s17 = sphi %s13421_s17, %s15184_s17  }
   0xe   : > { %15143 = sst [smem:[#allocation27_spill]] %s13336_s19  ;;  %s9650_s22 = sadd.s32 4294967294, %s13340_s20  }
   0xf   : > { %s13446_s23 = sadd.s32 1, %s13340_s20   ;;  %s272_s24 = sadd.s32 1, %s13336_s19 }
  0x10   : > { %15144 = sst [smem:[#allocation28_spill]] %s13446_s23  ;;  %s269_s25 = ssub.s32 %s13340_s20, %s13446_s23 }
  0x11   : > { %p282_p0 = scmp.ne.s32.totalorder %s13336_s19, %s13332_s18  ;;  %p270_p1 = scmp.eq.s32.totalorder %s269_s25, 0 }
  0x12   : > { %p283_p2 = scmp.eq.s32.totalorder %s13442_s21, 1  ;;  %p288_p3 = scmp.ne.s32.totalorder %s13332_s18, %s13328_s17 }
  0x13   : > { %p289_p4 = scmp.eq.s32.totalorder %s9650_s22, 1  ;;  %p9651_p7 = scmp.ge.s32.totalorder %s13340_s20, 1 }
  0x14   : > { %s13457_s26 = scalar_select %p270_p1, %s13336_s19, %s272_s24  }
  0x15   : > { %p13459_p5 = por %p283_p2, %p282_p0  ;;  %p13463_p6 = por %p289_p4, %p288_p3 }
  0x16   : > { %15145 = sst [smem:[#allocation29_spill]] %s13457_s26  ;;  %p296_p8 = scmp.lt.s32.totalorder %s13340_s20, 3 }
  0x17   : > { %s15146_s27 = scalar_select %p13459_p5, 1, 0 }
  0x18   : > { %s15147_s28 = scalar_select %p13463_p6, 1, 0 }
  0x19   : > { %p15127_p9 = scmp.eq.s32.totalorder %s13442_s21, 0  ;;  %p13470_p10 = pnand %p9651_p7, %p296_p8 }
  0x1a   : > { %15148 = sst [smem:[#allocation30_spill]] %s15147_s28  ;;  %s13342_s30 = smov [#allocation8]  }
  0x1b   : > { %s15149_s29 = scalar_select %p13470_p10, 1, 0 }
  0x1c   : > { %s322_s12 = sshll.u32 %s13342_s30, 4  ;;  %p12918_p11 = pneg %p13470_p10  ;;  %s323_s12 = int_to_ptr.vmem [resolvable:$true] %s322_s12 }
  0x1d   : > { %s13343_s13 = smov [#allocation11]   ;;  %s13344_s16 = smov [#allocation14]  }
  0x1e   : > { %s346_s14 = sshll.u32 %s13343_s13, 4  ;;  %p13478_p12 = pnand %p15127_p9, %p12918_p11  ;;  %s13482_s14 = int_to_ptr.vmem [resolvable:$true] %s346_s14 }
  0x1f   : > { %s370_s22 = sshll.u32 %s13344_s16, 4  ;;  %s15151_s2 = sld [smem:[#allocation33_spill]]  ;;  %s13484_s22 = int_to_ptr.vmem [resolvable:$true] %s370_s22 }
  0x20   : > { %p13494_p0 = pneg %p13478_p12 }
  0x25   : > { %s13034_s30 = scalar_lea.hbm %s15151_s2, 128 }
  0x26   : > { %p13035_p13 = scmp.ne.s32.totalorder %s15151_s2, %s13034_s30  ;;  %p13041_p3 = scmp.lt.u32.totalorder %s13034_s30, %s15151_s2 }
  0x28   : > { %p13037_p1 = pnand %p13494_p0, %p13035_p13 }
  0x2a   : > { %p13038_p2 = pneg %p13037_p1 }
  0x2c   : > { %p13043_p4 = pnand %p13041_p3, %p13038_p2 }
  0x2e   : > { %13046 = shalt.err (!%p13043_p4)
}
  0x2f   : > { %s13047_s24 = scalar_lea.vmem %s323_s12, 128  ;;  %p13055_p9 = scmp.lt.s32.totalorder %s323_s12, %s323_s12 }
  0x30   : > { %p13048_p7 = scmp.ne.s32.totalorder %s323_s12, %s13047_s24  ;;  %p13056_p6 = scmp.lt.s32.totalorder %s13047_s24, %s13047_s24 }
  0x32   : > { %p13050_p8 = pnand %p13048_p7, %p13494_p0  ;;  %p13057_p5 = por %p13056_p6, %p13055_p9 }
  0x34   : > { %p13051_p11 = pneg %p13050_p8 }
  0x36   : > { %p13058_p10 = pnand %p13057_p5, %p13051_p11 }
  0x38   : > { %13061 = shalt.err (!%p13058_p10)
}
  0x39   : > { %12924 = dma.hbm_to_vmem [thread:$0]  (!%p13478_p12), %s15151_s2, 128, %s323_s12, [#allocation9]  }
  0x3a   : > { %s15153_s4 = sld [smem:[#allocation34_spill]] }
  0x40   : > { %s13062_s30 = scalar_lea.hbm %s15153_s4, 64 }
  0x41   : > { %p13063_p13 = scmp.ne.s32.totalorder %s15153_s4, %s13062_s30  ;;  %p13069_p5 = scmp.lt.u32.totalorder %s13062_s30, %s15153_s4 }
  0x43   : > { %p13065_p1 = pnand %p13063_p13, %p13494_p0 }
  0x45   : > { %p13066_p6 = pneg %p13065_p1 }
  0x47   : > { %p13071_p9 = pnand %p13069_p5, %p13066_p6 }
  0x49   : > { %13074 = shalt.err (!%p13071_p9)
}
  0x4a   : > { %s13075_s12 = scalar_lea.vmem %s13482_s14, 64  ;;  %p13083_p4 = scmp.lt.s32.totalorder %s13482_s14, %s13482_s14 }
  0x4b   : > { %p13076_p10 = scmp.ne.s32.totalorder %s13482_s14, %s13075_s12  ;;  %p13084_p7 = scmp.lt.s32.totalorder %s13075_s12, %s13075_s12 }
  0x4d   : > { %p13078_p2 = pnand %p13076_p10, %p13494_p0  ;;  %p13085_p8 = por %p13084_p7, %p13083_p4 }
  0x4f   : > { %p13079_p3 = pneg %p13078_p2 }
  0x51   : > { %p13086_p11 = pnand %p13085_p8, %p13079_p3 }
  0x53   : > { %13089 = shalt.err (!%p13086_p11)
}
  0x54   : > { %12930 = dma.hbm_to_vmem [thread:$0]  (!%p13478_p12), %s15153_s4, 64, %s13482_s14, [#allocation12]  }
  0x55   : > { %s15154_s6 = sld [smem:[#allocation35_spill]] }
  0x5b   : > { %s13090_s23 = scalar_lea.hbm %s15154_s6, 64 }
  0x5c   : > { %p13091_p13 = scmp.ne.s32.totalorder %s15154_s6, %s13090_s23  ;;  %p13097_p5 = scmp.lt.u32.totalorder %s13090_s23, %s15154_s6 }
  0x5e   : > { %p13093_p1 = pnand %p13091_p13, %p13494_p0 }
  0x60   : > { %p13094_p6 = pneg %p13093_p1 }
  0x62   : > { %p13099_p9 = pnand %p13097_p5, %p13094_p6 }
  0x64   : > { %13102 = shalt.err (!%p13099_p9)
}
  0x65   : > { %s13103_s14 = scalar_lea.vmem %s13484_s22, 64  ;;  %p13111_p4 = scmp.lt.s32.totalorder %s13484_s22, %s13484_s22 }
  0x66   : > { %p13104_p10 = scmp.ne.s32.totalorder %s13484_s22, %s13103_s14  ;;  %p13112_p7 = scmp.lt.s32.totalorder %s13103_s14, %s13103_s14 }
  0x68   : > { %p13106_p2 = pnand %p13104_p10, %p13494_p0  ;;  %p13113_p8 = por %p13112_p7, %p13111_p4 }
  0x6a   : > { %p13107_p3 = pneg %p13106_p2 }
  0x6c   : > { %p13114_p11 = pnand %p13113_p8, %p13107_p3 }
  0x6e   : > { %13117 = shalt.err (!%p13114_p11)
}
  0x6f   : > { %12936 = dma.hbm_to_vmem [thread:$0]  (!%p13478_p12), %s15154_s6, 64, %s13484_s22, [#allocation15]  }
  0x70   : > { %s13345_s28 = smov [#allocation5]   ;;  %s15155_s1 = sld [smem:[#allocation32_spill]] }
  0x71   : > { %s308_s19 = sshll.u32 %s13345_s28, 4  ;;  %s309_s19 = int_to_ptr.vmem [resolvable:$true] %s308_s19 }
  0x76   : > { %s13118_s25 = scalar_lea.hbm %s15155_s1, 71680 }
  0x77   : > { %p13119_p13 = scmp.ne.s32.totalorder %s15155_s1, %s13118_s25  ;;  %p13125_p5 = scmp.lt.u32.totalorder %s13118_s25, %s15155_s1 }
  0x79   : > { %p13121_p1 = pnand %p13119_p13, %p13494_p0 }
  0x7b   : > { %p13122_p6 = pneg %p13121_p1 }
  0x7d   : > { %p13127_p9 = pnand %p13125_p5, %p13122_p6 }
  0x7f   : > { %13130 = shalt.err (!%p13127_p9)
}
  0x80   : > { %s13131_s22 = scalar_lea.vmem %s309_s19, 71680  ;;  %p13139_p4 = scmp.lt.s32.totalorder %s309_s19, %s309_s19 }
  0x81   : > { %p13132_p10 = scmp.ne.s32.totalorder %s309_s19, %s13131_s22  ;;  %p13140_p7 = scmp.lt.s32.totalorder %s13131_s22, %s13131_s22 }
  0x83   : > { %p13134_p2 = pnand %p13132_p10, %p13494_p0  ;;  %p13141_p8 = por %p13140_p7, %p13139_p4 }
  0x85   : > { %p13135_p3 = pneg %p13134_p2 }
  0x87   : > { %p13142_p11 = pnand %p13141_p8, %p13135_p3 }
  0x89   : > { %13145 = shalt.err (!%p13142_p11)
}
  0x8a   : > { %s13346_s12 = smov 1024   ;;  %s13347_s17 = smov 64  }
  0x8b   : > { %12921 = dma.hbm_to_vmem [thread:$0]  (!%p13478_p12), %s15155_s1, 71680, %s309_s19, [#allocation6], %s13346_s12, %s13346_s12, %s13347_s17  }
  0x8c   : > { %s13348_s23 = smov [#allocation10]   ;;  %s13146_s24 = scalar_lea.hbm %s15115_s3, 163840 }
  0x8d   : > { %s332_s25 = sshll.u32 %s13348_s23, 4  ;;  %p13147_p13 = scmp.ne.s32.totalorder %s15115_s3, %s13146_s24  ;;  %s333_s25 = int_to_ptr.vmem [resolvable:$true] %s332_s25 }
  0x8e   : > { %p13153_p5 = scmp.lt.u32.totalorder %s13146_s24, %s15115_s3 }
  0x8f   : > { %p13149_p1 = pnand %p13147_p13, %p13494_p0 }
  0x91   : > { %p13150_p6 = pneg %p13149_p1 }
  0x93   : > { %p13155_p9 = pnand %p13153_p5, %p13150_p6 }
  0x95   : > { %13158 = shalt.err (!%p13155_p9)
}
  0x96   : > { %s13159_s19 = scalar_lea.vmem %s333_s25, 163840  ;;  %p13167_p4 = scmp.lt.s32.totalorder %s333_s25, %s333_s25 }
  0x97   : > { %p13160_p10 = scmp.ne.s32.totalorder %s333_s25, %s13159_s19  ;;  %p13168_p7 = scmp.lt.s32.totalorder %s13159_s19, %s13159_s19 }
  0x99   : > { %p13162_p2 = pnand %p13160_p10, %p13494_p0  ;;  %p13169_p8 = por %p13168_p7, %p13167_p4 }
  0x9b   : > { %p13163_p3 = pneg %p13162_p2 }
  0x9d   : > { %p13170_p11 = pnand %p13169_p8, %p13163_p3 }
  0x9f   : > { %13173 = shalt.err (!%p13170_p11)
}
  0xa0   : > { %s13349_s12 = smov 512   ;;  %s13350_s17 = smov 32  }
  0xa1   : > { %12927 = dma.hbm_to_vmem [thread:$0]  (!%p13478_p12), %s15115_s3, 163840, %s333_s25, [#allocation9], %s13349_s12, %s13349_s12, %s13350_s17  }
  0xa2   : > { %s13351_s28 = smov [#allocation13]   ;;  %s13352_s23 = smov [#allocation16]  }
  0xa3   : > { %s356_s26 = sshll.u32 %s13351_s28, 4  ;;  %s384_s30 = sshll.u32 %s13352_s23, 4  ;;  %s357_s26 = int_to_ptr.vmem [resolvable:$true] %s356_s26  ;;  %s385_s30 = int_to_ptr.vmem [resolvable:$true] %s384_s30 }
  0xa4   : > { %s13174_s14 = scalar_lea.hbm %s15117_s5, 81920 }
  0xa5   : > { %p13175_p13 = scmp.ne.s32.totalorder %s15117_s5, %s13174_s14  ;;  %p13181_p5 = scmp.lt.u32.totalorder %s13174_s14, %s15117_s5 }
  0xa7   : > { %p13177_p1 = pnand %p13175_p13, %p13494_p0 }
  0xa9   : > { %p13178_p6 = pneg %p13177_p1 }
  0xab   : > { %p13183_p9 = pnand %p13181_p5, %p13178_p6 }
  0xad   : > { %13186 = shalt.err (!%p13183_p9)
}
  0xae   : > { %s13187_s25 = scalar_lea.vmem %s357_s26, 81920  ;;  %p13195_p4 = scmp.lt.s32.totalorder %s357_s26, %s357_s26 }
  0xaf   : > { %p13188_p10 = scmp.ne.s32.totalorder %s357_s26, %s13187_s25  ;;  %p13196_p7 = scmp.lt.s32.totalorder %s13187_s25, %s13187_s25 }
  0xb1   : > { %p13190_p2 = pnand %p13188_p10, %p13494_p0  ;;  %p13197_p8 = por %p13196_p7, %p13195_p4 }
  0xb3   : > { %p13191_p3 = pneg %p13190_p2 }
  0xb5   : > { %p13198_p11 = pnand %p13197_p8, %p13191_p3 }
  0xb7   : > { %13201 = shalt.err (!%p13198_p11)
}
  0xb8   : > { %12933 = dma.hbm_to_vmem [thread:$0]  (!%p13478_p12), %s15117_s5, 81920, %s357_s26, [#allocation12], %s13349_s12, %s13349_s12, %s13350_s17  }
  0xb9   : > { %s13202_s28 = scalar_lea.hbm %s15120_s8, 16 }
  0xba   : > { %p13203_p13 = scmp.ne.s32.totalorder %s15120_s8, %s13202_s28  ;;  %p13209_p5 = scmp.lt.u32.totalorder %s13202_s28, %s15120_s8 }
  0xbc   : > { %p13205_p1 = pnand %p13203_p13, %p13494_p0 }
  0xbe   : > { %p13206_p6 = pneg %p13205_p1 }
  0xc0   : > { %p13211_p9 = pnand %p13209_p5, %p13206_p6 }
  0xc2   : > { %13214 = shalt.err (!%p13211_p9)
}
  0xc3   : > { %s13215_s22 = scalar_lea.vmem %s385_s30, 16  ;;  %s13222_s12 = scalar_lea.vmem %s385_s30, 32 }
  0xc4   : > { %p13216_p10 = scmp.ne.s32.totalorder %s385_s30, %s13215_s22  ;;  %p13223_p4 = scmp.lt.s32.totalorder %s385_s30, %s385_s30 }
  0xc5   : > { %p13224_p7 = scmp.lt.s32.totalorder %s13222_s12, %s13215_s22 }
  0xc6   : > { %p13218_p2 = pnand %p13216_p10, %p13494_p0 }
  0xc7   : > { %p13225_p8 = por %p13224_p7, %p13223_p4 }
  0xc8   : > { %p13219_p3 = pneg %p13218_p2 }
  0xca   : > { %p13226_p11 = pnand %p13225_p8, %p13219_p3 }
  0xcc   : > { %13229 = shalt.err (!%p13226_p11)
}
  0xcd   : > { %12939 = dma.hbm_to_vmem [thread:$0]  (!%p13478_p12), %s15120_s8, 16, %s385_s30, [#allocation15]  }
  0xce   : > { %s13353_s19 = smov [#allocation17]   ;;  %s13230_s1 = scalar_lea.hbm %s15122_s10, 16 }
  0xcf   : > { %s398_s25 = sshll.u32 %s13353_s19, 4  ;;  %p13231_p13 = scmp.ne.s32.totalorder %s15122_s10, %s13230_s1  ;;  %s399_s25 = int_to_ptr.vmem [resolvable:$true] %s398_s25 }
  0xd0   : > { %p13237_p5 = scmp.lt.u32.totalorder %s13230_s1, %s15122_s10 }
  0xd1   : > { %p13233_p1 = pnand %p13231_p13, %p13494_p0 }
  0xd3   : > { %p13234_p6 = pneg %p13233_p1 }
  0xd5   : > { %p13239_p9 = pnand %p13237_p5, %p13234_p6 }
  0xd7   : > { %13242 = shalt.err (!%p13239_p9)
}
  0xd8   : > { %s13243_s30 = scalar_lea.vmem %s399_s25, 16  ;;  %s13250_s24 = scalar_lea.vmem %s399_s25, 32 }
  0xd9   : > { %p13244_p10 = scmp.ne.s32.totalorder %s399_s25, %s13243_s30  ;;  %p13251_p4 = scmp.lt.s32.totalorder %s399_s25, %s399_s25 }
  0xda   : > { %p13252_p7 = scmp.lt.s32.totalorder %s13250_s24, %s13243_s30 }
  0xdb   : > { %p13246_p2 = pnand %p13244_p10, %p13494_p0 }
  0xdc   : > { %p13253_p8 = por %p13252_p7, %p13251_p4 }
  0xdd   : > { %p13247_p3 = pneg %p13246_p2 }
  0xdf   : > { %p13254_p11 = pnand %p13253_p8, %p13247_p3 }
  0xe1   : > { %13257 = shalt.err (!%p13254_p11)
}
  0xe2   : > { %12942 = dma.hbm_to_vmem [thread:$0]  (!%p13478_p12), %s15122_s10, 16, %s399_s25, [#allocation18]  }
  0xe3   : > { %p15156_p13 = scmp.ne.s32.totalorder %s15149_s29, 0 }
  0xe5   : > { %419 = sbr.rel (%p15156_p13) target bundleno = 2634 (0xa4a), region = 64 }
  0xec   : > { %p15157_p1 = scmp.eq.s32.totalorder %s13442_s21, 0 }
  0xee   : > { %13303 = dma.done.wait (%p15157_p1), [#allocation6], 71680   ;;  %p15158_p0 = pmov %p15157_p1 }
  0xf0   : > { %13305 = vsyncadd (%p15158_p0), [#allocation6], 4294895616  ;;  %p15159_p6 = pmov %p15158_p0 }
  0xf1   : > { %p15160_p5 = pmov %p15158_p0 }
  0xf2   : > { %13307 = dma.done.wait (%p15159_p6), [#allocation9], 163968  }
  0xf3   : > { %13309 = vsyncadd (%p15160_p5), [#allocation9], 4294803328  ;;  %p15161_p9 = pmov %p15158_p0 }
  0xf4   : > { %p15162_p12 = pmov %p15158_p0 }
  0xf5   : > { %13311 = dma.done.wait (%p15161_p9), [#allocation12], 81984  }
  0xf6   : > { %13313 = vsyncadd (%p15162_p12), [#allocation12], 4294885312  ;;  %p15163_p10 = pmov %p15158_p0 }
  0xf7   : > { %p15164_p2 = pmov %p15158_p0 }
  0xf8   : > { %13315 = dma.done.wait (%p15163_p10), [#allocation15], 80  }
  0xf9   : > { %13317 = vsyncadd (%p15164_p2), [#allocation15], 4294967216  ;;  %p15165_p3 = pmov %p15158_p0 }
  0xfa   : > { %p15166_p4 = pmov %p15158_p0 }
  0xfb   : > { %13319 = dma.done.wait (%p15165_p3), [#allocation18], 16  }
  0xfc   : > { %13321 = vsyncadd (%p15166_p4), [#allocation18], 4294967280  ;;  %v15132_v0 = vmov 0.0   ;;  %v622_v1 = vld [vmem:[#allocation5 + $0x388] sm:$0xff]  ;;  %v624_v3 = vld [vmem:[#allocation5 + $0x398] sm:$0xff]  ;;  %p486_p7 = scmp.lt.s32.totalorder %s13442_s21, 1 }
  0xfd   : > { %846 = vmatprep.mubr.f32.mxu0 %v15132_v0  ;;  %491 = vst [vmem:[#allocation2] sm:$0x3] %v15132_v0  ;;  %492 = vst [vmem:[#allocation2 + $0x8] sm:$0x3] %v15132_v0  ;;  %935 = vmatprep.mubr.f32.mxu1 %v15132_v0  ;;  %v630_v2 = vld [vmem:[#allocation5 + $0x3c8] sm:$0xff]  ;;  %v632_v5 = vld [vmem:[#allocation5 + $0x3d8] sm:$0xff] }
  0xfe   : > { %493 = vst [vmem:[#allocation2 + $0x10] sm:$0x3] %v15132_v0  ;;  %494 = vst [vmem:[#allocation2 + $0x18] sm:$0x3] %v15132_v0  ;;  %v10007_v4 = vpack.c.bf16 %v630_v2, %v622_v1  ;;  %v621_v6 = vld [vmem:[#allocation5 + $0x380] sm:$0xff]  ;;  %v10037_v8 = vpack.c.bf16 %v632_v5, %v624_v3  ;;  %v623_v10 = vld [vmem:[#allocation5 + $0x390] sm:$0xff] }
  0xff   : > { %495 = vst [vmem:[#allocation2 + $0x40] sm:$0xc] %v15132_v0  ;;  %496 = vst [vmem:[#allocation2 + $0x48] sm:$0xc] %v15132_v0  ;;  %v629_v7 = vld [vmem:[#allocation5 + $0x3c0] sm:$0xff]  ;;  %v631_v11 = vld [vmem:[#allocation5 + $0x3d0] sm:$0xff] }
 0x100   : > { %497 = vst [vmem:[#allocation2 + $0x50] sm:$0xc] %v15132_v0  ;;  %498 = vst [vmem:[#allocation2 + $0x58] sm:$0xc] %v15132_v0  ;;  %v10009_v9 = vpack.c.bf16 %v629_v7, %v621_v6  ;;  %v638_v12 = vld [vmem:[#allocation5 + $0x408] sm:$0xff]  ;;  %10008 = vmatprep.subr.bf16.mxu0 %v10007_v4  ;;  %v10039_v13 = vpack.c.bf16 %v631_v11, %v623_v10  ;;  %v640_v15 = vld [vmem:[#allocation5 + $0x418] sm:$0xff]  ;;  %10038 = vmatprep.subr.bf16.mxu1 %v10037_v8 }
 0x101   : > { %499 = vst [vmem:[#allocation3] sm:$0x3] %v15132_v0  ;;  %500 = vst [vmem:[#allocation3 + $0x8] sm:$0x3] %v15132_v0  ;;  %v646_v14 = vld [vmem:[#allocation5 + $0x448] sm:$0xff]  ;;  %v648_v16 = vld [vmem:[#allocation5 + $0x458] sm:$0xff] }
 0x102   : > { %501 = vst [vmem:[#allocation3 + $0x10] sm:$0xc] %v15132_v0  ;;  %502 = vst [vmem:[#allocation3 + $0x18] sm:$0xc] %v15132_v0  ;;  %10010 = vmatpush1.bf16.msra.mxu0 %v10009_v9  ;;  %v10011_v17 = vpack.c.bf16 %v646_v14, %v638_v12  ;;  %v10041_v18 = vpack.c.bf16 %v648_v16, %v640_v15  ;;  %v637_v19 = vld [vmem:[#allocation5 + $0x400] sm:$0xff]  ;;  %v639_v21 = vld [vmem:[#allocation5 + $0x410] sm:$0xff]  ;;  %10040 = vmatpush1.bf16.msra.mxu1 %v10039_v13 }
 0x103   : > { %v645_v20 = vld [vmem:[#allocation5 + $0x440] sm:$0xff]  ;;  %v647_v23 = vld [vmem:[#allocation5 + $0x450] sm:$0xff]  ;;  %v654_v24 = vld [vmem:[#allocation5 + $0x488] sm:$0xff]  ;;  %s13686_s29 = scalar_select %p486_p7, %s13442_s21, 1  ;;  %vm757_vm0 = vcmask 1043456   ;;  %vm13355_vm1 = vmmov 1  }
 0x104   : > { %v10013_v22 = vpack.c.bf16 %v645_v20, %v637_v19  ;;  %v662_v25 = vld [vmem:[#allocation5 + $0x4c8] sm:$0xff]  ;;  %10012 = vmatprep.subr.bf16.mxu0 %v10011_v17  ;;  %10042 = vmatprep.subr.bf16.mxu1 %v10041_v18  ;;  %v10043_v26 = vpack.c.bf16 %v647_v23, %v639_v21  ;;  %v656_v28 = vld [vmem:[#allocation5 + $0x498] sm:$0xff]  ;;  %v653_v30 = vld [vmem:[#allocation5 + $0x480] sm:$0xff]  ;;  %vm738_vm3 = vcmask 1046528   ;;  %vm748_vm4 = vcmask 883712   ;;  %s484_s6 = sand.u32 1, %s13332_s18  }
 0x105   : > { %v10015_v27 = vpack.c.bf16 %v662_v25, %v654_v24  ;;  %v664_v29 = vld [vmem:[#allocation5 + $0x4d8] sm:$0xff]  ;;  %v661_v32 = vld [vmem:[#allocation5 + $0x4c0] sm:$0xff]  ;;  %v655_v33 = vld [vmem:[#allocation5 + $0x490] sm:$0xff]  ;;  %s12883_s15 = smul.u32 40, %s13686_s29  ;;  %vm1639_vm5 = vcmask 1045504   ;;  %vm2182_vm6 = vcmask 1044480  }
 0x106   : > { %v10045_v31 = vpack.c.bf16 %v664_v29, %v656_v28  ;;  %v663_v34 = vld [vmem:[#allocation5 + $0x4d0] sm:$0xff]  ;;  %10014 = vmatpush1.bf16.msra.mxu0 %v10013_v22  ;;  %v10017_v35 = vpack.c.bf16 %v661_v32, %v653_v30  ;;  %v670_v36 = vld [vmem:[#allocation5 + $0x508] sm:$0xff]  ;;  %v672_v38 = vld [vmem:[#allocation5 + $0x518] sm:$0xff]  ;;  %10044 = vmatpush1.bf16.msra.mxu1 %v10043_v26  ;;  %vm3996_vm7 = vcmask 1043459   ;;  %vm3998_vm8 = vcmask 1044484   ;;  %s9836_s28 = sshll.u32 %s13442_s21, 4 }
 0x107   : > { %v678_v37 = vld [vmem:[#allocation5 + $0x548] sm:$0xff]  ;;  %10016 = vmatprep.subr.bf16.mxu0 %v10015_v27  ;;  %v10047_v39 = vpack.c.bf16 %v663_v34, %v655_v33  ;;  %v680_v41 = vld [vmem:[#allocation5 + $0x558] sm:$0xff]  ;;  %v669_v42 = vld [vmem:[#allocation5 + $0x500] sm:$0xff]  ;;  %s13692_s17 = scalar_lea.vmem %s15112_s0, %s12883_s15  ;;  %vm4000_vm9 = vcmask 1045509   ;;  %vm4002_vm10 = vcmask 1046534   ;;  %vm4004_vm11 = vcmask 1047559   ;;  %s15070_s14 = scalar_lea.hbm %s15123_s11, %s9836_s28 }
 0x108   : > { %v10019_v40 = vpack.c.bf16 %v678_v37, %v670_v36  ;;  %v677_v43 = vld [vmem:[#allocation5 + $0x540] sm:$0xff]  ;;  %10046 = vmatprep.subr.bf16.mxu1 %v10045_v31  ;;  %v10049_v44 = vpack.c.bf16 %v680_v41, %v672_v38  ;;  %v671_v45 = vld [vmem:[#allocation5 + $0x510] sm:$0xff]  ;;  %v686_v47 = vld [vmem:[#allocation5 + $0x588] sm:$0xff]  ;;  %vm4021_vm12 = vcmask 1041409   ;;  %vm4023_vm13 = vcmask 1042434   ;;  %s485_s23 = scalar_lea.vmem [#allocation19], %s484_s6 }
 0x109   : > { %v679_v46 = vld [vmem:[#allocation5 + $0x550] sm:$0xff]  ;;  %v694_v48 = vld [vmem:[#allocation5 + $0x5c8] sm:$0xff]  ;;  %v688_v49 = vld [vmem:[#allocation5 + $0x598] sm:$0xff]  ;;  %v10021_v51 = vpack.c.bf16 %v677_v43, %v669_v42  ;;  %vm13359_vm15 = vmmov 0   ;;  %s9516_s16 = sshll.u32 %s485_s23, 4  ;;  %s9504_s22 = scalar_lea.sflag [#allocation7], %s484_s6  ;;  %s15072_s16 = int_to_ptr.vmem [resolvable:$true] %s9516_s16 }
 0x10a   : > { %v696_v50 = vld [vmem:[#allocation5 + $0x5d8] sm:$0xff]  ;;  %10018 = vmatpush1.bf16.msra.mxu0 %v10017_v35  ;;  %10048 = vmatpush1.bf16.msra.mxu1 %v10047_v39  ;;  %v10051_v52 = vpack.c.bf16 %v679_v46, %v671_v45  ;;  %v10023_v53 = vpack.c.bf16 %v694_v48, %v686_v47  ;;  %v685_v54 = vld [vmem:[#allocation5 + $0x580] sm:$0xff]  ;;  %v687_v56 = vld [vmem:[#allocation5 + $0x590] sm:$0xff]  ;;  %s13258_s29 = scalar_lea.vmem %s15072_s16, 16  ;;  %p15177_p11 = scmp.ne.s32.totalorder %s15146_s27, 0 }
 0x10b   : > { %10020 = vmatprep.subr.bf16.mxu0 %v10019_v40  ;;  %v693_v55 = vld [vmem:[#allocation5 + $0x5c0] sm:$0xff]  ;;  %10050 = vmatprep.subr.bf16.mxu1 %v10049_v44  ;;  %v10053_v57 = vpack.c.bf16 %v696_v50, %v688_v49  ;;  %v695_v58 = vld [vmem:[#allocation5 + $0x5d0] sm:$0xff]  ;;  %v702_v59 = vld [vmem:[#allocation5 + $0x608] sm:$0xff]  ;;  %p13259_p8 = scmp.ne.s32.totalorder %s15072_s16, %s13258_s29  ;;  %s13360_s21 = smov [#allocation19]  }
 0x10c   : > { %v710_v60 = vld [vmem:[#allocation5 + $0x648] sm:$0xff]  ;;  %v704_v61 = vld [vmem:[#allocation5 + $0x618] sm:$0xff]  ;;  %v10025_v63 = vpack.c.bf16 %v693_v55, %v685_v54  ;;  %v10055_v1 = vpack.c.bf16 %v695_v58, %v687_v56  ;;  %v701_v3 = vld [vmem:[#allocation5 + $0x600] sm:$0xff]  ;;  %s13262_s15 = sshll.u32 %s13360_s21, 4  ;;  %s13263_s15 = int_to_ptr.vmem [resolvable:$false] %s13262_s15 }
 0x10d   : > { %v712_v62 = vld [vmem:[#allocation5 + $0x658] sm:$0xff]  ;;  %v10027_v2 = vpack.c.bf16 %v710_v60, %v702_v59  ;;  %v709_v4 = vld [vmem:[#allocation5 + $0x640] sm:$0xff]  ;;  %v703_v5 = vld [vmem:[#allocation5 + $0x610] sm:$0xff]  ;;  %p13260_p13 = pnand %p13259_p8, %p15177_p11  ;;  %s13264_s13 = scalar_lea.vmem %s13263_s15, 32 }
 0x10e   : > { %10022 = vmatpush1.bf16.msra.mxu0 %v10021_v51  ;;  %10052 = vmatpush1.bf16.msra.mxu1 %v10051_v52  ;;  %v10057_v6 = vpack.c.bf16 %v712_v62, %v704_v61  ;;  %v711_v7 = vld [vmem:[#allocation5 + $0x650] sm:$0xff]  ;;  %v718_v8 = vld [vmem:[#allocation5 + $0x688] sm:$0xff]  ;;  %v720_v10 = vld [vmem:[#allocation5 + $0x698] sm:$0xff]  ;;  %v10029_v12 = vpack.c.bf16 %v709_v4, %v701_v3  ;;  %p13265_p0 = scmp.lt.s32.totalorder %s15072_s16, %s13263_s15  ;;  %p13266_p6 = scmp.lt.s32.totalorder %s13264_s13, %s13258_s29 }
 0x10f   : > { %10024 = vmatprep.subr.bf16.mxu0 %v10023_v53  ;;  %10054 = vmatprep.subr.bf16.mxu1 %v10053_v57  ;;  %v726_v9 = vld [vmem:[#allocation5 + $0x6c8] sm:$0xf]  ;;  %v728_v11 = vld [vmem:[#allocation5 + $0x6d8] sm:$0xf]  ;;  %vm13695_vm2 = vmpackc.low %vm757_vm0, %vm13355_vm1  ;;  %v10059_v16 = vpack.c.bf16 %v711_v7, %v703_v5  ;;  %vm9501_vm1 = vcmask 73728   ;;  %p13261_p1 = pneg %p13260_p13 }
 0x110   : > { %v717_v14 = vld [vmem:[#allocation5 + $0x680] sm:$0xff]  ;;  %v10031_v17 = vpack.c.bf16 %v726_v9, %v718_v8  ;;  %v719_v18 = vld [vmem:[#allocation5 + $0x690] sm:$0xff]  ;;  %v13700_v19 = vld [vmem:[%s13692_s17] sm:$0xff]  ;;  %v10061_v21 = vpack.c.bf16 %v728_v11, %v720_v10  ;;  %p13267_p5 = por %p13266_p6, %p13265_p0 }
 0x111   : > { %v725_v15 = vld [vmem:[#allocation5 + $0x6c0] sm:$0xf]  ;;  %v727_v22 = vld [vmem:[#allocation5 + $0x6d0] sm:$0xf]  ;;  %v626_v23 = vld [vmem:[#allocation5 + $0x3a8] sm:$0xff]  ;;  %v739_v28 = vrot.slane %v13700_v19, 1 }
 0x112   : > { %10026 = vmatpush1.bf16.msra.mxu0 %v10025_v63  ;;  %10056 = vmatpush1.bf16.msra.mxu1 %v10055_v1  ;;  %v13703_v20 = vld [vmem:[%s13692_s17 + $0x8] sm:$0xff]  ;;  %v634_v24 = vld [vmem:[#allocation5 + $0x3e8] sm:$0xff]  ;;  %v628_v25 = vld [vmem:[#allocation5 + $0x3b8] sm:$0xff]  ;;  %v10034_v27 = vpack.c.bf16 %v725_v15, %v717_v14  ;;  %v10064_v30 = vpack.c.bf16 %v727_v22, %v719_v18  ;;  %p13268_p9 = pnand %p13267_p5, %p13261_p1 }
 0x113   : > { %10028 = vmatprep.subr.bf16.mxu0 %v10027_v2  ;;  %10058 = vmatprep.subr.bf16.mxu1 %v10057_v6  ;;  %v636_v26 = vld [vmem:[#allocation5 + $0x3f8] sm:$0xff]  ;;  %v740_v29 = vrot.slane %v13703_v20, 1  ;;  %v10067_v31 = vpack.c.bf16 %v634_v24, %v626_v23  ;;  %v625_v32 = vld [vmem:[#allocation5 + $0x3a0] sm:$0xff]  ;;  %v627_v34 = vld [vmem:[#allocation5 + $0x3b0] sm:$0xff] }
 0x114   : > { %v633_v33 = vld [vmem:[#allocation5 + $0x3e0] sm:$0xff]  ;;  %v10097_v35 = vpack.c.bf16 %v636_v26, %v628_v25  ;;  %v635_v36 = vld [vmem:[#allocation5 + $0x3f0] sm:$0xff]  ;;  %v642_v37 = vld [vmem:[#allocation5 + $0x428] sm:$0xff] }
 0x115   : > { %v650_v38 = vld [vmem:[#allocation5 + $0x468] sm:$0xff]  ;;  %v644_v39 = vld [vmem:[#allocation5 + $0x438] sm:$0xff]  ;;  %v13714_v41 = vsel %vm738_vm3, %v739_v28, %v740_v29  ;;  %v10069_v42 = vpack.c.bf16 %v633_v33, %v625_v32  ;;  %v10099_v43 = vpack.c.bf16 %v635_v36, %v627_v34  ;;  %v641_v45 = vld [vmem:[#allocation5 + $0x420] sm:$0xff] }
 0x116   : > { %10030 = vmatpush1.bf16.msra.mxu0 %v10029_v12  ;;  %10060 = vmatpush1.bf16.msra.mxu1 %v10059_v16  ;;  %v652_v40 = vld [vmem:[#allocation5 + $0x478] sm:$0xff]  ;;  %v10071_v44 = vpack.c.bf16 %v650_v38, %v642_v37  ;;  %v649_v46 = vld [vmem:[#allocation5 + $0x460] sm:$0xff]  ;;  %v643_v47 = vld [vmem:[#allocation5 + $0x430] sm:$0xff] }
 0x117   : > { %10033 = vmatprep.subr.msk.bf16.mxu0 %vm13695_vm2, %v10031_v17  ;;  %10063 = vmatprep.subr.msk.bf16.mxu1 %vm13695_vm2, %v10061_v21  ;;  %v10101_v48 = vpack.c.bf16 %v652_v40, %v644_v39  ;;  %v651_v49 = vld [vmem:[#allocation5 + $0x470] sm:$0xff]  ;;  %v658_v50 = vld [vmem:[#allocation5 + $0x4a8] sm:$0xff]  ;;  %v660_v52 = vld [vmem:[#allocation5 + $0x4b8] sm:$0xff]  ;;  %v10073_v55 = vpack.c.bf16 %v649_v46, %v641_v45 }
 0x118   : > { %v666_v51 = vld [vmem:[#allocation5 + $0x4e8] sm:$0xff]  ;;  %v668_v53 = vld [vmem:[#allocation5 + $0x4f8] sm:$0xff]  ;;  %v657_v56 = vld [vmem:[#allocation5 + $0x4a0] sm:$0xff]  ;;  %v10103_v58 = vpack.c.bf16 %v651_v49, %v643_v47 }
 0x119   : > { %v13721_v54 = vld [vmem:[%s13692_s17 + $0x10] sm:$0xff]  ;;  %v10075_v59 = vpack.c.bf16 %v666_v51, %v658_v50  ;;  %v665_v60 = vld [vmem:[#allocation5 + $0x4e0] sm:$0xff]  ;;  %v659_v61 = vld [vmem:[#allocation5 + $0x4b0] sm:$0xff]  ;;  %v10105_v63 = vpack.c.bf16 %v668_v53, %v660_v52 }
 0x11a   : > { %10036 = vmatpush1.bf16.msk.msra.mxu0 %vm13695_vm2, %v10034_v27  ;;  %10066 = vmatpush1.bf16.msk.msra.mxu1 %vm13695_vm2, %v10064_v30  ;;  %v742_v57 = vrot.slane %v13721_v54, 1  ;;  %v667_v62 = vld [vmem:[#allocation5 + $0x4f0] sm:$0xff]  ;;  %v674_v1 = vld [vmem:[#allocation5 + $0x528] sm:$0xff]  ;;  %v676_v5 = vld [vmem:[#allocation5 + $0x538] sm:$0xff]  ;;  %v10077_v8 = vpack.c.bf16 %v665_v60, %v657_v56 }
 0x11b   : > { %10068 = vmatprep.subr.bf16.mxu0 %v10067_v31  ;;  %10098 = vmatprep.subr.bf16.mxu1 %v10097_v35  ;;  %v682_v2 = vld [vmem:[#allocation5 + $0x568] sm:$0xff]  ;;  %v13731_v4 = vld [vmem:[%s13692_s17 + $0x18] sm:$0xff]  ;;  %v684_v6 = vld [vmem:[#allocation5 + $0x578] sm:$0xff]  ;;  %v10107_v10 = vpack.c.bf16 %v667_v62, %v659_v61 }
 0x11c   : > { %v13728_v3 = vsel %vm738_vm3, %v740_v29, %v742_v57  ;;  %v744_v7 = vrot.slane %v13731_v4, 1  ;;  %v673_v9 = vld [vmem:[#allocation5 + $0x520] sm:$0xff]  ;;  %v10079_v11 = vpack.c.bf16 %v682_v2, %v674_v1  ;;  %v675_v14 = vld [vmem:[#allocation5 + $0x530] sm:$0xff]  ;;  %v507_v16 = vld [vmem:[%s13692_s17 + $0x20] sm:$0xf]  ;;  %v10109_v17 = vpack.c.bf16 %v684_v6, %v676_v5 }
 0x11d   : > { %9673 = vmatmul.mubr.msk.f32.vlgmr.msra.gmra.mrb[0].mxu0 %vm748_vm4, %v13714_v41  ;;  %9679 = vmatmul.mubr.msk.f32.vlgmr.msra.gmra.mrb[0].mxu1 %vm748_vm4, %v13714_v41  ;;  %v681_v12 = vld [vmem:[#allocation5 + $0x560] sm:$0xff]  ;;  %v683_v18 = vld [vmem:[#allocation5 + $0x570] sm:$0xff]  ;;  %v690_v21 = vld [vmem:[#allocation5 + $0x5a8] sm:$0xff]  ;;  %v746_v23 = vrot.slane %v507_v16, 1 }
 0x11e   : > { %10070 = vmatpush1.bf16.msra.mxu0 %v10069_v42  ;;  %10100 = vmatpush1.bf16.msra.mxu1 %v10099_v43  ;;  %v13740_v15 = vsel %vm738_vm3, %v742_v57, %v744_v7  ;;  %v698_v22 = vld [vmem:[#allocation5 + $0x5e8] sm:$0xff]  ;;  %v692_v24 = vld [vmem:[#allocation5 + $0x5b8] sm:$0xff]  ;;  %v10081_v26 = vpack.c.bf16 %v681_v12, %v673_v9  ;;  %v10111_v28 = vpack.c.bf16 %v683_v18, %v675_v14  ;;  %v689_v30 = vld [vmem:[#allocation5 + $0x5a0] sm:$0xff] }
 0x11f   : > { %10072 = vmatprep.subr.bf16.mxu0 %v10071_v44  ;;  %10102 = vmatprep.subr.bf16.mxu1 %v10101_v48  ;;  %v700_v25 = vld [vmem:[#allocation5 + $0x5f8] sm:$0xff]  ;;  %v13750_v27 = vsel %vm738_vm3, %v744_v7, %v746_v23  ;;  %v10083_v29 = vpack.c.bf16 %v698_v22, %v690_v21  ;;  %v697_v31 = vld [vmem:[#allocation5 + $0x5e0] sm:$0xff]  ;;  %v691_v32 = vld [vmem:[#allocation5 + $0x5b0] sm:$0xff] }
 0x120   : > { %852 = vmatprep.mubr.f32.mxu0 %v15132_v0  ;;  %941 = vmatprep.mubr.f32.mxu1 %v15132_v0  ;;  %v10113_v33 = vpack.c.bf16 %v700_v25, %v692_v24  ;;  %v699_v34 = vld [vmem:[#allocation5 + $0x5f0] sm:$0xff]  ;;  %v706_v35 = vld [vmem:[#allocation5 + $0x628] sm:$0xff]  ;;  %v708_v37 = vld [vmem:[#allocation5 + $0x638] sm:$0xff]  ;;  %v10085_v39 = vpack.c.bf16 %v697_v31, %v689_v30 }
 0x121   : > { %9674 = vmatmul.mubr.msk.f32.gmra.mrb[2].mxu0 %vm748_vm4, %v13728_v3  ;;  %9680 = vmatmul.mubr.msk.f32.gmra.mrb[2].mxu1 %vm748_vm4, %v13728_v3  ;;  %v714_v36 = vld [vmem:[#allocation5 + $0x668] sm:$0xff]  ;;  %v716_v38 = vld [vmem:[#allocation5 + $0x678] sm:$0xff]  ;;  %v10115_v40 = vpack.c.bf16 %v699_v34, %v691_v32  ;;  %v705_v43 = vld [vmem:[#allocation5 + $0x620] sm:$0xff] }
 0x122   : > { %10074 = vmatpush1.bf16.msra.mxu0 %v10073_v55  ;;  %10104 = vmatpush1.bf16.msra.mxu1 %v10103_v58  ;;  %v10087_v42 = vpack.c.bf16 %v714_v36, %v706_v35  ;;  %v713_v44 = vld [vmem:[#allocation5 + $0x660] sm:$0xff]  ;;  %v707_v45 = vld [vmem:[#allocation5 + $0x630] sm:$0xff]  ;;  %v10117_v46 = vpack.c.bf16 %v716_v38, %v708_v37  ;;  %v722_v48 = vld [vmem:[#allocation5 + $0x6a8] sm:$0xff] }
 0x123   : > { %10076 = vmatprep.subr.bf16.mxu0 %v10075_v59  ;;  %10106 = vmatprep.subr.bf16.mxu1 %v10105_v63  ;;  %v715_v47 = vld [vmem:[#allocation5 + $0x670] sm:$0xff]  ;;  %v730_v49 = vld [vmem:[#allocation5 + $0x6e8] sm:$0xf]  ;;  %v724_v50 = vld [vmem:[#allocation5 + $0x6b8] sm:$0xff]  ;;  %v10089_v52 = vpack.c.bf16 %v713_v44, %v705_v43 }
 0x124   : > { %858 = vmatprep.mubr.f32.mxu0 %v15132_v0  ;;  %947 = vmatprep.mubr.f32.mxu1 %v15132_v0  ;;  %v732_v51 = vld [vmem:[#allocation5 + $0x6f8] sm:$0xf]  ;;  %v10119_v53 = vpack.c.bf16 %v715_v47, %v707_v45  ;;  %v10091_v55 = vpack.c.bf16 %v730_v49, %v722_v48  ;;  %v721_v56 = vld [vmem:[#allocation5 + $0x6a0] sm:$0xff]  ;;  %v723_v58 = vld [vmem:[#allocation5 + $0x6b0] sm:$0xff] }
 0x125   : > { %9675 = vmatmul.mubr.msk.f32.gmra.mrb[4].mxu0 %vm748_vm4, %v13740_v15  ;;  %9681 = vmatmul.mubr.msk.f32.gmra.mrb[4].mxu1 %vm748_vm4, %v13740_v15  ;;  %v729_v57 = vld [vmem:[#allocation5 + $0x6e0] sm:$0xf]  ;;  %v10121_v59 = vpack.c.bf16 %v732_v51, %v724_v50  ;;  %v731_v60 = vld [vmem:[#allocation5 + $0x6f0] sm:$0xf]  ;;  %v509_v61 = vld [vmem:[#allocation5 + $0x8] sm:$0xff] }
 0x126   : > { %10078 = vmatpush1.bf16.msra.mxu0 %v10077_v8  ;;  %10108 = vmatpush1.bf16.msra.mxu1 %v10107_v10  ;;  %v517_v62 = vld [vmem:[#allocation5 + $0x48] sm:$0xff]  ;;  %v511_v63 = vld [vmem:[#allocation5 + $0x18] sm:$0xff]  ;;  %v10094_v2 = vpack.c.bf16 %v729_v57, %v721_v56  ;;  %v10124_v5 = vpack.c.bf16 %v731_v60, %v723_v58  ;;  %v508_v7 = vld [vmem:[#allocation5] sm:$0xff] }
 0x127   : > { %10080 = vmatprep.subr.bf16.mxu0 %v10079_v11  ;;  %10110 = vmatprep.subr.bf16.mxu1 %v10109_v17  ;;  %v519_v1 = vld [vmem:[#allocation5 + $0x58] sm:$0xff]  ;;  %v10127_v6 = vpack.c.bf16 %v517_v62, %v509_v61  ;;  %v516_v8 = vld [vmem:[#allocation5 + $0x40] sm:$0xff]  ;;  %v510_v9 = vld [vmem:[#allocation5 + $0x10] sm:$0xff] }
 0x128   : > { %864 = vmatprep.mubr.f32.mxu0 %v15132_v0  ;;  %953 = vmatprep.mubr.f32.mxu1 %v15132_v0  ;;  %v10157_v10 = vpack.c.bf16 %v519_v1, %v511_v63  ;;  %v518_v11 = vld [vmem:[#allocation5 + $0x50] sm:$0xff]  ;;  %v525_v12 = vld [vmem:[#allocation5 + $0x88] sm:$0xff]  ;;  %v527_v16 = vld [vmem:[#allocation5 + $0x98] sm:$0xff]  ;;  %v10129_v18 = vpack.c.bf16 %v516_v8, %v508_v7 }
 0x129   : > { %9676 = vmatmul.mubr.msk.f32.gmra.mrb[6].mxu0 %vm748_vm4, %v13750_v27  ;;  %9682 = vmatmul.mubr.msk.f32.gmra.mrb[6].mxu1 %vm748_vm4, %v13750_v27  ;;  %v533_v14 = vld [vmem:[#allocation5 + $0xc8] sm:$0xff]  ;;  %v535_v17 = vld [vmem:[#allocation5 + $0xd8] sm:$0xff]  ;;  %v10159_v21 = vpack.c.bf16 %v518_v11, %v510_v9  ;;  %v524_v23 = vld [vmem:[#allocation5 + $0x80] sm:$0xff] }
 0x12a   : > { %10082 = vmatpush1.bf16.msra.mxu0 %v10081_v26  ;;  %10112 = vmatpush1.bf16.msra.mxu1 %v10111_v28  ;;  %v10131_v22 = vpack.c.bf16 %v533_v14, %v525_v12  ;;  %v532_v24 = vld [vmem:[#allocation5 + $0xc0] sm:$0xff]  ;;  %v526_v25 = vld [vmem:[#allocation5 + $0x90] sm:$0xff]  ;;  %v10161_v26 = vpack.c.bf16 %v535_v17, %v527_v16  ;;  %v549_v30 = vld [vmem:[#allocation5 + $0x148] sm:$0xff] }
 0x12b   : > { %10084 = vmatprep.subr.bf16.mxu0 %v10083_v29  ;;  %10114 = vmatprep.subr.bf16.mxu1 %v10113_v33  ;;  %v534_v28 = vld [vmem:[#allocation5 + $0xd0] sm:$0xff]  ;;  %v541_v29 = vld [vmem:[#allocation5 + $0x108] sm:$0xff]  ;;  %v543_v31 = vld [vmem:[#allocation5 + $0x118] sm:$0xff]  ;;  %v10133_v33 = vpack.c.bf16 %v532_v24, %v524_v23 }
 0x12c   : > { %1024 = vmatprep.mubr.f32.mxu0 %v15132_v0  ;;  %1113 = vmatprep.mubr.f32.mxu1 %v15132_v0  ;;  %v551_v32 = vld [vmem:[#allocation5 + $0x158] sm:$0xff]  ;;  %v10163_v34 = vpack.c.bf16 %v534_v28, %v526_v25  ;;  %v10135_v35 = vpack.c.bf16 %v549_v30, %v541_v29  ;;  %v540_v36 = vld [vmem:[#allocation5 + $0x100] sm:$0xff]  ;;  %v542_v38 = vld [vmem:[#allocation5 + $0x110] sm:$0xff] }
 0x12d   : > { %v548_v37 = vld [vmem:[#allocation5 + $0x140] sm:$0xff]  ;;  %v565_v43 = vld [vmem:[#allocation5 + $0x1c8] sm:$0xff]  ;;  %v559_v44 = vld [vmem:[#allocation5 + $0x198] sm:$0xff] }
 0x12e   : > { %10086 = vmatpush1.bf16.msra.mxu0 %v10085_v39  ;;  %10116 = vmatpush1.bf16.msra.mxu1 %v10115_v40  ;;  %v10165_v39 = vpack.c.bf16 %v551_v32, %v543_v31  ;;  %v550_v40 = vld [vmem:[#allocation5 + $0x150] sm:$0xff]  ;;  %v567_v45 = vld [vmem:[#allocation5 + $0x1d8] sm:$0xff]  ;;  %v556_v48 = vld [vmem:[#allocation5 + $0x180] sm:$0xff] }
 0x12f   : > { %10088 = vmatprep.subr.bf16.mxu0 %v10087_v42  ;;  %10118 = vmatprep.subr.bf16.mxu1 %v10117_v46  ;;  %v557_v42 = vld [vmem:[#allocation5 + $0x188] sm:$0xff]  ;;  %v10167_v46 = vpack.c.bf16 %v550_v40, %v542_v38  ;;  %v564_v49 = vld [vmem:[#allocation5 + $0x1c0] sm:$0xff]  ;;  %v558_v50 = vld [vmem:[#allocation5 + $0x190] sm:$0xff]  ;;  %v10169_v51 = vpack.c.bf16 %v567_v45, %v559_v44 }
 0x130   : > { %v10139_v47 = vpack.c.bf16 %v565_v43, %v557_v42  ;;  %v575_v56 = vld [vmem:[#allocation5 + $0x218] sm:$0xff]  ;;  %v572_v60 = vld [vmem:[#allocation5 + $0x200] sm:$0xff]  ;;  %v574_v62 = vld [vmem:[#allocation5 + $0x210] sm:$0xff] }
 0x131   : > { %v583_v57 = vld [vmem:[#allocation5 + $0x258] sm:$0xff]  ;;  %v580_v61 = vld [vmem:[#allocation5 + $0x240] sm:$0xff]  ;;  %v582_v1 = vld [vmem:[#allocation5 + $0x250] sm:$0xff] }
 0x132   : > { %10090 = vmatpush1.bf16.msra.mxu0 %v10089_v52  ;;  %10120 = vmatpush1.bf16.msra.mxu1 %v10119_v53  ;;  %v566_v52 = vld [vmem:[#allocation5 + $0x1d0] sm:$0xff]  ;;  %v573_v53 = vld [vmem:[#allocation5 + $0x208] sm:$0xff]  ;;  %v10173_v63 = vpack.c.bf16 %v583_v57, %v575_v56  ;;  %v599_v7 = vld [vmem:[#allocation5 + $0x2d8] sm:$0xff]  ;;  %v10175_v8 = vpack.c.bf16 %v582_v1, %v574_v62 }
 0x133   : > { %10093 = vmatprep.subr.msk.bf16.mxu0 %vm13695_vm2, %v10091_v55  ;;  %10123 = vmatprep.subr.msk.bf16.mxu1 %vm13695_vm2, %v10121_v59  ;;  %v581_v55 = vld [vmem:[#allocation5 + $0x248] sm:$0xff]  ;;  %v10171_v58 = vpack.c.bf16 %v566_v52, %v558_v50  ;;  %v596_v11 = vld [vmem:[#allocation5 + $0x2c0] sm:$0xff]  ;;  %v590_v12 = vld [vmem:[#allocation5 + $0x290] sm:$0xff] }
 0x134   : > { %v10143_v59 = vpack.c.bf16 %v581_v55, %v573_v53  ;;  %v598_v16 = vld [vmem:[#allocation5 + $0x2d0] sm:$0xff]  ;;  %v605_v17 = vld [vmem:[#allocation5 + $0x308] sm:$0xff]  ;;  %v604_v25 = vld [vmem:[#allocation5 + $0x300] sm:$0xff] }
 0x135   : > { %v10179_v23 = vpack.c.bf16 %v598_v16, %v590_v12  ;;  %v606_v28 = vld [vmem:[#allocation5 + $0x310] sm:$0xff]  ;;  %v513_v31 = vld [vmem:[#allocation5 + $0x28] sm:$0xff]  ;;  %v512_v38 = vld [vmem:[#allocation5 + $0x20] sm:$0xff] }
 0x136   : > { %10096 = vmatpush1.bf16.msk.msra.mxu0 %vm13695_vm2, %v10094_v2  ;;  %10126 = vmatpush1.bf16.msk.msra.mxu1 %vm13695_vm2, %v10124_v5  ;;  %v589_v2 = vld [vmem:[#allocation5 + $0x288] sm:$0xff]  ;;  %v614_v30 = vld [vmem:[#allocation5 + $0x350] sm:$0xf]  ;;  %v528_v50 = vld [vmem:[#allocation5 + $0xa0] sm:$0xff] }
 0x137   : > { %10128 = vmatprep.subr.bf16.mxu0 %v10127_v6  ;;  %10158 = vmatprep.subr.bf16.mxu1 %v10157_v10  ;;  %v597_v5 = vld [vmem:[#allocation5 + $0x2c8] sm:$0xff]  ;;  %v591_v6 = vld [vmem:[#allocation5 + $0x298] sm:$0xff]  ;;  %v588_v10 = vld [vmem:[#allocation5 + $0x280] sm:$0xff] }
 0x138   : > { %v10147_v9 = vpack.c.bf16 %v597_v5, %v589_v2  ;;  %v10177_v14 = vpack.c.bf16 %v599_v7, %v591_v6  ;;  %v521_v32 = vld [vmem:[#allocation5 + $0x68] sm:$0xff]  ;;  %v514_v40 = vld [vmem:[#allocation5 + $0x30] sm:$0xff]  ;;  %v544_v62 = vld [vmem:[#allocation5 + $0x120] sm:$0xff] }
 0x139   : > { %9685 = vmatmul.mubr.msk.f32.vlgmr.msra.gmra.mrb[8].mxu0 %vm748_vm4, %v13714_v41  ;;  %9691 = vmatmul.mubr.msk.f32.vlgmr.msra.gmra.mrb[8].mxu1 %vm748_vm4, %v13714_v41  ;;  %v10137_v41 = vpack.c.bf16 %v548_v37, %v540_v36  ;;  %v10184_v36 = vpack.c.bf16 %v614_v30, %v606_v28  ;;  %v10187_v37 = vpack.c.bf16 %v521_v32, %v513_v31  ;;  %v522_v43 = vld [vmem:[#allocation5 + $0x70] sm:$0xff]  ;;  %v529_v44 = vld [vmem:[#allocation5 + $0xa8] sm:$0xff]  ;;  %v560_v12 = vld [vmem:[#allocation5 + $0x1a0] sm:$0xff] }
 0x13a   : > { %10130 = vmatpush1.bf16.msra.mxu0 %v10129_v18  ;;  %10160 = vmatpush1.bf16.msra.mxu1 %v10159_v21  ;;  %v613_v18 = vld [vmem:[#allocation5 + $0x348] sm:$0xf]  ;;  %v607_v21 = vld [vmem:[#allocation5 + $0x318] sm:$0xff]  ;;  %v530_v52 = vld [vmem:[#allocation5 + $0xb0] sm:$0xff] }
 0x13b   : > { %10132 = vmatprep.subr.bf16.mxu0 %v10131_v22  ;;  %10162 = vmatprep.subr.bf16.mxu1 %v10161_v26  ;;  %v615_v22 = vld [vmem:[#allocation5 + $0x358] sm:$0xf]  ;;  %v10151_v24 = vpack.c.bf16 %v613_v18, %v605_v17  ;;  %v612_v26 = vld [vmem:[#allocation5 + $0x340] sm:$0xf]  ;;  %v537_v45 = vld [vmem:[#allocation5 + $0xe8] sm:$0xff] }
 0x13c   : > { %1030 = vmatprep.mubr.f32.mxu0 %v15132_v0  ;;  %1119 = vmatprep.mubr.f32.mxu1 %v15132_v0  ;;  %v10181_v29 = vpack.c.bf16 %v615_v22, %v607_v21  ;;  %v538_v55 = vld [vmem:[#allocation5 + $0xf0] sm:$0xff]  ;;  %v545_v56 = vld [vmem:[#allocation5 + $0x128] sm:$0xff]  ;;  %v576_v28 = vld [vmem:[#allocation5 + $0x220] sm:$0xff] }
 0x13d   : > { %9686 = vmatmul.mubr.msk.f32.gmra.mrb[10].mxu0 %vm748_vm4, %v13728_v3  ;;  %9692 = vmatmul.mubr.msk.f32.gmra.mrb[10].mxu1 %vm748_vm4, %v13728_v3  ;;  %v10141_v3 = vpack.c.bf16 %v564_v49, %v556_v48  ;;  %v10219_v48 = vpack.c.bf16 %v522_v43, %v514_v40  ;;  %v10191_v49 = vpack.c.bf16 %v537_v45, %v529_v44  ;;  %v553_v57 = vld [vmem:[#allocation5 + $0x168] sm:$0xff]  ;;  %v546_v1 = vld [vmem:[#allocation5 + $0x130] sm:$0xff]  ;;  %v592_v40 = vld [vmem:[#allocation5 + $0x2a0] sm:$0xff] }
 0x13e   : > { %10134 = vmatpush1.bf16.msra.mxu0 %v10133_v33  ;;  %10164 = vmatpush1.bf16.msra.mxu1 %v10163_v34  ;;  %v515_v33 = vld [vmem:[#allocation5 + $0x38] sm:$0xff]  ;;  %v554_v5 = vld [vmem:[#allocation5 + $0x170] sm:$0xff]  ;;  %v561_v6 = vld [vmem:[#allocation5 + $0x1a8] sm:$0xff] }
 0x13f   : > { %10136 = vmatprep.subr.bf16.mxu0 %v10135_v35  ;;  %10166 = vmatprep.subr.bf16.mxu1 %v10165_v39  ;;  %v523_v34 = vld [vmem:[#allocation5 + $0x78] sm:$0xff]  ;;  %v10154_v35 = vpack.c.bf16 %v612_v26, %v604_v25  ;;  %v520_v39 = vld [vmem:[#allocation5 + $0x60] sm:$0xff]  ;;  %v569_v7 = vld [vmem:[#allocation5 + $0x1e8] sm:$0xff] }
 0x140   : > { %1036 = vmatprep.mubr.f32.mxu0 %v15132_v0  ;;  %1125 = vmatprep.mubr.f32.mxu1 %v15132_v0  ;;  %v10217_v42 = vpack.c.bf16 %v523_v34, %v515_v33  ;;  %v562_v16 = vld [vmem:[#allocation5 + $0x1b0] sm:$0xff]  ;;  %v577_v21 = vld [vmem:[#allocation5 + $0x228] sm:$0xff] }
 0x141   : > { %9687 = vmatmul.mubr.msk.f32.gmra.mrb[12].mxu0 %vm748_vm4, %v13740_v15  ;;  %9693 = vmatmul.mubr.msk.f32.gmra.mrb[12].mxu1 %vm748_vm4, %v13740_v15  ;;  %v10145_v15 = vpack.c.bf16 %v580_v61, %v572_v60  ;;  %v10223_v60 = vpack.c.bf16 %v538_v55, %v530_v52  ;;  %v10195_v61 = vpack.c.bf16 %v553_v57, %v545_v56  ;;  %v570_v18 = vld [vmem:[#allocation5 + $0x1f0] sm:$0xff]  ;;  %v585_v22 = vld [vmem:[#allocation5 + $0x268] sm:$0xff]  ;;  %v608_v52 = vld [vmem:[#allocation5 + $0x320] sm:$0xff] }
 0x142   : > { %10138 = vmatpush1.bf16.msra.mxu0 %v10137_v41  ;;  %10168 = vmatpush1.bf16.msra.mxu1 %v10167_v46  ;;  %v531_v41 = vld [vmem:[#allocation5 + $0xb8] sm:$0xff]  ;;  %v10231_v25 = vpack.c.bf16 %v570_v18, %v562_v16  ;;  %v10203_v26 = vpack.c.bf16 %v585_v22, %v577_v21  ;;  %v578_v30 = vld [vmem:[#allocation5 + $0x230] sm:$0xff]  ;;  %v593_v33 = vld [vmem:[#allocation5 + $0x2a8] sm:$0xff] }
 0x143   : > { %10140 = vmatprep.subr.bf16.mxu0 %v10139_v47  ;;  %10170 = vmatprep.subr.bf16.mxu1 %v10169_v51  ;;  %v539_v46 = vld [vmem:[#allocation5 + $0xf8] sm:$0xff]  ;;  %v10189_v47 = vpack.c.bf16 %v520_v39, %v512_v38  ;;  %v536_v51 = vld [vmem:[#allocation5 + $0xe0] sm:$0xff]  ;;  %v586_v32 = vld [vmem:[#allocation5 + $0x270] sm:$0xff] }
 0x144   : > { %1042 = vmatprep.mubr.f32.mxu0 %v15132_v0  ;;  %1131 = vmatprep.mubr.f32.mxu1 %v15132_v0  ;;  %v10221_v53 = vpack.c.bf16 %v539_v46, %v531_v41  ;;  %v601_v34 = vld [vmem:[#allocation5 + $0x2e8] sm:$0xff]  ;;  %v10235_v38 = vpack.c.bf16 %v586_v32, %v578_v30  ;;  %v594_v43 = vld [vmem:[#allocation5 + $0x2b0] sm:$0xff]  ;;  %v1543_v16 = vld [vmem:[#allocation5 + $0x780] sm:$0xff] }
 0x145   : > { %9688 = vmatmul.mubr.msk.f32.gmra.mrb[14].mxu0 %vm748_vm4, %v13750_v27  ;;  %9694 = vmatmul.mubr.msk.f32.gmra.mrb[14].mxu1 %vm748_vm4, %v13750_v27  ;;  %v10149_v27 = vpack.c.bf16 %v596_v11, %v588_v10  ;;  %v10227_v10 = vpack.c.bf16 %v554_v5, %v546_v1  ;;  %v10199_v11 = vpack.c.bf16 %v569_v7, %v561_v6  ;;  %v602_v45 = vld [vmem:[#allocation5 + $0x2f0] sm:$0xff]  ;;  %v609_v41 = vld [vmem:[#allocation5 + $0x328] sm:$0xff]  ;;  %v1527_v1 = vld [vmem:[#allocation5 + $0x700] sm:$0xff] }
 0x146   : > { %10142 = vmatpush1.bf16.msra.mxu0 %v10141_v3  ;;  %10172 = vmatpush1.bf16.msra.mxu1 %v10171_v58  ;;  %v547_v3 = vld [vmem:[#allocation5 + $0x138] sm:$0xff]  ;;  %v10207_v39 = vpack.c.bf16 %v601_v34, %v593_v33  ;;  %v617_v46 = vld [vmem:[#allocation5 + $0x368] sm:$0xf]  ;;  %v610_v55 = vld [vmem:[#allocation5 + $0x330] sm:$0xff] }
 0x147   : > { %10144 = vmatprep.subr.bf16.mxu0 %v10143_v59  ;;  %10174 = vmatprep.subr.bf16.mxu1 %v10173_v63  ;;  %v555_v58 = vld [vmem:[#allocation5 + $0x178] sm:$0xff]  ;;  %v10193_v59 = vpack.c.bf16 %v536_v51, %v528_v50  ;;  %v552_v63 = vld [vmem:[#allocation5 + $0x160] sm:$0xff]  ;;  %v10239_v50 = vpack.c.bf16 %v602_v45, %v594_v43  ;;  %v10211_v51 = vpack.c.bf16 %v617_v46, %v609_v41  ;;  %v618_v57 = vld [vmem:[#allocation5 + $0x370] sm:$0xf] }
 0x148   : > { %1234 = vmatprep.mubr.f32.mxu0 %v15132_v0  ;;  %1323 = vmatprep.mubr.f32.mxu1 %v15132_v0  ;;  %v10225_v2 = vpack.c.bf16 %v555_v58, %v547_v3  ;;  %v1528_v3 = vld [vmem:[#allocation5 + $0x708] sm:$0xff]  ;;  %v1529_v5 = vld [vmem:[#allocation5 + $0x710] sm:$0xff]  ;;  %v1559_v30 = vld [vmem:[#allocation5 + $0x800] sm:$0xff] }
 0x149   : > { %v1536_v58 = vld [vmem:[#allocation5 + $0x748] sm:$0xff]  ;;  %v1537_v7 = vld [vmem:[#allocation5 + $0x750] sm:$0xff]  ;;  %v1583_v43 = vld [vmem:[#allocation5 + $0x8c0] sm:$0xff] }
 0x14a   : > { %10146 = vmatpush1.bf16.msra.mxu0 %v10145_v15  ;;  %10176 = vmatpush1.bf16.msra.mxu1 %v10175_v8  ;;  %v563_v15 = vld [vmem:[#allocation5 + $0x1b8] sm:$0xff]  ;;  %v1545_v18 = vld [vmem:[#allocation5 + $0x790] sm:$0xff]  ;;  %v1592_v46 = vld [vmem:[#allocation5 + $0x908] sm:$0xff] }
 0x14b   : > { %10148 = vmatprep.subr.bf16.mxu0 %v10147_v9  ;;  %10178 = vmatprep.subr.bf16.mxu1 %v10177_v14  ;;  %v571_v8 = vld [vmem:[#allocation5 + $0x1f8] sm:$0xff]  ;;  %v10197_v9 = vpack.c.bf16 %v552_v63, %v544_v62  ;;  %v568_v14 = vld [vmem:[#allocation5 + $0x1e0] sm:$0xff]  ;;  %v10244_v62 = vpack.c.bf16 %v618_v57, %v610_v55  ;;  %v10247_v63 = vpack.c.bf16 %v1536_v58, %v1528_v3  ;;  %v1553_v22 = vld [vmem:[#allocation5 + $0x7d0] sm:$0xff] }
 0x14c   : > { %v10229_v17 = vpack.c.bf16 %v571_v8, %v563_v15  ;;  %v1544_v15 = vld [vmem:[#allocation5 + $0x788] sm:$0xff]  ;;  %v1561_v32 = vld [vmem:[#allocation5 + $0x810] sm:$0xff] }
 0x14d   : > { %v1552_v8 = vld [vmem:[#allocation5 + $0x7c8] sm:$0xff]  ;;  %v1569_v34 = vld [vmem:[#allocation5 + $0x850] sm:$0xff] }
 0x14e   : > { %10150 = vmatpush1.bf16.msra.mxu0 %v10149_v27  ;;  %10180 = vmatpush1.bf16.msra.mxu1 %v10179_v23  ;;  %v579_v27 = vld [vmem:[#allocation5 + $0x238] sm:$0xff]  ;;  %v1585_v41 = vld [vmem:[#allocation5 + $0x8d0] sm:$0xff]  ;;  %v1608_v3 = vld [vmem:[#allocation5 + $0x988] sm:$0xff] }
 0x14f   : > { %10153 = vmatprep.subr.msk.bf16.mxu0 %vm13695_vm2, %v10151_v24  ;;  %10183 = vmatprep.subr.msk.bf16.mxu1 %vm13695_vm2, %v10181_v29  ;;  %v587_v23 = vld [vmem:[#allocation5 + $0x278] sm:$0xff]  ;;  %v10201_v24 = vpack.c.bf16 %v568_v14, %v560_v12  ;;  %v584_v29 = vld [vmem:[#allocation5 + $0x260] sm:$0xff]  ;;  %v10279_v12 = vpack.c.bf16 %v1537_v7, %v1529_v5  ;;  %v10251_v14 = vpack.c.bf16 %v1552_v8, %v1544_v15  ;;  %v1593_v55 = vld [vmem:[#allocation5 + $0x910] sm:$0xff] }
 0x150   : > { %v10233_v31 = vpack.c.bf16 %v587_v23, %v579_v27  ;;  %v1560_v27 = vld [vmem:[#allocation5 + $0x808] sm:$0xff]  ;;  %v1601_v57 = vld [vmem:[#allocation5 + $0x950] sm:$0xff] }
 0x151   : > { %v1568_v23 = vld [vmem:[#allocation5 + $0x848] sm:$0xff]  ;;  %v1609_v5 = vld [vmem:[#allocation5 + $0x990] sm:$0xff] }
 0x152   : > { %10156 = vmatpush1.bf16.msk.msra.mxu0 %vm13695_vm2, %v10154_v35  ;;  %10186 = vmatpush1.bf16.msk.msra.mxu1 %vm13695_vm2, %v10184_v36  ;;  %v595_v35 = vld [vmem:[#allocation5 + $0x2b8] sm:$0xff]  ;;  %v1616_v58 = vld [vmem:[#allocation5 + $0x9c8] sm:$0xff]  ;;  %v1617_v7 = vld [vmem:[#allocation5 + $0x9d0] sm:$0xff] }
 0x153   : > { %10188 = vmatprep.subr.bf16.mxu0 %v10187_v37  ;;  %10218 = vmatprep.subr.bf16.mxu1 %v10217_v42  ;;  %v603_v36 = vld [vmem:[#allocation5 + $0x2f8] sm:$0xff]  ;;  %v10205_v37 = vpack.c.bf16 %v584_v29, %v576_v28  ;;  %v600_v42 = vld [vmem:[#allocation5 + $0x2e0] sm:$0xff]  ;;  %v10283_v28 = vpack.c.bf16 %v1553_v22, %v1545_v18  ;;  %v10255_v29 = vpack.c.bf16 %v1568_v23, %v1560_v27  ;;  %v1624_v15 = vld [vmem:[#allocation5 + $0xa08] sm:$0xff] }
 0x154   : > { %v10237_v44 = vpack.c.bf16 %v603_v36, %v595_v35  ;;  %v1576_v35 = vld [vmem:[#allocation5 + $0x888] sm:$0xff]  ;;  %v1625_v18 = vld [vmem:[#allocation5 + $0xa10] sm:$0xff] }
 0x155   : > { %9697 = vmatmul.mubr.msk.f32.vlgmr.msra.gmra.mrb[0].mxu0 %vm748_vm4, %v13700_v19  ;;  %9703 = vmatmul.mubr.msk.f32.vlgmr.msra.gmra.mrb[0].mxu1 %vm748_vm4, %v13700_v19  ;;  %v1584_v36 = vld [vmem:[#allocation5 + $0x8c8] sm:$0xff]  ;;  %v1633_v22 = vld [vmem:[#allocation5 + $0xa50] sm:$0xf] }
 0x156   : > { %10190 = vmatpush1.bf16.msra.mxu0 %v10189_v47  ;;  %10220 = vmatpush1.bf16.msra.mxu1 %v10219_v48  ;;  %v611_v47 = vld [vmem:[#allocation5 + $0x338] sm:$0xff]  ;;  %v1632_v8 = vld [vmem:[#allocation5 + $0xa48] sm:$0xf]  ;;  %v4353_v13 = vld [vmem:[#allocation10 + $0x808] sm:$0xff] }
 0x157   : > { %10192 = vmatprep.subr.bf16.mxu0 %v10191_v49  ;;  %10222 = vmatprep.subr.bf16.mxu1 %v10221_v53  ;;  %v619_v48 = vld [vmem:[#allocation5 + $0x378] sm:$0xf]  ;;  %v10209_v49 = vpack.c.bf16 %v600_v42, %v592_v40  ;;  %v616_v53 = vld [vmem:[#allocation5 + $0x360] sm:$0xf]  ;;  %v10259_v40 = vpack.c.bf16 %v1584_v36, %v1576_v35  ;;  %v1532_v27 = vld [vmem:[#allocation5 + $0x728] sm:$0xff] }
 0x158   : > { %1240 = vmatprep.mubr.f32.mxu0 %v15132_v0  ;;  %1329 = vmatprep.mubr.f32.mxu1 %v15132_v0  ;;  %v10241_v56 = vpack.c.bf16 %v619_v48, %v611_v47  ;;  %v1575_v42 = vld [vmem:[#allocation5 + $0x880] sm:$0xff]  ;;  %v1600_v47 = vld [vmem:[#allocation5 + $0x948] sm:$0xff]  ;;  %v1594_v48 = vld [vmem:[#allocation5 + $0x918] sm:$0xff] }
 0x159   : > { %9698 = vmatmul.mubr.msk.f32.gmra.mrb[2].mxu0 %vm748_vm4, %v13703_v20  ;;  %9704 = vmatmul.mubr.msk.f32.gmra.mrb[2].mxu1 %vm748_vm4, %v13703_v20  ;;  %v1540_v23 = vld [vmem:[#allocation5 + $0x768] sm:$0xff]  ;;  %v1539_v35 = vld [vmem:[#allocation5 + $0x760] sm:$0xff]  ;;  %v1533_v36 = vld [vmem:[#allocation5 + $0x730] sm:$0xff] }
 0x15a   : > { %10194 = vmatpush1.bf16.msra.mxu0 %v10193_v59  ;;  %10224 = vmatpush1.bf16.msra.mxu1 %v10223_v60  ;;  %v1530_v59 = vld [vmem:[#allocation5 + $0x718] sm:$0xff] }
 0x15b   : > { %10196 = vmatprep.subr.bf16.mxu0 %v10195_v61  ;;  %10226 = vmatprep.subr.bf16.mxu1 %v10225_v2  ;;  %v1538_v60 = vld [vmem:[#allocation5 + $0x758] sm:$0xff]  ;;  %v10214_v61 = vpack.c.bf16 %v616_v53, %v608_v52  ;;  %v1535_v2 = vld [vmem:[#allocation5 + $0x740] sm:$0xff] }
 0x15c   : > { %1246 = vmatprep.mubr.f32.mxu0 %v15132_v0  ;;  %1335 = vmatprep.mubr.f32.mxu1 %v15132_v0  ;;  %v10277_v6 = vpack.c.bf16 %v1538_v60, %v1530_v59  ;;  %v1591_v52 = vld [vmem:[#allocation5 + $0x900] sm:$0xff]  ;;  %v1610_v59 = vld [vmem:[#allocation5 + $0x998] sm:$0xff] }
 0x15d   : > { %9699 = vmatmul.mubr.msk.f32.gmra.mrb[4].mxu0 %vm748_vm4, %v13721_v54  ;;  %9705 = vmatmul.mubr.msk.f32.gmra.mrb[4].mxu1 %vm748_vm4, %v13721_v54  ;;  %v1599_v53 = vld [vmem:[#allocation5 + $0x940] sm:$0xff]  ;;  %v1618_v60 = vld [vmem:[#allocation5 + $0x9d8] sm:$0xff] }
 0x15e   : > { %10198 = vmatpush1.bf16.msra.mxu0 %v10197_v9  ;;  %10228 = vmatpush1.bf16.msra.mxu1 %v10227_v10  ;;  %v1546_v9 = vld [vmem:[#allocation5 + $0x798] sm:$0xff] }
 0x15f   : > { %10200 = vmatprep.subr.bf16.mxu0 %v10199_v11  ;;  %10230 = vmatprep.subr.bf16.mxu1 %v10229_v17  ;;  %v1554_v10 = vld [vmem:[#allocation5 + $0x7d8] sm:$0xff]  ;;  %v10249_v11 = vpack.c.bf16 %v1535_v2, %v1527_v1  ;;  %v1551_v17 = vld [vmem:[#allocation5 + $0x7c0] sm:$0xff] }
 0x160   : > { %1252 = vmatprep.mubr.f32.mxu0 %v15132_v0  ;;  %1341 = vmatprep.mubr.f32.mxu1 %v15132_v0  ;;  %v10281_v21 = vpack.c.bf16 %v1554_v10, %v1546_v9  ;;  %v1607_v1 = vld [vmem:[#allocation5 + $0x980] sm:$0xff]  ;;  %v1626_v9 = vld [vmem:[#allocation5 + $0xa18] sm:$0xff] }
 0x161   : > { %9700 = vmatmul.mubr.msk.f32.gmra.mrb[6].mxu0 %vm748_vm4, %v13731_v4  ;;  %9706 = vmatmul.mubr.msk.f32.gmra.mrb[6].mxu1 %vm748_vm4, %v13731_v4  ;;  %v1615_v2 = vld [vmem:[#allocation5 + $0x9c0] sm:$0xff]  ;;  %v1634_v10 = vld [vmem:[#allocation5 + $0xa58] sm:$0xf] }
 0x162   : > { %10202 = vmatpush1.bf16.msra.mxu0 %v10201_v24  ;;  %10232 = vmatpush1.bf16.msra.mxu1 %v10231_v25  ;;  %v1562_v24 = vld [vmem:[#allocation5 + $0x818] sm:$0xff] }
 0x163   : > { %10204 = vmatprep.subr.bf16.mxu0 %v10203_v26  ;;  %10234 = vmatprep.subr.bf16.mxu1 %v10233_v31  ;;  %v1570_v25 = vld [vmem:[#allocation5 + $0x858] sm:$0xff]  ;;  %v10253_v26 = vpack.c.bf16 %v1551_v17, %v1543_v16  ;;  %v1567_v31 = vld [vmem:[#allocation5 + $0x840] sm:$0xff] }
 0x164   : > { %1412 = vmatprep.mubr.f32.mxu0 %v15132_v0  ;;  %1501 = vmatprep.mubr.f32.mxu1 %v15132_v0  ;;  %v10285_v33 = vpack.c.bf16 %v1570_v25, %v1562_v24  ;;  %v1623_v16 = vld [vmem:[#allocation5 + $0xa00] sm:$0xff]  ;;  %v1534_v24 = vld [vmem:[#allocation5 + $0x738] sm:$0xff] }
 0x165   : > { %v1631_v17 = vld [vmem:[#allocation5 + $0xa40] sm:$0xf]  ;;  %v1542_v25 = vld [vmem:[#allocation5 + $0x778] sm:$0xff] }
 0x166   : > { %10206 = vmatpush1.bf16.msra.mxu0 %v10205_v37  ;;  %10236 = vmatpush1.bf16.msra.mxu1 %v10235_v38  ;;  %v1578_v37 = vld [vmem:[#allocation5 + $0x898] sm:$0xff] }
 0x167   : > { %10208 = vmatprep.subr.bf16.mxu0 %v10207_v39  ;;  %10238 = vmatprep.subr.bf16.mxu1 %v10237_v44  ;;  %v1586_v38 = vld [vmem:[#allocation5 + $0x8d8] sm:$0xff]  ;;  %v10287_v39 = vpack.c.bf16 %v1569_v34, %v1561_v32  ;;  %v1577_v44 = vld [vmem:[#allocation5 + $0x890] sm:$0xff]  ;;  %v10304_v32 = vpack.c.bf16 %v1633_v22, %v1625_v18  ;;  %v1531_v34 = vld [vmem:[#allocation5 + $0x720] sm:$0xff] }
 0x168   : > { %v10289_v45 = vpack.c.bf16 %v1586_v38, %v1578_v37  ;;  %v10337_v37 = vpack.c.bf16 %v1542_v25, %v1534_v24  ;;  %v1541_v38 = vld [vmem:[#allocation5 + $0x770] sm:$0xff]  ;;  %v1596_v18 = vld [vmem:[#allocation5 + $0x928] sm:$0xff]  ;;  %v1598_v22 = vld [vmem:[#allocation5 + $0x938] sm:$0xff] }
 0x16a   : > { %10210 = vmatpush1.bf16.msra.mxu0 %v10209_v49  ;;  %10240 = vmatpush1.bf16.msra.mxu1 %v10239_v50  ;;  %v1602_v49 = vld [vmem:[#allocation5 + $0x958] sm:$0xff]  ;;  %v10291_v50 = vpack.c.bf16 %v1585_v41, %v1577_v44  ;;  %v10309_v44 = vpack.c.bf16 %v1539_v35, %v1531_v34  ;;  %v10339_v41 = vpack.c.bf16 %v1541_v38, %v1533_v36  ;;  %v1605_v34 = vld [vmem:[#allocation5 + $0x970] sm:$0xff]  ;;  %v1612_v35 = vld [vmem:[#allocation5 + $0x9a8] sm:$0xff] }
 0x16b   : > { %10213 = vmatprep.subr.msk.bf16.mxu0 %vm13695_vm2, %v10211_v51  ;;  %10243 = vmatprep.subr.msk.bf16.mxu1 %vm13695_vm2, %v10241_v56  ;;  %v10263_v51 = vpack.c.bf16 %v1600_v47, %v1592_v46  ;;  %v10293_v56 = vpack.c.bf16 %v1602_v49, %v1594_v48  ;;  %v1547_v47 = vld [vmem:[#allocation5 + $0x7a0] sm:$0xff]  ;;  %v1549_v49 = vld [vmem:[#allocation5 + $0x7b0] sm:$0xff]  ;;  %v1620_v36 = vld [vmem:[#allocation5 + $0x9e8] sm:$0xff] }
 0x16c   : > { %v1555_v48 = vld [vmem:[#allocation5 + $0x7e0] sm:$0xff]  ;;  %v1622_v38 = vld [vmem:[#allocation5 + $0x9f8] sm:$0xff] }
 0x16e   : > { %10216 = vmatpush1.bf16.msk.msra.mxu0 %vm13695_vm2, %v10214_v61  ;;  %10246 = vmatpush1.bf16.msk.msra.mxu1 %vm13695_vm2, %v10244_v62  ;;  %v10265_v61 = vpack.c.bf16 %v1599_v53, %v1591_v52  ;;  %v10295_v62 = vpack.c.bf16 %v1601_v57, %v1593_v55  ;;  %v1572_v52 = vld [vmem:[#allocation5 + $0x868] sm:$0xff]  ;;  %v1566_v53 = vld [vmem:[#allocation5 + $0x838] sm:$0xff]  ;;  %v1645_v57 = vrot.slane %v13731_v4, 2 }
 0x16f   : > { %10248 = vmatprep.subr.bf16.mxu0 %v10247_v63  ;;  %10278 = vmatprep.subr.bf16.mxu1 %v10277_v6  ;;  %v10267_v63 = vpack.c.bf16 %v1616_v58, %v1608_v3  ;;  %v10297_v6 = vpack.c.bf16 %v1618_v60, %v1610_v59  ;;  %v1574_v55 = vld [vmem:[#allocation5 + $0x878] sm:$0xff]  ;;  %v1563_v59 = vld [vmem:[#allocation5 + $0x820] sm:$0xff] }
 0x170   : > { %v1571_v60 = vld [vmem:[#allocation5 + $0x860] sm:$0xff] }
 0x171   : > { %9709 = vmatmul.mubr.msk.f32.vlgmr.msra.gmra.mrb[8].mxu0 %vm748_vm4, %v13700_v19  ;;  %9715 = vmatmul.mubr.msk.f32.vlgmr.msra.gmra.mrb[8].mxu1 %vm748_vm4, %v13700_v19  ;;  %v10257_v19 = vpack.c.bf16 %v1567_v31, %v1559_v30  ;;  %v13861_v30 = vld [vmem:[%s13692_s17 + $0x8] sm:$0xff] }
 0x172   : > { %10250 = vmatpush1.bf16.msra.mxu0 %v10249_v11  ;;  %10280 = vmatpush1.bf16.msra.mxu1 %v10279_v12  ;;  %v10269_v11 = vpack.c.bf16 %v1615_v2, %v1607_v1  ;;  %v10299_v12 = vpack.c.bf16 %v1617_v7, %v1609_v5  ;;  %v1641_v31 = vrot.slane %v13861_v30, 2  ;;  %v1580_v1 = vld [vmem:[#allocation5 + $0x8a8] sm:$0xff]  ;;  %v1582_v5 = vld [vmem:[#allocation5 + $0x8b8] sm:$0xff] }
 0x173   : > { %10252 = vmatprep.subr.bf16.mxu0 %v10251_v14  ;;  %10282 = vmatprep.subr.bf16.mxu1 %v10281_v21  ;;  %v10271_v14 = vpack.c.bf16 %v1632_v8, %v1624_v15  ;;  %v10301_v21 = vpack.c.bf16 %v1634_v10, %v1626_v9  ;;  %v1588_v2 = vld [vmem:[#allocation5 + $0x8e8] sm:$0xff]  ;;  %v13894_v15 = vld [vmem:[%s13692_s17 + $0x20] sm:$0xf] }
 0x174   : > { %1418 = vmatprep.mubr.f32.mxu0 %v15132_v0  ;;  %1507 = vmatprep.mubr.f32.mxu1 %v15132_v0  ;;  %v1647_v8 = vrot.slane %v13894_v15, 2  ;;  %v10319_v10 = vpack.c.bf16 %v1588_v2, %v1580_v1  ;;  %v2070_v2 = vld [vmem:[#allocation5 + $0xa80] sm:$0xff] }
 0x175   : > { %9710 = vmatmul.mubr.msk.f32.gmra.mrb[10].mxu0 %vm748_vm4, %v13703_v20  ;;  %9716 = vmatmul.mubr.msk.f32.gmra.mrb[10].mxu1 %vm748_vm4, %v13703_v20  ;;  %v10261_v20 = vpack.c.bf16 %v1583_v43, %v1575_v42  ;;  %v1558_v42 = vld [vmem:[#allocation5 + $0x7f8] sm:$0xff] }
 0x176   : > { %10254 = vmatpush1.bf16.msra.mxu0 %v10253_v26  ;;  %10284 = vmatpush1.bf16.msra.mxu1 %v10283_v28  ;;  %v10274_v26 = vpack.c.bf16 %v1631_v17, %v1623_v16  ;;  %v13857_v28 = vld [vmem:[%s13692_s17] sm:$0xff]  ;;  %v1589_v17 = vld [vmem:[#allocation5 + $0x8f0] sm:$0xff]  ;;  %v13904_v24 = vsel %vm1639_vm5, %v1645_v57, %v1647_v8 }
 0x177   : > { %10256 = vmatprep.subr.bf16.mxu0 %v10255_v29  ;;  %10286 = vmatprep.subr.bf16.mxu1 %v10285_v33  ;;  %v1640_v29 = vrot.slane %v13857_v28, 2  ;;  %v10307_v33 = vpack.c.bf16 %v1540_v23, %v1532_v27  ;;  %v1606_v27 = vld [vmem:[#allocation5 + $0x978] sm:$0xff]  ;;  %v2080_v8 = vld [vmem:[#allocation5 + $0xad0] sm:$0xff] }
 0x178   : > { %1424 = vmatprep.mubr.f32.mxu0 %v15132_v0  ;;  %1513 = vmatprep.mubr.f32.mxu1 %v15132_v0 }
 0x179   : > { %9711 = vmatmul.mubr.msk.f32.gmra.mrb[12].mxu0 %vm748_vm4, %v13721_v54  ;;  %9717 = vmatmul.mubr.msk.f32.gmra.mrb[12].mxu1 %vm748_vm4, %v13721_v54  ;;  %v13871_v43 = vsel %vm1639_vm5, %v1640_v29, %v1641_v31  ;;  %v1595_v29 = vld [vmem:[#allocation5 + $0x920] sm:$0xff] }
 0x17a   : > { %10258 = vmatpush1.bf16.msra.mxu0 %v10257_v19  ;;  %10288 = vmatpush1.bf16.msra.mxu1 %v10287_v39  ;;  %v1548_v19 = vld [vmem:[#allocation5 + $0x7a8] sm:$0xff] }
 0x17b   : > { %10260 = vmatprep.subr.bf16.mxu0 %v10259_v40  ;;  %10290 = vmatprep.subr.bf16.mxu1 %v10289_v45  ;;  %v1556_v39 = vld [vmem:[#allocation5 + $0x7e8] sm:$0xff]  ;;  %v1550_v40 = vld [vmem:[#allocation5 + $0x7b8] sm:$0xff]  ;;  %v1643_v45 = vrot.slane %v13721_v54, 2  ;;  %v10313_v54 = vpack.c.bf16 %v1555_v48, %v1547_v47 }
 0x17c   : > { %1430 = vmatprep.mubr.f32.mxu0 %v15132_v0  ;;  %1519 = vmatprep.mubr.f32.mxu1 %v15132_v0  ;;  %v10311_v46 = vpack.c.bf16 %v1556_v39, %v1548_v19  ;;  %v1628_v47 = vld [vmem:[#allocation5 + $0xa28] sm:$0xff] }
 0x17d   : > { %9712 = vmatmul.mubr.msk.f32.gmra.mrb[14].mxu0 %vm748_vm4, %v13731_v4  ;;  %9718 = vmatmul.mubr.msk.f32.gmra.mrb[14].mxu1 %vm748_vm4, %v13731_v4  ;;  %v10317_v4 = vpack.c.bf16 %v1571_v60, %v1563_v59  ;;  %v13891_v7 = vsel %vm1639_vm5, %v1643_v45, %v1645_v57  ;;  %v1636_v48 = vld [vmem:[#allocation5 + $0xa68] sm:$0xf]  ;;  %v2073_v60 = vld [vmem:[#allocation5 + $0xa98] sm:$0xff] }
 0x17e   : > { %10262 = vmatpush1.bf16.msra.mxu0 %v10261_v20  ;;  %10292 = vmatpush1.bf16.msra.mxu1 %v10291_v50  ;;  %v10341_v20 = vpack.c.bf16 %v1558_v42, %v1550_v40  ;;  %v1557_v50 = vld [vmem:[#allocation5 + $0x7f0] sm:$0xff]  ;;  %v10327_v40 = vpack.c.bf16 %v1620_v36, %v1612_v35  ;;  %v1611_v42 = vld [vmem:[#allocation5 + $0x9a0] sm:$0xff]  ;;  %v2079_v59 = vld [vmem:[#allocation5 + $0xac8] sm:$0xff] }
 0x17f   : > { %10264 = vmatprep.subr.bf16.mxu0 %v10263_v51  ;;  %10294 = vmatprep.subr.bf16.mxu1 %v10293_v56  ;;  %v1564_v51 = vld [vmem:[#allocation5 + $0x828] sm:$0xff]  ;;  %v13881_v56 = vsel %vm1639_vm5, %v1641_v31, %v1643_v45  ;;  %v10343_v3 = vpack.c.bf16 %v1557_v50, %v1549_v49  ;;  %v1603_v31 = vld [vmem:[#allocation5 + $0x960] sm:$0xff]  ;;  %v1613_v45 = vld [vmem:[#allocation5 + $0x9b0] sm:$0xff] }
 0x180   : > { %1745 = vmatprep.mubr.f32.mxu0 %v15132_v0  ;;  %1834 = vmatprep.mubr.f32.mxu1 %v15132_v0  ;;  %v10315_v58 = vpack.c.bf16 %v1572_v52, %v1564_v51  ;;  %v10325_v19 = vpack.c.bf16 %v1603_v31, %v1595_v29  ;;  %v1630_v49 = vld [vmem:[#allocation5 + $0xa38] sm:$0xff]  ;;  %v10331_v52 = vpack.c.bf16 %v1636_v48, %v1628_v47  ;;  %v2102_v35 = vld [vmem:[#allocation5 + $0xb80] sm:$0xff]  ;;  %v2120_v48 = vld [vmem:[#allocation5 + $0xc10] sm:$0xff] }
 0x181   : > { %v2105_v29 = vld [vmem:[#allocation5 + $0xb98] sm:$0xff]  ;;  %v2110_v36 = vld [vmem:[#allocation5 + $0xbc0] sm:$0xff] }
 0x182   : > { %10266 = vmatpush1.bf16.msra.mxu0 %v10265_v61  ;;  %10296 = vmatpush1.bf16.msra.mxu1 %v10295_v62  ;;  %v1565_v61 = vld [vmem:[#allocation5 + $0x830] sm:$0xff]  ;;  %v10345_v62 = vpack.c.bf16 %v1574_v55, %v1566_v53  ;;  %v1627_v53 = vld [vmem:[#allocation5 + $0xa20] sm:$0xff]  ;;  %v2113_v31 = vld [vmem:[#allocation5 + $0xbd8] sm:$0xff] }
 0x183   : > { %10268 = vmatprep.subr.bf16.mxu0 %v10267_v63  ;;  %10298 = vmatprep.subr.bf16.mxu1 %v10297_v6  ;;  %v1573_v63 = vld [vmem:[#allocation5 + $0x870] sm:$0xff]  ;;  %v1590_v6 = vld [vmem:[#allocation5 + $0x8f8] sm:$0xff]  ;;  %v1635_v55 = vld [vmem:[#allocation5 + $0xa60] sm:$0xf] }
 0x184   : > { %v10347_v9 = vpack.c.bf16 %v1573_v63, %v1565_v61  ;;  %v10349_v16 = vpack.c.bf16 %v1590_v6, %v1582_v5  ;;  %v2081_v61 = vld [vmem:[#allocation5 + $0xad8] sm:$0xff]  ;;  %v2078_v5 = vld [vmem:[#allocation5 + $0xac0] sm:$0xff]  ;;  %v2072_v6 = vld [vmem:[#allocation5 + $0xa90] sm:$0xff] }
 0x185   : > { %v2126_v47 = vld [vmem:[#allocation5 + $0xc40] sm:$0xff] }
 0x186   : > { %10270 = vmatpush1.bf16.msra.mxu0 %v10269_v11  ;;  %10300 = vmatpush1.bf16.msra.mxu1 %v10299_v12  ;;  %v1579_v11 = vld [vmem:[#allocation5 + $0x8a0] sm:$0xff] }
 0x187   : > { %10273 = vmatprep.subr.msk.bf16.mxu0 %vm13695_vm2, %v10271_v14  ;;  %10303 = vmatprep.subr.msk.bf16.mxu1 %vm13695_vm2, %v10301_v21  ;;  %v1587_v12 = vld [vmem:[#allocation5 + $0x8e0] sm:$0xff]  ;;  %v1581_v14 = vld [vmem:[#allocation5 + $0x8b0] sm:$0xff]  ;;  %v1604_v21 = vld [vmem:[#allocation5 + $0x968] sm:$0xff] }
 0x188   : > { %v10321_v23 = vpack.c.bf16 %v1587_v12, %v1579_v11  ;;  %v10351_v25 = vpack.c.bf16 %v1589_v17, %v1581_v14  ;;  %v2089_v11 = vld [vmem:[#allocation5 + $0xb18] sm:$0xff]  ;;  %v10369_v14 = vpack.c.bf16 %v2078_v5, %v2070_v2 }
 0x189   : > { %v2097_v12 = vld [vmem:[#allocation5 + $0xb58] sm:$0xff] }
 0x18a   : > { %10276 = vmatpush1.bf16.msk.msra.mxu0 %vm13695_vm2, %v10274_v26  ;;  %10306 = vmatpush1.bf16.msk.msra.mxu1 %vm13695_vm2, %v10304_v32  ;;  %v10323_v26 = vpack.c.bf16 %v1604_v21, %v1596_v18  ;;  %v1597_v32 = vld [vmem:[#allocation5 + $0x930] sm:$0xff]  ;;  %v2086_v18 = vld [vmem:[#allocation5 + $0xb00] sm:$0xff] }
 0x18b   : > { %10308 = vmatprep.subr.bf16.mxu0 %v10307_v33  ;;  %10338 = vmatprep.subr.bf16.mxu1 %v10337_v37  ;;  %v10353_v33 = vpack.c.bf16 %v1606_v27, %v1598_v22  ;;  %v1614_v37 = vld [vmem:[#allocation5 + $0x9b8] sm:$0xff]  ;;  %v10355_v39 = vpack.c.bf16 %v1605_v34, %v1597_v32  ;;  %v2094_v21 = vld [vmem:[#allocation5 + $0xb40] sm:$0xff]  ;;  %v2088_v22 = vld [vmem:[#allocation5 + $0xb10] sm:$0xff]  ;;  %v10401_v27 = vpack.c.bf16 %v2097_v12, %v2089_v11 }
 0x18c   : > { %v10373_v32 = vpack.c.bf16 %v2094_v21, %v2086_v18  ;;  %v2167_v11 = vld [vmem:[#allocation5 + $0xd88] sm:$0xff]  ;;  %v2166_v21 = vld [vmem:[#allocation5 + $0xd80] sm:$0xff] }
 0x18d   : > { %9721 = vmatmul.mubr.msk.f32.vlgmr.msra.gmra.mrb[0].mxu0 %vm748_vm4, %v13871_v43  ;;  %9727 = vmatmul.mubr.msk.f32.vlgmr.msra.gmra.mrb[0].mxu1 %vm748_vm4, %v13871_v43  ;;  %v2175_v12 = vld [vmem:[#allocation5 + $0xdc8] sm:$0xf] }
 0x18e   : > { %10310 = vmatpush1.bf16.msra.mxu0 %v10309_v44  ;;  %10340 = vmatpush1.bf16.msra.mxu1 %v10339_v41  ;;  %v1619_v44 = vld [vmem:[#allocation5 + $0x9e0] sm:$0xff]  ;;  %v10357_v41 = vpack.c.bf16 %v1622_v38, %v1614_v37  ;;  %v2104_v37 = vld [vmem:[#allocation5 + $0xb90] sm:$0xff]  ;;  %v10405_v38 = vpack.c.bf16 %v2113_v31, %v2105_v29  ;;  %v10391_v18 = vpack.c.bf16 %v2175_v12, %v2167_v11  ;;  %v2083_v29 = vld [vmem:[#allocation5 + $0xae8] sm:$0xff]  ;;  %v2190_v12 = vrot.slane %v13894_v15, 3 }
 0x18f   : > { %10312 = vmatprep.subr.bf16.mxu0 %v10311_v46  ;;  %10342 = vmatprep.subr.bf16.mxu1 %v10341_v20  ;;  %v1621_v46 = vld [vmem:[#allocation5 + $0x9f0] sm:$0xff]  ;;  %v1638_v20 = vld [vmem:[#allocation5 + $0xa78] sm:$0xf]  ;;  %v10329_v50 = vpack.c.bf16 %v1619_v44, %v1611_v42 }
 0x190   : > { %1751 = vmatprep.mubr.f32.mxu0 %v15132_v0  ;;  %1840 = vmatprep.mubr.f32.mxu1 %v15132_v0  ;;  %v10359_v51 = vpack.c.bf16 %v1621_v46, %v1613_v45  ;;  %v10361_v57 = vpack.c.bf16 %v1638_v20, %v1630_v49  ;;  %v2121_v42 = vld [vmem:[#allocation5 + $0xc18] sm:$0xff]  ;;  %v2118_v46 = vld [vmem:[#allocation5 + $0xc00] sm:$0xff]  ;;  %v2128_v20 = vld [vmem:[#allocation5 + $0xc50] sm:$0xff] }
 0x191   : > { %9722 = vmatmul.mubr.msk.f32.gmra.mrb[2].mxu0 %vm748_vm4, %v13881_v56  ;;  %9728 = vmatmul.mubr.msk.f32.gmra.mrb[2].mxu1 %vm748_vm4, %v13881_v56  ;;  %v2129_v44 = vld [vmem:[#allocation5 + $0xc58] sm:$0xff] }
 0x192   : > { %10314 = vmatpush1.bf16.msra.mxu0 %v10313_v54  ;;  %10344 = vmatpush1.bf16.msra.mxu1 %v10343_v3  ;;  %v1629_v54 = vld [vmem:[#allocation5 + $0xa30] sm:$0xff]  ;;  %v10409_v49 = vpack.c.bf16 %v2129_v44, %v2121_v42  ;;  %v2077_v31 = vld [vmem:[#allocation5 + $0xab8] sm:$0xff]  ;;  %v2091_v44 = vld [vmem:[#allocation5 + $0xb28] sm:$0xff] }
 0x193   : > { %10316 = vmatprep.subr.bf16.mxu0 %v10315_v58  ;;  %10346 = vmatprep.subr.bf16.mxu1 %v10345_v62  ;;  %v1637_v3 = vld [vmem:[#allocation5 + $0xa70] sm:$0xf]  ;;  %v2071_v58 = vld [vmem:[#allocation5 + $0xa88] sm:$0xff]  ;;  %v10334_v62 = vpack.c.bf16 %v1635_v55, %v1627_v53  ;;  %v2145_v53 = vld [vmem:[#allocation5 + $0xcd8] sm:$0xff]  ;;  %v10411_v55 = vpack.c.bf16 %v2128_v20, %v2120_v48 }
 0x194   : > { %1757 = vmatprep.mubr.f32.mxu0 %v15132_v0  ;;  %1846 = vmatprep.mubr.f32.mxu1 %v15132_v0  ;;  %v10364_v63 = vpack.c.bf16 %v1637_v3, %v1629_v54  ;;  %v10367_v1 = vpack.c.bf16 %v2079_v59, %v2071_v58  ;;  %v2142_v3 = vld [vmem:[#allocation5 + $0xcc0] sm:$0xff]  ;;  %v2136_v58 = vld [vmem:[#allocation5 + $0xc90] sm:$0xff] }
 0x195   : > { %9723 = vmatmul.mubr.msk.f32.gmra.mrb[4].mxu0 %vm748_vm4, %v13891_v7  ;;  %9729 = vmatmul.mubr.msk.f32.gmra.mrb[4].mxu1 %vm748_vm4, %v13891_v7  ;;  %v2084_v42 = vld [vmem:[#allocation5 + $0xaf0] sm:$0xff]  ;;  %v2090_v20 = vld [vmem:[#allocation5 + $0xb20] sm:$0xff] }
 0x196   : > { %10318 = vmatpush1.bf16.msra.mxu0 %v10317_v4  ;;  %10348 = vmatpush1.bf16.msra.mxu1 %v10347_v9  ;;  %v10397_v4 = vpack.c.bf16 %v2081_v61, %v2073_v60  ;;  %v2087_v9 = vld [vmem:[#allocation5 + $0xb08] sm:$0xff]  ;;  %v2144_v60 = vld [vmem:[#allocation5 + $0xcd0] sm:$0xff] }
 0x197   : > { %10320 = vmatprep.subr.bf16.mxu0 %v10319_v10  ;;  %10350 = vmatprep.subr.bf16.mxu1 %v10349_v16  ;;  %v2095_v10 = vld [vmem:[#allocation5 + $0xb48] sm:$0xff]  ;;  %v10399_v16 = vpack.c.bf16 %v2080_v8, %v2072_v6  ;;  %v10415_v2 = vpack.c.bf16 %v2144_v60, %v2136_v58  ;;  %v2150_v6 = vld [vmem:[#allocation5 + $0xd00] sm:$0xff]  ;;  %v2152_v8 = vld [vmem:[#allocation5 + $0xd10] sm:$0xff] }
 0x198   : > { %1763 = vmatprep.mubr.f32.mxu0 %v15132_v0  ;;  %1852 = vmatprep.mubr.f32.mxu1 %v15132_v0  ;;  %v10371_v17 = vpack.c.bf16 %v2095_v10, %v2087_v9  ;;  %v2151_v61 = vld [vmem:[#allocation5 + $0xd08] sm:$0xff]  ;;  %v2160_v10 = vld [vmem:[#allocation5 + $0xd50] sm:$0xff] }
 0x199   : > { %9724 = vmatmul.mubr.msk.f32.gmra.mrb[6].mxu0 %vm748_vm4, %v13904_v24  ;;  %9730 = vmatmul.mubr.msk.f32.gmra.mrb[6].mxu1 %vm748_vm4, %v13904_v24 }
 0x19a   : > { %10322 = vmatpush1.bf16.msra.mxu0 %v10321_v23  ;;  %10352 = vmatpush1.bf16.msra.mxu1 %v10351_v25  ;;  %v2096_v23 = vld [vmem:[#allocation5 + $0xb50] sm:$0xff]  ;;  %v2103_v25 = vld [vmem:[#allocation5 + $0xb88] sm:$0xff] }
 0x19b   : > { %10324 = vmatprep.subr.bf16.mxu0 %v10323_v26  ;;  %10354 = vmatprep.subr.bf16.mxu1 %v10353_v33  ;;  %v2111_v26 = vld [vmem:[#allocation5 + $0xbc8] sm:$0xff]  ;;  %v10403_v33 = vpack.c.bf16 %v2096_v23, %v2088_v22  ;;  %v2174_v22 = vld [vmem:[#allocation5 + $0xdc0] sm:$0xf] }
 0x19c   : > { %1923 = vmatprep.mubr.f32.mxu0 %v15132_v0  ;;  %2012 = vmatprep.mubr.f32.mxu1 %v15132_v0  ;;  %v10375_v34 = vpack.c.bf16 %v2111_v26, %v2103_v25  ;;  %v2176_v25 = vld [vmem:[#allocation5 + $0xdd0] sm:$0xf]  ;;  %v2075_v26 = vld [vmem:[#allocation5 + $0xaa8] sm:$0xff] }
 0x19e   : > { %10326 = vmatpush1.bf16.msra.mxu0 %v10325_v19  ;;  %10356 = vmatpush1.bf16.msra.mxu1 %v10355_v39  ;;  %v2112_v19 = vld [vmem:[#allocation5 + $0xbd0] sm:$0xff]  ;;  %v2119_v39 = vld [vmem:[#allocation5 + $0xc08] sm:$0xff] }
 0x19f   : > { %10328 = vmatprep.subr.bf16.mxu0 %v10327_v40  ;;  %10358 = vmatprep.subr.bf16.mxu1 %v10357_v41  ;;  %v2127_v40 = vld [vmem:[#allocation5 + $0xc48] sm:$0xff]  ;;  %v10407_v45 = vpack.c.bf16 %v2112_v19, %v2104_v37  ;;  %v10427_v37 = vpack.c.bf16 %v2083_v29, %v2075_v26  ;;  %v2082_v19 = vld [vmem:[#allocation5 + $0xae0] sm:$0xff]  ;;  %v2149_v26 = vld [vmem:[#allocation5 + $0xcf8] sm:$0xff] }
 0x1a0   : > { %v10379_v41 = vpack.c.bf16 %v2127_v40, %v2119_v39  ;;  %v2076_v39 = vld [vmem:[#allocation5 + $0xab0] sm:$0xff] }
 0x1a1   : > { %v10459_v48 = vpack.c.bf16 %v2084_v42, %v2076_v39  ;;  %v2157_v39 = vld [vmem:[#allocation5 + $0xd38] sm:$0xff] }
 0x1a2   : > { %10330 = vmatpush1.bf16.msra.mxu0 %v10329_v50  ;;  %10360 = vmatpush1.bf16.msra.mxu1 %v10359_v51  ;;  %v2135_v50 = vld [vmem:[#allocation5 + $0xc88] sm:$0xff] }
 0x1a3   : > { %10333 = vmatprep.subr.msk.bf16.mxu0 %vm13695_vm2, %v10331_v52  ;;  %10363 = vmatprep.subr.msk.bf16.mxu1 %vm13695_vm2, %v10361_v57  ;;  %v2143_v51 = vld [vmem:[#allocation5 + $0xcc8] sm:$0xff]  ;;  %v2137_v52 = vld [vmem:[#allocation5 + $0xc98] sm:$0xff]  ;;  %v2134_v57 = vld [vmem:[#allocation5 + $0xc80] sm:$0xff] }
 0x1a4   : > { %v10383_v54 = vpack.c.bf16 %v2143_v51, %v2135_v50  ;;  %v10413_v59 = vpack.c.bf16 %v2145_v53, %v2137_v52  ;;  %v2098_v50 = vld [vmem:[#allocation5 + $0xb60] sm:$0xff]  ;;  %v2092_v51 = vld [vmem:[#allocation5 + $0xb30] sm:$0xff] }
 0x1a5   : > { %v2100_v53 = vld [vmem:[#allocation5 + $0xb70] sm:$0xff] }
 0x1a6   : > { %10336 = vmatpush1.bf16.msk.msra.mxu0 %vm13695_vm2, %v10334_v62  ;;  %10366 = vmatpush1.bf16.msk.msra.mxu1 %vm13695_vm2, %v10364_v63  ;;  %v2159_v62 = vld [vmem:[#allocation5 + $0xd48] sm:$0xff]  ;;  %v2153_v63 = vld [vmem:[#allocation5 + $0xd18] sm:$0xff] }
 0x1a7   : > { %10368 = vmatprep.subr.bf16.mxu0 %v10367_v1  ;;  %10398 = vmatprep.subr.bf16.mxu1 %v10397_v4  ;;  %v2161_v1 = vld [vmem:[#allocation5 + $0xd58] sm:$0xff]  ;;  %v10387_v5 = vpack.c.bf16 %v2159_v62, %v2151_v61  ;;  %v2158_v4 = vld [vmem:[#allocation5 + $0xd40] sm:$0xff]  ;;  %v10463_v61 = vpack.c.bf16 %v2100_v53, %v2092_v51 }
 0x1a8   : > { %v10417_v9 = vpack.c.bf16 %v2161_v1, %v2153_v63  ;;  %v2106_v63 = vld [vmem:[#allocation5 + $0xba0] sm:$0xff]  ;;  %v2181_v51 = vld [vmem:[#allocation5 + $0xdf8] sm:$0xf] }
 0x1a9   : > { %9733 = vmatmul.mubr.msk.f32.vlgmr.msra.gmra.mrb[8].mxu0 %vm748_vm4, %v13871_v43  ;;  %9739 = vmatmul.mubr.msk.f32.vlgmr.msra.gmra.mrb[8].mxu1 %vm748_vm4, %v13871_v43  ;;  %v10377_v43 = vpack.c.bf16 %v2110_v36, %v2102_v35  ;;  %v2184_v35 = vrot.slane %v13861_v30, 3  ;;  %v2101_v30 = vld [vmem:[#allocation5 + $0xb78] sm:$0xff]  ;;  %v2114_v1 = vld [vmem:[#allocation5 + $0xbe0] sm:$0xff] }
 0x1aa   : > { %10370 = vmatpush1.bf16.msra.mxu0 %v10369_v14  ;;  %10400 = vmatpush1.bf16.msra.mxu1 %v10399_v16  ;;  %v2169_v14 = vld [vmem:[#allocation5 + $0xd98] sm:$0xff] }
 0x1ab   : > { %10372 = vmatprep.subr.bf16.mxu0 %v10371_v17  ;;  %10402 = vmatprep.subr.bf16.mxu1 %v10401_v27  ;;  %v2177_v16 = vld [vmem:[#allocation5 + $0xdd8] sm:$0xf]  ;;  %v10419_v17 = vpack.c.bf16 %v2160_v10, %v2152_v8  ;;  %v2168_v27 = vld [vmem:[#allocation5 + $0xd90] sm:$0xff]  ;;  %v10437_v10 = vpack.c.bf16 %v2114_v1, %v2106_v63 }
 0x1ac   : > { %1929 = vmatprep.mubr.f32.mxu0 %v15132_v0  ;;  %2018 = vmatprep.mubr.f32.mxu1 %v15132_v0  ;;  %v10421_v23 = vpack.c.bf16 %v2177_v16, %v2169_v14  ;;  %v10424_v36 = vpack.c.bf16 %v2176_v25, %v2168_v27  ;;  %v2125_v8 = vld [vmem:[#allocation5 + $0xc38] sm:$0xff]  ;;  %v2139_v27 = vld [vmem:[#allocation5 + $0xca8] sm:$0xff] }
 0x1ad   : > { %9734 = vmatmul.mubr.msk.f32.gmra.mrb[10].mxu0 %vm748_vm4, %v13881_v56  ;;  %9740 = vmatmul.mubr.msk.f32.gmra.mrb[10].mxu1 %vm748_vm4, %v13881_v56  ;;  %v10381_v56 = vpack.c.bf16 %v2126_v47, %v2118_v46  ;;  %v13958_v46 = vld [vmem:[%s13692_s17 + $0x10] sm:$0xff]  ;;  %v2141_v25 = vld [vmem:[#allocation5 + $0xcb8] sm:$0xff] }
 0x1ae   : > { %10374 = vmatpush1.bf16.msra.mxu0 %v10373_v32  ;;  %10404 = vmatpush1.bf16.msra.mxu1 %v10403_v33  ;;  %v2085_v32 = vld [vmem:[#allocation5 + $0xaf8] sm:$0xff]  ;;  %v10394_v33 = vpack.c.bf16 %v2174_v22, %v2166_v21  ;;  %v2186_v47 = vrot.slane %v13958_v46, 3  ;;  %v2132_v22 = vld [vmem:[#allocation5 + $0xc70] sm:$0xff] }
 0x1af   : > { %10376 = vmatprep.subr.bf16.mxu0 %v10375_v34  ;;  %10406 = vmatprep.subr.bf16.mxu1 %v10405_v38  ;;  %v2183_v34 = vrot.slane %v13857_v28, 3  ;;  %v2074_v38 = vld [vmem:[#allocation5 + $0xaa0] sm:$0xff]  ;;  %v10457_v40 = vpack.c.bf16 %v2085_v32, %v2077_v31  ;;  %v2099_v28 = vld [vmem:[#allocation5 + $0xb68] sm:$0xff]  ;;  %v2616_v63 = vld [vmem:[#allocation5 + $0xe18] sm:$0xff] }
 0x1b0   : > { %1935 = vmatprep.mubr.f32.mxu0 %v15132_v0  ;;  %2024 = vmatprep.mubr.f32.mxu1 %v15132_v0  ;;  %v13968_v58 = vsel %vm2182_vm6, %v2184_v35, %v2186_v47  ;;  %v2624_v1 = vld [vmem:[#allocation5 + $0xe58] sm:$0xff] }
 0x1b1   : > { %9735 = vmatmul.mubr.msk.f32.gmra.mrb[12].mxu0 %vm748_vm4, %v13891_v7  ;;  %9741 = vmatmul.mubr.msk.f32.gmra.mrb[12].mxu1 %vm748_vm4, %v13891_v7  ;;  %v10385_v7 = vpack.c.bf16 %v2142_v3, %v2134_v57  ;;  %v2117_v57 = vld [vmem:[#allocation5 + $0xbf8] sm:$0xff]  ;;  %v10433_v3 = vpack.c.bf16 %v2098_v50, %v2090_v20  ;;  %v2179_v20 = vld [vmem:[#allocation5 + $0xde8] sm:$0xf] }
 0x1b2   : > { %10378 = vmatpush1.bf16.msra.mxu0 %v10377_v43  ;;  %10408 = vmatpush1.bf16.msra.mxu1 %v10407_v45  ;;  %v2093_v43 = vld [vmem:[#allocation5 + $0xb38] sm:$0xff]  ;;  %v13955_v45 = vsel %vm2182_vm6, %v2183_v34, %v2184_v35  ;;  %v2146_v34 = vld [vmem:[#allocation5 + $0xce0] sm:$0xff]  ;;  %v2140_v35 = vld [vmem:[#allocation5 + $0xcb0] sm:$0xff] }
 0x1b3   : > { %10380 = vmatprep.subr.bf16.mxu0 %v10379_v41  ;;  %10410 = vmatprep.subr.bf16.mxu1 %v10409_v49  ;;  %v10429_v41 = vpack.c.bf16 %v2082_v19, %v2074_v38  ;;  %v10431_v49 = vpack.c.bf16 %v2099_v28, %v2091_v44  ;;  %v10461_v52 = vpack.c.bf16 %v2101_v30, %v2093_v43  ;;  %v2155_v38 = vld [vmem:[#allocation5 + $0xd28] sm:$0xff]  ;;  %v2154_v43 = vld [vmem:[#allocation5 + $0xd20] sm:$0xff]  ;;  %v2173_v50 = vld [vmem:[#allocation5 + $0xdb8] sm:$0xff] }
 0x1b4   : > { %1941 = vmatprep.mubr.f32.mxu0 %v15132_v0  ;;  %2030 = vmatprep.mubr.f32.mxu1 %v15132_v0  ;;  %v2163_v19 = vld [vmem:[#allocation5 + $0xd68] sm:$0xff]  ;;  %v2162_v30 = vld [vmem:[#allocation5 + $0xd60] sm:$0xff] }
 0x1b5   : > { %9736 = vmatmul.mubr.msk.f32.gmra.mrb[14].mxu0 %vm748_vm4, %v13904_v24  ;;  %9742 = vmatmul.mubr.msk.f32.gmra.mrb[14].mxu1 %vm748_vm4, %v13904_v24  ;;  %v10389_v24 = vpack.c.bf16 %v2158_v4, %v2150_v6  ;;  %v2123_v6 = vld [vmem:[#allocation5 + $0xc28] sm:$0xff]  ;;  %v10447_v28 = vpack.c.bf16 %v2163_v19, %v2155_v38  ;;  %v2653_v38 = vld [vmem:[#allocation5 + $0xf40] sm:$0xff]  ;;  %v2647_v19 = vld [vmem:[#allocation5 + $0xf10] sm:$0xff] }
 0x1b6   : > { %10382 = vmatpush1.bf16.msra.mxu0 %v10381_v56  ;;  %10412 = vmatpush1.bf16.msra.mxu1 %v10411_v55  ;;  %v2107_v56 = vld [vmem:[#allocation5 + $0xba8] sm:$0xff] }
 0x1b7   : > { %10384 = vmatprep.subr.bf16.mxu0 %v10383_v54  ;;  %10414 = vmatprep.subr.bf16.mxu1 %v10413_v59  ;;  %v2115_v55 = vld [vmem:[#allocation5 + $0xbe8] sm:$0xff]  ;;  %v2109_v54 = vld [vmem:[#allocation5 + $0xbb8] sm:$0xff]  ;;  %v13971_v59 = vld [vmem:[%s13692_s17 + $0x18] sm:$0xff] }
 0x1b8   : > { %2288 = vmatprep.mubr.f32.mxu0 %v15132_v0  ;;  %2377 = vmatprep.mubr.f32.mxu1 %v15132_v0  ;;  %v2188_v60 = vrot.slane %v13971_v59, 3  ;;  %v10435_v62 = vpack.c.bf16 %v2115_v55, %v2107_v56  ;;  %v2131_v4 = vld [vmem:[#allocation5 + $0xc68] sm:$0xff]  ;;  %v2170_v55 = vld [vmem:[#allocation5 + $0xda0] sm:$0xff] }
 0x1b9   : > { %v10439_v16 = vpack.c.bf16 %v2131_v4, %v2123_v6  ;;  %v2613_v6 = vld [vmem:[#allocation5 + $0xe00] sm:$0xff] }
 0x1ba   : > { %10386 = vmatpush1.bf16.msra.mxu0 %v10385_v7  ;;  %10416 = vmatpush1.bf16.msra.mxu1 %v10415_v2  ;;  %v2108_v7 = vld [vmem:[#allocation5 + $0xbb0] sm:$0xff]  ;;  %v10465_v2 = vpack.c.bf16 %v2117_v57, %v2109_v54  ;;  %v13981_v11 = vsel %vm2182_vm6, %v2186_v47, %v2188_v60  ;;  %v13991_v29 = vsel %vm2182_vm6, %v2188_v60, %v2190_v12  ;;  %v2178_v54 = vld [vmem:[#allocation5 + $0xde0] sm:$0xf]  ;;  %v2630_v12 = vld [vmem:[#allocation5 + $0xe88] sm:$0xff] }
 0x1bb   : > { %10388 = vmatprep.subr.bf16.mxu0 %v10387_v5  ;;  %10418 = vmatprep.subr.bf16.mxu1 %v10417_v9  ;;  %v2116_v5 = vld [vmem:[#allocation5 + $0xbf0] sm:$0xff]  ;;  %v2133_v9 = vld [vmem:[#allocation5 + $0xc78] sm:$0xff]  ;;  %v2621_v4 = vld [vmem:[#allocation5 + $0xe40] sm:$0xff] }
 0x1bc   : > { %v10467_v14 = vpack.c.bf16 %v2116_v5, %v2108_v7  ;;  %v10469_v21 = vpack.c.bf16 %v2133_v9, %v2125_v8  ;;  %v2172_v57 = vld [vmem:[#allocation5 + $0xdb0] sm:$0xff]  ;;  %v10454_v7 = vpack.c.bf16 %v2178_v54, %v2170_v55  ;;  %v10517_v9 = vpack.c.bf16 %v2624_v1, %v2616_v63  ;;  %v2694_v63 = vld [vmem:[#allocation5 + $0x1088] sm:$0xff] }
 0x1bd   : > { %v2180_v60 = vld [vmem:[#allocation5 + $0xdf0] sm:$0xf]  ;;  %v2702_v1 = vld [vmem:[#allocation5 + $0x10c8] sm:$0xff] }
 0x1be   : > { %10390 = vmatpush1.bf16.msra.mxu0 %v10389_v24  ;;  %10420 = vmatpush1.bf16.msra.mxu1 %v10419_v17  ;;  %v2122_v24 = vld [vmem:[#allocation5 + $0xc20] sm:$0xff]  ;;  %v2615_v8 = vld [vmem:[#allocation5 + $0xe10] sm:$0xff] }
 0x1bf   : > { %10393 = vmatprep.subr.msk.bf16.mxu0 %vm13695_vm2, %v10391_v18  ;;  %10423 = vmatprep.subr.msk.bf16.mxu1 %vm13695_vm2, %v10421_v23  ;;  %v2130_v17 = vld [vmem:[#allocation5 + $0xc60] sm:$0xff]  ;;  %v2124_v18 = vld [vmem:[#allocation5 + $0xc30] sm:$0xff]  ;;  %v2147_v23 = vld [vmem:[#allocation5 + $0xce8] sm:$0xff] }
 0x1c0   : > { %v10441_v15 = vpack.c.bf16 %v2130_v17, %v2122_v24  ;;  %v10471_v31 = vpack.c.bf16 %v2132_v22, %v2124_v18  ;;  %v10443_v32 = vpack.c.bf16 %v2147_v23, %v2139_v27  ;;  %v2640_v24 = vld [vmem:[#allocation5 + $0xed8] sm:$0xff]  ;;  %v10489_v17 = vpack.c.bf16 %v2621_v4, %v2613_v6  ;;  %v2629_v22 = vld [vmem:[#allocation5 + $0xe80] sm:$0xff]  ;;  %v2631_v23 = vld [vmem:[#allocation5 + $0xe90] sm:$0xff] }
 0x1c1   : > { %v2637_v27 = vld [vmem:[#allocation5 + $0xec0] sm:$0xff]  ;;  %v10507_v6 = vpack.c.bf16 %v2702_v1, %v2694_v63 }
 0x1c2   : > { %10396 = vmatpush1.bf16.msk.msra.mxu0 %vm13695_vm2, %v10394_v33  ;;  %10426 = vmatpush1.bf16.msk.msra.mxu1 %vm13695_vm2, %v10424_v36  ;;  %v2138_v33 = vld [vmem:[#allocation5 + $0xca0] sm:$0xff]  ;;  %v10473_v36 = vpack.c.bf16 %v2149_v26, %v2141_v25  ;;  %v2639_v26 = vld [vmem:[#allocation5 + $0xed0] sm:$0xff] }
 0x1c3   : > { %10428 = vmatprep.subr.bf16.mxu0 %v10427_v37  ;;  %10458 = vmatprep.subr.bf16.mxu1 %v10457_v40  ;;  %v2148_v37 = vld [vmem:[#allocation5 + $0xcf0] sm:$0xff]  ;;  %v2165_v40 = vld [vmem:[#allocation5 + $0xd78] sm:$0xff]  ;;  %v10445_v42 = vpack.c.bf16 %v2146_v34, %v2138_v33  ;;  %v10493_v34 = vpack.c.bf16 %v2637_v27, %v2629_v22  ;;  %v2693_v4 = vld [vmem:[#allocation5 + $0x1080] sm:$0xff] }
 0x1c4   : > { %v10475_v44 = vpack.c.bf16 %v2148_v37, %v2140_v35  ;;  %v10477_v47 = vpack.c.bf16 %v2165_v40, %v2157_v39  ;;  %v2656_v33 = vld [vmem:[#allocation5 + $0xf58] sm:$0xff]  ;;  %v10523_v35 = vpack.c.bf16 %v2639_v26, %v2631_v23  ;;  %v2645_v37 = vld [vmem:[#allocation5 + $0xf00] sm:$0xff]  ;;  %v2655_v40 = vld [vmem:[#allocation5 + $0xf50] sm:$0xff] }
 0x1c5   : > { %9745 = vmatmul.mubr.msk.f32.vlgmr.msra.gmra.mrb[0].mxu0 %vm748_vm4, %v13955_v45  ;;  %9751 = vmatmul.mubr.msk.f32.vlgmr.msra.gmra.mrb[0].mxu1 %vm748_vm4, %v13955_v45  ;;  %v2709_v22 = vld [vmem:[#allocation5 + $0x1100] sm:$0xff]  ;;  %v2711_v23 = vld [vmem:[#allocation5 + $0x1110] sm:$0xff] }
 0x1c6   : > { %10430 = vmatpush1.bf16.msra.mxu0 %v10429_v41  ;;  %10460 = vmatpush1.bf16.msra.mxu1 %v10459_v48  ;;  %v2156_v41 = vld [vmem:[#allocation5 + $0xd30] sm:$0xff]  ;;  %v2717_v27 = vld [vmem:[#allocation5 + $0x1140] sm:$0xf] }
 0x1c7   : > { %10432 = vmatprep.subr.bf16.mxu0 %v10431_v49  ;;  %10462 = vmatprep.subr.bf16.mxu1 %v10461_v52  ;;  %v2164_v48 = vld [vmem:[#allocation5 + $0xd70] sm:$0xff]  ;;  %v2171_v49 = vld [vmem:[#allocation5 + $0xda8] sm:$0xff]  ;;  %v10449_v52 = vpack.c.bf16 %v2162_v30, %v2154_v43  ;;  %v2672_v43 = vld [vmem:[#allocation5 + $0xfd8] sm:$0xff]  ;;  %v10527_v30 = vpack.c.bf16 %v2655_v40, %v2647_v19 }
 0x1c8   : > { %2294 = vmatprep.mubr.f32.mxu0 %v15132_v0  ;;  %2383 = vmatprep.mubr.f32.mxu1 %v15132_v0  ;;  %v10479_v53 = vpack.c.bf16 %v2164_v48, %v2156_v41  ;;  %v10451_v56 = vpack.c.bf16 %v2179_v20, %v2171_v49  ;;  %v2669_v48 = vld [vmem:[#allocation5 + $0xfc0] sm:$0xff]  ;;  %v2663_v49 = vld [vmem:[#allocation5 + $0xf90] sm:$0xff] }
 0x1c9   : > { %9746 = vmatmul.mubr.msk.f32.gmra.mrb[2].mxu0 %vm748_vm4, %v13968_v58  ;;  %9752 = vmatmul.mubr.msk.f32.gmra.mrb[2].mxu1 %vm748_vm4, %v13968_v58  ;;  %v2719_v26 = vld [vmem:[#allocation5 + $0x1150] sm:$0xf]  ;;  %v2617_v40 = vld [vmem:[#allocation5 + $0xe20] sm:$0xff] }
 0x1ca   : > { %10434 = vmatpush1.bf16.msra.mxu0 %v10433_v3  ;;  %10464 = vmatpush1.bf16.msra.mxu1 %v10463_v61  ;;  %v10481_v3 = vpack.c.bf16 %v2181_v51, %v2173_v50  ;;  %v2614_v61 = vld [vmem:[#allocation5 + $0xe08] sm:$0xff]  ;;  %v2671_v50 = vld [vmem:[#allocation5 + $0xfd0] sm:$0xff]  ;;  %v10544_v19 = vpack.c.bf16 %v2719_v26, %v2711_v23  ;;  %v2649_v1 = vld [vmem:[#allocation5 + $0xf20] sm:$0xff] }
 0x1cb   : > { %10436 = vmatprep.subr.bf16.mxu0 %v10435_v62  ;;  %10466 = vmatprep.subr.bf16.mxu1 %v10465_v2  ;;  %v2622_v62 = vld [vmem:[#allocation5 + $0xe48] sm:$0xff]  ;;  %v10484_v2 = vpack.c.bf16 %v2180_v60, %v2172_v57  ;;  %v10531_v55 = vpack.c.bf16 %v2671_v50, %v2663_v49  ;;  %v2677_v57 = vld [vmem:[#allocation5 + $0x1000] sm:$0xff]  ;;  %v2679_v60 = vld [vmem:[#allocation5 + $0x1010] sm:$0xff] }
 0x1cc   : > { %2300 = vmatprep.mubr.f32.mxu0 %v15132_v0  ;;  %2389 = vmatprep.mubr.f32.mxu1 %v15132_v0  ;;  %v10487_v5 = vpack.c.bf16 %v2622_v62, %v2614_v61  ;;  %v2678_v51 = vld [vmem:[#allocation5 + $0x1008] sm:$0xff]  ;;  %v2687_v62 = vld [vmem:[#allocation5 + $0x1050] sm:$0xff]  ;;  %v2636_v49 = vld [vmem:[#allocation5 + $0xeb8] sm:$0xff] }
 0x1cd   : > { %9747 = vmatmul.mubr.msk.f32.gmra.mrb[4].mxu0 %vm748_vm4, %v13981_v11  ;;  %9753 = vmatmul.mubr.msk.f32.gmra.mrb[4].mxu1 %vm748_vm4, %v13981_v11  ;;  %v2690_v23 = vld [vmem:[#allocation5 + $0x1068] sm:$0xff]  ;;  %v2684_v26 = vld [vmem:[#allocation5 + $0x1038] sm:$0xff] }
 0x1ce   : > { %10438 = vmatpush1.bf16.msra.mxu0 %v10437_v10  ;;  %10468 = vmatpush1.bf16.msra.mxu1 %v10467_v14  ;;  %v2623_v10 = vld [vmem:[#allocation5 + $0xe50] sm:$0xff]  ;;  %v2638_v14 = vld [vmem:[#allocation5 + $0xec8] sm:$0xff] }
 0x1cf   : > { %10440 = vmatprep.subr.bf16.mxu0 %v10439_v16  ;;  %10470 = vmatprep.subr.bf16.mxu1 %v10469_v21  ;;  %v2632_v16 = vld [vmem:[#allocation5 + $0xe98] sm:$0xff]  ;;  %v10519_v18 = vpack.c.bf16 %v2623_v10, %v2615_v8  ;;  %v10491_v21 = vpack.c.bf16 %v2638_v14, %v2630_v12  ;;  %v2701_v8 = vld [vmem:[#allocation5 + $0x10c0] sm:$0xff]  ;;  %v2703_v12 = vld [vmem:[#allocation5 + $0x10d0] sm:$0xff] }
 0x1d0   : > { %2306 = vmatprep.mubr.f32.mxu0 %v15132_v0  ;;  %2395 = vmatprep.mubr.f32.mxu1 %v15132_v0  ;;  %v10521_v25 = vpack.c.bf16 %v2640_v24, %v2632_v16  ;;  %v2710_v14 = vld [vmem:[#allocation5 + $0x1108] sm:$0xff]  ;;  %v2712_v24 = vld [vmem:[#allocation5 + $0x1118] sm:$0xff] }
 0x1d1   : > { %9748 = vmatmul.mubr.msk.f32.gmra.mrb[6].mxu0 %vm748_vm4, %v13991_v29  ;;  %9754 = vmatmul.mubr.msk.f32.gmra.mrb[6].mxu1 %vm748_vm4, %v13991_v29  ;;  %v2718_v16 = vld [vmem:[#allocation5 + $0x1148] sm:$0xf] }
 0x1d2   : > { %10442 = vmatpush1.bf16.msra.mxu0 %v10441_v15  ;;  %10472 = vmatpush1.bf16.msra.mxu1 %v10471_v31  ;;  %v2646_v15 = vld [vmem:[#allocation5 + $0xf08] sm:$0xff] }
 0x1d3   : > { %10444 = vmatprep.subr.bf16.mxu0 %v10443_v32  ;;  %10474 = vmatprep.subr.bf16.mxu1 %v10473_v36  ;;  %v2654_v31 = vld [vmem:[#allocation5 + $0xf48] sm:$0xff]  ;;  %v2648_v32 = vld [vmem:[#allocation5 + $0xf18] sm:$0xff] }
 0x1d4   : > { %2466 = vmatprep.mubr.f32.mxu0 %v15132_v0  ;;  %2555 = vmatprep.mubr.f32.mxu1 %v15132_v0  ;;  %v10495_v36 = vpack.c.bf16 %v2654_v31, %v2646_v15  ;;  %v10525_v39 = vpack.c.bf16 %v2656_v33, %v2648_v32  ;;  %v2618_v15 = vld [vmem:[#allocation5 + $0xe28] sm:$0xff]  ;;  %v2620_v32 = vld [vmem:[#allocation5 + $0xe38] sm:$0xff] }
 0x1d5   : > { %v2626_v31 = vld [vmem:[#allocation5 + $0xe68] sm:$0xff]  ;;  %v2628_v33 = vld [vmem:[#allocation5 + $0xe78] sm:$0xff] }
 0x1d6   : > { %10446 = vmatpush1.bf16.msra.mxu0 %v10445_v42  ;;  %10476 = vmatpush1.bf16.msra.mxu1 %v10475_v44  ;;  %v2662_v42 = vld [vmem:[#allocation5 + $0xf88] sm:$0xff] }
 0x1d7   : > { %10448 = vmatprep.subr.bf16.mxu0 %v10447_v28  ;;  %10478 = vmatprep.subr.bf16.mxu1 %v10477_v47  ;;  %v2670_v44 = vld [vmem:[#allocation5 + $0xfc8] sm:$0xff]  ;;  %v2664_v28 = vld [vmem:[#allocation5 + $0xf98] sm:$0xff]  ;;  %v2661_v47 = vld [vmem:[#allocation5 + $0xf80] sm:$0xff] }
 0x1d8   : > { %v10499_v41 = vpack.c.bf16 %v2670_v44, %v2662_v42  ;;  %v10529_v20 = vpack.c.bf16 %v2672_v43, %v2664_v28  ;;  %v2625_v42 = vld [vmem:[#allocation5 + $0xe60] sm:$0xff]  ;;  %v10577_v44 = vpack.c.bf16 %v2628_v33, %v2620_v32  ;;  %v2619_v28 = vld [vmem:[#allocation5 + $0xe30] sm:$0xff] }
 0x1d9   : > { %v2627_v43 = vld [vmem:[#allocation5 + $0xe70] sm:$0xff] }
 0x1da   : > { %10450 = vmatpush1.bf16.msra.mxu0 %v10449_v52  ;;  %10480 = vmatpush1.bf16.msra.mxu1 %v10479_v53  ;;  %v2686_v52 = vld [vmem:[#allocation5 + $0x1048] sm:$0xff]  ;;  %v2680_v53 = vld [vmem:[#allocation5 + $0x1018] sm:$0xff]  ;;  %v10579_v50 = vpack.c.bf16 %v2627_v43, %v2619_v28 }
 0x1db   : > { %10453 = vmatprep.subr.msk.bf16.mxu0 %vm13695_vm2, %v10451_v56  ;;  %10483 = vmatprep.subr.msk.bf16.mxu1 %vm13695_vm2, %v10481_v3  ;;  %v2688_v56 = vld [vmem:[#allocation5 + $0x1058] sm:$0xff]  ;;  %v10503_v54 = vpack.c.bf16 %v2686_v52, %v2678_v51  ;;  %v2685_v3 = vld [vmem:[#allocation5 + $0x1040] sm:$0xff] }
 0x1dc   : > { %v10533_v61 = vpack.c.bf16 %v2688_v56, %v2680_v53  ;;  %v2633_v51 = vld [vmem:[#allocation5 + $0xea0] sm:$0xff]  ;;  %v2635_v56 = vld [vmem:[#allocation5 + $0xeb0] sm:$0xff] }
 0x1dd   : > { %v2641_v52 = vld [vmem:[#allocation5 + $0xee0] sm:$0xff] }
 0x1de   : > { %10456 = vmatpush1.bf16.msk.msra.mxu0 %vm13695_vm2, %v10454_v7  ;;  %10486 = vmatpush1.bf16.msk.msra.mxu1 %vm13695_vm2, %v10484_v2  ;;  %v2696_v7 = vld [vmem:[#allocation5 + $0x1098] sm:$0xff] }
 0x1df   : > { %10488 = vmatprep.subr.bf16.mxu0 %v10487_v5  ;;  %10518 = vmatprep.subr.bf16.mxu1 %v10517_v9  ;;  %v2704_v2 = vld [vmem:[#allocation5 + $0x10d8] sm:$0xff]  ;;  %v10535_v5 = vpack.c.bf16 %v2687_v62, %v2679_v60  ;;  %v2695_v9 = vld [vmem:[#allocation5 + $0x1090] sm:$0xff]  ;;  %v2730_v60 = vrot.slane %v13971_v59, 4 }
 0x1e0   : > { %v10537_v10 = vpack.c.bf16 %v2704_v2, %v2696_v7  ;;  %v2660_v62 = vld [vmem:[#allocation5 + $0xf78] sm:$0xff]  ;;  %v2657_v7 = vld [vmem:[#allocation5 + $0xf60] sm:$0xff] }
 0x1e1   : > { %9757 = vmatmul.mubr.msk.f32.vlgmr.msra.gmra.mrb[8].mxu0 %vm748_vm4, %v13955_v45  ;;  %9763 = vmatmul.mubr.msk.f32.vlgmr.msra.gmra.mrb[8].mxu1 %vm748_vm4, %v13955_v45  ;;  %v10497_v45 = vpack.c.bf16 %v2653_v38, %v2645_v37  ;;  %v13020_v37 = vld [vmem:[%s13692_s17 + $0x8] sm:$0xff] }
 0x1e2   : > { %10490 = vmatpush1.bf16.msra.mxu0 %v10489_v17  ;;  %10520 = vmatpush1.bf16.msra.mxu1 %v10519_v18  ;;  %v2720_v17 = vld [vmem:[#allocation5 + $0x1158] sm:$0xf]  ;;  %v10539_v18 = vpack.c.bf16 %v2703_v12, %v2695_v9  ;;  %v2726_v38 = vrot.slane %v13020_v37, 4  ;;  %v10557_v9 = vpack.c.bf16 %v2657_v7, %v2649_v1  ;;  %v2683_v37 = vld [vmem:[#allocation5 + $0x1030] sm:$0xff]  ;;  %v4359_v7 = vld [vmem:[#allocation10 + $0x838] sm:$0xff] }
 0x1e3   : > { %10492 = vmatprep.subr.bf16.mxu0 %v10491_v21  ;;  %10522 = vmatprep.subr.bf16.mxu1 %v10521_v25  ;;  %v10511_v21 = vpack.c.bf16 %v2718_v16, %v2710_v14  ;;  %v10541_v25 = vpack.c.bf16 %v2720_v17, %v2712_v24  ;;  %v2668_v14 = vld [vmem:[#allocation5 + $0xfb8] sm:$0xff]  ;;  %v2665_v17 = vld [vmem:[#allocation5 + $0xfa0] sm:$0xff] }
 0x1e4   : > { %2472 = vmatprep.mubr.f32.mxu0 %v15132_v0  ;;  %2561 = vmatprep.mubr.f32.mxu1 %v15132_v0  ;;  %v2676_v16 = vld [vmem:[#allocation5 + $0xff8] sm:$0xff] }
 0x1e5   : > { %9758 = vmatmul.mubr.msk.f32.gmra.mrb[10].mxu0 %vm748_vm4, %v13968_v58  ;;  %9764 = vmatmul.mubr.msk.f32.gmra.mrb[10].mxu1 %vm748_vm4, %v13968_v58  ;;  %v10501_v58 = vpack.c.bf16 %v2669_v48, %v2661_v47  ;;  %v10549_v47 = vpack.c.bf16 %v2625_v42, %v2617_v40  ;;  %v2728_v48 = vrot.slane %v13958_v46, 4  ;;  %v2706_v40 = vld [vmem:[#allocation5 + $0x10e8] sm:$0xff]  ;;  %v2700_v42 = vld [vmem:[#allocation5 + $0x10b8] sm:$0xff] }
 0x1e6   : > { %10494 = vmatpush1.bf16.msra.mxu0 %v10493_v34  ;;  %10524 = vmatpush1.bf16.msra.mxu1 %v10523_v35  ;;  %v10514_v34 = vpack.c.bf16 %v2717_v27, %v2709_v22  ;;  %v13019_v35 = vld [vmem:[%s13692_s17] sm:$0xff]  ;;  %v2675_v22 = vld [vmem:[#allocation5 + $0xff0] sm:$0xff]  ;;  %v2682_v27 = vld [vmem:[#allocation5 + $0x1028] sm:$0xff] }
 0x1e7   : > { %10496 = vmatprep.subr.bf16.mxu0 %v10495_v36  ;;  %10526 = vmatprep.subr.bf16.mxu1 %v10525_v39  ;;  %v2725_v36 = vrot.slane %v13019_v35, 4  ;;  %v10547_v39 = vpack.c.bf16 %v2626_v31, %v2618_v15  ;;  %v14052_v46 = vsel %vm757_vm0, %v2726_v38, %v2728_v48  ;;  %v2692_v15 = vld [vmem:[#allocation5 + $0x1078] sm:$0xff]  ;;  %v2681_v35 = vld [vmem:[#allocation5 + $0x1020] sm:$0xff] }
 0x1e8   : > { %2478 = vmatprep.mubr.f32.mxu0 %v15132_v0  ;;  %2567 = vmatprep.mubr.f32.mxu1 %v15132_v0 }
 0x1e9   : > { %9759 = vmatmul.mubr.msk.f32.gmra.mrb[12].mxu0 %vm748_vm4, %v13981_v11  ;;  %9765 = vmatmul.mubr.msk.f32.gmra.mrb[12].mxu1 %vm748_vm4, %v13981_v11  ;;  %v10505_v11 = vpack.c.bf16 %v2685_v3, %v2677_v57  ;;  %v2658_v57 = vld [vmem:[#allocation5 + $0xf68] sm:$0xff]  ;;  %v10553_v3 = vpack.c.bf16 %v2641_v52, %v2633_v51  ;;  %v2716_v52 = vld [vmem:[#allocation5 + $0x1138] sm:$0xff] }
 0x1ea   : > { %10498 = vmatpush1.bf16.msra.mxu0 %v10497_v45  ;;  %10528 = vmatpush1.bf16.msra.mxu1 %v10527_v30  ;;  %v2634_v45 = vld [vmem:[#allocation5 + $0xea8] sm:$0xff] }
 0x1eb   : > { %10500 = vmatprep.subr.bf16.mxu0 %v10499_v41  ;;  %10530 = vmatprep.subr.bf16.mxu1 %v10529_v20  ;;  %v2642_v30 = vld [vmem:[#allocation5 + $0xee8] sm:$0xff]  ;;  %v14042_v41 = vsel %vm757_vm0, %v2725_v36, %v2726_v38  ;;  %v2644_v20 = vld [vmem:[#allocation5 + $0xef8] sm:$0xff]  ;;  %v2689_v36 = vld [vmem:[#allocation5 + $0x1060] sm:$0xff]  ;;  %v10593_v38 = vpack.c.bf16 %v2692_v15, %v2684_v26 }
 0x1ec   : > { %2484 = vmatprep.mubr.f32.mxu0 %v15132_v0  ;;  %2573 = vmatprep.mubr.f32.mxu1 %v15132_v0  ;;  %v10551_v53 = vpack.c.bf16 %v2642_v30, %v2634_v45  ;;  %v10565_v28 = vpack.c.bf16 %v2689_v36, %v2681_v35  ;;  %v2697_v30 = vld [vmem:[#allocation5 + $0x10a0] sm:$0xff]  ;;  %v2722_v51 = vld [vmem:[#allocation5 + $0x1168] sm:$0xf]  ;;  %v4370_v36 = vld [vmem:[#allocation10 + $0x890] sm:$0xff] }
 0x1ed   : > { %9760 = vmatmul.mubr.msk.f32.gmra.mrb[14].mxu0 %vm748_vm4, %v13991_v29  ;;  %9766 = vmatmul.mubr.msk.f32.gmra.mrb[14].mxu1 %vm748_vm4, %v13991_v29  ;;  %v10509_v29 = vpack.c.bf16 %v2701_v8, %v2693_v4  ;;  %v2674_v4 = vld [vmem:[#allocation5 + $0xfe8] sm:$0xff]  ;;  %v14062_v8 = vsel %vm757_vm0, %v2728_v48, %v2730_v60  ;;  %v2699_v48 = vld [vmem:[#allocation5 + $0x10b0] sm:$0xff]  ;;  %v4371_v26 = vld [vmem:[#allocation10 + $0x898] sm:$0xff] }
 0x1ee   : > { %10502 = vmatpush1.bf16.msra.mxu0 %v10501_v58  ;;  %10532 = vmatpush1.bf16.msra.mxu1 %v10531_v55  ;;  %v2643_v58 = vld [vmem:[#allocation5 + $0xef0] sm:$0xff]  ;;  %v10581_v55 = vpack.c.bf16 %v2644_v20, %v2636_v49 }
 0x1ef   : > { %10504 = vmatprep.subr.bf16.mxu0 %v10503_v54  ;;  %10534 = vmatprep.subr.bf16.mxu1 %v10533_v61  ;;  %v2650_v54 = vld [vmem:[#allocation5 + $0xf28] sm:$0xff]  ;;  %v2652_v61 = vld [vmem:[#allocation5 + $0xf38] sm:$0xff]  ;;  %v10583_v63 = vpack.c.bf16 %v2643_v58, %v2635_v56  ;;  %v2707_v20 = vld [vmem:[#allocation5 + $0x10f0] sm:$0xff] }
 0x1f0   : > { %2830 = vmatprep.mubr.f32.mxu0 %v15132_v0  ;;  %2919 = vmatprep.mubr.f32.mxu1 %v15132_v0  ;;  %v10555_v2 = vpack.c.bf16 %v2658_v57, %v2650_v54  ;;  %v10585_v59 = vpack.c.bf16 %v2660_v62, %v2652_v61  ;;  %v10599_v58 = vpack.c.bf16 %v2707_v20, %v2699_v48  ;;  %v2713_v54 = vld [vmem:[#allocation5 + $0x1120] sm:$0xff]  ;;  %v2723_v61 = vld [vmem:[#allocation5 + $0x1170] sm:$0xf]  ;;  %v4382_v48 = vld [vmem:[#allocation10 + $0x8f0] sm:$0xff] }
 0x1f1   : > { %v2721_v57 = vld [vmem:[#allocation5 + $0x1160] sm:$0xf]  ;;  %v4385_v20 = vld [vmem:[#allocation10 + $0x908] sm:$0xff] }
 0x1f2   : > { %10506 = vmatpush1.bf16.msra.mxu0 %v10505_v11  ;;  %10536 = vmatpush1.bf16.msra.mxu1 %v10535_v5  ;;  %v2651_v11 = vld [vmem:[#allocation5 + $0xf30] sm:$0xff]  ;;  %v10574_v62 = vpack.c.bf16 %v2721_v57, %v2713_v54  ;;  %v4386_v57 = vld [vmem:[#allocation10 + $0x910] sm:$0xff] }
 0x1f3   : > { %10508 = vmatprep.subr.bf16.mxu0 %v10507_v6  ;;  %10538 = vmatprep.subr.bf16.mxu1 %v10537_v10  ;;  %v2659_v5 = vld [vmem:[#allocation5 + $0xf70] sm:$0xff]  ;;  %v2666_v6 = vld [vmem:[#allocation5 + $0xfa8] sm:$0xff]  ;;  %v13021_v10 = vld [vmem:[%s13692_s17 + $0x20] sm:$0xf] }
 0x1f4   : > { %v2732_v12 = vrot.slane %v13021_v10, 4  ;;  %v10587_v24 = vpack.c.bf16 %v2659_v5, %v2651_v11  ;;  %v4352_v11 = vld [vmem:[#allocation10 + $0x800] sm:$0xff]  ;;  %v4365_v10 = vld [vmem:[#allocation10 + $0x868] sm:$0xff] }
 0x1f5   : > { %v4356_v5 = vld [vmem:[#allocation10 + $0x820] sm:$0xff] }
 0x1f6   : > { %10510 = vmatpush1.bf16.msra.mxu0 %v10509_v29  ;;  %10540 = vmatpush1.bf16.msra.mxu1 %v10539_v18  ;;  %v2673_v29 = vld [vmem:[#allocation5 + $0xfe0] sm:$0xff]  ;;  %v2667_v18 = vld [vmem:[#allocation5 + $0xfb0] sm:$0xff]  ;;  %v14072_v31 = vsel %vm757_vm0, %v2730_v60, %v2732_v12 }
 0x1f7   : > { %10513 = vmatprep.subr.msk.bf16.mxu0 %vm13695_vm2, %v10511_v21  ;;  %10543 = vmatprep.subr.msk.bf16.mxu1 %vm13695_vm2, %v10541_v25  ;;  %v10559_v21 = vpack.c.bf16 %v2674_v4, %v2666_v6  ;;  %v10589_v25 = vpack.c.bf16 %v2676_v16, %v2668_v14  ;;  %v10561_v32 = vpack.c.bf16 %v2673_v29, %v2665_v17  ;;  %v2715_v60 = vld [vmem:[#allocation5 + $0x1130] sm:$0xff]  ;;  %v4358_v4 = vld [vmem:[#allocation10 + $0x830] sm:$0xff]  ;;  %v4363_v12 = vld [vmem:[#allocation10 + $0x858] sm:$0xff] }
 0x1f8   : > { %v10591_v33 = vpack.c.bf16 %v2675_v22, %v2667_v18  ;;  %v10609_v6 = vpack.c.bf16 %v4356_v5, %v4352_v11  ;;  %v4367_v16 = vld [vmem:[#allocation10 + $0x878] sm:$0xff]  ;;  %v4364_v17 = vld [vmem:[#allocation10 + $0x860] sm:$0xff]  ;;  %v4366_v22 = vld [vmem:[#allocation10 + $0x870] sm:$0xff] }
 0x1f9   : > { %v10739_v29 = vpack.c.bf16 %v4367_v16, %v4363_v12  ;;  %v4394_v11 = vld [vmem:[#allocation10 + $0x950] sm:$0xff]  ;;  %v4400_v12 = vld [vmem:[#allocation10 + $0x980] sm:$0xff] }
 0x1fa   : > { %10516 = vmatpush1.bf16.msk.msra.mxu0 %vm13695_vm2, %v10514_v34  ;;  %10546 = vmatpush1.bf16.msk.msra.mxu1 %vm13695_vm2, %v10544_v19  ;;  %v10563_v34 = vpack.c.bf16 %v2690_v23, %v2682_v27  ;;  %v2691_v19 = vld [vmem:[#allocation5 + $0x1070] sm:$0xff]  ;;  %v4398_v5 = vld [vmem:[#allocation10 + $0x970] sm:$0xff] }
 0x1fb   : > { %10548 = vmatprep.subr.bf16.mxu0 %v10547_v39  ;;  %10578 = vmatprep.subr.bf16.mxu1 %v10577_v44  ;;  %v2698_v39 = vld [vmem:[#allocation5 + $0x10a8] sm:$0xff]  ;;  %v2708_v44 = vld [vmem:[#allocation5 + $0x10f8] sm:$0xff]  ;;  %v10595_v43 = vpack.c.bf16 %v2691_v19, %v2683_v37  ;;  %v4369_v23 = vld [vmem:[#allocation10 + $0x888] sm:$0xff] }
 0x1fc   : > { %v10567_v45 = vpack.c.bf16 %v2706_v40, %v2698_v39  ;;  %v10597_v49 = vpack.c.bf16 %v2708_v44, %v2700_v42  ;;  %v4374_v37 = vld [vmem:[#allocation10 + $0x8b0] sm:$0xff]  ;;  %v4377_v19 = vld [vmem:[#allocation10 + $0x8c8] sm:$0xff]  ;;  %v4379_v40 = vld [vmem:[#allocation10 + $0x8d8] sm:$0xff] }
 0x1fd   : > { %9769 = vmatmul.mubr.msk.f32.vlgmr.msra.gmra.mrb[0].mxu0 %vm748_vm4, %v14042_v41  ;;  %9775 = vmatmul.mubr.msk.f32.vlgmr.msra.gmra.mrb[0].mxu1 %vm748_vm4, %v14042_v41  ;;  %v4381_v39 = vld [vmem:[#allocation10 + $0x8e8] sm:$0xff]  ;;  %v4383_v44 = vld [vmem:[#allocation10 + $0x8f8] sm:$0xff] }
 0x1fe   : > { %10550 = vmatpush1.bf16.msra.mxu0 %v10549_v47  ;;  %10580 = vmatpush1.bf16.msra.mxu1 %v10579_v50  ;;  %v2705_v47 = vld [vmem:[#allocation5 + $0x10e0] sm:$0xff]  ;;  %v2714_v50 = vld [vmem:[#allocation5 + $0x1128] sm:$0xff]  ;;  %v10619_v42 = vpack.c.bf16 %v4381_v39, %v4377_v19 }
 0x1ff   : > { %2836 = vmatprep.mubr.f32.mxu0 %v15132_v0  ;;  %2925 = vmatprep.mubr.f32.mxu1 %v15132_v0  ;;  %v10569_v56 = vpack.c.bf16 %v2705_v47, %v2697_v30  ;;  %v4378_v47 = vld [vmem:[#allocation10 + $0x8d0] sm:$0xff]  ;;  %v4423_v39 = vld [vmem:[#allocation10 + $0xa38] sm:$0xff] }
 0x200   : > { %10552 = vmatprep.subr.bf16.mxu0 %v10551_v53  ;;  %10582 = vmatprep.subr.bf16.mxu1 %v10581_v55  ;;  %v2724_v53 = vld [vmem:[#allocation5 + $0x1178] sm:$0xf]  ;;  %v10571_v55 = vpack.c.bf16 %v2722_v51, %v2714_v50  ;;  %v4389_v50 = vld [vmem:[#allocation10 + $0x928] sm:$0xff]  ;;  %v4387_v51 = vld [vmem:[#allocation10 + $0x918] sm:$0xff] }
 0x201   : > { %9770 = vmatmul.mubr.msk.f32.gmra.mrb[2].mxu0 %vm748_vm4, %v14052_v46  ;;  %9776 = vmatmul.mubr.msk.f32.gmra.mrb[2].mxu1 %vm748_vm4, %v14052_v46 }
 0x202   : > { %10554 = vmatpush1.bf16.msra.mxu0 %v10553_v3  ;;  %10584 = vmatpush1.bf16.msra.mxu1 %v10583_v63  ;;  %v10601_v3 = vpack.c.bf16 %v2724_v53, %v2716_v52  ;;  %v10604_v63 = vpack.c.bf16 %v2723_v61, %v2715_v60  ;;  %v10623_v52 = vpack.c.bf16 %v4389_v50, %v4385_v20  ;;  %v4391_v53 = vld [vmem:[#allocation10 + $0x938] sm:$0xff]  ;;  %v4393_v61 = vld [vmem:[#allocation10 + $0x948] sm:$0xff] }
 0x203   : > { %2842 = vmatprep.mubr.f32.mxu0 %v15132_v0  ;;  %2931 = vmatprep.mubr.f32.mxu1 %v15132_v0  ;;  %v4431_v50 = vld [vmem:[#allocation10 + $0xa78] sm:$0xff] }
 0x204   : > { %10556 = vmatprep.subr.bf16.mxu0 %v10555_v2  ;;  %10586 = vmatprep.subr.bf16.mxu1 %v10585_v59  ;;  %v4354_v59 = vld [vmem:[#allocation10 + $0x810] sm:$0xff] }
 0x205   : > { %9771 = vmatmul.mubr.msk.f32.gmra.mrb[4].mxu0 %vm748_vm4, %v14062_v8  ;;  %9777 = vmatmul.mubr.msk.f32.gmra.mrb[4].mxu1 %vm748_vm4, %v14062_v8 }
 0x206   : > { %10558 = vmatpush1.bf16.msra.mxu0 %v10557_v9  ;;  %10588 = vmatpush1.bf16.msra.mxu1 %v10587_v24  ;;  %v4361_v9 = vld [vmem:[#allocation10 + $0x848] sm:$0xff]  ;;  %v4360_v24 = vld [vmem:[#allocation10 + $0x840] sm:$0xff] }
 0x207   : > { %2848 = vmatprep.mubr.f32.mxu0 %v15132_v0  ;;  %2937 = vmatprep.mubr.f32.mxu1 %v15132_v0  ;;  %v10611_v14 = vpack.c.bf16 %v4365_v10, %v4361_v9  ;;  %v10613_v18 = vpack.c.bf16 %v4364_v17, %v4360_v24  ;;  %v4407_v10 = vld [vmem:[#allocation10 + $0x9b8] sm:$0xff]  ;;  %v4402_v17 = vld [vmem:[#allocation10 + $0x990] sm:$0xff] }
 0x208   : > { %10560 = vmatprep.subr.bf16.mxu0 %v10559_v21  ;;  %10590 = vmatprep.subr.bf16.mxu1 %v10589_v25  ;;  %v4362_v21 = vld [vmem:[#allocation10 + $0x850] sm:$0xff]  ;;  %v4373_v25 = vld [vmem:[#allocation10 + $0x8a8] sm:$0xff] }
 0x209   : > { %9772 = vmatmul.mubr.msk.f32.gmra.mrb[6].mxu0 %vm748_vm4, %v14072_v31  ;;  %9778 = vmatmul.mubr.msk.f32.gmra.mrb[6].mxu1 %vm748_vm4, %v14072_v31  ;;  %v10741_v27 = vpack.c.bf16 %v4366_v22, %v4362_v21  ;;  %v10615_v15 = vpack.c.bf16 %v4373_v25, %v4369_v23  ;;  %v4409_v21 = vld [vmem:[#allocation10 + $0x9c8] sm:$0xff]  ;;  %v4415_v25 = vld [vmem:[#allocation10 + $0x9f8] sm:$0xff] }
 0x20a   : > { %10562 = vmatpush1.bf16.msra.mxu0 %v10561_v32  ;;  %10592 = vmatpush1.bf16.msra.mxu1 %v10591_v33  ;;  %v4368_v32 = vld [vmem:[#allocation10 + $0x880] sm:$0xff]  ;;  %v4413_v22 = vld [vmem:[#allocation10 + $0x9e8] sm:$0xff] }
 0x20b   : > { %10564 = vmatprep.subr.bf16.mxu0 %v10563_v34  ;;  %10594 = vmatprep.subr.bf16.mxu1 %v10593_v38  ;;  %v4372_v33 = vld [vmem:[#allocation10 + $0x8a0] sm:$0xff]  ;;  %v10745_v38 = vpack.c.bf16 %v4374_v37, %v4370_v36  ;;  %v10635_v23 = vpack.c.bf16 %v4413_v22, %v4409_v21  ;;  %v4417_v36 = vld [vmem:[#allocation10 + $0xa08] sm:$0xff]  ;;  %v4455_v22 = vld [vmem:[#allocation10 + $0xb38] sm:$0xff] }
 0x20c   : > { %3008 = vmatprep.mubr.f32.mxu0 %v15132_v0  ;;  %3097 = vmatprep.mubr.f32.mxu1 %v15132_v0  ;;  %v10617_v35 = vpack.c.bf16 %v4372_v33, %v4368_v32  ;;  %v4410_v33 = vld [vmem:[#allocation10 + $0x9d0] sm:$0xff]  ;;  %v4421_v37 = vld [vmem:[#allocation10 + $0xa28] sm:$0xff] }
 0x20d   : > { %v10639_v19 = vpack.c.bf16 %v4421_v37, %v4417_v36  ;;  %v4463_v37 = vld [vmem:[#allocation10 + $0xb78] sm:$0xff] }
 0x20e   : > { %10566 = vmatpush1.bf16.msra.mxu0 %v10565_v28  ;;  %10596 = vmatpush1.bf16.msra.mxu1 %v10595_v43  ;;  %v4376_v28 = vld [vmem:[#allocation10 + $0x8c0] sm:$0xff] }
 0x20f   : > { %10568 = vmatprep.subr.bf16.mxu0 %v10567_v45  ;;  %10598 = vmatprep.subr.bf16.mxu1 %v10597_v49  ;;  %v4380_v43 = vld [vmem:[#allocation10 + $0x8e0] sm:$0xff]  ;;  %v10747_v45 = vpack.c.bf16 %v4383_v44, %v4379_v40  ;;  %v10749_v49 = vpack.c.bf16 %v4382_v48, %v4378_v47  ;;  %v4425_v47 = vld [vmem:[#allocation10 + $0xa48] sm:$0xff] }
 0x210   : > { %v10621_v30 = vpack.c.bf16 %v4380_v43, %v4376_v28  ;;  %v4416_v40 = vld [vmem:[#allocation10 + $0xa00] sm:$0xff]  ;;  %v4418_v43 = vld [vmem:[#allocation10 + $0xa10] sm:$0xff]  ;;  %v4429_v48 = vld [vmem:[#allocation10 + $0xa68] sm:$0xff] }
 0x211   : > { %v10643_v20 = vpack.c.bf16 %v4429_v48, %v4425_v47  ;;  %v4471_v48 = vld [vmem:[#allocation10 + $0xbb8] sm:$0xff] }
 0x212   : > { %10570 = vmatpush1.bf16.msra.mxu0 %v10569_v56  ;;  %10600 = vmatpush1.bf16.msra.mxu1 %v10599_v58  ;;  %v4384_v56 = vld [vmem:[#allocation10 + $0x900] sm:$0xff] }
 0x213   : > { %10573 = vmatprep.subr.msk.bf16.mxu0 %vm13695_vm2, %v10571_v55  ;;  %10603 = vmatprep.subr.msk.bf16.mxu1 %vm13695_vm2, %v10601_v3  ;;  %v4388_v58 = vld [vmem:[#allocation10 + $0x920] sm:$0xff]  ;;  %v10751_v55 = vpack.c.bf16 %v4391_v53, %v4387_v51  ;;  %v4390_v3 = vld [vmem:[#allocation10 + $0x930] sm:$0xff] }
 0x214   : > { %v10625_v54 = vpack.c.bf16 %v4388_v58, %v4384_v56  ;;  %v10753_v60 = vpack.c.bf16 %v4390_v3, %v4386_v57  ;;  %v4424_v51 = vld [vmem:[#allocation10 + $0xa40] sm:$0xff]  ;;  %v4426_v58 = vld [vmem:[#allocation10 + $0xa50] sm:$0xff]  ;;  %v4433_v57 = vld [vmem:[#allocation10 + $0xa88] sm:$0xff] }
 0x215   : > { %v4437_v3 = vld [vmem:[#allocation10 + $0xaa8] sm:$0xff] }
 0x216   : > { %10576 = vmatpush1.bf16.msk.msra.mxu0 %vm13695_vm2, %v10574_v62  ;;  %10606 = vmatpush1.bf16.msk.msra.mxu1 %vm13695_vm2, %v10604_v63  ;;  %v4397_v62 = vld [vmem:[#allocation10 + $0x968] sm:$0xff]  ;;  %v4395_v63 = vld [vmem:[#allocation10 + $0x958] sm:$0xff] }
 0x219   : > { %9781 = vmatmul.mubr.msk.f32.vlgmr.msra.gmra.mrb[8].mxu0 %vm748_vm4, %v14042_v41  ;;  %9787 = vmatmul.mubr.msk.f32.vlgmr.msra.gmra.mrb[8].mxu1 %vm748_vm4, %v14042_v41  ;;  %v4357_v41 = vld [vmem:[#allocation10 + $0x828] sm:$0xff] }
 0x21a   : > { %3014 = vmatprep.mubr.f32.mxu0 %v15132_v0  ;;  %3103 = vmatprep.mubr.f32.mxu1 %v15132_v0  ;;  %v10607_v1 = vpack.c.bf16 %v4357_v41, %v4353_v13  ;;  %v10627_v13 = vpack.c.bf16 %v4397_v62, %v4393_v61  ;;  %v4399_v41 = vld [vmem:[#allocation10 + $0x978] sm:$0xff]  ;;  %v10647_v61 = vpack.c.bf16 %v4437_v3, %v4433_v57 }
 0x21b   : > { %v4439_v62 = vld [vmem:[#allocation10 + $0xab8] sm:$0xff] }
 0x21c   : > { %10608 = vmatprep.subr.bf16.mxu0 %v10607_v1  ;;  %v4396_v1 = vld [vmem:[#allocation10 + $0x960] sm:$0xff]  ;;  %v4479_v3 = vld [vmem:[#allocation10 + $0xbf8] sm:$0xff] }
 0x21d   : > { %9782 = vmatmul.mubr.msk.f32.gmra.mrb[10].mxu0 %vm748_vm4, %v14052_v46  ;;  %9788 = vmatmul.mubr.msk.f32.gmra.mrb[10].mxu1 %vm748_vm4, %v14052_v46  ;;  %v4355_v46 = vld [vmem:[#allocation10 + $0x818] sm:$0xff] }
 0x21e   : > { %3020 = vmatprep.mubr.f32.mxu0 %v15132_v0  ;;  %3109 = vmatprep.mubr.f32.mxu1 %v15132_v0  ;;  %v10735_v2 = vpack.c.bf16 %v4359_v7, %v4355_v46  ;;  %v4392_v46 = vld [vmem:[#allocation10 + $0x940] sm:$0xff]  ;;  %v10755_v7 = vpack.c.bf16 %v4399_v41, %v4395_v63 }
 0x21f   : > { %10610 = vmatpush1.bf16.msra.mxu0 %v10609_v6  ;;  %v4401_v6 = vld [vmem:[#allocation10 + $0x988] sm:$0xff]  ;;  %v4432_v63 = vld [vmem:[#allocation10 + $0xa80] sm:$0xff] }
 0x220   : > { %10736 = vmatprep.subr.bf16.mxu1 %v10735_v2  ;;  %10612 = vmatprep.subr.bf16.mxu0 %v10611_v14  ;;  %v10629_v2 = vpack.c.bf16 %v4396_v1, %v4392_v46  ;;  %v4404_v14 = vld [vmem:[#allocation10 + $0x9a0] sm:$0xff]  ;;  %v4434_v1 = vld [vmem:[#allocation10 + $0xa90] sm:$0xff] }
 0x221   : > { %9783 = vmatmul.mubr.msk.f32.gmra.mrb[12].mxu0 %vm748_vm4, %v14062_v8  ;;  %9789 = vmatmul.mubr.msk.f32.gmra.mrb[12].mxu1 %vm748_vm4, %v14062_v8  ;;  %v10737_v8 = vpack.c.bf16 %v4358_v4, %v4354_v59  ;;  %v10757_v59 = vpack.c.bf16 %v4398_v5, %v4394_v11  ;;  %v4405_v4 = vld [vmem:[#allocation10 + $0x9a8] sm:$0xff]  ;;  %v10633_v24 = vpack.c.bf16 %v4404_v14, %v4400_v12  ;;  %v4442_v14 = vld [vmem:[#allocation10 + $0xad0] sm:$0xff] }
 0x222   : > { %3026 = vmatprep.mubr.f32.mxu0 %v15132_v0  ;;  %3115 = vmatprep.mubr.f32.mxu1 %v15132_v0  ;;  %v10631_v9 = vpack.c.bf16 %v4405_v4, %v4401_v6  ;;  %v4441_v11 = vld [vmem:[#allocation10 + $0xac8] sm:$0xff]  ;;  %v4447_v4 = vld [vmem:[#allocation10 + $0xaf8] sm:$0xff] }
 0x223   : > { %10738 = vmatpush1.bf16.msra.mxu1 %v10737_v8  ;;  %10614 = vmatpush1.bf16.msra.mxu0 %v10613_v18  ;;  %v4403_v8 = vld [vmem:[#allocation10 + $0x998] sm:$0xff]  ;;  %v4445_v5 = vld [vmem:[#allocation10 + $0xae8] sm:$0xff] }
 0x224   : > { %10740 = vmatprep.subr.bf16.mxu1 %v10739_v29  ;;  %10616 = vmatprep.subr.bf16.mxu0 %v10615_v15  ;;  %v10759_v16 = vpack.c.bf16 %v4407_v10, %v4403_v8  ;;  %v4406_v29 = vld [vmem:[#allocation10 + $0x9b0] sm:$0xff]  ;;  %v4412_v15 = vld [vmem:[#allocation10 + $0x9e0] sm:$0xff]  ;;  %v10651_v6 = vpack.c.bf16 %v4445_v5, %v4441_v11  ;;  %v4487_v5 = vld [vmem:[#allocation10 + $0xc38] sm:$0xff] }
 0x225   : > { %9784 = vmatmul.mubr.msk.f32.gmra.mrb[14].mxu0 %vm748_vm4, %v14072_v31  ;;  %9790 = vmatmul.mubr.msk.f32.gmra.mrb[14].mxu1 %vm748_vm4, %v14072_v31  ;;  %v4375_v31 = vld [vmem:[#allocation10 + $0x8b8] sm:$0xff]  ;;  %v10761_v18 = vpack.c.bf16 %v4406_v29, %v4402_v17  ;;  %v4440_v8 = vld [vmem:[#allocation10 + $0xac0] sm:$0xff]  ;;  %v4449_v17 = vld [vmem:[#allocation10 + $0xb08] sm:$0xff] }
 0x226   : > { %v10743_v34 = vpack.c.bf16 %v4375_v31, %v4371_v26  ;;  %v4408_v26 = vld [vmem:[#allocation10 + $0x9c0] sm:$0xff]  ;;  %v4453_v29 = vld [vmem:[#allocation10 + $0xb28] sm:$0xff] }
 0x227   : > { %10742 = vmatpush1.bf16.msra.mxu1 %v10741_v27  ;;  %10618 = vmatpush1.bf16.msra.mxu0 %v10617_v35  ;;  %v4411_v27 = vld [vmem:[#allocation10 + $0x9d8] sm:$0xff]  ;;  %v10637_v32 = vpack.c.bf16 %v4412_v15, %v4408_v26  ;;  %v10655_v21 = vpack.c.bf16 %v4453_v29, %v4449_v17  ;;  %v4450_v15 = vld [vmem:[#allocation10 + $0xb10] sm:$0xff] }
 0x228   : > { %10744 = vmatprep.subr.bf16.mxu1 %v10743_v34  ;;  %10620 = vmatprep.subr.bf16.mxu0 %v10619_v42  ;;  %v10763_v31 = vpack.c.bf16 %v4415_v25, %v4411_v27  ;;  %v4414_v34 = vld [vmem:[#allocation10 + $0x9f0] sm:$0xff]  ;;  %v4420_v42 = vld [vmem:[#allocation10 + $0xa20] sm:$0xff] }
 0x229   : > { %v10765_v35 = vpack.c.bf16 %v4414_v34, %v4410_v33  ;;  %v10641_v28 = vpack.c.bf16 %v4420_v42, %v4416_v40  ;;  %v4448_v27 = vld [vmem:[#allocation10 + $0xb00] sm:$0xff]  ;;  %v4457_v33 = vld [vmem:[#allocation10 + $0xb48] sm:$0xff]  ;;  %v4458_v42 = vld [vmem:[#allocation10 + $0xb50] sm:$0xff] }
 0x22a   : > { %v4461_v34 = vld [vmem:[#allocation10 + $0xb68] sm:$0xff] }
 0x22b   : > { %10746 = vmatpush1.bf16.msra.mxu1 %v10745_v38  ;;  %10622 = vmatpush1.bf16.msra.mxu0 %v10621_v30  ;;  %v4419_v38 = vld [vmem:[#allocation10 + $0xa18] sm:$0xff]  ;;  %v10659_v36 = vpack.c.bf16 %v4461_v34, %v4457_v33 }
 0x22c   : > { %10748 = vmatprep.subr.bf16.mxu1 %v10747_v45  ;;  %10624 = vmatprep.subr.bf16.mxu0 %v10623_v52  ;;  %v10767_v44 = vpack.c.bf16 %v4423_v39, %v4419_v38  ;;  %v4422_v45 = vld [vmem:[#allocation10 + $0xa30] sm:$0xff]  ;;  %v4428_v52 = vld [vmem:[#allocation10 + $0xa60] sm:$0xff] }
 0x22d   : > { %v10769_v30 = vpack.c.bf16 %v4422_v45, %v4418_v43  ;;  %v10645_v56 = vpack.c.bf16 %v4428_v52, %v4424_v51  ;;  %v4456_v38 = vld [vmem:[#allocation10 + $0xb40] sm:$0xff]  ;;  %v4465_v43 = vld [vmem:[#allocation10 + $0xb88] sm:$0xff]  ;;  %v4466_v52 = vld [vmem:[#allocation10 + $0xb90] sm:$0xff] }
 0x22e   : > { %v4469_v45 = vld [vmem:[#allocation10 + $0xba8] sm:$0xff] }
 0x22f   : > { %10750 = vmatpush1.bf16.msra.mxu1 %v10749_v49  ;;  %10626 = vmatpush1.bf16.msra.mxu0 %v10625_v54  ;;  %v4427_v49 = vld [vmem:[#allocation10 + $0xa58] sm:$0xff]  ;;  %v10663_v47 = vpack.c.bf16 %v4469_v45, %v4465_v43 }
 0x230   : > { %10752 = vmatprep.subr.bf16.mxu1 %v10751_v55  ;;  %10628 = vmatprep.subr.bf16.mxu0 %v10627_v13  ;;  %v10771_v53 = vpack.c.bf16 %v4431_v50, %v4427_v49  ;;  %v4430_v55 = vld [vmem:[#allocation10 + $0xa70] sm:$0xff]  ;;  %v4436_v13 = vld [vmem:[#allocation10 + $0xaa0] sm:$0xff] }
 0x231   : > { %v10773_v54 = vpack.c.bf16 %v4430_v55, %v4426_v58  ;;  %v10649_v46 = vpack.c.bf16 %v4436_v13, %v4432_v63  ;;  %v4464_v49 = vld [vmem:[#allocation10 + $0xb80] sm:$0xff]  ;;  %v4473_v58 = vld [vmem:[#allocation10 + $0xbc8] sm:$0xff]  ;;  %v4474_v13 = vld [vmem:[#allocation10 + $0xbd0] sm:$0xff] }
 0x232   : > { %v4477_v55 = vld [vmem:[#allocation10 + $0xbe8] sm:$0xff] }
 0x233   : > { %10754 = vmatpush1.bf16.msra.mxu1 %v10753_v60  ;;  %10630 = vmatpush1.bf16.msra.mxu0 %v10629_v2  ;;  %v4435_v60 = vld [vmem:[#allocation10 + $0xa98] sm:$0xff]  ;;  %v10667_v57 = vpack.c.bf16 %v4477_v55, %v4473_v58 }
 0x234   : > { %10756 = vmatprep.subr.bf16.mxu1 %v10755_v7  ;;  %10632 = vmatprep.subr.bf16.mxu0 %v10631_v9  ;;  %v10775_v41 = vpack.c.bf16 %v4439_v62, %v4435_v60  ;;  %v4438_v7 = vld [vmem:[#allocation10 + $0xab0] sm:$0xff]  ;;  %v4444_v9 = vld [vmem:[#allocation10 + $0xae0] sm:$0xff] }
 0x235   : > { %v10777_v2 = vpack.c.bf16 %v4438_v7, %v4434_v1  ;;  %v10653_v12 = vpack.c.bf16 %v4444_v9, %v4440_v8  ;;  %v4472_v60 = vld [vmem:[#allocation10 + $0xbc0] sm:$0xff]  ;;  %v4481_v1 = vld [vmem:[#allocation10 + $0xc08] sm:$0xff]  ;;  %v14118_v9 = vld [vmem:[#allocation8] sm:$0xff] }
 0x236   : > { %v4485_v7 = vld [vmem:[#allocation10 + $0xc28] sm:$0xff] }
 0x237   : > { %10758 = vmatpush1.bf16.msra.mxu1 %v10757_v59  ;;  %10634 = vmatpush1.bf16.msra.mxu0 %v10633_v24  ;;  %v4443_v59 = vld [vmem:[#allocation10 + $0xad8] sm:$0xff]  ;;  %v10671_v11 = vpack.c.bf16 %v4485_v7, %v4481_v1 }
 0x238   : > { %10760 = vmatprep.subr.bf16.mxu1 %v10759_v16  ;;  %10636 = vmatprep.subr.bf16.mxu0 %v10635_v23  ;;  %v10779_v10 = vpack.c.bf16 %v4447_v4, %v4443_v59  ;;  %v4446_v16 = vld [vmem:[#allocation10 + $0xaf0] sm:$0xff]  ;;  %v4452_v23 = vld [vmem:[#allocation10 + $0xb20] sm:$0xff] }
 0x239   : > { %v10781_v24 = vpack.c.bf16 %v4446_v16, %v4442_v14  ;;  %v10657_v26 = vpack.c.bf16 %v4452_v23, %v4448_v27  ;;  %v13356_v14 = vmov 1983009808  }
 0x23a   : > { %v3265_v16 = vunpack.c.l.s4 %v13356_v14 }
 0x23b   : > { %10762 = vmatpush1.bf16.msra.mxu1 %v10761_v18  ;;  %10638 = vmatpush1.bf16.msra.mxu0 %v10637_v32  ;;  %v4451_v18 = vld [vmem:[#allocation10 + $0xb18] sm:$0xff] }
 0x23c   : > { %10764 = vmatprep.subr.bf16.mxu1 %v10763_v31  ;;  %10640 = vmatprep.subr.bf16.mxu0 %v10639_v19  ;;  %v10783_v25 = vpack.c.bf16 %v4455_v22, %v4451_v18  ;;  %v4454_v31 = vld [vmem:[#allocation10 + $0xb30] sm:$0xff]  ;;  %v4460_v19 = vld [vmem:[#allocation10 + $0xb60] sm:$0xff] }
 0x23d   : > { %v10785_v32 = vpack.c.bf16 %v4454_v31, %v4450_v15  ;;  %v10661_v40 = vpack.c.bf16 %v4460_v19, %v4456_v38 }
 0x23f   : > { %10766 = vmatpush1.bf16.msra.mxu1 %v10765_v35  ;;  %10642 = vmatpush1.bf16.msra.mxu0 %v10641_v28  ;;  %v4459_v35 = vld [vmem:[#allocation10 + $0xb58] sm:$0xff] }
 0x240   : > { %10768 = vmatprep.subr.bf16.mxu1 %v10767_v44  ;;  %10644 = vmatprep.subr.bf16.mxu0 %v10643_v20  ;;  %v10787_v39 = vpack.c.bf16 %v4463_v37, %v4459_v35  ;;  %v4462_v44 = vld [vmem:[#allocation10 + $0xb70] sm:$0xff]  ;;  %v4468_v20 = vld [vmem:[#allocation10 + $0xba0] sm:$0xff] }
 0x241   : > { %v10789_v28 = vpack.c.bf16 %v4462_v44, %v4458_v42  ;;  %v10665_v51 = vpack.c.bf16 %v4468_v20, %v4464_v49 }
 0x243   : > { %10770 = vmatpush1.bf16.msra.mxu1 %v10769_v30  ;;  %10646 = vmatpush1.bf16.msra.mxu0 %v10645_v56  ;;  %v4467_v30 = vld [vmem:[#allocation10 + $0xb98] sm:$0xff] }
 0x244   : > { %10772 = vmatprep.subr.bf16.mxu1 %v10771_v53  ;;  %10648 = vmatprep.subr.bf16.mxu0 %v10647_v61  ;;  %v10791_v50 = vpack.c.bf16 %v4471_v48, %v4467_v30  ;;  %v4470_v53 = vld [vmem:[#allocation10 + $0xbb0] sm:$0xff]  ;;  %v4476_v61 = vld [vmem:[#allocation10 + $0xbe0] sm:$0xff] }
 0x245   : > { %v10793_v56 = vpack.c.bf16 %v4470_v53, %v4466_v52  ;;  %v10669_v63 = vpack.c.bf16 %v4476_v61, %v4472_v60 }
 0x247   : > { %10774 = vmatpush1.bf16.msra.mxu1 %v10773_v54  ;;  %10650 = vmatpush1.bf16.msra.mxu0 %v10649_v46  ;;  %v4475_v54 = vld [vmem:[#allocation10 + $0xbd8] sm:$0xff] }
 0x248   : > { %10776 = vmatprep.subr.bf16.mxu1 %v10775_v41  ;;  %10652 = vmatprep.subr.bf16.mxu0 %v10651_v6  ;;  %v10795_v62 = vpack.c.bf16 %v4479_v3, %v4475_v54  ;;  %v4478_v41 = vld [vmem:[#allocation10 + $0xbf0] sm:$0xff]  ;;  %v15135_v6 = vlaneseq }
 0x249   : > { %v10797_v46 = vpack.c.bf16 %v4478_v41, %v4474_v13 }
 0x24a   : > { %v14113_v4 = vshrl.u32 %v15135_v6, 7 }
 0x24b   : > { %10778 = vmatpush1.bf16.msra.mxu1 %v10777_v2  ;;  %10654 = vmatpush1.bf16.msra.mxu0 %v10653_v12  ;;  %v4483_v2 = vld [vmem:[#allocation10 + $0xc18] sm:$0xff] }
 0x24c   : > { %10780 = vmatprep.subr.bf16.mxu1 %v10779_v10  ;;  %10656 = vmatprep.subr.bf16.mxu0 %v10655_v21  ;;  %v10799_v59 = vpack.c.bf16 %v4487_v5, %v4483_v2  ;;  %15169 = vst [vmem:[#allocation31_spill] sm:$0xff] %v14113_v4  ;;  %v14116_v8 = vsub.s32 0, %v14113_v4  ;;  %v14121_v10 = vsub.s32 2, %v14113_v4  ;;  %v14124_v12 = vsub.s32 1, %v14113_v4 }
 0x24d   : > { %v3266_v21 = vunpack.c.0.s8 %v3265_v16  ;;  %v14178_v5 = vsub.s32 6, %v14113_v4 }
 0x24e   : > { %v14131_v17 = vrot.slane %v14118_v9, %v14116_v8  ;;  %v14135_v29 = vrot.slane %v14118_v9, %v14121_v10  ;;  %v14139_v18 = vrot.slane %v14118_v9, %v14124_v12 }
 0x24f   : > { %10782 = vmatpush1.bf16.msra.mxu1 %v10781_v24  ;;  %10658 = vmatpush1.bf16.msra.mxu0 %v10657_v26  ;;  %v14127_v24 = vsub.s32 3, %v14113_v4 }
 0x250   : > { %10784 = vmatprep.subr.bf16.mxu1 %v10783_v25  ;;  %10660 = vmatprep.subr.bf16.mxu0 %v10659_v36 }
 0x251   : > { %v14143_v22 = vrot.slane %v14118_v9, %v14127_v24 }
 0x253   : > { %10786 = vmatpush1.bf16.msra.mxu1 %v10785_v32  ;;  %10662 = vmatpush1.bf16.msra.mxu0 %v10661_v40  ;;  %v14149_v32 = vsub.s32 %v3266_v21, %v14113_v4 }
 0x254   : > { %10788 = vmatprep.subr.bf16.mxu1 %v10787_v39  ;;  %10664 = vmatprep.subr.bf16.mxu0 %v10663_v47 }
 0x257   : > { %10790 = vmatpush1.bf16.msra.mxu1 %v10789_v28  ;;  %10666 = vmatpush1.bf16.msra.mxu0 %v10665_v51 }
 0x258   : > { %10792 = vmatprep.subr.bf16.mxu1 %v10791_v50  ;;  %10668 = vmatprep.subr.bf16.mxu0 %v10667_v57 }
 0x25b   : > { %10794 = vmatpush1.bf16.msra.mxu1 %v10793_v56  ;;  %10670 = vmatpush1.bf16.msra.mxu0 %v10669_v63 }
 0x25c   : > { %10796 = vmatprep.subr.bf16.mxu1 %v10795_v62  ;;  %10672 = vmatprep.subr.bf16.mxu0 %v10671_v11 }
 0x25f   : > { %10798 = vmatpush1.bf16.msra.mxu1 %v10797_v46  ;;  %v14173_v46 = vsub.s32 4, %v14113_v4 }
 0x260   : > { %10800 = vmatprep.subr.bf16.mxu1 %v10799_v59 }
 0x2d0   : > { %v2832_v27 = vpop.f32.mrb[0].mxu0  ;;  %v2921_v25 = vpop.f32.mrb[0].mxu1 }
 0x2d1   : > { %v3196_v23 = vadd.f32 %v14131_v17, %v2832_v27  ;;  %v2834_v26 = vpop.f32.mrb[1].mxu0  ;;  %v3198_v15 = vadd.f32 %v14135_v29, %v2921_v25  ;;  %v2923_v33 = vpop.f32.mrb[1].mxu1 }
 0x2d2   : > { %v3197_v31 = vadd.f32 %v14139_v18, %v2834_v26  ;;  %v3199_v34 = vadd.f32 %v14143_v22, %v2923_v33  ;;  %v14184_v26 = vrot.slane %v14118_v9, %v14173_v46 }
 0x2d4   : > { %v3260_v35 = vcombine.low %v3196_v23, %v3197_v31  ;;  %v3261_v36 = vcombine.high %v3196_v23, %v3197_v31  ;;  %v2838_v37 = vpop.f32.mrb[2].mxu0  ;;  %v3262_v38 = vcombine.low %v3198_v15, %v3199_v34  ;;  %v3263_v19 = vcombine.high %v3198_v15, %v3199_v34  ;;  %v2927_v40 = vpop.f32.mrb[2].mxu1 }
 0x2d5   : > { %v3204_v39 = vadd.f32 %v14131_v17, %v2838_v37  ;;  %v2840_v42 = vpop.f32.mrb[3].mxu0  ;;  %v3206_v43 = vadd.f32 %v14135_v29, %v2927_v40  ;;  %v2929_v30 = vpop.f32.mrb[3].mxu1  ;;  %v15134_v15 = vsub.s32 5, %v14113_v4 }
 0x2d6   : > { %v3270_v44 = vrot.slane %v3260_v35, %v14149_v32  ;;  %v3277_v28 = vrot.slane %v3261_v36, %v14149_v32  ;;  %v3205_v45 = vadd.f32 %v14139_v18, %v2840_v42  ;;  %v3284_v47 = vrot.slane %v3262_v38, %v14149_v32 }
 0x2d7   : > { %v3291_v48 = vrot.slane %v3263_v19, %v14149_v32  ;;  %v3207_v49 = vadd.f32 %v14143_v22, %v2929_v30  ;;  %v14191_v38 = vrot.slane %v14118_v9, %v14178_v5  ;;  %v15133_v19 = vsub.s32 7, %v14113_v4 }
 0x2d8   : > { %v3332_v20 = vcombine.low %v3204_v39, %v3205_v45  ;;  %v3333_v50 = vcombine.high %v3204_v39, %v3205_v45  ;;  %v2844_v51 = vpop.f32.mrb[4].mxu0  ;;  %v14160_v52 = vcombine.low %v3270_v44, %v3284_v47  ;;  %v14162_v53 = vcombine.high %v3270_v44, %v3284_v47  ;;  %v2933_v55 = vpop.f32.mrb[4].mxu1 }
 0x2d9   : > { %v14164_v56 = vcombine.low %v3277_v28, %v3291_v48  ;;  %v14166_v58 = vcombine.high %v3277_v28, %v3291_v48  ;;  %v2846_v54 = vpop.f32.mrb[5].mxu0  ;;  %v3334_v60 = vcombine.low %v3206_v43, %v3207_v49  ;;  %v3335_v61 = vcombine.high %v3206_v43, %v3207_v49  ;;  %v2935_v62 = vpop.f32.mrb[5].mxu1 }
 0x2da   : > { %v3342_v57 = vrot.slane %v3332_v20, %v14149_v32  ;;  %v3349_v3 = vrot.slane %v3333_v50, %v14149_v32  ;;  %v3212_v1 = vadd.f32 %v14131_v17, %v2844_v51  ;;  %v3214_v7 = vadd.f32 %v14135_v29, %v2933_v55 }
 0x2db   : > { %v3356_v63 = vrot.slane %v3334_v60, %v14149_v32  ;;  %v3363_v13 = vrot.slane %v3335_v61, %v14149_v32  ;;  %v3213_v23 = vadd.f32 %v14139_v18, %v2846_v54  ;;  %v3215_v25 = vadd.f32 %v14143_v22, %v2935_v62 }
 0x2dc   : > { %v2850_v41 = vpop.f32.mrb[6].mxu0  ;;  %v2939_v2 = vpop.f32.mrb[6].mxu1  ;;  %v9791_v28 = vrot.slane %v14160_v52, 9  ;;  %v9795_v55 = vrot.slane %v14164_v56, 9  ;;  %v9797_v54 = vrot.slane %v14166_v58, 9 }
 0x2dd   : > { %v2852_v11 = vpop.f32.mrb[7].mxu0  ;;  %v3364_v59 = vcombine.low %v3342_v57, %v3356_v63  ;;  %v3365_v14 = vcombine.high %v3342_v57, %v3356_v63  ;;  %v3366_v16 = vcombine.low %v3349_v3, %v3363_v13  ;;  %v3367_v21 = vcombine.high %v3349_v3, %v3363_v13  ;;  %v2941_v27 = vpop.f32.mrb[7].mxu1 }
 0x2de   : > { %v3404_v31 = vcombine.low %v3212_v1, %v3213_v23  ;;  %v3405_v33 = vcombine.high %v3212_v1, %v3213_v23  ;;  %v3406_v34 = vcombine.low %v3214_v7, %v3215_v25  ;;  %v3407_v35 = vcombine.high %v3214_v7, %v3215_v25 }
 0x2df   : > { %v3220_v36 = vadd.f32 %v14131_v17, %v2850_v41  ;;  %v3222_v37 = vadd.f32 %v14135_v29, %v2939_v2  ;;  %v9793_v17 = vrot.slane %v14162_v53, 9  ;;  %v3221_v29 = vadd.f32 %v14139_v18, %v2852_v11 }
 0x2e0   : > { %v3414_v39 = vrot.slane %v3404_v31, %v14149_v32  ;;  %v3421_v40 = vrot.slane %v3405_v33, %v14149_v32  ;;  %v3428_v42 = vrot.slane %v3406_v34, %v14149_v32  ;;  %v3435_v44 = vrot.slane %v3407_v35, %v14149_v32 }
 0x2e1   : > { %v3223_v43 = vadd.f32 %v14143_v22, %v2941_v27  ;;  %v3476_v49 = vcombine.low %v3220_v36, %v3221_v29  ;;  %v3477_v20 = vcombine.high %v3220_v36, %v3221_v29  ;;  %v9799_v57 = vrot.slane %v3364_v59, 9 }
 0x2e2   : > { %v3436_v45 = vcombine.low %v3414_v39, %v3428_v42  ;;  %v3437_v30 = vcombine.high %v3414_v39, %v3428_v42  ;;  %v3438_v47 = vcombine.low %v3421_v40, %v3435_v44  ;;  %v3439_v48 = vcombine.high %v3421_v40, %v3435_v44 }
 0x2e3   : > { %v3478_v50 = vcombine.low %v3222_v37, %v3223_v43  ;;  %v3479_v51 = vcombine.high %v3222_v37, %v3223_v43  ;;  %v9801_v3 = vrot.slane %v3365_v14, 9  ;;  %v3486_v60 = vrot.slane %v3476_v49, %v14149_v32 }
 0x2e4   : > { %v3493_v18 = vrot.slane %v3477_v20, %v14149_v32  ;;  %v9803_v62 = vrot.slane %v3366_v16, 9  ;;  %v9805_v63 = vrot.slane %v3367_v21, 9  ;;  %v9807_v13 = vrot.slane %v3436_v45, 9 }
 0x2e5   : > { %v3500_v22 = vrot.slane %v3478_v50, %v14149_v32  ;;  %v3507_v61 = vrot.slane %v3479_v51, %v14149_v32  ;;  %v9809_v41 = vrot.slane %v3437_v30, 9  ;;  %v14213_v27 = vmax.f32 %v14160_v52, %v9791_v28 }
 0x2e6   : > { %v9811_v23 = vrot.slane %v3438_v47, 9  ;;  %v14218_v25 = vrot.slane %v14118_v9, %v15134_v15  ;;  %v14223_v31 = vrot.slane %v14118_v9, %v15133_v19  ;;  %v14226_v33 = vmax.f32 %v14162_v53, %v9793_v17 }
 0x2e7   : > { %v3508_v1 = vcombine.low %v3486_v60, %v3500_v22  ;;  %v3509_v7 = vcombine.high %v3486_v60, %v3500_v22  ;;  %v14208_v2 = vcombine.low %v3493_v18, %v3507_v61  ;;  %v14210_v11 = vcombine.high %v3493_v18, %v3507_v61 }
 0x2e8   : > { %v14229_v34 = vmax.f32 %v14164_v56, %v9795_v55  ;;  %v14232_v52 = vmax.f32 %v14166_v58, %v9797_v54  ;;  %v9813_v35 = vrot.slane %v3439_v48, 9  ;;  %v14234_v37 = vmax.f32 %v3364_v59, %v9799_v57 }
 0x2e9   : > { %v14236_v39 = vmax.f32 %v3365_v14, %v9801_v3  ;;  %v14238_v40 = vmax.f32 %v3366_v16, %v9803_v62  ;;  %v14241_v53 = vmax.f32 %v3367_v21, %v9805_v63  ;;  %v14243_v28 = vmax.f32 %v3436_v45, %v9807_v13 }
 0x2ea   : > { %v14245_v56 = vmax.f32 %v3437_v30, %v9809_v41  ;;  %v9815_v58 = vrot.slane %v3508_v1, 9  ;;  %v14247_v29 = vmax.f32 %v3438_v47, %v9811_v23  ;;  %v14252_v43 = vmax.f32 %v3439_v48, %v9813_v35 }
 0x2eb   : > { %v9817_v49 = vrot.slane %v3509_v7, 9 }
 0x2ec   : > { %v3010_v36 = vpop.f32.mrb[8].mxu0  ;;  %v3099_v42 = vpop.f32.mrb[8].mxu1  ;;  %v14256_v57 = vmax.f32 %v3508_v1, %v9815_v58 }
 0x2ed   : > { %v3200_v9 = vadd.f32 %v14184_v26, %v3010_v36  ;;  %v3012_v44 = vpop.f32.mrb[9].mxu0  ;;  %v3101_v17 = vpop.f32.mrb[9].mxu1  ;;  %v3202_v59 = vadd.f32 %v14191_v38, %v3099_v42  ;;  %v14265_v13 = vmax.f32 %v3509_v7, %v9817_v49 }
 0x2ee   : > { %v3201_v14 = vadd.f32 %v14218_v25, %v3012_v44  ;;  %v3203_v16 = vadd.f32 %v14223_v31, %v3101_v17 }
 0x2f0   : > { %v3016_v20 = vpop.f32.mrb[10].mxu0  ;;  %v3296_v30 = vcombine.low %v3200_v9, %v3201_v14  ;;  %v3297_v50 = vcombine.high %v3200_v9, %v3201_v14  ;;  %v3298_v51 = vcombine.low %v3202_v59, %v3203_v16  ;;  %v3299_v55 = vcombine.high %v3202_v59, %v3203_v16  ;;  %v3105_v47 = vpop.f32.mrb[10].mxu1 }
 0x2f1   : > { %v3018_v54 = vpop.f32.mrb[11].mxu0  ;;  %v3208_v3 = vadd.f32 %v14184_v26, %v3016_v20  ;;  %v3210_v60 = vadd.f32 %v14191_v38, %v3105_v47  ;;  %v3107_v18 = vpop.f32.mrb[11].mxu1 }
 0x2f2   : > { %v3209_v48 = vadd.f32 %v14218_v25, %v3018_v54  ;;  %v3306_v22 = vrot.slane %v3296_v30, %v14149_v32  ;;  %v3313_v61 = vrot.slane %v3297_v50, %v14149_v32  ;;  %v3320_v62 = vrot.slane %v3298_v51, %v14149_v32 }
 0x2f3   : > { %v3327_v63 = vrot.slane %v3299_v55, %v14149_v32  ;;  %v3211_v23 = vadd.f32 %v14223_v31, %v3107_v18 }
 0x2f4   : > { %v3368_v41 = vcombine.low %v3208_v3, %v3209_v48  ;;  %v3369_v1 = vcombine.high %v3208_v3, %v3209_v48  ;;  %v3022_v35 = vpop.f32.mrb[12].mxu0  ;;  %v3328_v36 = vcombine.low %v3306_v22, %v3320_v62  ;;  %v3329_v9 = vcombine.high %v3306_v22, %v3320_v62  ;;  %v3111_v58 = vpop.f32.mrb[12].mxu1 }
 0x2f5   : > { %v3330_v42 = vcombine.low %v3313_v61, %v3327_v63  ;;  %v3331_v44 = vcombine.high %v3313_v61, %v3327_v63  ;;  %v14268_v17 = vpop.f32.mrb[13].mxu0  ;;  %v3370_v16 = vcombine.low %v3210_v60, %v3211_v23  ;;  %v3371_v7 = vcombine.high %v3210_v60, %v3211_v23  ;;  %v14272_v49 = vpop.f32.mrb[13].mxu1 }
 0x2f6   : > { %v3378_v59 = vrot.slane %v3368_v41, %v14149_v32  ;;  %v3385_v14 = vrot.slane %v3369_v1, %v14149_v32  ;;  %v9792_v20 = vrot.slane %v3328_v36, 9  ;;  %v9794_v30 = vrot.slane %v3329_v9, 9 }
 0x2f7   : > { %v9796_v50 = vrot.slane %v3330_v42, 9  ;;  %v9798_v51 = vrot.slane %v3331_v44, 9  ;;  %v3392_v55 = vrot.slane %v3370_v16, %v14149_v32  ;;  %v3399_v47 = vrot.slane %v3371_v7, %v14149_v32 }
 0x2f8   : > { %v14277_v54 = vadd.f32 %v14184_v26, %v3022_v35  ;;  %v14280_v3 = vadd.f32 %v14191_v38, %v3111_v58  ;;  %v3028_v48 = vpop.f32.mrb[14].mxu0  ;;  %v3677_v60 = vmax.f32 %v3328_v36, %v9792_v20  ;;  %v3679_v18 = vmax.f32 %v3329_v9, %v9794_v30  ;;  %v3117_v62 = vpop.f32.mrb[14].mxu1 }
 0x2f9   : > { %v3681_v22 = vmax.f32 %v3330_v42, %v9796_v50  ;;  %v3683_v61 = vmax.f32 %v3331_v44, %v9798_v51  ;;  %v14282_v63 = vpop.f32.mrb[15].mxu0  ;;  %v3400_v41 = vcombine.low %v3378_v59, %v3392_v55  ;;  %v3401_v1 = vcombine.high %v3378_v59, %v3392_v55  ;;  %v14284_v0 = vpop.f32.mrb[15].mxu1 }
 0x2fa   : > { %v3402_v23 = vcombine.low %v3385_v14, %v3399_v47  ;;  %v3403_v16 = vcombine.high %v3385_v14, %v3399_v47  ;;  %v3708_v35 = vmax.f32 %v14213_v27, %v3677_v60  ;;  %v3709_v7 = vmax.f32 %v14226_v33, %v3679_v18 }
 0x2fb   : > { %v3710_v58 = vmax.f32 %v14229_v34, %v3681_v22  ;;  %v3711_v36 = vmax.f32 %v14232_v52, %v3683_v61  ;;  %v9800_v9 = vrot.slane %v3400_v41, 9  ;;  %v9802_v42 = vrot.slane %v3401_v1, 9 }
 0x2fc   : > { %v9804_v44 = vrot.slane %v3402_v23, 9  ;;  %v9806_v20 = vrot.slane %v3403_v16, 9  ;;  %v3743_v30 = vrot.slane %v3708_v35, %v14116_v8  ;;  %v3747_v59 = vrot.slane %v3708_v35, %v14121_v10 }
 0x2fd   : > { %v3751_v14 = vrot.slane %v3708_v35, %v14173_v46  ;;  %v3755_v50 = vrot.slane %v3708_v35, %v14178_v5  ;;  %v3759_v27 = vrot.slane %v3709_v7, %v14116_v8  ;;  %v3763_v33 = vrot.slane %v3709_v7, %v14121_v10 }
 0x2fe   : > { %v3767_v34 = vrot.slane %v3709_v7, %v14173_v46  ;;  %v3771_v52 = vrot.slane %v3709_v7, %v14178_v5  ;;  %v3775_v51 = vrot.slane %v3710_v58, %v14116_v8  ;;  %v3779_v55 = vrot.slane %v3710_v58, %v14121_v10 }
 0x2ff   : > { %v3783_v47 = vrot.slane %v3710_v58, %v14173_v46  ;;  %v3787_v60 = vrot.slane %v3710_v58, %v14178_v5  ;;  %v3791_v18 = vrot.slane %v3711_v36, %v14116_v8  ;;  %v3795_v22 = vrot.slane %v3711_v36, %v14121_v10 }
 0x300   : > { %v3799_v61 = vrot.slane %v3711_v36, %v14173_v46  ;;  %v3803_v35 = vrot.slane %v3711_v36, %v14178_v5  ;;  %v3997_v19 = vsel %vm3996_vm7, %v3759_v27, %v3743_v30  ;;  %v4006_v7 = vsel %vm3996_vm7, %v3763_v33, %v3747_v59 }
 0x301   : > { %v4011_v15 = vsel %vm3996_vm7, %v3767_v34, %v3751_v14  ;;  %v4016_v6 = vsel %vm3996_vm7, %v3771_v52, %v3755_v50  ;;  %v3999_v45 = vsel %vm3998_vm8, %v3775_v51, %v3997_v19  ;;  %v4007_v58 = vsel %vm3998_vm8, %v3779_v55, %v4006_v7 }
 0x302   : > { %v4012_v21 = vsel %vm3998_vm8, %v3783_v47, %v4011_v15  ;;  %v4017_v4 = vsel %vm3998_vm8, %v3787_v60, %v4016_v6  ;;  %v4001_v36 = vsel %vm4000_vm9, %v3791_v18, %v3999_v45  ;;  %v4008_v30 = vsel %vm4000_vm9, %v3795_v22, %v4007_v58 }
 0x303   : > { %v4013_v59 = vsel %vm4000_vm9, %v3799_v61, %v4012_v21  ;;  %v4018_v14 = vsel %vm4000_vm9, %v3803_v35, %v4017_v4  ;;  %v3685_v50 = vmax.f32 %v3400_v41, %v9800_v9  ;;  %v3687_v27 = vmax.f32 %v3401_v1, %v9802_v42 }
 0x304   : > { %v3689_v33 = vmax.f32 %v3402_v23, %v9804_v44  ;;  %v3691_v19 = vmax.f32 %v3403_v16, %v9806_v20  ;;  %v3217_v34 = vadd.f32 %v14218_v25, %v14268_v17  ;;  %v3219_v6 = vadd.f32 %v14223_v31, %v14272_v49 }
 0x305   : > { %v14323_v15 = vadd.f32 %v14184_v26, %v3028_v48  ;;  %v14326_v45 = vadd.f32 %v14191_v38, %v3117_v62  ;;  %v3712_v21 = vmax.f32 %v14234_v37, %v3685_v50  ;;  %v3713_v4 = vmax.f32 %v14236_v39, %v3687_v27 }
 0x306   : > { %v3714_v41 = vmax.f32 %v14238_v40, %v3689_v33  ;;  %v3715_v1 = vmax.f32 %v14241_v53, %v3691_v19  ;;  %v3440_v23 = vcombine.low %v14277_v54, %v3217_v34  ;;  %v3441_v17 = vcombine.high %v14277_v54, %v3217_v34 }
 0x307   : > { %v3442_v49 = vcombine.low %v14280_v3, %v3219_v6  ;;  %v3443_v26 = vcombine.high %v14280_v3, %v3219_v6  ;;  %v3807_v48 = vrot.slane %v3712_v21, %v14116_v8  ;;  %v3811_v38 = vrot.slane %v3712_v21, %v14121_v10 }
 0x308   : > { %v3815_v37 = vrot.slane %v3712_v21, %v14173_v46  ;;  %v3819_v39 = vrot.slane %v3712_v21, %v14178_v5  ;;  %v3823_v40 = vrot.slane %v3713_v4, %v14116_v8  ;;  %v3827_v53 = vrot.slane %v3713_v4, %v14121_v10 }
 0x309   : > { %v3831_v62 = vrot.slane %v3713_v4, %v14173_v46  ;;  %v3835_v54 = vrot.slane %v3713_v4, %v14178_v5  ;;  %v3839_v16 = vrot.slane %v3714_v41, %v14116_v8  ;;  %v3843_v3 = vrot.slane %v3714_v41, %v14121_v10 }
 0x30a   : > { %v3847_v9 = vrot.slane %v3714_v41, %v14173_v46  ;;  %v3851_v42 = vrot.slane %v3714_v41, %v14178_v5  ;;  %v3855_v44 = vrot.slane %v3715_v1, %v14116_v8  ;;  %v3859_v20 = vrot.slane %v3715_v1, %v14121_v10 }
 0x30b   : > { %v3863_v52 = vrot.slane %v3715_v1, %v14173_v46  ;;  %v3867_v51 = vrot.slane %v3715_v1, %v14178_v5  ;;  %v4003_v55 = vsel %vm4002_vm10, %v3807_v48, %v4001_v36  ;;  %v4009_v47 = vsel %vm4002_vm10, %v3811_v38, %v4008_v30 }
 0x30c   : > { %v4014_v60 = vsel %vm4002_vm10, %v3815_v37, %v4013_v59  ;;  %v4019_v18 = vsel %vm4002_vm10, %v3819_v39, %v4018_v14  ;;  %v4005_v22 = vsel %vm4004_vm11, %v3823_v40, %v4003_v55  ;;  %v4010_v61 = vsel %vm4004_vm11, %v3827_v53, %v4009_v47 }
 0x30d   : > { %v4015_v35 = vsel %vm4004_vm11, %v3831_v62, %v4014_v60  ;;  %v4020_v7 = vsel %vm4004_vm11, %v3835_v54, %v4019_v18  ;;  %v14361_v58 = vsel %vm4021_vm12, %v3855_v44, %v3839_v16  ;;  %v14364_v50 = vsel %vm4021_vm12, %v3859_v20, %v3843_v3  ;;  %4067 = vst [vmem:[#allocation2] sm:$0xfc] %v4005_v22 }
 0x30e   : > { %v14367_v36 = vsel %vm4021_vm12, %v3863_v52, %v3847_v9  ;;  %v14370_v30 = vsel %vm4021_vm12, %v3867_v51, %v3851_v42  ;;  %4068 = vst [vmem:[#allocation2 + $0x8] sm:$0xfc] %v4010_v61  ;;  %4069 = vst [vmem:[#allocation2 + $0x10] sm:$0xfc] %v4015_v35  ;;  %v3450_v59 = vrot.slane %v3440_v23, %v14149_v32  ;;  %v15170_v19 = vrot.slane %v14208_v2, 9 }
 0x30f   : > { %4070 = vst [vmem:[#allocation2 + $0x18] sm:$0xfc] %v4020_v7  ;;  %v3457_v14 = vrot.slane %v3441_v17, %v14149_v32  ;;  %v3464_v27 = vrot.slane %v3442_v49, %v14149_v32  ;;  %v3471_v33 = vrot.slane %v3443_v26, %v14149_v32  ;;  %v15171_v6 = vrot.slane %v14210_v11, 9 }
 0x310   : > { %v14379_v34 = vmax.f32 %v14208_v2, %v15170_v19  ;;  %v3225_v4 = vadd.f32 %v14218_v25, %v14282_v63  ;;  %v3227_v41 = vadd.f32 %v14223_v31, %v14284_v0 }
 0x311   : > { %v14384_v21 = vmax.f32 %v14210_v11, %v15171_v6  ;;  %v3472_v1 = vcombine.low %v3450_v59, %v3464_v27  ;;  %v3473_v23 = vcombine.high %v3450_v59, %v3464_v27  ;;  %v3474_v17 = vcombine.low %v3457_v14, %v3471_v33 }
 0x312   : > { %v3475_v49 = vcombine.high %v3457_v14, %v3471_v33  ;;  %v3512_v26 = vcombine.low %v14323_v15, %v3225_v4  ;;  %v3513_v2 = vcombine.high %v14323_v15, %v3225_v4  ;;  %v3514_v48 = vcombine.low %v14326_v45, %v3227_v41 }
 0x313   : > { %v3515_v11 = vcombine.high %v14326_v45, %v3227_v41  ;;  %v9808_v38 = vrot.slane %v3472_v1, 9  ;;  %v9810_v37 = vrot.slane %v3473_v23, 9  ;;  %v9812_v39 = vrot.slane %v3474_v17, 9 }
 0x314   : > { %v9814_v25 = vrot.slane %v3475_v49, 9  ;;  %v3522_v63 = vrot.slane %v3512_v26, %v14149_v32  ;;  %v3529_v0 = vrot.slane %v3513_v2, %v14149_v32  ;;  %v3536_v31 = vrot.slane %v3514_v48, %v14149_v32 }
 0x315   : > { %v3543_v40 = vrot.slane %v3515_v11, %v14149_v32  ;;  %v3693_v53 = vmax.f32 %v3472_v1, %v9808_v38  ;;  %v3695_v62 = vmax.f32 %v3473_v23, %v9810_v37  ;;  %v3697_v54 = vmax.f32 %v3474_v17, %v9812_v39 }
 0x316   : > { %v3699_v15 = vmax.f32 %v3475_v49, %v9814_v25  ;;  %v3544_v16 = vcombine.low %v3522_v63, %v3536_v31  ;;  %v3545_v3 = vcombine.high %v3522_v63, %v3536_v31 }
 0x317   : > { %v3546_v9 = vcombine.low %v3529_v0, %v3543_v40  ;;  %v3547_v45 = vcombine.high %v3529_v0, %v3543_v40  ;;  %v3716_v42 = vmax.f32 %v14243_v28, %v3693_v53  ;;  %v3717_v44 = vmax.f32 %v14245_v56, %v3695_v62  ;;  %v4344_v40 = vld [vmem:[#allocation2 + $0x8] sm:$0xfe]  ;;  %v4343_v53 = vld [vmem:[#allocation2] sm:$0xfe] }
 0x318   : > { %v3718_v20 = vmax.f32 %v14247_v29, %v3697_v54  ;;  %v3719_v52 = vmax.f32 %v14252_v43, %v3699_v15  ;;  %v9816_v51 = vrot.slane %v3544_v16, 9  ;;  %v9818_v55 = vrot.slane %v3545_v3, 9 }
 0x319   : > { %v9820_v47 = vrot.slane %v3546_v9, 9  ;;  %v9822_v60 = vrot.slane %v3547_v45, 9  ;;  %v3871_v18 = vrot.slane %v3716_v42, %v14116_v8  ;;  %v3875_v22 = vrot.slane %v3716_v42, %v14121_v10 }
 0x31a   : > { %v3879_v61 = vrot.slane %v3716_v42, %v14173_v46  ;;  %v3883_v35 = vrot.slane %v3716_v42, %v14178_v5  ;;  %v3887_v28 = vrot.slane %v3717_v44, %v14116_v8  ;;  %v3891_v56 = vrot.slane %v3717_v44, %v14121_v10 }
 0x31b   : > { %v3895_v29 = vrot.slane %v3717_v44, %v14173_v46  ;;  %v3899_v43 = vrot.slane %v3717_v44, %v14178_v5  ;;  %v3903_v7 = vrot.slane %v3718_v20, %v14116_v8  ;;  %v3907_v59 = vrot.slane %v3718_v20, %v14121_v10 }
 0x31c   : > { %v3911_v14 = vrot.slane %v3718_v20, %v14173_v46  ;;  %v3915_v27 = vrot.slane %v3718_v20, %v14178_v5  ;;  %v3919_v33 = vrot.slane %v3719_v52, %v14116_v8  ;;  %v3923_v19 = vrot.slane %v3719_v52, %v14121_v10 }
 0x31d   : > { %v3927_v6 = vrot.slane %v3719_v52, %v14173_v46  ;;  %v3931_v4 = vrot.slane %v3719_v52, %v14178_v5  ;;  %v4024_v41 = vsel %vm4023_vm13, %v3871_v18, %v14361_v58  ;;  %v4031_v1 = vsel %vm4023_vm13, %v3875_v22, %v14364_v50 }
 0x31e   : > { %v4038_v23 = vsel %vm4023_vm13, %v3879_v61, %v14367_v36  ;;  %v4045_v17 = vsel %vm4023_vm13, %v3883_v35, %v14370_v30  ;;  %v4025_v49 = vsel %vm3996_vm7, %v3887_v28, %v4024_v41  ;;  %v4032_v26 = vsel %vm3996_vm7, %v3891_v56, %v4031_v1 }
 0x31f   : > { %v4039_v2 = vsel %vm3996_vm7, %v3895_v29, %v4038_v23  ;;  %v4046_v48 = vsel %vm3996_vm7, %v3899_v43, %v4045_v17  ;;  %v4026_v11 = vsel %vm3998_vm8, %v3903_v7, %v4025_v49  ;;  %v4033_v58 = vsel %vm3998_vm8, %v3907_v59, %v4032_v26  ;;  %v4480_v43 = vld [vmem:[#allocation10 + $0xc00] sm:$0xff]  ;;  %v4493_v49 = vld [vmem:[#allocation10 + $0xc68] sm:$0xff]  ;;  %v4491_v26 = vld [vmem:[#allocation10 + $0xc58] sm:$0xff] }
 0x320   : > { %v4040_v50 = vsel %vm3998_vm8, %v3911_v14, %v4039_v2  ;;  %v4047_v38 = vsel %vm3998_vm8, %v3915_v27, %v4046_v48  ;;  %v4027_v36 = vsel %vm4000_vm9, %v3919_v33, %v4026_v11  ;;  %v4034_v30 = vsel %vm4000_vm9, %v3923_v19, %v4033_v58  ;;  %v4484_v7 = vld [vmem:[#allocation10 + $0xc20] sm:$0xff]  ;;  %v4482_v19 = vld [vmem:[#allocation10 + $0xc10] sm:$0xff]  ;;  %v4495_v2 = vld [vmem:[#allocation10 + $0xc78] sm:$0xff] }
 0x321   : > { %v4041_v37 = vsel %vm4000_vm9, %v3927_v6, %v4040_v50  ;;  %v4048_v39 = vsel %vm4000_vm9, %v3931_v4, %v4047_v38  ;;  %v3701_v25 = vmax.f32 %v3544_v16, %v9816_v51  ;;  %v3703_v63 = vmax.f32 %v3545_v3, %v9818_v55  ;;  %v4486_v6 = vld [vmem:[#allocation10 + $0xc30] sm:$0xff]  ;;  %v4489_v4 = vld [vmem:[#allocation10 + $0xc48] sm:$0xff]  ;;  %v4488_v38 = vld [vmem:[#allocation10 + $0xc40] sm:$0xff] }
 0x322   : > { %v3705_v0 = vmax.f32 %v3546_v9, %v9820_v47  ;;  %v3707_v31 = vmax.f32 %v3547_v45, %v9822_v60  ;;  %v4623_v44 = vrot.slane %v4344_v40, 1  ;;  %v4620_v20 = vrot.slane %v4343_v53, 1  ;;  %v4501_v40 = vld [vmem:[#allocation10 + $0xca8] sm:$0xff]  ;;  %v4499_v53 = vld [vmem:[#allocation10 + $0xc98] sm:$0xff] }
 0x323   : > { %v3720_v62 = vmax.f32 %v14256_v57, %v3701_v25  ;;  %v3721_v54 = vmax.f32 %v14265_v13, %v3703_v63  ;;  %v10673_v58 = vpack.c.bf16 %v4484_v7, %v4480_v43  ;;  %v10801_v50 = vpack.c.bf16 %v4486_v6, %v4482_v19  ;;  %v4490_v63 = vld [vmem:[#allocation10 + $0xc50] sm:$0xff]  ;;  %v4513_v19 = vld [vmem:[#allocation10 + $0xd08] sm:$0xff] }
 0x324   : > { %v3722_v15 = vmax.f32 %v14379_v34, %v3705_v0  ;;  %v3723_v42 = vmax.f32 %v14384_v21, %v3707_v31  ;;  %v10803_v25 = vpack.c.bf16 %v4495_v2, %v4491_v26  ;;  %v4494_v0 = vld [vmem:[#allocation10 + $0xc70] sm:$0xff]  ;;  %v4497_v31 = vld [vmem:[#allocation10 + $0xc88] sm:$0xff]  ;;  %v4516_v26 = vld [vmem:[#allocation10 + $0xd20] sm:$0xff] }
 0x325   : > { %v3935_v52 = vrot.slane %v3720_v62, %v14116_v8  ;;  %v3939_v18 = vrot.slane %v3720_v62, %v14121_v10  ;;  %v3943_v16 = vrot.slane %v3720_v62, %v14173_v46  ;;  %v3947_v3 = vrot.slane %v3720_v62, %v14178_v5  ;;  %v4503_v62 = vld [vmem:[#allocation10 + $0xcb8] sm:$0xff] }
 0x326   : > { %v3951_v9 = vrot.slane %v3721_v54, %v14116_v8  ;;  %v3955_v57 = vrot.slane %v3721_v54, %v14121_v10  ;;  %v3959_v13 = vrot.slane %v3721_v54, %v14173_v46  ;;  %v3963_v34 = vrot.slane %v3721_v54, %v14178_v5 }
 0x327   : > { %v3967_v21 = vrot.slane %v3722_v15, %v14116_v8  ;;  %v3971_v45 = vrot.slane %v3722_v15, %v14121_v10  ;;  %v3975_v51 = vrot.slane %v3722_v15, %v14173_v46  ;;  %v3979_v55 = vrot.slane %v3722_v15, %v14178_v5 }
 0x328   : > { %v3983_v47 = vrot.slane %v3723_v42, %v14116_v8  ;;  %v3987_v60 = vrot.slane %v3723_v42, %v14121_v10  ;;  %v3991_v22 = vrot.slane %v3723_v42, %v14173_v46  ;;  %v3995_v61 = vrot.slane %v3723_v42, %v14178_v5  ;;  %v4346_v42 = vld [vmem:[#allocation2 + $0x18] sm:$0xfe] }
 0x329   : > { %v4028_v35 = vsel %vm4002_vm10, %v3935_v52, %v4027_v36  ;;  %v4035_v28 = vsel %vm4002_vm10, %v3939_v18, %v4034_v30  ;;  %v4042_v56 = vsel %vm4002_vm10, %v3943_v16, %v4041_v37  ;;  %v4049_v29 = vsel %vm4002_vm10, %v3947_v3, %v4048_v39  ;;  %v4492_v36 = vld [vmem:[#allocation10 + $0xc60] sm:$0xff]  ;;  %v4498_v16 = vld [vmem:[#allocation10 + $0xc90] sm:$0xff] }
 0x32a   : > { %v14463_v59 = vsel %vm4004_vm11, %v3951_v9, %v4028_v35  ;;  %v14466_v14 = vsel %vm4004_vm11, %v3955_v57, %v4035_v28  ;;  %v14469_v27 = vsel %vm4004_vm11, %v3959_v13, %v4042_v56  ;;  %v14472_v33 = vsel %vm4004_vm11, %v3963_v34, %v4049_v29  ;;  %v4500_v52 = vld [vmem:[#allocation10 + $0xca0] sm:$0xff]  ;;  %v4502_v3 = vld [vmem:[#allocation10 + $0xcb0] sm:$0xff]  ;;  %v4505_v9 = vld [vmem:[#allocation10 + $0xcc8] sm:$0xff] }
 0x32b   : > { %v4051_v41 = vsel %vm4021_vm12, %v3983_v47, %v3967_v21  ;;  %v4052_v1 = vsel %vm4021_vm12, %v3987_v60, %v3971_v45  ;;  %v4053_v23 = vsel %vm4021_vm12, %v3991_v22, %v3975_v51  ;;  %v4054_v17 = vsel %vm4021_vm12, %v3995_v61, %v3979_v55  ;;  %4071 = vst [vmem:[#allocation2 + $0x20] sm:$0xff] %v14463_v59  ;;  %v4509_v34 = vld [vmem:[#allocation10 + $0xce8] sm:$0xff]  ;;  %v4507_v47 = vld [vmem:[#allocation10 + $0xcd8] sm:$0xff]  ;;  %v4504_v56 = vld [vmem:[#allocation10 + $0xcc0] sm:$0xff] }
 0x32c   : > { %4072 = vst [vmem:[#allocation2 + $0x28] sm:$0xff] %v14466_v14  ;;  %4073 = vst [vmem:[#allocation2 + $0x30] sm:$0xff] %v14469_v27  ;;  %v4624_v48 = vrot.slane %v14466_v14, 1  ;;  %v4621_v11 = vrot.slane %v14463_v59, 1  ;;  %v10675_v39 = vpack.c.bf16 %v4493_v49, %v4489_v4  ;;  %v10677_v54 = vpack.c.bf16 %v4492_v36, %v4488_v38  ;;  %v4511_v60 = vld [vmem:[#allocation10 + $0xcf8] sm:$0xff]  ;;  %v4508_v29 = vld [vmem:[#allocation10 + $0xce0] sm:$0xff] }
 0x32d   : > { %4074 = vst [vmem:[#allocation2 + $0x38] sm:$0xff] %v14472_v33  ;;  %4075 = vst [vmem:[#allocation2 + $0x40] sm:$0x3] %v4051_v41  ;;  %v10805_v15 = vpack.c.bf16 %v4494_v0, %v4490_v63  ;;  %v10807_v18 = vpack.c.bf16 %v4503_v62, %v4499_v53  ;;  %v4629_v51 = vrot.slane %v4346_v42, 1  ;;  %v4630_v55 = vrot.slane %v14472_v33, 1  ;;  %v4506_v59 = vld [vmem:[#allocation10 + $0xcd0] sm:$0xff] }
 0x32e   : > { %4076 = vst [vmem:[#allocation2 + $0x48] sm:$0x3] %v4052_v1  ;;  %4077 = vst [vmem:[#allocation2 + $0x50] sm:$0x3] %v4053_v23  ;;  %v4625_v30 = vsel %vm738_vm3, %v4623_v44, %v4624_v48  ;;  %v4622_v37 = vsel %vm738_vm3, %v4620_v20, %v4621_v11  ;;  %v4496_v44 = vld [vmem:[#allocation10 + $0xc80] sm:$0xff]  ;;  %v10679_v20 = vpack.c.bf16 %v4501_v40, %v4497_v31  ;;  %v4510_v14 = vld [vmem:[#allocation10 + $0xcf0] sm:$0xff] }
 0x32f   : > { %4078 = vst [vmem:[#allocation2 + $0x58] sm:$0x3] %v4054_v17  ;;  %4712 = vmatprep.mubr.f32.mxu0 %v4625_v30  ;;  %4866 = vmatprep.mubr.f32.mxu1 %v4625_v30  ;;  %v10681_v22 = vpack.c.bf16 %v4500_v52, %v4496_v44  ;;  %v10809_v28 = vpack.c.bf16 %v4502_v3, %v4498_v16  ;;  %v4517_v4 = vld [vmem:[#allocation10 + $0xd28] sm:$0xff]  ;;  %v4515_v41 = vld [vmem:[#allocation10 + $0xd18] sm:$0xff]  ;;  %v4512_v49 = vld [vmem:[#allocation10 + $0xd00] sm:$0xff] }
 0x330   : > { %4713 = vmatmul.mubr.f32.vlgmr.msra.gmra.mrb[16].mxu0 %v4622_v37  ;;  %4867 = vmatmul.mubr.f32.vlgmr.msra.gmra.mrb[16].mxu1 %v4622_v37  ;;  %v10683_v43 = vpack.c.bf16 %v4509_v34, %v4505_v9  ;;  %v10811_v7 = vpack.c.bf16 %v4511_v60, %v4507_v47  ;;  %v4631_v6 = vsel %vm738_vm3, %v4629_v51, %v4630_v55  ;;  %v4519_v1 = vld [vmem:[#allocation10 + $0xd38] sm:$0xff]  ;;  %v4525_v38 = vld [vmem:[#allocation10 + $0xd68] sm:$0xff]  ;;  %v4524_v63 = vld [vmem:[#allocation10 + $0xd60] sm:$0xff] }
 0x331   : > { %10674 = vmatpush1.bf16.msra.mxu0 %v10673_v58  ;;  %10802 = vmatpush1.bf16.msra.mxu1 %v10801_v50  ;;  %v10685_v23 = vpack.c.bf16 %v4508_v29, %v4504_v56  ;;  %v10813_v17 = vpack.c.bf16 %v4510_v14, %v4506_v59  ;;  %v10687_v2 = vpack.c.bf16 %v4517_v4, %v4513_v19  ;;  %v4518_v58 = vld [vmem:[#allocation10 + $0xd30] sm:$0xff]  ;;  %v4521_v50 = vld [vmem:[#allocation10 + $0xd48] sm:$0xff]  ;;  %v4523_v36 = vld [vmem:[#allocation10 + $0xd58] sm:$0xff] }
 0x332   : > { %10676 = vmatprep.subr.bf16.mxu0 %v10675_v39  ;;  %10804 = vmatprep.subr.bf16.mxu1 %v10803_v25  ;;  %v4527_v30 = vld [vmem:[#allocation10 + $0xd78] sm:$0xff]  ;;  %v10689_v37 = vpack.c.bf16 %v4516_v26, %v4512_v49  ;;  %v4520_v25 = vld [vmem:[#allocation10 + $0xd40] sm:$0xff]  ;;  %v10691_v0 = vpack.c.bf16 %v4525_v38, %v4521_v50  ;;  %v4522_v40 = vld [vmem:[#allocation10 + $0xd50] sm:$0xff] }
 0x333   : > { %v10819_v31 = vpack.c.bf16 %v4527_v30, %v4523_v36  ;;  %v4526_v53 = vld [vmem:[#allocation10 + $0xd70] sm:$0xff]  ;;  %v4529_v62 = vld [vmem:[#allocation10 + $0xd88] sm:$0xff]  ;;  %v4535_v42 = vld [vmem:[#allocation10 + $0xdb8] sm:$0xff]  ;;  %v10693_v44 = vpack.c.bf16 %v4524_v63, %v4520_v25 }
 0x334   : > { %v4347_v13 = vld [vmem:[#allocation2 + $0x40] sm:$0x1]  ;;  %v10821_v52 = vpack.c.bf16 %v4526_v53, %v4522_v40  ;;  %v4541_v34 = vld [vmem:[#allocation10 + $0xde8] sm:$0xff]  ;;  %v4536_v60 = vld [vmem:[#allocation10 + $0xdc0] sm:$0xff] }
 0x335   : > { %v4348_v57 = vld [vmem:[#allocation2 + $0x48] sm:$0x1]  ;;  %v4632_v45 = vrot.slane %v4347_v13, 1  ;;  %10678 = vmatpush1.bf16.msra.mxu0 %v10677_v54  ;;  %10806 = vmatpush1.bf16.msra.mxu1 %v10805_v15  ;;  %v4533_v54 = vld [vmem:[#allocation10 + $0xda8] sm:$0xff]  ;;  %v4530_v9 = vld [vmem:[#allocation10 + $0xd90] sm:$0xff] }
 0x336   : > { %v4634_v21 = vrot.slane %v4348_v57, 1  ;;  %10680 = vmatprep.subr.bf16.mxu0 %v10679_v20  ;;  %10808 = vmatprep.subr.bf16.mxu1 %v10807_v18  ;;  %v4531_v15 = vld [vmem:[#allocation10 + $0xd98] sm:$0xff]  ;;  %v4528_v20 = vld [vmem:[#allocation10 + $0xd80] sm:$0xff]  ;;  %v10695_v16 = vpack.c.bf16 %v4533_v54, %v4529_v62  ;;  %v4534_v57 = vld [vmem:[#allocation10 + $0xdb0] sm:$0xff] }
 0x337   : > { %v4633_v35 = vsel %vm738_vm3, %v4621_v11, %v4632_v45  ;;  %v4514_v11 = vld [vmem:[#allocation10 + $0xd10] sm:$0xff]  ;;  %v4532_v18 = vld [vmem:[#allocation10 + $0xda0] sm:$0xff]  ;;  %v10823_v3 = vpack.c.bf16 %v4535_v42, %v4531_v15  ;;  %v4537_v13 = vld [vmem:[#allocation10 + $0xdc8] sm:$0xff]  ;;  %v10825_v47 = vpack.c.bf16 %v4534_v57, %v4530_v9 }
 0x338   : > { %v4635_v61 = vsel %vm738_vm3, %v4624_v48, %v4634_v21  ;;  %v10815_v48 = vpack.c.bf16 %v4519_v1, %v4515_v41  ;;  %v10817_v39 = vpack.c.bf16 %v4518_v58, %v4514_v11  ;;  %v4539_v21 = vld [vmem:[#allocation10 + $0xdd8] sm:$0xff]  ;;  %v10697_v51 = vpack.c.bf16 %v4532_v18, %v4528_v20  ;;  %v4542_v56 = vld [vmem:[#allocation10 + $0xdf0] sm:$0xff]  ;;  %v4545_v29 = vld [vmem:[#allocation10 + $0xe08] sm:$0xff] }
 0x339   : > { %4718 = vmatprep.mubr.f32.mxu0 %v4635_v61  ;;  %4872 = vmatprep.mubr.f32.mxu1 %v4635_v61  ;;  %v4543_v45 = vld [vmem:[#allocation10 + $0xdf8] sm:$0xff]  ;;  %v10699_v61 = vpack.c.bf16 %v4541_v34, %v4537_v13  ;;  %v4548_v4 = vld [vmem:[#allocation10 + $0xe20] sm:$0xff]  ;;  %v4553_v49 = vld [vmem:[#allocation10 + $0xe48] sm:$0xff] }
 0x33a   : > { %4719 = vmatmul.mubr.f32.gmra.mrb[18].mxu0 %v4633_v35  ;;  %4873 = vmatmul.mubr.f32.gmra.mrb[18].mxu1 %v4633_v35  ;;  %v10827_v35 = vpack.c.bf16 %v4543_v45, %v4539_v21  ;;  %v4551_v59 = vld [vmem:[#allocation10 + $0xe38] sm:$0xff]  ;;  %v4557_v26 = vld [vmem:[#allocation10 + $0xe68] sm:$0xff]  ;;  %v4552_v50 = vld [vmem:[#allocation10 + $0xe40] sm:$0xff] }
 0x33b   : > { %4789 = vmatprep.mubr.f32.mxu0 %v4631_v6  ;;  %4943 = vmatprep.mubr.f32.mxu1 %v4631_v6  ;;  %v4544_v6 = vld [vmem:[#allocation10 + $0xe00] sm:$0xff]  ;;  %v10707_v36 = vpack.c.bf16 %v4557_v26, %v4553_v49  ;;  %v4561_v25 = vld [vmem:[#allocation10 + $0xe88] sm:$0xff] }
 0x33c   : > { %10682 = vmatpush1.bf16.msra.mxu0 %v10681_v22  ;;  %10810 = vmatpush1.bf16.msra.mxu1 %v10809_v28  ;;  %v4540_v22 = vld [vmem:[#allocation10 + $0xde0] sm:$0xff]  ;;  %v4538_v28 = vld [vmem:[#allocation10 + $0xdd0] sm:$0xff]  ;;  %v10705_v11 = vpack.c.bf16 %v4548_v4, %v4544_v6  ;;  %v4565_v63 = vld [vmem:[#allocation10 + $0xea8] sm:$0xff] }
 0x33d   : > { %10684 = vmatprep.subr.bf16.mxu0 %v10683_v43  ;;  %10812 = vmatprep.subr.bf16.mxu1 %v10811_v7  ;;  %v4549_v43 = vld [vmem:[#allocation10 + $0xe28] sm:$0xff]  ;;  %v4547_v7 = vld [vmem:[#allocation10 + $0xe18] sm:$0xff]  ;;  %v10701_v14 = vpack.c.bf16 %v4540_v22, %v4536_v60  ;;  %v10829_v19 = vpack.c.bf16 %v4542_v56, %v4538_v28  ;;  %v4556_v38 = vld [vmem:[#allocation10 + $0xe60] sm:$0xff]  ;;  %v10711_v15 = vpack.c.bf16 %v4565_v63, %v4561_v25 }
 0x33e   : > { %v10703_v41 = vpack.c.bf16 %v4549_v43, %v4545_v29  ;;  %v10831_v1 = vpack.c.bf16 %v4551_v59, %v4547_v7  ;;  %v10709_v40 = vpack.c.bf16 %v4556_v38, %v4552_v50  ;;  %v4560_v62 = vld [vmem:[#allocation10 + $0xe80] sm:$0xff]  ;;  %v4569_v20 = vld [vmem:[#allocation10 + $0xec8] sm:$0xff] }
 0x33f   : > { %v4564_v54 = vld [vmem:[#allocation10 + $0xea0] sm:$0xff]  ;;  %v4573_v18 = vld [vmem:[#allocation10 + $0xee8] sm:$0xff] }
 0x340   : > { %10686 = vmatpush1.bf16.msra.mxu0 %v10685_v23  ;;  %10814 = vmatpush1.bf16.msra.mxu1 %v10813_v17  ;;  %v4546_v23 = vld [vmem:[#allocation10 + $0xe10] sm:$0xff]  ;;  %v10713_v9 = vpack.c.bf16 %v4564_v54, %v4560_v62  ;;  %v4568_v13 = vld [vmem:[#allocation10 + $0xec0] sm:$0xff]  ;;  %v10715_v21 = vpack.c.bf16 %v4573_v18, %v4569_v20  ;;  %v4577_v60 = vld [vmem:[#allocation10 + $0xf08] sm:$0xff] }
 0x341   : > { %10688 = vmatprep.subr.bf16.mxu0 %v10687_v2  ;;  %10816 = vmatprep.subr.bf16.mxu1 %v10815_v48  ;;  %v4550_v17 = vld [vmem:[#allocation10 + $0xe30] sm:$0xff]  ;;  %v4555_v2 = vld [vmem:[#allocation10 + $0xe58] sm:$0xff]  ;;  %v4572_v34 = vld [vmem:[#allocation10 + $0xee0] sm:$0xff] }
 0x342   : > { %v4559_v48 = vld [vmem:[#allocation10 + $0xe78] sm:$0xff]  ;;  %v10833_v58 = vpack.c.bf16 %v4550_v17, %v4546_v23  ;;  %v4581_v22 = vld [vmem:[#allocation10 + $0xf28] sm:$0xff]  ;;  %v10717_v28 = vpack.c.bf16 %v4572_v34, %v4568_v13  ;;  %v4576_v29 = vld [vmem:[#allocation10 + $0xf00] sm:$0xff] }
 0x343   : > { %v10835_v30 = vpack.c.bf16 %v4559_v48, %v4555_v2  ;;  %v4580_v43 = vld [vmem:[#allocation10 + $0xf20] sm:$0xff]  ;;  %v10719_v7 = vpack.c.bf16 %v4581_v22, %v4577_v60  ;;  %v4585_v6 = vld [vmem:[#allocation10 + $0xf48] sm:$0xff] }
 0x344   : > { %10690 = vmatpush1.bf16.msra.mxu0 %v10689_v37  ;;  %10818 = vmatpush1.bf16.msra.mxu1 %v10817_v39  ;;  %v4554_v37 = vld [vmem:[#allocation10 + $0xe50] sm:$0xff]  ;;  %v4589_v4 = vld [vmem:[#allocation10 + $0xf68] sm:$0xff]  ;;  %v10721_v23 = vpack.c.bf16 %v4580_v43, %v4576_v29  ;;  %v4584_v49 = vld [vmem:[#allocation10 + $0xf40] sm:$0xff] }
 0x345   : > { %10692 = vmatprep.subr.bf16.mxu0 %v10691_v0  ;;  %10820 = vmatprep.subr.bf16.mxu1 %v10819_v31  ;;  %v4558_v39 = vld [vmem:[#allocation10 + $0xe70] sm:$0xff]  ;;  %v4563_v0 = vld [vmem:[#allocation10 + $0xe98] sm:$0xff]  ;;  %v4588_v26 = vld [vmem:[#allocation10 + $0xf60] sm:$0xff]  ;;  %v10723_v2 = vpack.c.bf16 %v4589_v4, %v4585_v6 }
 0x346   : > { %v4567_v31 = vld [vmem:[#allocation10 + $0xeb8] sm:$0xff]  ;;  %v10837_v53 = vpack.c.bf16 %v4558_v39, %v4554_v37  ;;  %v4593_v50 = vld [vmem:[#allocation10 + $0xf88] sm:$0xff]  ;;  %v10725_v37 = vpack.c.bf16 %v4588_v26, %v4584_v49  ;;  %v4592_v25 = vld [vmem:[#allocation10 + $0xf80] sm:$0xff] }
 0x347   : > { %v10839_v42 = vpack.c.bf16 %v4567_v31, %v4563_v0  ;;  %v4597_v38 = vld [vmem:[#allocation10 + $0xfa8] sm:$0xff]  ;;  %v4596_v63 = vld [vmem:[#allocation10 + $0xfa0] sm:$0xff]  ;;  %v4089_v29 = vld [vmem:[#allocation10 + $0x10] sm:$0xff] }
 0x348   : > { %10694 = vmatpush1.bf16.msra.mxu0 %v10693_v44  ;;  %10822 = vmatpush1.bf16.msra.mxu1 %v10821_v52  ;;  %v4562_v44 = vld [vmem:[#allocation10 + $0xe90] sm:$0xff]  ;;  %v10727_v0 = vpack.c.bf16 %v4597_v38, %v4593_v50  ;;  %v4601_v62 = vld [vmem:[#allocation10 + $0xfc8] sm:$0xff]  ;;  %v4600_v20 = vld [vmem:[#allocation10 + $0xfc0] sm:$0xff] }
 0x349   : > { %10696 = vmatprep.subr.bf16.mxu0 %v10695_v16  ;;  %10824 = vmatprep.subr.bf16.mxu1 %v10823_v3  ;;  %v4566_v52 = vld [vmem:[#allocation10 + $0xeb0] sm:$0xff]  ;;  %v4571_v16 = vld [vmem:[#allocation10 + $0xed8] sm:$0xff]  ;;  %v4605_v54 = vld [vmem:[#allocation10 + $0xfe8] sm:$0xff] }
 0x34a   : > { %v4575_v3 = vld [vmem:[#allocation10 + $0xef8] sm:$0xff]  ;;  %v10841_v57 = vpack.c.bf16 %v4566_v52, %v4562_v44  ;;  %v10729_v44 = vpack.c.bf16 %v4596_v63, %v4592_v25  ;;  %v4604_v18 = vld [vmem:[#allocation10 + $0xfe0] sm:$0xff]  ;;  %v4088_v13 = vld [vmem:[#allocation10 + $0x8] sm:$0xff] }
 0x34b   : > { %v10843_v45 = vpack.c.bf16 %v4575_v3, %v4571_v16  ;;  %v10731_v16 = vpack.c.bf16 %v4605_v54, %v4601_v62  ;;  %v4092_v34 = vld [vmem:[#allocation10 + $0x28] sm:$0xff]  ;;  %v4349_v4 = vld [vmem:[#allocation2 + $0x50] sm:$0x1]  ;;  %v4101_v50 = vld [vmem:[#allocation10 + $0x70] sm:$0xff] }
 0x34c   : > { %10698 = vmatpush1.bf16.msra.mxu0 %v10697_v51  ;;  %10826 = vmatpush1.bf16.msra.mxu1 %v10825_v47  ;;  %v4570_v51 = vld [vmem:[#allocation10 + $0xed0] sm:$0xff]  ;;  %v4350_v22 = vld [vmem:[#allocation2 + $0x58] sm:$0x1]  ;;  %v4095_v49 = vld [vmem:[#allocation10 + $0x40] sm:$0xff] }
 0x34d   : > { %10700 = vmatprep.subr.bf16.mxu0 %v10699_v61  ;;  %10828 = vmatprep.subr.bf16.mxu1 %v10827_v35  ;;  %v4574_v47 = vld [vmem:[#allocation10 + $0xef0] sm:$0xff]  ;;  %v4579_v61 = vld [vmem:[#allocation10 + $0xf18] sm:$0xff]  ;;  %v4638_v6 = vrot.slane %v4350_v22, 1  ;;  %v4099_v26 = vld [vmem:[#allocation10 + $0x60] sm:$0xff] }
 0x34e   : > { %v4583_v35 = vld [vmem:[#allocation10 + $0xf38] sm:$0xff]  ;;  %v10845_v56 = vpack.c.bf16 %v4574_v47, %v4570_v51  ;;  %v4345_v51 = vld [vmem:[#allocation2 + $0x10] sm:$0xfe]  ;;  %v10733_v47 = vpack.c.bf16 %v4604_v18, %v4600_v20  ;;  %v4104_v38 = vld [vmem:[#allocation10 + $0x88] sm:$0xff]  ;;  %v10869_v25 = vpack.c.bf16 %v4099_v26, %v4095_v49 }
 0x34f   : > { %v10847_v59 = vpack.c.bf16 %v4583_v35, %v4579_v61  ;;  %v10863_v61 = vpack.c.bf16 %v4092_v34, %v4088_v13  ;;  %v4626_v43 = vrot.slane %v4345_v51, 1  ;;  %v4109_v54 = vld [vmem:[#allocation10 + $0xb0] sm:$0xff]  ;;  %v4122_v51 = vld [vmem:[#allocation10 + $0x118] sm:$0xff] }
 0x350   : > { %10702 = vmatpush1.bf16.msra.mxu0 %v10701_v14  ;;  %10830 = vmatpush1.bf16.msra.mxu1 %v10829_v19  ;;  %v4578_v14 = vld [vmem:[#allocation10 + $0xf10] sm:$0xff] }
 0x351   : > { %10704 = vmatprep.subr.bf16.mxu0 %v10703_v41  ;;  %10832 = vmatprep.subr.bf16.mxu1 %v10831_v1  ;;  %v4582_v19 = vld [vmem:[#allocation10 + $0xf30] sm:$0xff]  ;;  %v4587_v41 = vld [vmem:[#allocation10 + $0xf58] sm:$0xff] }
 0x352   : > { %v4591_v1 = vld [vmem:[#allocation10 + $0xf78] sm:$0xff]  ;;  %v10849_v17 = vpack.c.bf16 %v4582_v19, %v4578_v14  ;;  %v4096_v14 = vld [vmem:[#allocation10 + $0x48] sm:$0xff]  ;;  %v4113_v13 = vld [vmem:[#allocation10 + $0xd0] sm:$0xff] }
 0x353   : > { %v10851_v48 = vpack.c.bf16 %v4591_v1, %v4587_v41  ;;  %v4100_v19 = vld [vmem:[#allocation10 + $0x68] sm:$0xff]  ;;  %v4098_v41 = vld [vmem:[#allocation10 + $0x58] sm:$0xff]  ;;  %v4117_v34 = vld [vmem:[#allocation10 + $0xf0] sm:$0xff] }
 0x354   : > { %10706 = vmatpush1.bf16.msra.mxu0 %v10705_v11  ;;  %10834 = vmatpush1.bf16.msra.mxu1 %v10833_v58  ;;  %v4586_v11 = vld [vmem:[#allocation10 + $0xf50] sm:$0xff]  ;;  %v4102_v1 = vld [vmem:[#allocation10 + $0x78] sm:$0xff]  ;;  %v11005_v22 = vpack.c.bf16 %v4117_v34, %v4113_v13  ;;  %v4155_v13 = vld [vmem:[#allocation10 + $0x220] sm:$0xff] }
 0x355   : > { %10708 = vmatprep.subr.bf16.mxu0 %v10707_v36  ;;  %10836 = vmatprep.subr.bf16.mxu1 %v10835_v30  ;;  %v4590_v58 = vld [vmem:[#allocation10 + $0xf70] sm:$0xff]  ;;  %v4595_v36 = vld [vmem:[#allocation10 + $0xf98] sm:$0xff] }
 0x356   : > { %v4599_v30 = vld [vmem:[#allocation10 + $0xfb8] sm:$0xff]  ;;  %v10853_v39 = vpack.c.bf16 %v4590_v58, %v4586_v11  ;;  %v10867_v11 = vpack.c.bf16 %v4100_v19, %v4096_v14  ;;  %v4097_v58 = vld [vmem:[#allocation10 + $0x50] sm:$0xff] }
 0x357   : > { %v10855_v31 = vpack.c.bf16 %v4599_v30, %v4595_v36  ;;  %v4639_v36 = vsel %vm738_vm3, %v4630_v55, %v4638_v6  ;;  %v4108_v30 = vld [vmem:[#allocation10 + $0xa8] sm:$0xff]  ;;  %v10997_v63 = vpack.c.bf16 %v4101_v50, %v4097_v58  ;;  %v4130_v14 = vld [vmem:[#allocation10 + $0x158] sm:$0xff]  ;;  %v4129_v49 = vld [vmem:[#allocation10 + $0x150] sm:$0xff] }
 0x358   : > { %10710 = vmatpush1.bf16.msra.mxu0 %v10709_v40  ;;  %10838 = vmatpush1.bf16.msra.mxu1 %v10837_v53  ;;  %v4594_v40 = vld [vmem:[#allocation10 + $0xf90] sm:$0xff]  ;;  %v10871_v62 = vpack.c.bf16 %v4108_v30, %v4104_v38  ;;  %v4112_v55 = vld [vmem:[#allocation10 + $0xc8] sm:$0xff]  ;;  %v4134_v19 = vld [vmem:[#allocation10 + $0x178] sm:$0xff] }
 0x359   : > { %10712 = vmatprep.subr.bf16.mxu0 %v10711_v15  ;;  %10840 = vmatprep.subr.bf16.mxu1 %v10839_v42  ;;  %v4598_v53 = vld [vmem:[#allocation10 + $0xfb0] sm:$0xff]  ;;  %v4603_v15 = vld [vmem:[#allocation10 + $0xfd8] sm:$0xff]  ;;  %v4135_v38 = vld [vmem:[#allocation10 + $0x180] sm:$0xff] }
 0x35a   : > { %v4607_v42 = vld [vmem:[#allocation10 + $0xff8] sm:$0xff]  ;;  %v10857_v52 = vpack.c.bf16 %v4598_v53, %v4594_v40  ;;  %v4105_v40 = vld [vmem:[#allocation10 + $0x90] sm:$0xff] }
 0x35b   : > { %v10859_v3 = vpack.c.bf16 %v4607_v42, %v4603_v15  ;;  %v4116_v15 = vld [vmem:[#allocation10 + $0xe8] sm:$0xff]  ;;  %v4080_v42 = vld [vmem:[#allocation2 + $0x8] sm:$0xff]  ;;  %v11001_v18 = vpack.c.bf16 %v4109_v54, %v4105_v40  ;;  %v4133_v26 = vld [vmem:[#allocation10 + $0x170] sm:$0xff] }
 0x35c   : > { %10714 = vmatpush1.bf16.msra.mxu0 %v10713_v9  ;;  %10842 = vmatpush1.bf16.msra.mxu1 %v10841_v57  ;;  %v4602_v9 = vld [vmem:[#allocation10 + $0xfd0] sm:$0xff]  ;;  %v11013_v50 = vpack.c.bf16 %v4133_v26, %v4129_v49  ;;  %v4150_v40 = vld [vmem:[#allocation10 + $0x1f8] sm:$0xff]  ;;  %v4147_v54 = vld [vmem:[#allocation10 + $0x1e0] sm:$0xff] }
 0x35d   : > { %10716 = vmatprep.subr.bf16.mxu0 %v10715_v21  ;;  %10844 = vmatprep.subr.bf16.mxu1 %v10843_v45  ;;  %v4606_v57 = vld [vmem:[#allocation10 + $0xff0] sm:$0xff]  ;;  %v4090_v21 = vld [vmem:[#allocation10 + $0x18] sm:$0xff]  ;;  %v4171_v49 = vld [vmem:[#allocation10 + $0x2a0] sm:$0xff] }
 0x35e   : > { %v4094_v45 = vld [vmem:[#allocation10 + $0x38] sm:$0xff]  ;;  %v10861_v60 = vpack.c.bf16 %v4606_v57, %v4602_v9  ;;  %v10875_v9 = vpack.c.bf16 %v4116_v15, %v4112_v55 }
 0x35f   : > { %v10991_v35 = vpack.c.bf16 %v4094_v45, %v4090_v21  ;;  %v4120_v21 = vld [vmem:[#allocation10 + $0x108] sm:$0xff] }
 0x360   : > { %10718 = vmatpush1.bf16.msra.mxu0 %v10717_v28  ;;  %10846 = vmatpush1.bf16.msra.mxu1 %v10845_v56  ;;  %v4087_v28 = vld [vmem:[#allocation10] sm:$0xff]  ;;  %v4124_v45 = vld [vmem:[#allocation10 + $0x128] sm:$0xff] }
 0x361   : > { %10720 = vmatprep.subr.bf16.mxu0 %v10719_v7  ;;  %10848 = vmatprep.subr.bf16.mxu1 %v10847_v59  ;;  %v4091_v56 = vld [vmem:[#allocation10 + $0x20] sm:$0xff]  ;;  %v4627_v7 = vrot.slane %v14469_v27, 1  ;;  %v4093_v59 = vld [vmem:[#allocation10 + $0x30] sm:$0xff]  ;;  %v10995_v27 = vpack.c.bf16 %v4102_v1, %v4098_v41 }
 0x362   : > { %v4127_v41 = vld [vmem:[#allocation10 + $0x140] sm:$0xff] }
 0x363   : > { %v4131_v1 = vld [vmem:[#allocation10 + $0x160] sm:$0xff] }
 0x364   : > { %10722 = vmatpush1.bf16.msra.mxu0 %v10721_v23  ;;  %10850 = vmatpush1.bf16.msra.mxu1 %v10849_v17  ;;  %v10865_v23 = vpack.c.bf16 %v4091_v56, %v4087_v28  ;;  %v10993_v17 = vpack.c.bf16 %v4093_v59, %v4089_v29  ;;  %v10879_v28 = vpack.c.bf16 %v4124_v45, %v4120_v21  ;;  %v4121_v29 = vld [vmem:[#allocation10 + $0x110] sm:$0xff]  ;;  %v4132_v59 = vld [vmem:[#allocation10 + $0x168] sm:$0xff] }
 0x365   : > { %10724 = vmatprep.subr.bf16.mxu0 %v10723_v2  ;;  %10852 = vmatprep.subr.bf16.mxu1 %v10851_v48  ;;  %v4628_v2 = vsel %vm738_vm3, %v4626_v43, %v4627_v7  ;;  %v4636_v48 = vrot.slane %v4349_v4, 1  ;;  %v4125_v43 = vld [vmem:[#allocation10 + $0x130] sm:$0xff]  ;;  %v10885_v58 = vpack.c.bf16 %v4131_v1, %v4127_v41  ;;  %v4174_v41 = vld [vmem:[#allocation10 + $0x2b8] sm:$0xff] }
 0x366   : > { %v11009_v4 = vpack.c.bf16 %v4125_v43, %v4121_v29  ;;  %v4153_v45 = vld [vmem:[#allocation10 + $0x210] sm:$0xff]  ;;  %v4163_v29 = vld [vmem:[#allocation10 + $0x260] sm:$0xff] }
 0x367   : > { %v4637_v53 = vsel %vm738_vm3, %v4627_v7, %v4636_v48  ;;  %v4128_v7 = vld [vmem:[#allocation10 + $0x148] sm:$0xff] }
 0x368   : > { %10726 = vmatpush1.bf16.msra.mxu0 %v10725_v37  ;;  %10854 = vmatpush1.bf16.msra.mxu1 %v10853_v39  ;;  %v4106_v37 = vld [vmem:[#allocation10 + $0x98] sm:$0xff]  ;;  %v4140_v48 = vld [vmem:[#allocation10 + $0x1a8] sm:$0xff] }
 0x369   : > { %10728 = vmatprep.subr.bf16.mxu0 %v10727_v0  ;;  %10856 = vmatprep.subr.bf16.mxu1 %v10855_v31  ;;  %v4110_v39 = vld [vmem:[#allocation10 + $0xb8] sm:$0xff]  ;;  %v4103_v0 = vld [vmem:[#allocation10 + $0x80] sm:$0xff] }
 0x36a   : > { %v4107_v31 = vld [vmem:[#allocation10 + $0xa0] sm:$0xff]  ;;  %v10999_v33 = vpack.c.bf16 %v4110_v39, %v4106_v37  ;;  %v4137_v39 = vld [vmem:[#allocation10 + $0x190] sm:$0xff] }
 0x36b   : > { %v10873_v20 = vpack.c.bf16 %v4107_v31, %v4103_v0  ;;  %v4148_v0 = vld [vmem:[#allocation10 + $0x1e8] sm:$0xff]  ;;  %v4146_v31 = vld [vmem:[#allocation10 + $0x1d8] sm:$0xff] }
 0x36c   : > { %10730 = vmatpush1.bf16.msra.mxu0 %v10729_v44  ;;  %10858 = vmatpush1.bf16.msra.mxu1 %v10857_v52  ;;  %v4114_v44 = vld [vmem:[#allocation10 + $0xd8] sm:$0xff]  ;;  %v11019_v15 = vpack.c.bf16 %v4150_v40, %v4146_v31  ;;  %v4181_v31 = vld [vmem:[#allocation10 + $0x2f0] sm:$0xff]  ;;  %v4184_v40 = vld [vmem:[#allocation10 + $0x308] sm:$0xff] }
 0x36d   : > { %10732 = vmatprep.subr.bf16.mxu0 %v10731_v16  ;;  %10860 = vmatprep.subr.bf16.mxu1 %v10859_v3  ;;  %v4118_v52 = vld [vmem:[#allocation10 + $0xf8] sm:$0xff]  ;;  %v4111_v16 = vld [vmem:[#allocation10 + $0xc0] sm:$0xff] }
 0x36e   : > { %v4115_v3 = vld [vmem:[#allocation10 + $0xe0] sm:$0xff]  ;;  %v11003_v57 = vpack.c.bf16 %v4118_v52, %v4114_v44  ;;  %v4149_v44 = vld [vmem:[#allocation10 + $0x1f0] sm:$0xff]  ;;  %v4152_v52 = vld [vmem:[#allocation10 + $0x208] sm:$0xff] }
 0x370   : > { %10734 = vmatpush1.bf16.msra.mxu0 %v10733_v47  ;;  %10862 = vmatpush1.bf16.msra.mxu1 %v10861_v60  ;;  %v4126_v47 = vld [vmem:[#allocation10 + $0x138] sm:$0xff]  ;;  %v10877_v60 = vpack.c.bf16 %v4115_v3, %v4111_v16 }
 0x371   : > { %10864 = vmatprep.subr.bf16.mxu0 %v10863_v61  ;;  %10992 = vmatprep.subr.bf16.mxu1 %v10991_v35  ;;  %v4119_v61 = vld [vmem:[#allocation10 + $0x100] sm:$0xff]  ;;  %v11007_v56 = vpack.c.bf16 %v4126_v47, %v4122_v51  ;;  %v4158_v16 = vld [vmem:[#allocation10 + $0x238] sm:$0xff]  ;;  %v4157_v51 = vld [vmem:[#allocation10 + $0x230] sm:$0xff] }
 0x372   : > { %v4123_v35 = vld [vmem:[#allocation10 + $0x120] sm:$0xff]  ;;  %v4160_v47 = vld [vmem:[#allocation10 + $0x248] sm:$0xff] }
 0x373   : > { %4790 = vmatmul.mubr.f32.vlgmr.msra.gmra.mrb[16].mxu0 %v4628_v2  ;;  %4944 = vmatmul.mubr.f32.vlgmr.msra.gmra.mrb[16].mxu1 %v4628_v2  ;;  %v10881_v6 = vpack.c.bf16 %v4123_v35, %v4119_v61  ;;  %v4136_v2 = vld [vmem:[#allocation10 + $0x188] sm:$0xff]  ;;  %v4166_v61 = vld [vmem:[#allocation10 + $0x278] sm:$0xff] }
 0x374   : > { %4795 = vmatprep.mubr.f32.mxu0 %v4639_v36  ;;  %4949 = vmatprep.mubr.f32.mxu1 %v4639_v36  ;;  %v4139_v36 = vld [vmem:[#allocation10 + $0x1a0] sm:$0xff]  ;;  %v10887_v30 = vpack.c.bf16 %v4140_v48, %v4136_v2  ;;  %v4169_v48 = vld [vmem:[#allocation10 + $0x290] sm:$0xff] }
 0x375   : > { %10866 = vmatpush1.bf16.msra.mxu0 %v10865_v23  ;;  %10994 = vmatpush1.bf16.msra.mxu1 %v10993_v17  ;;  %v10883_v23 = vpack.c.bf16 %v4132_v59, %v4128_v7  ;;  %v11011_v17 = vpack.c.bf16 %v4134_v19, %v4130_v14  ;;  %v4161_v59 = vld [vmem:[#allocation10 + $0x250] sm:$0xff]  ;;  %v4168_v19 = vld [vmem:[#allocation10 + $0x288] sm:$0xff] }
 0x376   : > { %10868 = vmatprep.subr.bf16.mxu0 %v10867_v11  ;;  %10996 = vmatprep.subr.bf16.mxu1 %v10995_v27  ;;  %v4138_v11 = vld [vmem:[#allocation10 + $0x198] sm:$0xff]  ;;  %v4165_v14 = vld [vmem:[#allocation10 + $0x270] sm:$0xff] }
 0x377   : > { %4796 = vmatmul.mubr.f32.gmra.mrb[18].mxu0 %v4637_v53  ;;  %4950 = vmatmul.mubr.f32.gmra.mrb[18].mxu1 %v4637_v53  ;;  %v4142_v27 = vld [vmem:[#allocation10 + $0x1b8] sm:$0xff]  ;;  %v10889_v53 = vpack.c.bf16 %v4139_v36, %v4135_v38 }
 0x378   : > { %5020 = vmatprep.mubr.f32.mxu0 %v4080_v42  ;;  %5174 = vmatprep.mubr.f32.mxu1 %v4080_v42  ;;  %v11015_v37 = vpack.c.bf16 %v4142_v27, %v4138_v11  ;;  %v4145_v42 = vld [vmem:[#allocation10 + $0x1d0] sm:$0xff]  ;;  %v4176_v27 = vld [vmem:[#allocation10 + $0x2c8] sm:$0xff]  ;;  %v4182_v38 = vld [vmem:[#allocation10 + $0x2f8] sm:$0xff] }
 0x379   : > { %10870 = vmatpush1.bf16.msra.mxu0 %v10869_v25  ;;  %10998 = vmatpush1.bf16.msra.mxu1 %v10997_v63  ;;  %v4141_v25 = vld [vmem:[#allocation10 + $0x1b0] sm:$0xff]  ;;  %v4144_v63 = vld [vmem:[#allocation10 + $0x1c8] sm:$0xff] }
 0x37a   : > { %10872 = vmatprep.subr.bf16.mxu0 %v10871_v62  ;;  %11000 = vmatprep.subr.bf16.mxu1 %v10999_v33  ;;  %v11017_v62 = vpack.c.bf16 %v4141_v25, %v4137_v39  ;;  %v4143_v33 = vld [vmem:[#allocation10 + $0x1c0] sm:$0xff]  ;;  %v10891_v55 = vpack.c.bf16 %v4148_v0, %v4144_v63  ;;  %v4173_v11 = vld [vmem:[#allocation10 + $0x2b0] sm:$0xff] }
 0x37b   : > { %v10893_v3 = vpack.c.bf16 %v4147_v54, %v4143_v33  ;;  %v4179_v39 = vld [vmem:[#allocation10 + $0x2e0] sm:$0xff]  ;;  %v4177_v0 = vld [vmem:[#allocation10 + $0x2d0] sm:$0xff]  ;;  %v4190_v33 = vld [vmem:[#allocation10 + $0x338] sm:$0xff] }
 0x37d   : > { %10874 = vmatpush1.bf16.msra.mxu0 %v10873_v20  ;;  %11002 = vmatpush1.bf16.msra.mxu1 %v11001_v18  ;;  %v4156_v20 = vld [vmem:[#allocation10 + $0x228] sm:$0xff]  ;;  %v4154_v18 = vld [vmem:[#allocation10 + $0x218] sm:$0xff] }
 0x37e   : > { %10876 = vmatprep.subr.bf16.mxu0 %v10875_v9  ;;  %11004 = vmatprep.subr.bf16.mxu1 %v11003_v57  ;;  %v11021_v9 = vpack.c.bf16 %v4149_v44, %v4145_v42  ;;  %v4151_v57 = vld [vmem:[#allocation10 + $0x200] sm:$0xff]  ;;  %v10895_v34 = vpack.c.bf16 %v4156_v20, %v4152_v52  ;;  %v11023_v21 = vpack.c.bf16 %v4158_v16, %v4154_v18  ;;  %v4185_v20 = vld [vmem:[#allocation10 + $0x310] sm:$0xff]  ;;  %v4192_v16 = vld [vmem:[#allocation10 + $0x348] sm:$0xff] }
 0x37f   : > { %v10897_v35 = vpack.c.bf16 %v4155_v13, %v4151_v57  ;;  %v4187_v42 = vld [vmem:[#allocation10 + $0x320] sm:$0xff]  ;;  %v4189_v18 = vld [vmem:[#allocation10 + $0x330] sm:$0xff]  ;;  %v4198_v57 = vld [vmem:[#allocation10 + $0x378] sm:$0xff] }
 0x381   : > { %10878 = vmatpush1.bf16.msra.mxu0 %v10877_v60  ;;  %11006 = vmatpush1.bf16.msra.mxu1 %v11005_v22  ;;  %v4164_v60 = vld [vmem:[#allocation10 + $0x268] sm:$0xff]  ;;  %v4162_v22 = vld [vmem:[#allocation10 + $0x258] sm:$0xff] }
 0x382   : > { %10880 = vmatprep.subr.bf16.mxu0 %v10879_v28  ;;  %11008 = vmatprep.subr.bf16.mxu1 %v11007_v56  ;;  %v11025_v28 = vpack.c.bf16 %v4157_v51, %v4153_v45  ;;  %v4159_v56 = vld [vmem:[#allocation10 + $0x240] sm:$0xff]  ;;  %v10899_v43 = vpack.c.bf16 %v4164_v60, %v4160_v47  ;;  %v11027_v7 = vpack.c.bf16 %v4166_v61, %v4162_v22  ;;  %v4193_v60 = vld [vmem:[#allocation10 + $0x350] sm:$0xff]  ;;  %v4200_v61 = vld [vmem:[#allocation10 + $0x388] sm:$0xff] }
 0x383   : > { %v10901_v1 = vpack.c.bf16 %v4163_v29, %v4159_v56  ;;  %v4195_v45 = vld [vmem:[#allocation10 + $0x360] sm:$0xff]  ;;  %v4197_v22 = vld [vmem:[#allocation10 + $0x370] sm:$0xff]  ;;  %v4206_v56 = vld [vmem:[#allocation10 + $0x3b8] sm:$0xff] }
 0x385   : > { %10882 = vmatpush1.bf16.msra.mxu0 %v10881_v6  ;;  %11010 = vmatpush1.bf16.msra.mxu1 %v11009_v4  ;;  %v4172_v6 = vld [vmem:[#allocation10 + $0x2a8] sm:$0xff]  ;;  %v4170_v4 = vld [vmem:[#allocation10 + $0x298] sm:$0xff] }
 0x386   : > { %10884 = vmatprep.subr.bf16.mxu0 %v10883_v23  ;;  %11012 = vmatprep.subr.bf16.mxu1 %v11011_v17  ;;  %v11029_v23 = vpack.c.bf16 %v4165_v14, %v4161_v59  ;;  %v4167_v17 = vld [vmem:[#allocation10 + $0x280] sm:$0xff]  ;;  %v10903_v26 = vpack.c.bf16 %v4172_v6, %v4168_v19  ;;  %v11031_v2 = vpack.c.bf16 %v4174_v41, %v4170_v4  ;;  %v4201_v6 = vld [vmem:[#allocation10 + $0x390] sm:$0xff]  ;;  %v4208_v41 = vld [vmem:[#allocation10 + $0x3c8] sm:$0xff] }
 0x387   : > { %v10905_v36 = vpack.c.bf16 %v4171_v49, %v4167_v17  ;;  %v4203_v59 = vld [vmem:[#allocation10 + $0x3a0] sm:$0xff]  ;;  %v4205_v4 = vld [vmem:[#allocation10 + $0x3b0] sm:$0xff]  ;;  %v4214_v17 = vld [vmem:[#allocation10 + $0x3f8] sm:$0xff] }
 0x389   : > { %10886 = vmatpush1.bf16.msra.mxu0 %v10885_v58  ;;  %11014 = vmatpush1.bf16.msra.mxu1 %v11013_v50  ;;  %v4180_v58 = vld [vmem:[#allocation10 + $0x2e8] sm:$0xff]  ;;  %v4178_v50 = vld [vmem:[#allocation10 + $0x2d8] sm:$0xff] }
 0x38a   : > { %10888 = vmatprep.subr.bf16.mxu0 %v10887_v30  ;;  %11016 = vmatprep.subr.bf16.mxu1 %v11015_v37  ;;  %v11033_v30 = vpack.c.bf16 %v4173_v11, %v4169_v48  ;;  %v4175_v37 = vld [vmem:[#allocation10 + $0x2c0] sm:$0xff]  ;;  %v10907_v25 = vpack.c.bf16 %v4180_v58, %v4176_v27  ;;  %v11035_v63 = vpack.c.bf16 %v4182_v38, %v4178_v50  ;;  %v4209_v58 = vld [vmem:[#allocation10 + $0x3d0] sm:$0xff]  ;;  %v4216_v38 = vld [vmem:[#allocation10 + $0x408] sm:$0xff] }
 0x38b   : > { %v10909_v54 = vpack.c.bf16 %v4179_v39, %v4175_v37  ;;  %v4211_v48 = vld [vmem:[#allocation10 + $0x3e0] sm:$0xff]  ;;  %v4213_v50 = vld [vmem:[#allocation10 + $0x3f0] sm:$0xff]  ;;  %v4222_v37 = vld [vmem:[#allocation10 + $0x438] sm:$0xff] }
 0x38d   : > { %10890 = vmatpush1.bf16.msra.mxu0 %v10889_v53  ;;  %11018 = vmatpush1.bf16.msra.mxu1 %v11017_v62  ;;  %v4188_v53 = vld [vmem:[#allocation10 + $0x328] sm:$0xff]  ;;  %v4186_v62 = vld [vmem:[#allocation10 + $0x318] sm:$0xff] }
 0x38e   : > { %10892 = vmatprep.subr.bf16.mxu0 %v10891_v55  ;;  %11020 = vmatprep.subr.bf16.mxu1 %v11019_v15  ;;  %v11037_v55 = vpack.c.bf16 %v4181_v31, %v4177_v0  ;;  %v4183_v15 = vld [vmem:[#allocation10 + $0x300] sm:$0xff]  ;;  %v10911_v44 = vpack.c.bf16 %v4188_v53, %v4184_v40  ;;  %v11039_v52 = vpack.c.bf16 %v4190_v33, %v4186_v62  ;;  %v4217_v53 = vld [vmem:[#allocation10 + $0x410] sm:$0xff]  ;;  %v4224_v33 = vld [vmem:[#allocation10 + $0x448] sm:$0xff] }
 0x38f   : > { %v10913_v13 = vpack.c.bf16 %v4187_v42, %v4183_v15  ;;  %v4215_v31 = vld [vmem:[#allocation10 + $0x400] sm:$0xff]  ;;  %v4221_v62 = vld [vmem:[#allocation10 + $0x430] sm:$0xff]  ;;  %v4230_v15 = vld [vmem:[#allocation10 + $0x478] sm:$0xff] }
 0x390   : > { %v4219_v40 = vld [vmem:[#allocation10 + $0x420] sm:$0xff] }
 0x391   : > { %10894 = vmatpush1.bf16.msra.mxu0 %v10893_v3  ;;  %11022 = vmatpush1.bf16.msra.mxu1 %v11021_v9  ;;  %v4196_v3 = vld [vmem:[#allocation10 + $0x368] sm:$0xff]  ;;  %v4194_v9 = vld [vmem:[#allocation10 + $0x358] sm:$0xff]  ;;  %v10929_v42 = vpack.c.bf16 %v4219_v40, %v4215_v31 }
 0x392   : > { %10896 = vmatprep.subr.bf16.mxu0 %v10895_v34  ;;  %11024 = vmatprep.subr.bf16.mxu1 %v11023_v21  ;;  %v11041_v34 = vpack.c.bf16 %v4189_v18, %v4185_v20  ;;  %v4191_v21 = vld [vmem:[#allocation10 + $0x340] sm:$0xff]  ;;  %v10915_v51 = vpack.c.bf16 %v4196_v3, %v4192_v16  ;;  %v11043_v47 = vpack.c.bf16 %v4198_v57, %v4194_v9  ;;  %v4225_v9 = vld [vmem:[#allocation10 + $0x450] sm:$0xff]  ;;  %v4260_v31 = vld [vmem:[#allocation10 + $0x568] sm:$0xff] }
 0x393   : > { %v10917_v29 = vpack.c.bf16 %v4195_v45, %v4191_v21  ;;  %v4223_v20 = vld [vmem:[#allocation10 + $0x440] sm:$0xff]  ;;  %v4229_v57 = vld [vmem:[#allocation10 + $0x470] sm:$0xff]  ;;  %v4234_v21 = vld [vmem:[#allocation10 + $0x498] sm:$0xff] }
 0x394   : > { %v4227_v18 = vld [vmem:[#allocation10 + $0x460] sm:$0xff]  ;;  %v4238_v45 = vld [vmem:[#allocation10 + $0x4b8] sm:$0xff] }
 0x395   : > { %10898 = vmatpush1.bf16.msra.mxu0 %v10897_v35  ;;  %11026 = vmatpush1.bf16.msra.mxu1 %v11025_v28  ;;  %v4204_v35 = vld [vmem:[#allocation10 + $0x3a8] sm:$0xff]  ;;  %v4202_v28 = vld [vmem:[#allocation10 + $0x398] sm:$0xff] }
 0x396   : > { %10900 = vmatprep.subr.bf16.mxu0 %v10899_v43  ;;  %11028 = vmatprep.subr.bf16.mxu1 %v11027_v7  ;;  %v11045_v43 = vpack.c.bf16 %v4197_v22, %v4193_v60  ;;  %v4199_v7 = vld [vmem:[#allocation10 + $0x380] sm:$0xff]  ;;  %v10919_v14 = vpack.c.bf16 %v4204_v35, %v4200_v61  ;;  %v11047_v19 = vpack.c.bf16 %v4206_v56, %v4202_v28  ;;  %v4233_v35 = vld [vmem:[#allocation10 + $0x490] sm:$0xff]  ;;  %v4258_v40 = vld [vmem:[#allocation10 + $0x558] sm:$0xff] }
 0x397   : > { %v10921_v49 = vpack.c.bf16 %v4203_v59, %v4199_v7  ;;  %v11061_v60 = vpack.c.bf16 %v4229_v57, %v4225_v9  ;;  %v4231_v22 = vld [vmem:[#allocation10 + $0x480] sm:$0xff]  ;;  %v11063_v56 = vpack.c.bf16 %v4238_v45, %v4234_v21  ;;  %v4244_v7 = vld [vmem:[#allocation10 + $0x4e8] sm:$0xff]  ;;  %v14502_v59 = vld [vmem:[#allocation2 + $0x20] sm:$0xff] }
 0x398   : > { %v4235_v61 = vld [vmem:[#allocation10 + $0x4a0] sm:$0xff]  ;;  %v4265_v45 = vld [vmem:[#allocation10 + $0x590] sm:$0xff] }
 0x399   : > { %10902 = vmatpush1.bf16.msra.mxu0 %v10901_v1  ;;  %11030 = vmatpush1.bf16.msra.mxu1 %v11029_v23  ;;  %v4212_v1 = vld [vmem:[#allocation10 + $0x3e8] sm:$0xff]  ;;  %v4210_v23 = vld [vmem:[#allocation10 + $0x3d8] sm:$0xff]  ;;  %v4267_v21 = vld [vmem:[#allocation10 + $0x5a0] sm:$0xff] }
 0x39a   : > { %10904 = vmatprep.subr.bf16.mxu0 %v10903_v26  ;;  %11032 = vmatprep.subr.bf16.mxu1 %v11031_v2  ;;  %v11049_v26 = vpack.c.bf16 %v4205_v4, %v4201_v6  ;;  %v4207_v2 = vld [vmem:[#allocation10 + $0x3c0] sm:$0xff]  ;;  %v10923_v11 = vpack.c.bf16 %v4212_v1, %v4208_v41  ;;  %v11051_v27 = vpack.c.bf16 %v4214_v17, %v4210_v23  ;;  %v4246_v6 = vld [vmem:[#allocation10 + $0x4f8] sm:$0xff] }
 0x39b   : > { %v10925_v39 = vpack.c.bf16 %v4211_v48, %v4207_v2  ;;  %v10937_v4 = vpack.c.bf16 %v4235_v61, %v4231_v22  ;;  %v4239_v23 = vld [vmem:[#allocation10 + $0x4c0] sm:$0xff]  ;;  %v4245_v2 = vld [vmem:[#allocation10 + $0x4f0] sm:$0xff]  ;;  %v4248_v48 = vld [vmem:[#allocation10 + $0x508] sm:$0xff] }
 0x39c   : > { %v4243_v17 = vld [vmem:[#allocation10 + $0x4e0] sm:$0xff]  ;;  %v4272_v22 = vld [vmem:[#allocation10 + $0x5c8] sm:$0xff] }
 0x39d   : > { %10906 = vmatpush1.bf16.msra.mxu0 %v10905_v36  ;;  %11034 = vmatpush1.bf16.msra.mxu1 %v11033_v30  ;;  %v4220_v36 = vld [vmem:[#allocation10 + $0x428] sm:$0xff]  ;;  %v4218_v30 = vld [vmem:[#allocation10 + $0x418] sm:$0xff] }
 0x39e   : > { %10908 = vmatprep.subr.bf16.mxu0 %v10907_v25  ;;  %11036 = vmatprep.subr.bf16.mxu1 %v11035_v63  ;;  %v11053_v25 = vpack.c.bf16 %v4213_v50, %v4209_v58  ;;  %v10927_v63 = vpack.c.bf16 %v4220_v36, %v4216_v38  ;;  %v11055_v0 = vpack.c.bf16 %v4222_v37, %v4218_v30  ;;  %v4254_v58 = vld [vmem:[#allocation10 + $0x538] sm:$0xff]  ;;  %v4247_v30 = vld [vmem:[#allocation10 + $0x500] sm:$0xff]  ;;  %v4276_v61 = vld [vmem:[#allocation10 + $0x5e8] sm:$0xff] }
 0x39f   : > { %v10941_v50 = vpack.c.bf16 %v4243_v17, %v4239_v23  ;;  %v4251_v37 = vld [vmem:[#allocation10 + $0x520] sm:$0xff]  ;;  %v4282_v23 = vld [vmem:[#allocation10 + $0x618] sm:$0xff] }
 0x3a0   : > { %v4286_v17 = vld [vmem:[#allocation10 + $0x638] sm:$0xff] }
 0x3a1   : > { %10910 = vmatpush1.bf16.msra.mxu0 %v10909_v54  ;;  %11038 = vmatpush1.bf16.msra.mxu1 %v11037_v55  ;;  %v4228_v54 = vld [vmem:[#allocation10 + $0x468] sm:$0xff]  ;;  %v4226_v55 = vld [vmem:[#allocation10 + $0x458] sm:$0xff] }
 0x3a2   : > { %10912 = vmatprep.subr.bf16.mxu0 %v10911_v44  ;;  %11040 = vmatprep.subr.bf16.mxu1 %v11039_v52  ;;  %v4079_v44 = vld [vmem:[#allocation2] sm:$0xff]  ;;  %v11057_v52 = vpack.c.bf16 %v4221_v62, %v4217_v53  ;;  %v10931_v16 = vpack.c.bf16 %v4228_v54, %v4224_v33  ;;  %v11059_v3 = vpack.c.bf16 %v4230_v15, %v4226_v55  ;;  %v4262_v53 = vld [vmem:[#allocation10 + $0x578] sm:$0xff]  ;;  %v4255_v55 = vld [vmem:[#allocation10 + $0x540] sm:$0xff] }
 0x3a3   : > { %v10945_v62 = vpack.c.bf16 %v4251_v37, %v4247_v30  ;;  %v4259_v15 = vld [vmem:[#allocation10 + $0x560] sm:$0xff]  ;;  %v4290_v30 = vld [vmem:[#allocation10 + $0x658] sm:$0xff] }
 0x3a4   : > { %v10949_v9 = vpack.c.bf16 %v4259_v15, %v4255_v55  ;;  %v4294_v37 = vld [vmem:[#allocation10 + $0x678] sm:$0xff] }
 0x3a5   : > { %10914 = vmatpush1.bf16.msra.mxu0 %v10913_v13  ;;  %11042 = vmatpush1.bf16.msra.mxu1 %v11041_v34  ;;  %v4232_v13 = vld [vmem:[#allocation10 + $0x488] sm:$0xff]  ;;  %v4298_v55 = vld [vmem:[#allocation10 + $0x698] sm:$0xff] }
 0x3a6   : > { %10916 = vmatprep.subr.bf16.mxu0 %v10915_v51  ;;  %11044 = vmatprep.subr.bf16.mxu1 %v11043_v47  ;;  %v4236_v34 = vld [vmem:[#allocation10 + $0x4a8] sm:$0xff]  ;;  %v14498_v51 = vld [vmem:[#allocation2 + $0x28] sm:$0xff]  ;;  %v10933_v47 = vpack.c.bf16 %v4227_v18, %v4223_v20 }
 0x3a7   : > { %v10935_v28 = vpack.c.bf16 %v4236_v34, %v4232_v13  ;;  %v4264_v20 = vld [vmem:[#allocation10 + $0x588] sm:$0xff]  ;;  %v4263_v34 = vld [vmem:[#allocation10 + $0x580] sm:$0xff]  ;;  %v4302_v15 = vld [vmem:[#allocation10 + $0x6b8] sm:$0xff] }
 0x3a8   : > { %v4268_v18 = vld [vmem:[#allocation10 + $0x5a8] sm:$0xff] }
 0x3a9   : > { %10918 = vmatpush1.bf16.msra.mxu0 %v10917_v29  ;;  %11046 = vmatpush1.bf16.msra.mxu1 %v11045_v43  ;;  %v4237_v29 = vld [vmem:[#allocation10 + $0x4b0] sm:$0xff]  ;;  %v4240_v43 = vld [vmem:[#allocation10 + $0x4c8] sm:$0xff]  ;;  %v10951_v13 = vpack.c.bf16 %v4268_v18, %v4264_v20  ;;  %v4295_v20 = vld [vmem:[#allocation10 + $0x680] sm:$0xff] }
 0x3aa   : > { %10920 = vmatprep.subr.bf16.mxu0 %v10919_v14  ;;  %11048 = vmatprep.subr.bf16.mxu1 %v11047_v19  ;;  %v4082_v14 = vld [vmem:[#allocation2 + $0x18] sm:$0xff]  ;;  %v4242_v19 = vld [vmem:[#allocation10 + $0x4d8] sm:$0xff]  ;;  %v11065_v41 = vpack.c.bf16 %v4237_v29, %v4233_v35  ;;  %v10939_v1 = vpack.c.bf16 %v4244_v7, %v4240_v43  ;;  %v10955_v43 = vpack.c.bf16 %v4276_v61, %v4272_v22  ;;  %v4271_v7 = vld [vmem:[#allocation10 + $0x5c0] sm:$0xff] }
 0x3ab   : > { %v4274_v35 = vld [vmem:[#allocation10 + $0x5d8] sm:$0xff]  ;;  %v4299_v18 = vld [vmem:[#allocation10 + $0x6a0] sm:$0xff] }
 0x3ac   : > { %v4303_v22 = vld [vmem:[#allocation10 + $0x6c0] sm:$0xff] }
 0x3ad   : > { %10922 = vmatpush1.bf16.msra.mxu0 %v10921_v49  ;;  %11050 = vmatpush1.bf16.msra.mxu1 %v11049_v26  ;;  %v4241_v49 = vld [vmem:[#allocation10 + $0x4d0] sm:$0xff]  ;;  %v11067_v26 = vpack.c.bf16 %v4246_v6, %v4242_v19  ;;  %v4307_v61 = vld [vmem:[#allocation10 + $0x6e0] sm:$0xff] }
 0x3ae   : > { %10924 = vmatprep.subr.bf16.mxu0 %v10923_v11  ;;  %11052 = vmatprep.subr.bf16.mxu1 %v11051_v27  ;;  %v4252_v11 = vld [vmem:[#allocation10 + $0x528] sm:$0xff]  ;;  %v4250_v27 = vld [vmem:[#allocation10 + $0x518] sm:$0xff]  ;;  %v11069_v38 = vpack.c.bf16 %v4245_v2, %v4241_v49  ;;  %v4273_v19 = vld [vmem:[#allocation10 + $0x5d0] sm:$0xff] }
 0x3af   : > { %v10943_v36 = vpack.c.bf16 %v4252_v11, %v4248_v48  ;;  %v4279_v48 = vld [vmem:[#allocation10 + $0x600] sm:$0xff] }
 0x3b0   : > { %v4283_v11 = vld [vmem:[#allocation10 + $0x620] sm:$0xff] }
 0x3b1   : > { %10926 = vmatpush1.bf16.msra.mxu0 %v10925_v39  ;;  %11054 = vmatpush1.bf16.msra.mxu1 %v11053_v25  ;;  %v4249_v39 = vld [vmem:[#allocation10 + $0x510] sm:$0xff]  ;;  %v11071_v25 = vpack.c.bf16 %v4254_v58, %v4250_v27  ;;  %v11087_v58 = vpack.c.bf16 %v4286_v17, %v4282_v23 }
 0x3b2   : > { %10928 = vmatprep.subr.bf16.mxu0 %v10927_v63  ;;  %11056 = vmatprep.subr.bf16.mxu1 %v11055_v0  ;;  %v4253_v63 = vld [vmem:[#allocation10 + $0x530] sm:$0xff]  ;;  %v4256_v0 = vld [vmem:[#allocation10 + $0x548] sm:$0xff] }
 0x3b3   : > { %v11073_v33 = vpack.c.bf16 %v4253_v63, %v4249_v39  ;;  %v10947_v54 = vpack.c.bf16 %v4260_v31, %v4256_v0  ;;  %v4281_v27 = vld [vmem:[#allocation10 + $0x610] sm:$0xff]  ;;  %v10961_v39 = vpack.c.bf16 %v4283_v11, %v4279_v48  ;;  %v4287_v0 = vld [vmem:[#allocation10 + $0x640] sm:$0xff]  ;;  %v4322_v48 = vld [vmem:[#allocation10 + $0x758] sm:$0xff] }
 0x3b4   : > { %5021 = vmatmul.mubr.f32.vlgmr.msra.gmra.mrb[16].mxu0 %v4079_v44  ;;  %5175 = vmatmul.mubr.f32.vlgmr.msra.gmra.mrb[16].mxu1 %v4079_v44  ;;  %v11075_v44 = vpack.c.bf16 %v4262_v53, %v4258_v40  ;;  %v4291_v31 = vld [vmem:[#allocation10 + $0x660] sm:$0xff]  ;;  %v4289_v40 = vld [vmem:[#allocation10 + $0x650] sm:$0xff]  ;;  %v11091_v53 = vpack.c.bf16 %v4294_v37, %v4290_v30  ;;  %v4326_v11 = vld [vmem:[#allocation10 + $0x778] sm:$0xff] }
 0x3b5   : > { %5026 = vmatprep.mubr.f32.mxu0 %v14498_v51  ;;  %10930 = vmatpush1.bf16.msra.mxu0 %v10929_v42  ;;  %v4257_v42 = vld [vmem:[#allocation10 + $0x550] sm:$0xff]  ;;  %v11107_v37 = vpack.c.bf16 %v4326_v11, %v4322_v48  ;;  %v5281_v48 = vld [vmem:[#allocation10 + $0x1040] sm:$0xff] }
 0x3b6   : > { %5180 = vmatprep.mubr.f32.mxu1 %v14498_v51  ;;  %11058 = vmatpush1.bf16.msra.mxu1 %v11057_v52  ;;  %v4261_v52 = vld [vmem:[#allocation10 + $0x570] sm:$0xff]  ;;  %v5285_v11 = vld [vmem:[#allocation10 + $0x1060] sm:$0xff] }
 0x3b7   : > { %10932 = vmatprep.subr.bf16.mxu0 %v10931_v16  ;;  %11060 = vmatprep.subr.bf16.mxu1 %v11059_v3  ;;  %v4266_v16 = vld [vmem:[#allocation10 + $0x598] sm:$0xff]  ;;  %v11077_v57 = vpack.c.bf16 %v4261_v52, %v4257_v42  ;;  %v10965_v42 = vpack.c.bf16 %v4291_v31, %v4287_v0  ;;  %v4313_v23 = vld [vmem:[#allocation10 + $0x710] sm:$0xff] }
 0x3b8   : > { %5027 = vmatmul.mubr.f32.gmra.mrb[18].mxu0 %v14502_v59  ;;  %5181 = vmatmul.mubr.f32.gmra.mrb[18].mxu1 %v14502_v59  ;;  %v4270_v3 = vld [vmem:[#allocation10 + $0x5b8] sm:$0xff]  ;;  %v4321_v30 = vld [vmem:[#allocation10 + $0x750] sm:$0xff] }
 0x3b9   : > { %10934 = vmatpush1.bf16.msra.mxu0 %v10933_v47  ;;  %5097 = vmatprep.mubr.f32.mxu0 %v4082_v14  ;;  %v11079_v47 = vpack.c.bf16 %v4270_v3, %v4266_v16  ;;  %v4297_v16 = vld [vmem:[#allocation10 + $0x690] sm:$0xff]  ;;  %v11095_v3 = vpack.c.bf16 %v4302_v15, %v4298_v55  ;;  %v4330_v0 = vld [vmem:[#allocation10 + $0x798] sm:$0xff] }
 0x3ba   : > { %11062 = vmatpush1.bf16.msra.mxu1 %v11061_v60  ;;  %5251 = vmatprep.mubr.f32.mxu1 %v4082_v14  ;;  %v4269_v60 = vld [vmem:[#allocation10 + $0x5b0] sm:$0xff]  ;;  %v4275_v14 = vld [vmem:[#allocation10 + $0x5e0] sm:$0xff]  ;;  %v4334_v31 = vld [vmem:[#allocation10 + $0x7b8] sm:$0xff] }
 0x3bb   : > { %10936 = vmatprep.subr.bf16.mxu0 %v10935_v28  ;;  %11064 = vmatprep.subr.bf16.mxu1 %v11063_v56  ;;  %v4278_v28 = vld [vmem:[#allocation10 + $0x5f8] sm:$0xff]  ;;  %v10953_v56 = vpack.c.bf16 %v4267_v21, %v4263_v34  ;;  %v11081_v29 = vpack.c.bf16 %v4269_v60, %v4265_v45  ;;  %v10957_v49 = vpack.c.bf16 %v4275_v14, %v4271_v7  ;;  %v4329_v55 = vld [vmem:[#allocation10 + $0x790] sm:$0xff] }
 0x3bc   : > { %v11083_v6 = vpack.c.bf16 %v4278_v28, %v4274_v35  ;;  %v4306_v34 = vld [vmem:[#allocation10 + $0x6d8] sm:$0xff]  ;;  %v10969_v45 = vpack.c.bf16 %v4299_v18, %v4295_v20  ;;  %v4305_v35 = vld [vmem:[#allocation10 + $0x6d0] sm:$0xff]  ;;  %v11111_v15 = vpack.c.bf16 %v4334_v31, %v4330_v0  ;;  %v11125_v0 = vpack.c.bf16 %v5285_v11, %v5281_v48 }
 0x3bd   : > { %10938 = vmatpush1.bf16.msra.mxu0 %v10937_v4  ;;  %v4277_v4 = vld [vmem:[#allocation10 + $0x5f0] sm:$0xff]  ;;  %v4310_v21 = vld [vmem:[#allocation10 + $0x6f8] sm:$0xff] }
 0x3be   : > { %11066 = vmatpush1.bf16.msra.mxu1 %v11065_v41  ;;  %10940 = vmatprep.subr.bf16.mxu0 %v10939_v1  ;;  %v4280_v41 = vld [vmem:[#allocation10 + $0x608] sm:$0xff]  ;;  %v11099_v28 = vpack.c.bf16 %v4310_v21, %v4306_v34  ;;  %v4314_v7 = vld [vmem:[#allocation10 + $0x718] sm:$0xff]  ;;  %v4337_v34 = vld [vmem:[#allocation10 + $0x7d0] sm:$0xff] }
 0x3bf   : > { %11068 = vmatprep.subr.bf16.mxu1 %v11067_v26  ;;  %v4284_v1 = vld [vmem:[#allocation10 + $0x628] sm:$0xff]  ;;  %v11085_v26 = vpack.c.bf16 %v4277_v4, %v4273_v19  ;;  %v4318_v14 = vld [vmem:[#allocation10 + $0x738] sm:$0xff]  ;;  %v10973_v19 = vpack.c.bf16 %v4307_v61, %v4303_v22  ;;  %v5315_v48 = vld [vmem:[#allocation10 + $0x1150] sm:$0xff] }
 0x3c0   : > { %v10959_v2 = vpack.c.bf16 %v4284_v1, %v4280_v41  ;;  %v4311_v41 = vld [vmem:[#allocation10 + $0x700] sm:$0xff]  ;;  %v11103_v17 = vpack.c.bf16 %v4318_v14, %v4314_v7  ;;  %v4338_v20 = vld [vmem:[#allocation10 + $0x7d8] sm:$0xff]  ;;  %v5275_v14 = vld [vmem:[#allocation10 + $0x1010] sm:$0xff] }
 0x3c1   : > { %10942 = vmatpush1.bf16.msra.mxu0 %v10941_v50  ;;  %v4285_v50 = vld [vmem:[#allocation10 + $0x630] sm:$0xff]  ;;  %v4315_v1 = vld [vmem:[#allocation10 + $0x720] sm:$0xff]  ;;  %v4342_v18 = vld [vmem:[#allocation10 + $0x7f8] sm:$0xff] }
 0x3c2   : > { %11070 = vmatpush1.bf16.msra.mxu1 %v11069_v38  ;;  %10944 = vmatprep.subr.bf16.mxu0 %v10943_v36  ;;  %v4288_v38 = vld [vmem:[#allocation10 + $0x648] sm:$0xff]  ;;  %v11115_v21 = vpack.c.bf16 %v4342_v18, %v4338_v20  ;;  %v5276_v22 = vld [vmem:[#allocation10 + $0x1018] sm:$0xff]  ;;  %v5277_v7 = vld [vmem:[#allocation10 + $0x1020] sm:$0xff] }
 0x3c3   : > { %11072 = vmatprep.subr.bf16.mxu1 %v11071_v25  ;;  %v4292_v36 = vld [vmem:[#allocation10 + $0x668] sm:$0xff]  ;;  %v11089_v25 = vpack.c.bf16 %v4285_v50, %v4281_v27  ;;  %v10977_v27 = vpack.c.bf16 %v4315_v1, %v4311_v41  ;;  %v5280_v61 = vld [vmem:[#allocation10 + $0x1038] sm:$0xff] }
 0x3c4   : > { %v10963_v63 = vpack.c.bf16 %v4292_v36, %v4288_v38  ;;  %v4319_v38 = vld [vmem:[#allocation10 + $0x740] sm:$0xff]  ;;  %v5284_v41 = vld [vmem:[#allocation10 + $0x1058] sm:$0xff] }
 0x3c5   : > { %10946 = vmatpush1.bf16.msra.mxu0 %v10945_v62  ;;  %v4293_v62 = vld [vmem:[#allocation10 + $0x670] sm:$0xff]  ;;  %v4323_v36 = vld [vmem:[#allocation10 + $0x760] sm:$0xff]  ;;  %v5288_v1 = vld [vmem:[#allocation10 + $0x1078] sm:$0xff] }
 0x3c6   : > { %11074 = vmatpush1.bf16.msra.mxu1 %v11073_v33  ;;  %10948 = vmatprep.subr.bf16.mxu0 %v10947_v54  ;;  %v4296_v33 = vld [vmem:[#allocation10 + $0x688] sm:$0xff]  ;;  %v5300_v20 = vld [vmem:[#allocation10 + $0x10d8] sm:$0xff] }
 0x3c7   : > { %11076 = vmatprep.subr.bf16.mxu1 %v11075_v44  ;;  %v4300_v54 = vld [vmem:[#allocation10 + $0x6a8] sm:$0xff]  ;;  %v11093_v44 = vpack.c.bf16 %v4293_v62, %v4289_v40  ;;  %v10981_v40 = vpack.c.bf16 %v4323_v36, %v4319_v38  ;;  %v5541_v38 = vrot.slane %v14498_v51, 2  ;;  %v5287_v36 = vld [vmem:[#allocation10 + $0x1070] sm:$0xff]  ;;  %v5304_v18 = vld [vmem:[#allocation10 + $0x10f8] sm:$0xff] }
 0x3c8   : > { %v10967_v52 = vpack.c.bf16 %v4300_v54, %v4296_v33  ;;  %v4327_v33 = vld [vmem:[#allocation10 + $0x780] sm:$0xff] }
 0x3c9   : > { %10950 = vmatpush1.bf16.msra.mxu0 %v10949_v9  ;;  %v4301_v9 = vld [vmem:[#allocation10 + $0x6b0] sm:$0xff]  ;;  %v4331_v54 = vld [vmem:[#allocation10 + $0x7a0] sm:$0xff] }
 0x3ca   : > { %11078 = vmatpush1.bf16.msra.mxu1 %v11077_v57  ;;  %10952 = vmatprep.subr.bf16.mxu0 %v10951_v13  ;;  %v4304_v57 = vld [vmem:[#allocation10 + $0x6c8] sm:$0xff] }
 0x3cb   : > { %11080 = vmatprep.subr.bf16.mxu1 %v11079_v47  ;;  %v4308_v13 = vld [vmem:[#allocation10 + $0x6e8] sm:$0xff]  ;;  %v11097_v47 = vpack.c.bf16 %v4301_v9, %v4297_v16  ;;  %v10985_v16 = vpack.c.bf16 %v4331_v54, %v4327_v33  ;;  %v5291_v33 = vld [vmem:[#allocation10 + $0x1090] sm:$0xff]  ;;  %v14511_v54 = vld [vmem:[#allocation2 + $0x30] sm:$0xff] }
 0x3cc   : > { %v10971_v60 = vpack.c.bf16 %v4308_v13, %v4304_v57  ;;  %v4335_v57 = vld [vmem:[#allocation10 + $0x7c0] sm:$0xff] }
 0x3cd   : > { %10954 = vmatpush1.bf16.msra.mxu0 %v10953_v56  ;;  %v4309_v56 = vld [vmem:[#allocation10 + $0x6f0] sm:$0xff]  ;;  %v4339_v13 = vld [vmem:[#allocation10 + $0x7e0] sm:$0xff] }
 0x3ce   : > { %11082 = vmatpush1.bf16.msra.mxu1 %v11081_v29  ;;  %10956 = vmatprep.subr.bf16.mxu0 %v10955_v43  ;;  %v4312_v29 = vld [vmem:[#allocation10 + $0x708] sm:$0xff] }
 0x3cf   : > { %11084 = vmatprep.subr.bf16.mxu1 %v11083_v6  ;;  %v4316_v43 = vld [vmem:[#allocation10 + $0x728] sm:$0xff]  ;;  %v11101_v6 = vpack.c.bf16 %v4309_v56, %v4305_v35  ;;  %v10989_v35 = vpack.c.bf16 %v4339_v13, %v4335_v57  ;;  %v5297_v57 = vld [vmem:[#allocation10 + $0x10c0] sm:$0xff] }
 0x3d0   : > { %v10975_v4 = vpack.c.bf16 %v4316_v43, %v4312_v29  ;;  %v11247_v29 = vpack.c.bf16 %v5280_v61, %v5276_v22  ;;  %v5273_v43 = vld [vmem:[#allocation10 + $0x1000] sm:$0xff]  ;;  %v5308_v22 = vld [vmem:[#allocation10 + $0x1118] sm:$0xff] }
 0x3d1   : > { %10958 = vmatpush1.bf16.msra.mxu0 %v10957_v49  ;;  %v4317_v49 = vld [vmem:[#allocation10 + $0x730] sm:$0xff]  ;;  %v5301_v13 = vld [vmem:[#allocation10 + $0x10e0] sm:$0xff]  ;;  %v5312_v61 = vld [vmem:[#allocation10 + $0x1138] sm:$0xff] }
 0x3d2   : > { %11086 = vmatpush1.bf16.msra.mxu1 %v11085_v26  ;;  %10960 = vmatprep.subr.bf16.mxu0 %v10959_v2  ;;  %v4320_v26 = vld [vmem:[#allocation10 + $0x748] sm:$0xff] }
 0x3d3   : > { %11088 = vmatprep.subr.bf16.mxu1 %v11087_v58  ;;  %v4324_v2 = vld [vmem:[#allocation10 + $0x768] sm:$0xff]  ;;  %v11105_v58 = vpack.c.bf16 %v4317_v49, %v4313_v23  ;;  %v5265_v23 = vld [vmem:[#allocation2 + $0x8] sm:$0xfc]  ;;  %v11121_v49 = vpack.c.bf16 %v5277_v7, %v5273_v43  ;;  %v5309_v43 = vld [vmem:[#allocation10 + $0x1120] sm:$0xff] }
 0x3d4   : > { %v10979_v50 = vpack.c.bf16 %v4324_v2, %v4320_v26  ;;  %v5307_v7 = vld [vmem:[#allocation10 + $0x1110] sm:$0xff] }
 0x3d5   : > { %10962 = vmatpush1.bf16.msra.mxu0 %v10961_v39  ;;  %v4325_v39 = vld [vmem:[#allocation10 + $0x770] sm:$0xff] }
 0x3d6   : > { %11090 = vmatpush1.bf16.msra.mxu1 %v11089_v25  ;;  %10964 = vmatprep.subr.bf16.mxu0 %v10963_v63  ;;  %v4328_v25 = vld [vmem:[#allocation10 + $0x788] sm:$0xff] }
 0x3d7   : > { %11092 = vmatprep.subr.bf16.mxu1 %v11091_v53  ;;  %v4332_v63 = vld [vmem:[#allocation10 + $0x7a8] sm:$0xff]  ;;  %v11109_v53 = vpack.c.bf16 %v4325_v39, %v4321_v30 }
 0x3d8   : > { %v10983_v62 = vpack.c.bf16 %v4332_v63, %v4328_v25  ;;  %v5290_v30 = vld [vmem:[#allocation10 + $0x1088] sm:$0xff]  ;;  %v5292_v25 = vld [vmem:[#allocation10 + $0x1098] sm:$0xff] }
 0x3d9   : > { %10966 = vmatpush1.bf16.msra.mxu0 %v10965_v42  ;;  %v4333_v42 = vld [vmem:[#allocation10 + $0x7b0] sm:$0xff]  ;;  %v14507_v39 = vld [vmem:[#allocation2 + $0x38] sm:$0xff]  ;;  %v5296_v63 = vld [vmem:[#allocation10 + $0x10b8] sm:$0xff] }
 0x3da   : > { %11094 = vmatpush1.bf16.msra.mxu1 %v11093_v44  ;;  %10968 = vmatprep.subr.bf16.mxu0 %v10967_v52  ;;  %v4336_v44 = vld [vmem:[#allocation10 + $0x7c8] sm:$0xff] }
 0x3db   : > { %11096 = vmatprep.subr.bf16.mxu1 %v11095_v3  ;;  %v4340_v52 = vld [vmem:[#allocation10 + $0x7e8] sm:$0xff]  ;;  %v11113_v3 = vpack.c.bf16 %v4333_v42, %v4329_v55  ;;  %v5295_v42 = vld [vmem:[#allocation10 + $0x10b0] sm:$0xff] }
 0x3dc   : > { %v10987_v9 = vpack.c.bf16 %v4340_v52, %v4336_v44  ;;  %v5298_v44 = vld [vmem:[#allocation10 + $0x10c8] sm:$0xff] }
 0x3dd   : > { %10970 = vmatpush1.bf16.msra.mxu0 %v10969_v45  ;;  %v4341_v45 = vld [vmem:[#allocation10 + $0x7f0] sm:$0xff]  ;;  %v5302_v52 = vld [vmem:[#allocation10 + $0x10e8] sm:$0xff] }
 0x3de   : > { %11098 = vmatpush1.bf16.msra.mxu1 %v11097_v47  ;;  %10972 = vmatprep.subr.bf16.mxu0 %v10971_v60  ;;  %v5274_v47 = vld [vmem:[#allocation10 + $0x1008] sm:$0xff] }
 0x3df   : > { %11100 = vmatprep.subr.bf16.mxu1 %v11099_v28  ;;  %v5278_v60 = vld [vmem:[#allocation10 + $0x1028] sm:$0xff]  ;;  %v11117_v28 = vpack.c.bf16 %v4341_v45, %v4337_v34  ;;  %v5299_v34 = vld [vmem:[#allocation10 + $0x10d0] sm:$0xff] }
 0x3e0   : > { %v11119_v56 = vpack.c.bf16 %v5278_v60, %v5274_v47  ;;  %v5303_v45 = vld [vmem:[#allocation10 + $0x10f0] sm:$0xff]  ;;  %v5306_v47 = vld [vmem:[#allocation10 + $0x1108] sm:$0xff] }
 0x3e1   : > { %10974 = vmatpush1.bf16.msra.mxu0 %v10973_v19  ;;  %v5279_v19 = vld [vmem:[#allocation10 + $0x1030] sm:$0xff]  ;;  %v5310_v60 = vld [vmem:[#allocation10 + $0x1128] sm:$0xff] }
 0x3e2   : > { %11102 = vmatpush1.bf16.msra.mxu1 %v11101_v6  ;;  %10976 = vmatprep.subr.bf16.mxu0 %v10975_v4  ;;  %v5282_v6 = vld [vmem:[#allocation10 + $0x1048] sm:$0xff]  ;;  %v11249_v26 = vpack.c.bf16 %v5279_v19, %v5275_v14  ;;  %v11263_v14 = vpack.c.bf16 %v5312_v61, %v5308_v22  ;;  %v5311_v19 = vld [vmem:[#allocation10 + $0x1130] sm:$0xff]  ;;  %v5337_v61 = vld [vmem:[#allocation10 + $0x1200] sm:$0xff] }
 0x3e3   : > { %11104 = vmatprep.subr.bf16.mxu1 %v11103_v17  ;;  %v5286_v4 = vld [vmem:[#allocation10 + $0x1068] sm:$0xff]  ;;  %v4081_v17 = vld [vmem:[#allocation2 + $0x10] sm:$0xff] }
 0x3e4   : > { %v11123_v2 = vpack.c.bf16 %v5286_v4, %v5282_v6  ;;  %v5314_v6 = vld [vmem:[#allocation10 + $0x1148] sm:$0xff] }
 0x3e5   : > { %10978 = vmatpush1.bf16.msra.mxu0 %v10977_v27  ;;  %v5283_v27 = vld [vmem:[#allocation10 + $0x1050] sm:$0xff]  ;;  %v5318_v4 = vld [vmem:[#allocation10 + $0x1168] sm:$0xff] }
 0x3e6   : > { %11106 = vmatpush1.bf16.msra.mxu1 %v11105_v58  ;;  %10980 = vmatprep.subr.bf16.mxu0 %v10979_v50  ;;  %v11251_v58 = vpack.c.bf16 %v5288_v1, %v5284_v41  ;;  %v5540_v50 = vrot.slane %v5265_v23, 2  ;;  %v11253_v31 = vpack.c.bf16 %v5287_v36, %v5283_v27  ;;  %v5316_v41 = vld [vmem:[#allocation10 + $0x1158] sm:$0xff]  ;;  %v5319_v27 = vld [vmem:[#allocation10 + $0x1170] sm:$0xff] }
 0x3e7   : > { %11108 = vmatprep.subr.bf16.mxu1 %v11107_v37  ;;  %v5294_v37 = vld [vmem:[#allocation10 + $0x10a8] sm:$0xff]  ;;  %v5320_v1 = vld [vmem:[#allocation10 + $0x1178] sm:$0xff] }
 0x3e8   : > { %v5542_v55 = vsel %vm1639_vm5, %v5540_v50, %v5541_v38  ;;  %v11267_v11 = vpack.c.bf16 %v5320_v1, %v5316_v41  ;;  %v5326_v50 = vld [vmem:[#allocation10 + $0x11a8] sm:$0xff]  ;;  %v5324_v36 = vld [vmem:[#allocation10 + $0x1198] sm:$0xff]  ;;  %v5345_v1 = vld [vmem:[#allocation10 + $0x1240] sm:$0xff] }
 0x3e9   : > { %10982 = vmatpush1.bf16.msra.mxu0 %v10981_v40  ;;  %v11127_v40 = vpack.c.bf16 %v5294_v37, %v5290_v30  ;;  %v5328_v30 = vld [vmem:[#allocation10 + $0x11b8] sm:$0xff] }
 0x3ea   : > { %11110 = vmatpush1.bf16.msra.mxu1 %v11109_v53  ;;  %10984 = vmatprep.subr.bf16.mxu0 %v10983_v62  ;;  %v5289_v53 = vld [vmem:[#allocation10 + $0x1080] sm:$0xff] }
 0x3eb   : > { %11112 = vmatprep.subr.bf16.mxu1 %v11111_v15  ;;  %v5293_v62 = vld [vmem:[#allocation10 + $0x10a0] sm:$0xff]  ;;  %v11255_v15 = vpack.c.bf16 %v5296_v63, %v5292_v25  ;;  %v11269_v25 = vpack.c.bf16 %v5319_v27, %v5315_v48  ;;  %v5358_v48 = vld [vmem:[#allocation10 + $0x12a8] sm:$0xff]  ;;  %v5360_v27 = vld [vmem:[#allocation10 + $0x12b8] sm:$0xff] }
 0x3ed   : > { %10986 = vmatpush1.bf16.msra.mxu0 %v10985_v16  ;;  %v11129_v16 = vpack.c.bf16 %v5293_v62, %v5289_v53  ;;  %v11271_v53 = vpack.c.bf16 %v5328_v30, %v5324_v36  ;;  %v5327_v62 = vld [vmem:[#allocation10 + $0x11b0] sm:$0xff]  ;;  %v5353_v30 = vld [vmem:[#allocation10 + $0x1280] sm:$0xff] }
 0x3ee   : > { %11114 = vmatpush1.bf16.msra.mxu1 %v11113_v3  ;;  %10988 = vmatprep.subr.bf16.mxu0 %v10987_v9  ;;  %v11257_v3 = vpack.c.bf16 %v5295_v42, %v5291_v33  ;;  %v11131_v9 = vpack.c.bf16 %v5302_v52, %v5298_v44  ;;  %v5330_v33 = vld [vmem:[#allocation10 + $0x11c8] sm:$0xff]  ;;  %v5336_v42 = vld [vmem:[#allocation10 + $0x11f8] sm:$0xff] }
 0x3ef   : > { %11116 = vmatprep.subr.bf16.mxu1 %v11115_v21  ;;  %v11259_v21 = vpack.c.bf16 %v5304_v18, %v5300_v20  ;;  %v5329_v18 = vld [vmem:[#allocation10 + $0x11c0] sm:$0xff] }
 0x3f1   : > { %10990 = vmatpush1.bf16.msra.mxu0 %v10989_v35  ;;  %v11133_v35 = vpack.c.bf16 %v5301_v13, %v5297_v57  ;;  %v5335_v57 = vld [vmem:[#allocation10 + $0x11f0] sm:$0xff]  ;;  %v5338_v13 = vld [vmem:[#allocation10 + $0x1208] sm:$0xff] }
 0x3f2   : > { %11118 = vmatpush1.bf16.msra.mxu1 %v11117_v28  ;;  %11120 = vmatprep.subr.bf16.mxu0 %v11119_v56  ;;  %v11261_v28 = vpack.c.bf16 %v5303_v45, %v5299_v34  ;;  %v11135_v56 = vpack.c.bf16 %v5310_v60, %v5306_v47  ;;  %v5342_v34 = vld [vmem:[#allocation10 + $0x1228] sm:$0xff]  ;;  %v5344_v45 = vld [vmem:[#allocation10 + $0x1238] sm:$0xff] }
 0x3f3   : > { %11248 = vmatprep.subr.bf16.mxu1 %v11247_v29  ;;  %v5305_v29 = vld [vmem:[#allocation10 + $0x1100] sm:$0xff]  ;;  %v11151_v22 = vpack.c.bf16 %v5342_v34, %v5338_v13 }
 0x3f4   : > { %5098 = vmatmul.mubr.f32.vlgmr.msra.gmra.mrb[16].mxu0 %v4081_v17  ;;  %v11137_v23 = vpack.c.bf16 %v5309_v43, %v5305_v29  ;;  %v5343_v29 = vld [vmem:[#allocation10 + $0x1230] sm:$0xff]  ;;  %v5346_v43 = vld [vmem:[#allocation10 + $0x1248] sm:$0xff] }
 0x3f5   : > { %5252 = vmatmul.mubr.f32.vlgmr.msra.gmra.mrb[16].mxu1 %v4081_v17  ;;  %5103 = vmatprep.mubr.f32.mxu0 %v14507_v39  ;;  %v11265_v17 = vpack.c.bf16 %v5311_v19, %v5307_v7  ;;  %v5350_v7 = vld [vmem:[#allocation10 + $0x1268] sm:$0xff]  ;;  %v5352_v19 = vld [vmem:[#allocation10 + $0x1278] sm:$0xff] }
 0x3f6   : > { %5257 = vmatprep.mubr.f32.mxu1 %v14507_v39  ;;  %11122 = vmatpush1.bf16.msra.mxu0 %v11121_v49  ;;  %v11139_v49 = vpack.c.bf16 %v5318_v4, %v5314_v6  ;;  %v11155_v41 = vpack.c.bf16 %v5350_v7, %v5346_v43 }
 0x3f7   : > { %11250 = vmatpush1.bf16.msra.mxu1 %v11249_v26  ;;  %11124 = vmatprep.subr.bf16.mxu0 %v11123_v2  ;;  %v5313_v26 = vld [vmem:[#allocation10 + $0x1140] sm:$0xff] }
 0x3f8   : > { %5104 = vmatmul.mubr.f32.gmra.mrb[18].mxu0 %v14511_v54  ;;  %11252 = vmatprep.subr.bf16.mxu1 %v11251_v58  ;;  %v5317_v2 = vld [vmem:[#allocation10 + $0x1160] sm:$0xff]  ;;  %v5322_v58 = vld [vmem:[#allocation10 + $0x1188] sm:$0xff] }
 0x3f9   : > { %5258 = vmatmul.mubr.f32.gmra.mrb[18].mxu1 %v14511_v54  ;;  %5629 = vmatprep.mubr.f32.mxu0 %v5542_v55  ;;  %v11141_v37 = vpack.c.bf16 %v5317_v2, %v5313_v26  ;;  %v11143_v63 = vpack.c.bf16 %v5326_v50, %v5322_v58  ;;  %v5351_v26 = vld [vmem:[#allocation10 + $0x1270] sm:$0xff]  ;;  %v5354_v2 = vld [vmem:[#allocation10 + $0x1288] sm:$0xff] }
 0x3fa   : > { %11126 = vmatpush1.bf16.msra.mxu0 %v11125_v0  ;;  %5783 = vmatprep.mubr.f32.mxu1 %v5542_v55  ;;  %v5321_v0 = vld [vmem:[#allocation10 + $0x1180] sm:$0xff]  ;;  %v5334_v55 = vld [vmem:[#allocation10 + $0x11e8] sm:$0xff]  ;;  %v11159_v36 = vpack.c.bf16 %v5358_v48, %v5354_v2 }
 0x3fb   : > { %11254 = vmatpush1.bf16.msra.mxu1 %v11253_v31  ;;  %11128 = vmatprep.subr.bf16.mxu0 %v11127_v40  ;;  %v5325_v31 = vld [vmem:[#allocation10 + $0x11a0] sm:$0xff]  ;;  %v5323_v40 = vld [vmem:[#allocation10 + $0x1190] sm:$0xff]  ;;  %v11147_v20 = vpack.c.bf16 %v5334_v55, %v5330_v33 }
 0x3fc   : > { %11256 = vmatprep.subr.bf16.mxu1 %v11255_v15  ;;  %v5332_v15 = vld [vmem:[#allocation10 + $0x11d8] sm:$0xff]  ;;  %v11145_v44 = vpack.c.bf16 %v5325_v31, %v5321_v0  ;;  %v11273_v52 = vpack.c.bf16 %v5327_v62, %v5323_v40  ;;  %v5359_v0 = vld [vmem:[#allocation10 + $0x12b0] sm:$0xff]  ;;  %v5362_v31 = vld [vmem:[#allocation10 + $0x12c8] sm:$0xff] }
 0x3fd   : > { %v5366_v40 = vld [vmem:[#allocation10 + $0x12e8] sm:$0xff]  ;;  %v5368_v62 = vld [vmem:[#allocation10 + $0x12f8] sm:$0xff] }
 0x3fe   : > { %11130 = vmatpush1.bf16.msra.mxu0 %v11129_v16  ;;  %v5333_v16 = vld [vmem:[#allocation10 + $0x11e0] sm:$0xff] }
 0x3ff   : > { %11258 = vmatpush1.bf16.msra.mxu1 %v11257_v3  ;;  %11132 = vmatprep.subr.bf16.mxu0 %v11131_v9  ;;  %v5331_v3 = vld [vmem:[#allocation10 + $0x11d0] sm:$0xff]  ;;  %v11275_v9 = vpack.c.bf16 %v5336_v42, %v5332_v15  ;;  %v11149_v47 = vpack.c.bf16 %v5333_v16, %v5329_v18  ;;  %v11163_v15 = vpack.c.bf16 %v5366_v40, %v5362_v31  ;;  %v5361_v42 = vld [vmem:[#allocation10 + $0x12c0] sm:$0xff]  ;;  %v5370_v16 = vld [vmem:[#allocation10 + $0x1308] sm:$0xff] }
 0x400   : > { %11260 = vmatprep.subr.bf16.mxu1 %v11259_v21  ;;  %v5340_v21 = vld [vmem:[#allocation10 + $0x1218] sm:$0xff]  ;;  %v11277_v60 = vpack.c.bf16 %v5335_v57, %v5331_v3  ;;  %v5367_v18 = vld [vmem:[#allocation10 + $0x12f0] sm:$0xff]  ;;  %v5374_v3 = vld [vmem:[#allocation10 + $0x1328] sm:$0xff] }
 0x401   : > { %v5376_v57 = vld [vmem:[#allocation10 + $0x1338] sm:$0xff] }
 0x402   : > { %11134 = vmatpush1.bf16.msra.mxu0 %v11133_v35  ;;  %v5341_v35 = vld [vmem:[#allocation10 + $0x1220] sm:$0xff] }
 0x403   : > { %11262 = vmatpush1.bf16.msra.mxu1 %v11261_v28  ;;  %11136 = vmatprep.subr.bf16.mxu0 %v11135_v56  ;;  %v5339_v28 = vld [vmem:[#allocation10 + $0x1210] sm:$0xff]  ;;  %v11279_v56 = vpack.c.bf16 %v5344_v45, %v5340_v21  ;;  %v11153_v6 = vpack.c.bf16 %v5341_v35, %v5337_v61  ;;  %v11167_v21 = vpack.c.bf16 %v5374_v3, %v5370_v16  ;;  %v5369_v45 = vld [vmem:[#allocation10 + $0x1300] sm:$0xff]  ;;  %v5378_v35 = vld [vmem:[#allocation10 + $0x1348] sm:$0xff] }
 0x404   : > { %11264 = vmatprep.subr.bf16.mxu1 %v11263_v14  ;;  %v5348_v14 = vld [vmem:[#allocation10 + $0x1258] sm:$0xff]  ;;  %v11281_v4 = vpack.c.bf16 %v5343_v29, %v5339_v28  ;;  %v5375_v61 = vld [vmem:[#allocation10 + $0x1330] sm:$0xff]  ;;  %v5382_v28 = vld [vmem:[#allocation10 + $0x1368] sm:$0xff] }
 0x405   : > { %v5384_v29 = vld [vmem:[#allocation10 + $0x1378] sm:$0xff] }
 0x406   : > { %11138 = vmatpush1.bf16.msra.mxu0 %v11137_v23  ;;  %v5349_v23 = vld [vmem:[#allocation10 + $0x1260] sm:$0xff]  ;;  %v5408_v16 = vld [vmem:[#allocation10 + $0x1438] sm:$0xff] }
 0x407   : > { %11266 = vmatpush1.bf16.msra.mxu1 %v11265_v17  ;;  %11140 = vmatprep.subr.bf16.mxu0 %v11139_v49  ;;  %v5347_v17 = vld [vmem:[#allocation10 + $0x1250] sm:$0xff]  ;;  %v11283_v49 = vpack.c.bf16 %v5352_v19, %v5348_v14  ;;  %v11157_v58 = vpack.c.bf16 %v5349_v23, %v5345_v1  ;;  %v11171_v14 = vpack.c.bf16 %v5382_v28, %v5378_v35  ;;  %v5377_v19 = vld [vmem:[#allocation10 + $0x1340] sm:$0xff]  ;;  %v5386_v23 = vld [vmem:[#allocation10 + $0x1388] sm:$0xff] }
 0x408   : > { %11268 = vmatprep.subr.bf16.mxu1 %v11267_v11  ;;  %v5356_v11 = vld [vmem:[#allocation10 + $0x1298] sm:$0xff]  ;;  %v11285_v50 = vpack.c.bf16 %v5351_v26, %v5347_v17  ;;  %v5383_v1 = vld [vmem:[#allocation10 + $0x1370] sm:$0xff]  ;;  %v5390_v17 = vld [vmem:[#allocation10 + $0x13a8] sm:$0xff] }
 0x409   : > { %v5392_v26 = vld [vmem:[#allocation10 + $0x13b8] sm:$0xff]  ;;  %v5407_v28 = vld [vmem:[#allocation10 + $0x1430] sm:$0xff] }
 0x40a   : > { %11142 = vmatpush1.bf16.msra.mxu0 %v11141_v37  ;;  %v5357_v37 = vld [vmem:[#allocation10 + $0x12a0] sm:$0xff] }
 0x40b   : > { %11270 = vmatpush1.bf16.msra.mxu1 %v11269_v25  ;;  %11144 = vmatprep.subr.bf16.mxu0 %v11143_v63  ;;  %v5355_v25 = vld [vmem:[#allocation10 + $0x1290] sm:$0xff]  ;;  %v11287_v63 = vpack.c.bf16 %v5360_v27, %v5356_v11  ;;  %v11161_v33 = vpack.c.bf16 %v5357_v37, %v5353_v30  ;;  %v11175_v11 = vpack.c.bf16 %v5390_v17, %v5386_v23  ;;  %v5385_v27 = vld [vmem:[#allocation10 + $0x1380] sm:$0xff]  ;;  %v5394_v37 = vld [vmem:[#allocation10 + $0x13c8] sm:$0xff] }
 0x40c   : > { %11272 = vmatprep.subr.bf16.mxu1 %v11271_v53  ;;  %v5364_v53 = vld [vmem:[#allocation10 + $0x12d8] sm:$0xff]  ;;  %v11289_v55 = vpack.c.bf16 %v5359_v0, %v5355_v25  ;;  %v5391_v30 = vld [vmem:[#allocation10 + $0x13b0] sm:$0xff]  ;;  %v5398_v25 = vld [vmem:[#allocation10 + $0x13e8] sm:$0xff] }
 0x40d   : > { %v5400_v0 = vld [vmem:[#allocation10 + $0x13f8] sm:$0xff]  ;;  %v5413_v23 = vld [vmem:[#allocation10 + $0x1460] sm:$0xff]  ;;  %v5411_v17 = vld [vmem:[#allocation10 + $0x1450] sm:$0xff] }
 0x40e   : > { %11146 = vmatpush1.bf16.msra.mxu0 %v11145_v44  ;;  %v5365_v44 = vld [vmem:[#allocation10 + $0x12e0] sm:$0xff] }
 0x40f   : > { %11274 = vmatpush1.bf16.msra.mxu1 %v11273_v52  ;;  %11148 = vmatprep.subr.bf16.mxu0 %v11147_v20  ;;  %v5363_v52 = vld [vmem:[#allocation10 + $0x12d0] sm:$0xff]  ;;  %v11291_v20 = vpack.c.bf16 %v5368_v62, %v5364_v53  ;;  %v11165_v13 = vpack.c.bf16 %v5365_v44, %v5361_v42  ;;  %v11179_v53 = vpack.c.bf16 %v5398_v25, %v5394_v37  ;;  %v5393_v62 = vld [vmem:[#allocation10 + $0x13c0] sm:$0xff]  ;;  %v5402_v44 = vld [vmem:[#allocation10 + $0x1408] sm:$0xff] }
 0x410   : > { %11276 = vmatprep.subr.bf16.mxu1 %v11275_v9  ;;  %v5372_v9 = vld [vmem:[#allocation10 + $0x1318] sm:$0xff]  ;;  %v11293_v34 = vpack.c.bf16 %v5367_v18, %v5363_v52  ;;  %v5399_v42 = vld [vmem:[#allocation10 + $0x13f0] sm:$0xff]  ;;  %v5406_v52 = vld [vmem:[#allocation10 + $0x1428] sm:$0xff] }
 0x411   : > { %v5404_v18 = vld [vmem:[#allocation10 + $0x1418] sm:$0xff]  ;;  %v5417_v25 = vld [vmem:[#allocation10 + $0x1480] sm:$0xff] }
 0x412   : > { %11150 = vmatpush1.bf16.msra.mxu0 %v11149_v47  ;;  %v5373_v47 = vld [vmem:[#allocation10 + $0x1320] sm:$0xff] }
 0x413   : > { %11278 = vmatpush1.bf16.msra.mxu1 %v11277_v60  ;;  %11152 = vmatprep.subr.bf16.mxu0 %v11151_v22  ;;  %v5371_v60 = vld [vmem:[#allocation10 + $0x1310] sm:$0xff]  ;;  %v11295_v22 = vpack.c.bf16 %v5376_v57, %v5372_v9  ;;  %v11169_v43 = vpack.c.bf16 %v5373_v47, %v5369_v45  ;;  %v5269_v9 = vld [vmem:[#allocation2 + $0x48] sm:$0x3]  ;;  %v5538_v45 = vrot.slane %v14502_v59, 2  ;;  %v11311_v47 = vpack.c.bf16 %v5408_v16, %v5404_v18  ;;  %v5429_v18 = vld [vmem:[#allocation10 + $0x14e0] sm:$0xff] }
 0x414   : > { %11280 = vmatprep.subr.bf16.mxu1 %v11279_v56  ;;  %v5380_v56 = vld [vmem:[#allocation10 + $0x1358] sm:$0xff]  ;;  %v11297_v7 = vpack.c.bf16 %v5375_v61, %v5371_v60  ;;  %v5401_v60 = vld [vmem:[#allocation10 + $0x1400] sm:$0xff]  ;;  %v5403_v61 = vld [vmem:[#allocation10 + $0x1410] sm:$0xff]  ;;  %v5551_v35 = vrot.slane %v5269_v9, 2 }
 0x415   : > { %v5427_v16 = vld [vmem:[#allocation10 + $0x14d0] sm:$0xff] }
 0x416   : > { %11154 = vmatpush1.bf16.msra.mxu0 %v11153_v6  ;;  %v5381_v6 = vld [vmem:[#allocation10 + $0x1360] sm:$0xff]  ;;  %v5431_v9 = vld [vmem:[#allocation10 + $0x14f0] sm:$0xff] }
 0x417   : > { %11282 = vmatpush1.bf16.msra.mxu1 %v11281_v4  ;;  %11156 = vmatprep.subr.bf16.mxu0 %v11155_v41  ;;  %v5379_v4 = vld [vmem:[#allocation10 + $0x1350] sm:$0xff]  ;;  %v11299_v41 = vpack.c.bf16 %v5384_v29, %v5380_v56  ;;  %v11173_v2 = vpack.c.bf16 %v5381_v6, %v5377_v19  ;;  %v5410_v56 = vld [vmem:[#allocation10 + $0x1448] sm:$0xff] }
 0x418   : > { %11284 = vmatprep.subr.bf16.mxu1 %v11283_v49  ;;  %v5388_v49 = vld [vmem:[#allocation10 + $0x1398] sm:$0xff]  ;;  %v11301_v48 = vpack.c.bf16 %v5383_v1, %v5379_v4  ;;  %v5414_v29 = vld [vmem:[#allocation10 + $0x1468] sm:$0xff]  ;;  %v11313_v4 = vpack.c.bf16 %v5407_v28, %v5403_v61  ;;  %v5409_v1 = vld [vmem:[#allocation10 + $0x1440] sm:$0xff] }
 0x419   : > { %v5437_v61 = vld [vmem:[#allocation10 + $0x1520] sm:$0xff] }
 0x41a   : > { %11158 = vmatpush1.bf16.msra.mxu0 %v11157_v58  ;;  %v5389_v58 = vld [vmem:[#allocation10 + $0x13a0] sm:$0xff] }
 0x41b   : > { %11286 = vmatpush1.bf16.msra.mxu1 %v11285_v50  ;;  %11160 = vmatprep.subr.bf16.mxu0 %v11159_v36  ;;  %v5387_v50 = vld [vmem:[#allocation10 + $0x1390] sm:$0xff]  ;;  %v11303_v36 = vpack.c.bf16 %v5392_v26, %v5388_v49  ;;  %v11177_v31 = vpack.c.bf16 %v5389_v58, %v5385_v27  ;;  %v5552_v49 = vsel %vm1639_vm5, %v5541_v38, %v5551_v35  ;;  %v5418_v27 = vld [vmem:[#allocation10 + $0x1488] sm:$0xff] }
 0x41c   : > { %11288 = vmatprep.subr.bf16.mxu1 %v11287_v63  ;;  %v5396_v63 = vld [vmem:[#allocation10 + $0x13d8] sm:$0xff]  ;;  %v11305_v40 = vpack.c.bf16 %v5391_v30, %v5387_v50  ;;  %v5422_v58 = vld [vmem:[#allocation10 + $0x14a8] sm:$0xff]  ;;  %v11189_v30 = vpack.c.bf16 %v5413_v23, %v5409_v1  ;;  %v5435_v35 = vld [vmem:[#allocation10 + $0x1510] sm:$0xff] }
 0x41d   : > { %v5420_v50 = vld [vmem:[#allocation10 + $0x1498] sm:$0xff]  ;;  %v11191_v38 = vpack.c.bf16 %v5422_v58, %v5418_v27  ;;  %v5443_v1 = vld [vmem:[#allocation10 + $0x1550] sm:$0xff] }
 0x41e   : > { %11162 = vmatpush1.bf16.msra.mxu0 %v11161_v33  ;;  %v5397_v33 = vld [vmem:[#allocation10 + $0x13e0] sm:$0xff] }
 0x41f   : > { %11290 = vmatpush1.bf16.msra.mxu1 %v11289_v55  ;;  %11164 = vmatprep.subr.bf16.mxu0 %v11163_v15  ;;  %v5395_v55 = vld [vmem:[#allocation10 + $0x13d0] sm:$0xff]  ;;  %v11307_v15 = vpack.c.bf16 %v5400_v0, %v5396_v63  ;;  %v11181_v3 = vpack.c.bf16 %v5397_v33, %v5393_v62  ;;  %v5421_v63 = vld [vmem:[#allocation10 + $0x14a0] sm:$0xff]  ;;  %v5426_v62 = vld [vmem:[#allocation10 + $0x14c8] sm:$0xff] }
 0x420   : > { %11292 = vmatprep.subr.bf16.mxu1 %v11291_v20  ;;  %v5264_v20 = vld [vmem:[#allocation2] sm:$0xfc]  ;;  %v11309_v57 = vpack.c.bf16 %v5399_v42, %v5395_v55  ;;  %v5430_v33 = vld [vmem:[#allocation10 + $0x14e8] sm:$0xff]  ;;  %v5428_v55 = vld [vmem:[#allocation10 + $0x14d8] sm:$0xff]  ;;  %v11193_v42 = vpack.c.bf16 %v5421_v63, %v5417_v25 }
 0x421   : > { %v5419_v0 = vld [vmem:[#allocation10 + $0x1490] sm:$0xff]  ;;  %v5458_v25 = vld [vmem:[#allocation10 + $0x15c8] sm:$0xff] }
 0x422   : > { %11166 = vmatpush1.bf16.msra.mxu0 %v11165_v13  ;;  %v11183_v13 = vpack.c.bf16 %v5406_v52, %v5402_v44  ;;  %v11195_v52 = vpack.c.bf16 %v5430_v33, %v5426_v62  ;;  %v5462_v63 = vld [vmem:[#allocation10 + $0x15e8] sm:$0xff]  ;;  %v5457_v33 = vld [vmem:[#allocation10 + $0x15c0] sm:$0xff] }
 0x423   : > { %11294 = vmatpush1.bf16.msra.mxu1 %v11293_v34  ;;  %11168 = vmatprep.subr.bf16.mxu0 %v11167_v21  ;;  %v5268_v34 = vld [vmem:[#allocation2 + $0x40] sm:$0x3]  ;;  %v5537_v21 = vrot.slane %v5264_v20, 2  ;;  %v5425_v20 = vld [vmem:[#allocation10 + $0x14c0] sm:$0xff]  ;;  %v11211_v62 = vpack.c.bf16 %v5462_v63, %v5458_v25 }
 0x424   : > { %11296 = vmatprep.subr.bf16.mxu1 %v11295_v22  ;;  %v5405_v22 = vld [vmem:[#allocation10 + $0x1420] sm:$0xff]  ;;  %v5549_v59 = vrot.slane %v5268_v34, 2  ;;  %v5436_v34 = vld [vmem:[#allocation10 + $0x1518] sm:$0xff] }
 0x425   : > { %v11185_v19 = vpack.c.bf16 %v5405_v22, %v5401_v60  ;;  %v5539_v6 = vsel %vm1639_vm5, %v5537_v21, %v5538_v45  ;;  %v5440_v21 = vld [vmem:[#allocation10 + $0x1538] sm:$0xff]  ;;  %v5433_v22 = vld [vmem:[#allocation10 + $0x1500] sm:$0xff] }
 0x426   : > { %11170 = vmatpush1.bf16.msra.mxu0 %v11169_v43  ;;  %v5412_v43 = vld [vmem:[#allocation10 + $0x1458] sm:$0xff]  ;;  %v5550_v37 = vsel %vm1639_vm5, %v5538_v45, %v5549_v59  ;;  %v11197_v45 = vpack.c.bf16 %v5429_v18, %v5425_v20  ;;  %v11327_v28 = vpack.c.bf16 %v5440_v21, %v5436_v34  ;;  %v5441_v59 = vld [vmem:[#allocation10 + $0x1540] sm:$0xff]  ;;  %v5470_v20 = vld [vmem:[#allocation10 + $0x1628] sm:$0xff] }
 0x427   : > { %11298 = vmatpush1.bf16.msra.mxu1 %v11297_v7  ;;  %11172 = vmatprep.subr.bf16.mxu0 %v11171_v14  ;;  %v5416_v7 = vld [vmem:[#allocation10 + $0x1478] sm:$0xff]  ;;  %v5267_v14 = vld [vmem:[#allocation2 + $0x18] sm:$0xfc]  ;;  %v5469_v34 = vld [vmem:[#allocation10 + $0x1620] sm:$0xff] }
 0x428   : > { %11300 = vmatprep.subr.bf16.mxu1 %v11299_v41  ;;  %v11187_v41 = vpack.c.bf16 %v5414_v29, %v5410_v56  ;;  %v11315_v26 = vpack.c.bf16 %v5416_v7, %v5412_v43  ;;  %v5439_v56 = vld [vmem:[#allocation10 + $0x1530] sm:$0xff]  ;;  %v5442_v29 = vld [vmem:[#allocation10 + $0x1548] sm:$0xff]  ;;  %v5444_v7 = vld [vmem:[#allocation10 + $0x1558] sm:$0xff] }
 0x429   : > { %v5446_v43 = vld [vmem:[#allocation10 + $0x1568] sm:$0xff]  ;;  %v5468_v18 = vld [vmem:[#allocation10 + $0x1618] sm:$0xff]  ;;  %v5467_v21 = vld [vmem:[#allocation10 + $0x1610] sm:$0xff] }
 0x42a   : > { %11174 = vmatpush1.bf16.msra.mxu0 %v11173_v2  ;;  %v5546_v2 = vrot.slane %v5267_v14, 2  ;;  %v5448_v14 = vld [vmem:[#allocation10 + $0x1578] sm:$0xff]  ;;  %v5489_v63 = vld [vmem:[#allocation10 + $0x16c0] sm:$0xff] }
 0x42b   : > { %11302 = vmatpush1.bf16.msra.mxu1 %v11301_v48  ;;  %11176 = vmatprep.subr.bf16.mxu0 %v11175_v11  ;;  %v5547_v48 = vrot.slane %v14507_v39, 2  ;;  %v5415_v11 = vld [vmem:[#allocation10 + $0x1470] sm:$0xff]  ;;  %v11331_v23 = vpack.c.bf16 %v5448_v14, %v5444_v7  ;;  %v5477_v7 = vld [vmem:[#allocation10 + $0x1660] sm:$0xff] }
 0x42c   : > { %11304 = vmatprep.subr.bf16.mxu1 %v11303_v36  ;;  %v5424_v36 = vld [vmem:[#allocation10 + $0x14b8] sm:$0xff]  ;;  %v11317_v51 = vpack.c.bf16 %v5415_v11, %v5411_v17  ;;  %v5447_v17 = vld [vmem:[#allocation10 + $0x1570] sm:$0xff] }
 0x42d   : > { %v5456_v11 = vld [vmem:[#allocation10 + $0x15b8] sm:$0xff]  ;;  %v11333_v58 = vpack.c.bf16 %v5447_v17, %v5443_v1  ;;  %v5475_v14 = vld [vmem:[#allocation10 + $0x1650] sm:$0xff] }
 0x42e   : > { %11178 = vmatpush1.bf16.msra.mxu0 %v11177_v31  ;;  %v5548_v31 = vsel %vm1639_vm5, %v5546_v2, %v5547_v48  ;;  %v5452_v2 = vld [vmem:[#allocation10 + $0x1598] sm:$0xff] }
 0x42f   : > { %11306 = vmatpush1.bf16.msra.mxu1 %v11305_v40  ;;  %11180 = vmatprep.subr.bf16.mxu0 %v11179_v53  ;;  %v11319_v40 = vpack.c.bf16 %v5424_v36, %v5420_v50  ;;  %v5423_v53 = vld [vmem:[#allocation10 + $0x14b0] sm:$0xff]  ;;  %v5449_v36 = vld [vmem:[#allocation10 + $0x1580] sm:$0xff]  ;;  %v5488_v1 = vld [vmem:[#allocation10 + $0x16b8] sm:$0xff] }
 0x430   : > { %11308 = vmatprep.subr.bf16.mxu1 %v11307_v15  ;;  %v5432_v15 = vld [vmem:[#allocation10 + $0x14f8] sm:$0xff]  ;;  %v11321_v44 = vpack.c.bf16 %v5423_v53, %v5419_v0 }
 0x431   : > { %v5460_v0 = vld [vmem:[#allocation10 + $0x15d8] sm:$0xff] }
 0x432   : > { %11182 = vmatpush1.bf16.msra.mxu0 %v11181_v3  ;;  %v11323_v3 = vpack.c.bf16 %v5432_v15, %v5428_v55  ;;  %v5461_v55 = vld [vmem:[#allocation10 + $0x15e0] sm:$0xff]  ;;  %v5459_v15 = vld [vmem:[#allocation10 + $0x15d0] sm:$0xff] }
 0x433   : > { %11310 = vmatpush1.bf16.msra.mxu1 %v11309_v57  ;;  %11184 = vmatprep.subr.bf16.mxu0 %v11183_v13  ;;  %v5434_v57 = vld [vmem:[#allocation10 + $0x1508] sm:$0xff] }
 0x434   : > { %11312 = vmatprep.subr.bf16.mxu1 %v11311_v47  ;;  %v5438_v13 = vld [vmem:[#allocation10 + $0x1528] sm:$0xff]  ;;  %v11325_v47 = vpack.c.bf16 %v5431_v9, %v5427_v16  ;;  %v5472_v16 = vld [vmem:[#allocation10 + $0x1638] sm:$0xff] }
 0x435   : > { %5630 = vmatmul.mubr.f32.vlgmr.msra.gmra.mrb[16].mxu0 %v5539_v6  ;;  %v11199_v60 = vpack.c.bf16 %v5438_v13, %v5434_v57  ;;  %v5465_v13 = vld [vmem:[#allocation10 + $0x1600] sm:$0xff] }
 0x436   : > { %5784 = vmatmul.mubr.f32.vlgmr.msra.gmra.mrb[16].mxu1 %v5539_v6  ;;  %5635 = vmatprep.mubr.f32.mxu0 %v5552_v49  ;;  %v11329_v6 = vpack.c.bf16 %v5439_v56, %v5435_v35  ;;  %v5480_v35 = vld [vmem:[#allocation10 + $0x1678] sm:$0xff] }
 0x437   : > { %11186 = vmatpush1.bf16.msra.mxu0 %v11185_v19  ;;  %5789 = vmatprep.mubr.f32.mxu1 %v5552_v49  ;;  %v11201_v19 = vpack.c.bf16 %v5437_v61, %v5433_v22  ;;  %v5450_v49 = vld [vmem:[#allocation10 + $0x1588] sm:$0xff]  ;;  %v5476_v61 = vld [vmem:[#allocation10 + $0x1658] sm:$0xff] }
 0x438   : > { %11314 = vmatpush1.bf16.msra.mxu1 %v11313_v4  ;;  %11188 = vmatprep.subr.bf16.mxu0 %v11187_v41  ;;  %v11203_v4 = vpack.c.bf16 %v5446_v43, %v5442_v29  ;;  %v5445_v41 = vld [vmem:[#allocation10 + $0x1560] sm:$0xff]  ;;  %v5478_v22 = vld [vmem:[#allocation10 + $0x1668] sm:$0xff] }
 0x439   : > { %5636 = vmatmul.mubr.f32.gmra.mrb[18].mxu0 %v5550_v37  ;;  %11316 = vmatprep.subr.bf16.mxu1 %v11315_v26  ;;  %v5454_v26 = vld [vmem:[#allocation10 + $0x15a8] sm:$0xff]  ;;  %v11205_v27 = vpack.c.bf16 %v5445_v41, %v5441_v59  ;;  %v5473_v43 = vld [vmem:[#allocation10 + $0x1640] sm:$0xff]  ;;  %v5484_v41 = vld [vmem:[#allocation10 + $0x1698] sm:$0xff] }
 0x43a   : > { %5790 = vmatmul.mubr.f32.gmra.mrb[18].mxu1 %v5550_v37  ;;  %5706 = vmatprep.mubr.f32.mxu0 %v5548_v31  ;;  %v11207_v50 = vpack.c.bf16 %v5454_v26, %v5450_v49  ;;  %v5451_v37 = vld [vmem:[#allocation10 + $0x1590] sm:$0xff]  ;;  %v5486_v59 = vld [vmem:[#allocation10 + $0x16a8] sm:$0xff]  ;;  %v5481_v26 = vld [vmem:[#allocation10 + $0x1680] sm:$0xff] }
 0x43b   : > { %11190 = vmatpush1.bf16.msra.mxu0 %v11189_v30  ;;  %5860 = vmatprep.mubr.f32.mxu1 %v5548_v31  ;;  %v5453_v30 = vld [vmem:[#allocation10 + $0x15a0] sm:$0xff]  ;;  %v5464_v31 = vld [vmem:[#allocation10 + $0x15f8] sm:$0xff] }
 0x43c   : > { %11318 = vmatpush1.bf16.msra.mxu1 %v11317_v51  ;;  %11192 = vmatprep.subr.bf16.mxu0 %v11191_v38  ;;  %v11335_v51 = vpack.c.bf16 %v5456_v11, %v5452_v2  ;;  %v5455_v38 = vld [vmem:[#allocation10 + $0x15b0] sm:$0xff]  ;;  %v5485_v2 = vld [vmem:[#allocation10 + $0x16a0] sm:$0xff] }
 0x43d   : > { %11320 = vmatprep.subr.bf16.mxu1 %v11319_v40  ;;  %v11209_v40 = vpack.c.bf16 %v5453_v30, %v5449_v36  ;;  %v11337_v53 = vpack.c.bf16 %v5455_v38, %v5451_v37  ;;  %v5483_v11 = vld [vmem:[#allocation10 + $0x1690] sm:$0xff]  ;;  %v5494_v36 = vld [vmem:[#allocation10 + $0x16e8] sm:$0xff]  ;;  %v5492_v30 = vld [vmem:[#allocation10 + $0x16d8] sm:$0xff] }
 0x43e   : > { %v5496_v37 = vld [vmem:[#allocation10 + $0x16f8] sm:$0xff] }
 0x43f   : > { %11194 = vmatpush1.bf16.msra.mxu0 %v11193_v42  ;;  %v11339_v42 = vpack.c.bf16 %v5464_v31, %v5460_v0  ;;  %v5493_v0 = vld [vmem:[#allocation10 + $0x16e0] sm:$0xff]  ;;  %v5491_v31 = vld [vmem:[#allocation10 + $0x16d0] sm:$0xff] }
 0x440   : > { %11322 = vmatpush1.bf16.msra.mxu1 %v11321_v44  ;;  %11196 = vmatprep.subr.bf16.mxu0 %v11195_v52  ;;  %v5463_v44 = vld [vmem:[#allocation10 + $0x15f0] sm:$0xff]  ;;  %v5466_v52 = vld [vmem:[#allocation10 + $0x1608] sm:$0xff] }
 0x441   : > { %11324 = vmatprep.subr.bf16.mxu1 %v11323_v3  ;;  %v11213_v3 = vpack.c.bf16 %v5461_v55, %v5457_v33  ;;  %v11341_v9 = vpack.c.bf16 %v5463_v44, %v5459_v15  ;;  %v11215_v57 = vpack.c.bf16 %v5470_v20, %v5466_v52  ;;  %v5502_v33 = vld [vmem:[#allocation10 + $0x1728] sm:$0xff]  ;;  %v5500_v55 = vld [vmem:[#allocation10 + $0x1718] sm:$0xff]  ;;  %v5497_v20 = vld [vmem:[#allocation10 + $0x1700] sm:$0xff] }
 0x442   : > { %v5504_v15 = vld [vmem:[#allocation10 + $0x1738] sm:$0xff] }
 0x443   : > { %11198 = vmatpush1.bf16.msra.mxu0 %v11197_v45  ;;  %v11343_v45 = vpack.c.bf16 %v5472_v16, %v5468_v18  ;;  %v5501_v18 = vld [vmem:[#allocation10 + $0x1720] sm:$0xff]  ;;  %v5499_v16 = vld [vmem:[#allocation10 + $0x1710] sm:$0xff] }
 0x444   : > { %11326 = vmatpush1.bf16.msra.mxu1 %v11325_v47  ;;  %11200 = vmatprep.subr.bf16.mxu0 %v11199_v60  ;;  %v5471_v47 = vld [vmem:[#allocation10 + $0x1630] sm:$0xff]  ;;  %v5474_v60 = vld [vmem:[#allocation10 + $0x1648] sm:$0xff] }
 0x445   : > { %11328 = vmatprep.subr.bf16.mxu1 %v11327_v28  ;;  %v11217_v28 = vpack.c.bf16 %v5469_v34, %v5465_v13  ;;  %v11345_v56 = vpack.c.bf16 %v5471_v47, %v5467_v21  ;;  %v11219_v29 = vpack.c.bf16 %v5478_v22, %v5474_v60  ;;  %v5510_v13 = vld [vmem:[#allocation10 + $0x1768] sm:$0xff]  ;;  %v5508_v34 = vld [vmem:[#allocation10 + $0x1758] sm:$0xff]  ;;  %v5505_v22 = vld [vmem:[#allocation10 + $0x1740] sm:$0xff] }
 0x446   : > { %v5512_v21 = vld [vmem:[#allocation10 + $0x1778] sm:$0xff] }
 0x447   : > { %11202 = vmatpush1.bf16.msra.mxu0 %v11201_v19  ;;  %v11347_v19 = vpack.c.bf16 %v5480_v35, %v5476_v61  ;;  %v5509_v61 = vld [vmem:[#allocation10 + $0x1760] sm:$0xff]  ;;  %v5507_v35 = vld [vmem:[#allocation10 + $0x1750] sm:$0xff] }
 0x448   : > { %11330 = vmatpush1.bf16.msra.mxu1 %v11329_v6  ;;  %11204 = vmatprep.subr.bf16.mxu0 %v11203_v4  ;;  %v5479_v6 = vld [vmem:[#allocation10 + $0x1670] sm:$0xff]  ;;  %v5482_v4 = vld [vmem:[#allocation10 + $0x1688] sm:$0xff] }
 0x449   : > { %11332 = vmatprep.subr.bf16.mxu1 %v11331_v23  ;;  %v11221_v23 = vpack.c.bf16 %v5477_v7, %v5473_v43  ;;  %v11349_v17 = vpack.c.bf16 %v5479_v6, %v5475_v14  ;;  %v11223_v49 = vpack.c.bf16 %v5486_v59, %v5482_v4  ;;  %v5518_v43 = vld [vmem:[#allocation10 + $0x17a8] sm:$0xff]  ;;  %v5516_v7 = vld [vmem:[#allocation10 + $0x1798] sm:$0xff]  ;;  %v5513_v59 = vld [vmem:[#allocation10 + $0x1780] sm:$0xff] }
 0x44a   : > { %v5520_v14 = vld [vmem:[#allocation10 + $0x17b8] sm:$0xff] }
 0x44b   : > { %11206 = vmatpush1.bf16.msra.mxu0 %v11205_v27  ;;  %v11351_v27 = vpack.c.bf16 %v5488_v1, %v5484_v41  ;;  %v5517_v41 = vld [vmem:[#allocation10 + $0x17a0] sm:$0xff]  ;;  %v5515_v1 = vld [vmem:[#allocation10 + $0x1790] sm:$0xff] }
 0x44c   : > { %11334 = vmatpush1.bf16.msra.mxu1 %v11333_v58  ;;  %11208 = vmatprep.subr.bf16.mxu0 %v11207_v50  ;;  %v5487_v58 = vld [vmem:[#allocation10 + $0x16b0] sm:$0xff]  ;;  %v5490_v50 = vld [vmem:[#allocation10 + $0x16c8] sm:$0xff] }
 0x44d   : > { %11336 = vmatprep.subr.bf16.mxu1 %v11335_v51  ;;  %v11225_v51 = vpack.c.bf16 %v5485_v2, %v5481_v26  ;;  %v11353_v38 = vpack.c.bf16 %v5487_v58, %v5483_v11  ;;  %v11227_v25 = vpack.c.bf16 %v5494_v36, %v5490_v50  ;;  %v5526_v26 = vld [vmem:[#allocation10 + $0x17e8] sm:$0xff]  ;;  %v5524_v2 = vld [vmem:[#allocation10 + $0x17d8] sm:$0xff]  ;;  %v5521_v36 = vld [vmem:[#allocation10 + $0x17c0] sm:$0xff] }
 0x44e   : > { %v5528_v11 = vld [vmem:[#allocation10 + $0x17f8] sm:$0xff] }
 0x44f   : > { %11210 = vmatpush1.bf16.msra.mxu0 %v11209_v40  ;;  %v11355_v40 = vpack.c.bf16 %v5496_v37, %v5492_v30  ;;  %v5525_v30 = vld [vmem:[#allocation10 + $0x17e0] sm:$0xff]  ;;  %v5523_v37 = vld [vmem:[#allocation10 + $0x17d0] sm:$0xff] }
 0x450   : > { %11338 = vmatpush1.bf16.msra.mxu1 %v11337_v53  ;;  %11212 = vmatprep.subr.bf16.mxu0 %v11211_v62  ;;  %v5495_v53 = vld [vmem:[#allocation10 + $0x16f0] sm:$0xff]  ;;  %v5498_v62 = vld [vmem:[#allocation10 + $0x1708] sm:$0xff] }
 0x451   : > { %11340 = vmatprep.subr.bf16.mxu1 %v11339_v42  ;;  %v11229_v42 = vpack.c.bf16 %v5493_v0, %v5489_v63  ;;  %v11357_v44 = vpack.c.bf16 %v5495_v53, %v5491_v31  ;;  %v11231_v52 = vpack.c.bf16 %v5502_v33, %v5498_v62  ;;  %v5895_v63 = vld [vmem:[#allocation10 + $0x1828] sm:$0xff]  ;;  %v5266_v0 = vld [vmem:[#allocation2 + $0x10] sm:$0xfc]  ;;  %v5893_v31 = vld [vmem:[#allocation10 + $0x1818] sm:$0xff]  ;;  %v11245_v53 = vpack.c.bf16 %v5525_v30, %v5521_v36 }
 0x452   : > { %v5271_v62 = vld [vmem:[#allocation2 + $0x58] sm:$0x3]  ;;  %v5917_v30 = vld [vmem:[#allocation10 + $0x18d8] sm:$0xff] }
 0x453   : > { %11214 = vmatpush1.bf16.msra.mxu0 %v11213_v3  ;;  %v11359_v3 = vpack.c.bf16 %v5504_v15, %v5500_v55  ;;  %v5270_v15 = vld [vmem:[#allocation2 + $0x50] sm:$0x3]  ;;  %v5919_v36 = vld [vmem:[#allocation10 + $0x18e8] sm:$0xff] }
 0x454   : > { %11342 = vmatpush1.bf16.msra.mxu1 %v11341_v9  ;;  %11216 = vmatprep.subr.bf16.mxu0 %v11215_v57  ;;  %v5503_v9 = vld [vmem:[#allocation10 + $0x1730] sm:$0xff]  ;;  %v5506_v57 = vld [vmem:[#allocation10 + $0x1748] sm:$0xff] }
 0x455   : > { %11344 = vmatprep.subr.bf16.mxu1 %v11343_v45  ;;  %v11233_v45 = vpack.c.bf16 %v5501_v18, %v5497_v20  ;;  %v11361_v47 = vpack.c.bf16 %v5503_v9, %v5499_v16  ;;  %v11235_v60 = vpack.c.bf16 %v5510_v13, %v5506_v57  ;;  %v5890_v20 = vld [vmem:[#allocation10 + $0x1800] sm:$0xff]  ;;  %v5892_v16 = vld [vmem:[#allocation10 + $0x1810] sm:$0xff]  ;;  %v5899_v57 = vld [vmem:[#allocation10 + $0x1848] sm:$0xff] }
 0x456   : > { %v5894_v18 = vld [vmem:[#allocation10 + $0x1820] sm:$0xff]  ;;  %v5896_v9 = vld [vmem:[#allocation10 + $0x1830] sm:$0xff]  ;;  %v5903_v13 = vld [vmem:[#allocation10 + $0x1868] sm:$0xff] }
 0x457   : > { %11218 = vmatpush1.bf16.msra.mxu0 %v11217_v28  ;;  %v11363_v28 = vpack.c.bf16 %v5512_v21, %v5508_v34  ;;  %v5901_v34 = vld [vmem:[#allocation10 + $0x1858] sm:$0xff] }
 0x458   : > { %11346 = vmatpush1.bf16.msra.mxu1 %v11345_v56  ;;  %11220 = vmatprep.subr.bf16.mxu0 %v11219_v29  ;;  %v5511_v56 = vld [vmem:[#allocation10 + $0x1770] sm:$0xff]  ;;  %v5514_v29 = vld [vmem:[#allocation10 + $0x1788] sm:$0xff]  ;;  %v5905_v21 = vld [vmem:[#allocation10 + $0x1878] sm:$0xff] }
 0x459   : > { %11348 = vmatprep.subr.bf16.mxu1 %v11347_v19  ;;  %v11237_v19 = vpack.c.bf16 %v5509_v61, %v5505_v22  ;;  %v11365_v6 = vpack.c.bf16 %v5511_v56, %v5507_v35  ;;  %v11239_v4 = vpack.c.bf16 %v5518_v43, %v5514_v29  ;;  %v11505_v22 = vpack.c.bf16 %v5896_v9, %v5892_v16  ;;  %v5898_v35 = vld [vmem:[#allocation10 + $0x1840] sm:$0xff]  ;;  %v5900_v56 = vld [vmem:[#allocation10 + $0x1850] sm:$0xff] }
 0x45a   : > { %v11379_v61 = vpack.c.bf16 %v5903_v13, %v5899_v57  ;;  %v11507_v43 = vpack.c.bf16 %v5905_v21, %v5901_v34  ;;  %v5924_v16 = vld [vmem:[#allocation10 + $0x1910] sm:$0xff]  ;;  %v5931_v57 = vld [vmem:[#allocation10 + $0x1948] sm:$0xff]  ;;  %v5933_v34 = vld [vmem:[#allocation10 + $0x1958] sm:$0xff] }
 0x45b   : > { %11222 = vmatpush1.bf16.msra.mxu0 %v11221_v23  ;;  %v11367_v23 = vpack.c.bf16 %v5520_v14, %v5516_v7  ;;  %v14533_v14 = vld [vmem:[#allocation2 + $0x28] sm:$0xff]  ;;  %v5928_v9 = vld [vmem:[#allocation10 + $0x1930] sm:$0xff]  ;;  %v5935_v13 = vld [vmem:[#allocation10 + $0x1968] sm:$0xff] }
 0x45c   : > { %11350 = vmatpush1.bf16.msra.mxu1 %v11349_v17  ;;  %11224 = vmatprep.subr.bf16.mxu0 %v11223_v49  ;;  %v5519_v17 = vld [vmem:[#allocation10 + $0x17b0] sm:$0xff]  ;;  %v5522_v49 = vld [vmem:[#allocation10 + $0x17c8] sm:$0xff]  ;;  %v5937_v21 = vld [vmem:[#allocation10 + $0x1978] sm:$0xff] }
 0x45d   : > { %11352 = vmatprep.subr.bf16.mxu1 %v11351_v27  ;;  %v11241_v27 = vpack.c.bf16 %v5517_v41, %v5513_v59  ;;  %v11369_v58 = vpack.c.bf16 %v5519_v17, %v5515_v1  ;;  %v11243_v50 = vpack.c.bf16 %v5526_v26, %v5522_v49  ;;  %v5911_v59 = vld [vmem:[#allocation10 + $0x18a8] sm:$0xff]  ;;  %v5909_v41 = vld [vmem:[#allocation10 + $0x1898] sm:$0xff]  ;;  %v5906_v49 = vld [vmem:[#allocation10 + $0x1880] sm:$0xff] }
 0x45e   : > { %v5913_v1 = vld [vmem:[#allocation10 + $0x18b8] sm:$0xff]  ;;  %v5910_v26 = vld [vmem:[#allocation10 + $0x18a0] sm:$0xff] }
 0x45f   : > { %11226 = vmatpush1.bf16.msra.mxu0 %v11225_v51  ;;  %v11371_v51 = vpack.c.bf16 %v5528_v11, %v5524_v2  ;;  %v5908_v2 = vld [vmem:[#allocation10 + $0x1890] sm:$0xff] }
 0x460   : > { %11354 = vmatpush1.bf16.msra.mxu1 %v11353_v38  ;;  %11228 = vmatprep.subr.bf16.mxu0 %v11227_v25  ;;  %v5527_v38 = vld [vmem:[#allocation10 + $0x17f0] sm:$0xff]  ;;  %v5891_v25 = vld [vmem:[#allocation10 + $0x1808] sm:$0xff] }
 0x461   : > { %11356 = vmatprep.subr.bf16.mxu1 %v11355_v40  ;;  %v5897_v40 = vld [vmem:[#allocation10 + $0x1838] sm:$0xff]  ;;  %v11373_v33 = vpack.c.bf16 %v5527_v38, %v5523_v37  ;;  %v11375_v55 = vpack.c.bf16 %v5895_v63, %v5891_v25  ;;  %v5914_v63 = vld [vmem:[#allocation10 + $0x18c0] sm:$0xff] }
 0x462   : > { %v5921_v37 = vld [vmem:[#allocation10 + $0x18f8] sm:$0xff] }
 0x463   : > { %11230 = vmatpush1.bf16.msra.mxu0 %v11229_v42  ;;  %v5543_v42 = vrot.slane %v5266_v0, 2  ;;  %v5918_v0 = vld [vmem:[#allocation10 + $0x18e0] sm:$0xff] }
 0x464   : > { %11358 = vmatpush1.bf16.msra.mxu1 %v11357_v44  ;;  %11232 = vmatprep.subr.bf16.mxu0 %v11231_v52  ;;  %v5544_v44 = vrot.slane %v14511_v54, 2  ;;  %v11503_v52 = vpack.c.bf16 %v5897_v40, %v5893_v31  ;;  %v5553_v54 = vrot.slane %v5270_v15, 2  ;;  %v5916_v31 = vld [vmem:[#allocation10 + $0x18d0] sm:$0xff]  ;;  %v11515_v40 = vpack.c.bf16 %v5921_v37, %v5917_v30  ;;  %v5929_v15 = vld [vmem:[#allocation10 + $0x1938] sm:$0xff] }
 0x465   : > { %11360 = vmatprep.subr.bf16.mxu1 %v11359_v3  ;;  %v5555_v3 = vrot.slane %v5271_v62, 2  ;;  %v5923_v62 = vld [vmem:[#allocation10 + $0x1908] sm:$0xff]  ;;  %v5948_v30 = vld [vmem:[#allocation10 + $0x19d0] sm:$0xff] }
 0x466   : > { %v5554_v39 = vsel %vm1639_vm5, %v5544_v44, %v5553_v54  ;;  %v5934_v54 = vld [vmem:[#allocation10 + $0x1960] sm:$0xff] }
 0x467   : > { %11234 = vmatpush1.bf16.msra.mxu0 %v11233_v45  ;;  %v5882_v45 = vld [vmem:[#allocation2 + $0x8] sm:$0xf8]  ;;  %v5556_v29 = vsel %vm1639_vm5, %v5547_v48, %v5555_v3 }
 0x468   : > { %11362 = vmatpush1.bf16.msra.mxu1 %v11361_v47  ;;  %11236 = vmatprep.subr.bf16.mxu0 %v11235_v60  ;;  %v11377_v47 = vpack.c.bf16 %v5894_v18, %v5890_v20  ;;  %v5545_v60 = vsel %vm1639_vm5, %v5543_v42, %v5544_v44  ;;  %v6157_v7 = vrot.slane %v5882_v45, 3  ;;  %v11389_v42 = vpack.c.bf16 %v5918_v0, %v5914_v63  ;;  %v5922_v20 = vld [vmem:[#allocation10 + $0x1900] sm:$0xff]  ;;  %v5957_v63 = vld [vmem:[#allocation10 + $0x1a18] sm:$0xff] }
 0x469   : > { %11364 = vmatprep.subr.bf16.mxu1 %v11363_v28  ;;  %v5902_v28 = vld [vmem:[#allocation10 + $0x1860] sm:$0xff]  ;;  %v5961_v0 = vld [vmem:[#allocation10 + $0x1a38] sm:$0xff] }
 0x46a   : > { %v5926_v18 = vld [vmem:[#allocation10 + $0x1920] sm:$0xff] }
 0x46b   : > { %11238 = vmatpush1.bf16.msra.mxu0 %v11237_v19  ;;  %v6158_v19 = vrot.slane %v14533_v14, 3  ;;  %v11393_v45 = vpack.c.bf16 %v5926_v18, %v5922_v20  ;;  %v5965_v20 = vld [vmem:[#allocation10 + $0x1a58] sm:$0xff] }
 0x46c   : > { %11366 = vmatpush1.bf16.msra.mxu1 %v11365_v6  ;;  %11240 = vmatprep.subr.bf16.mxu0 %v11239_v4  ;;  %v5904_v6 = vld [vmem:[#allocation10 + $0x1870] sm:$0xff]  ;;  %v5907_v4 = vld [vmem:[#allocation10 + $0x1888] sm:$0xff]  ;;  %v5969_v18 = vld [vmem:[#allocation10 + $0x1a78] sm:$0xff] }
 0x46d   : > { %11368 = vmatprep.subr.bf16.mxu1 %v11367_v23  ;;  %v11381_v23 = vpack.c.bf16 %v5902_v28, %v5898_v35  ;;  %v11509_v48 = vpack.c.bf16 %v5904_v6, %v5900_v56  ;;  %v11383_v17 = vpack.c.bf16 %v5911_v59, %v5907_v4  ;;  %v6159_v11 = vsel %vm2182_vm6, %v6157_v7, %v6158_v19  ;;  %v5936_v28 = vld [vmem:[#allocation10 + $0x1970] sm:$0xff]  ;;  %v5939_v56 = vld [vmem:[#allocation10 + $0x1988] sm:$0xff]  ;;  %v5945_v7 = vld [vmem:[#allocation10 + $0x19b8] sm:$0xff] }
 0x46e   : > { %v11523_v35 = vpack.c.bf16 %v5937_v21, %v5933_v34  ;;  %v5964_v34 = vld [vmem:[#allocation10 + $0x1a50] sm:$0xff]  ;;  %v11539_v21 = vpack.c.bf16 %v5969_v18, %v5965_v20 }
 0x46f   : > { %11242 = vmatpush1.bf16.msra.mxu0 %v11241_v27  ;;  %v11511_v27 = vpack.c.bf16 %v5913_v1, %v5909_v41  ;;  %v5938_v41 = vld [vmem:[#allocation10 + $0x1980] sm:$0xff]  ;;  %v5996_v20 = vld [vmem:[#allocation10 + $0x1b50] sm:$0xff] }
 0x470   : > { %11370 = vmatpush1.bf16.msra.mxu1 %v11369_v58  ;;  %11244 = vmatprep.subr.bf16.mxu0 %v11243_v50  ;;  %v5912_v58 = vld [vmem:[#allocation10 + $0x18b0] sm:$0xff]  ;;  %v5915_v50 = vld [vmem:[#allocation10 + $0x18c8] sm:$0xff]  ;;  %v5942_v1 = vld [vmem:[#allocation10 + $0x19a0] sm:$0xff] }
 0x471   : > { %11372 = vmatprep.subr.bf16.mxu1 %v11371_v51  ;;  %v11385_v51 = vpack.c.bf16 %v5910_v26, %v5906_v49  ;;  %v11513_v38 = vpack.c.bf16 %v5912_v58, %v5908_v2  ;;  %v11387_v25 = vpack.c.bf16 %v5919_v36, %v5915_v50  ;;  %v5951_v49 = vld [vmem:[#allocation10 + $0x19e8] sm:$0xff]  ;;  %v5949_v26 = vld [vmem:[#allocation10 + $0x19d8] sm:$0xff]  ;;  %v5946_v50 = vld [vmem:[#allocation10 + $0x19c0] sm:$0xff] }
 0x472   : > { %v5953_v2 = vld [vmem:[#allocation10 + $0x19f8] sm:$0xff]  ;;  %v5950_v36 = vld [vmem:[#allocation10 + $0x19e0] sm:$0xff] }
 0x473   : > { %11246 = vmatpush1.bf16.msra.mxu0 %v11245_v53  ;;  %v5920_v53 = vld [vmem:[#allocation10 + $0x18f0] sm:$0xff]  ;;  %v11531_v37 = vpack.c.bf16 %v5953_v2, %v5949_v26 }
 0x474   : > { %11374 = vmatpush1.bf16.msra.mxu1 %v11373_v33  ;;  %11376 = vmatprep.subr.bf16.mxu0 %v11375_v55  ;;  %v5927_v33 = vld [vmem:[#allocation10 + $0x1928] sm:$0xff]  ;;  %v5925_v55 = vld [vmem:[#allocation10 + $0x1918] sm:$0xff]  ;;  %v11517_v44 = vpack.c.bf16 %v5920_v53, %v5916_v31  ;;  %v11405_v31 = vpack.c.bf16 %v5950_v36, %v5946_v50  ;;  %v5980_v26 = vld [vmem:[#allocation10 + $0x1ad0] sm:$0xff] }
 0x475   : > { %11504 = vmatprep.subr.bf16.mxu1 %v11503_v52  ;;  %v11391_v52 = vpack.c.bf16 %v5927_v33, %v5923_v62  ;;  %v11519_v3 = vpack.c.bf16 %v5929_v15, %v5925_v55  ;;  %v5954_v62 = vld [vmem:[#allocation10 + $0x1a00] sm:$0xff]  ;;  %v5956_v55 = vld [vmem:[#allocation10 + $0x1a10] sm:$0xff]  ;;  %v11535_v15 = vpack.c.bf16 %v5961_v0, %v5957_v63  ;;  %v5989_v50 = vld [vmem:[#allocation10 + $0x1b18] sm:$0xff] }
 0x476   : > { %5707 = vmatmul.mubr.f32.vlgmr.msra.gmra.mrb[16].mxu0 %v5545_v60  ;;  %v5958_v33 = vld [vmem:[#allocation10 + $0x1a20] sm:$0xff]  ;;  %v5993_v36 = vld [vmem:[#allocation10 + $0x1b38] sm:$0xff]  ;;  %v5988_v63 = vld [vmem:[#allocation10 + $0x1b10] sm:$0xff] }
 0x477   : > { %5861 = vmatmul.mubr.f32.vlgmr.msra.gmra.mrb[16].mxu1 %v5545_v60  ;;  %5712 = vmatprep.mubr.f32.mxu0 %v5556_v29  ;;  %v11395_v60 = vpack.c.bf16 %v5935_v13, %v5931_v57  ;;  %v5962_v57 = vld [vmem:[#allocation10 + $0x1a40] sm:$0xff]  ;;  %v11551_v0 = vpack.c.bf16 %v5993_v36, %v5989_v50  ;;  %v5885_v50 = vld [vmem:[#allocation2 + $0x40] sm:$0x7] }
 0x478   : > { %5866 = vmatprep.mubr.f32.mxu1 %v5556_v29  ;;  %11378 = vmatpush1.bf16.msra.mxu0 %v11377_v47  ;;  %v11521_v47 = vpack.c.bf16 %v5928_v9, %v5924_v16  ;;  %v5943_v29 = vld [vmem:[#allocation10 + $0x19a8] sm:$0xff]  ;;  %v11409_v16 = vpack.c.bf16 %v5958_v33, %v5954_v62  ;;  %v5966_v13 = vld [vmem:[#allocation10 + $0x1a60] sm:$0xff]  ;;  %v5997_v62 = vld [vmem:[#allocation10 + $0x1b58] sm:$0xff] }
 0x479   : > { %11506 = vmatpush1.bf16.msra.mxu1 %v11505_v22  ;;  %11380 = vmatprep.subr.bf16.mxu0 %v11379_v61  ;;  %v5930_v22 = vld [vmem:[#allocation10 + $0x1940] sm:$0xff]  ;;  %v5932_v61 = vld [vmem:[#allocation10 + $0x1950] sm:$0xff]  ;;  %v11399_v59 = vpack.c.bf16 %v5943_v29, %v5939_v56  ;;  %v6001_v33 = vld [vmem:[#allocation10 + $0x1b78] sm:$0xff] }
 0x47a   : > { %5713 = vmatmul.mubr.f32.gmra.mrb[18].mxu0 %v5554_v39  ;;  %11508 = vmatprep.subr.bf16.mxu1 %v11507_v43  ;;  %v5941_v43 = vld [vmem:[#allocation10 + $0x1998] sm:$0xff]  ;;  %v11397_v6 = vpack.c.bf16 %v5934_v54, %v5930_v22  ;;  %v11525_v4 = vpack.c.bf16 %v5936_v28, %v5932_v61  ;;  %v11413_v61 = vpack.c.bf16 %v5966_v13, %v5962_v57  ;;  %v5970_v56 = vld [vmem:[#allocation10 + $0x1a80] sm:$0xff] }
 0x47b   : > { %5867 = vmatmul.mubr.f32.gmra.mrb[18].mxu1 %v5554_v39  ;;  %6246 = vmatprep.mubr.f32.mxu0 %v6159_v11  ;;  %v11527_v39 = vpack.c.bf16 %v5945_v7, %v5941_v43  ;;  %v5973_v22 = vld [vmem:[#allocation10 + $0x1a98] sm:$0xff]  ;;  %v5974_v29 = vld [vmem:[#allocation10 + $0x1aa0] sm:$0xff]  ;;  %v5972_v43 = vld [vmem:[#allocation10 + $0x1a90] sm:$0xff]  ;;  %v11555_v18 = vpack.c.bf16 %v6001_v33, %v5997_v62 }
 0x47c   : > { %11382 = vmatpush1.bf16.msra.mxu0 %v11381_v23  ;;  %6400 = vmatprep.mubr.f32.mxu1 %v6159_v11  ;;  %v5940_v23 = vld [vmem:[#allocation10 + $0x1990] sm:$0xff]  ;;  %v11401_v11 = vpack.c.bf16 %v5942_v1, %v5938_v41  ;;  %v5977_v54 = vld [vmem:[#allocation10 + $0x1ab8] sm:$0xff] }
 0x47d   : > { %11510 = vmatpush1.bf16.msra.mxu1 %v11509_v48  ;;  %11384 = vmatprep.subr.bf16.mxu0 %v11383_v17  ;;  %v5944_v48 = vld [vmem:[#allocation10 + $0x19b0] sm:$0xff]  ;;  %v5947_v17 = vld [vmem:[#allocation10 + $0x19c8] sm:$0xff]  ;;  %v11543_v7 = vpack.c.bf16 %v5977_v54, %v5973_v22  ;;  %v5981_v41 = vld [vmem:[#allocation10 + $0x1ad8] sm:$0xff] }
 0x47e   : > { %11512 = vmatprep.subr.bf16.mxu1 %v11511_v27  ;;  %v11529_v27 = vpack.c.bf16 %v5944_v48, %v5940_v23  ;;  %v11403_v58 = vpack.c.bf16 %v5951_v49, %v5947_v17  ;;  %v5985_v1 = vld [vmem:[#allocation10 + $0x1af8] sm:$0xff]  ;;  %v11417_v23 = vpack.c.bf16 %v5974_v29, %v5970_v56  ;;  %v5978_v17 = vld [vmem:[#allocation10 + $0x1ac0] sm:$0xff]  ;;  %v6004_v22 = vld [vmem:[#allocation10 + $0x1b90] sm:$0xff] }
 0x47f   : > { %v5982_v49 = vld [vmem:[#allocation10 + $0x1ae0] sm:$0xff]  ;;  %v11547_v2 = vpack.c.bf16 %v5985_v1, %v5981_v41  ;;  %v6005_v57 = vld [vmem:[#allocation10 + $0x1b98] sm:$0xff]  ;;  %v6012_v41 = vld [vmem:[#allocation10 + $0x1bd0] sm:$0xff] }
 0x480   : > { %11386 = vmatpush1.bf16.msra.mxu0 %v11385_v51  ;;  %v5952_v51 = vld [vmem:[#allocation10 + $0x19f0] sm:$0xff]  ;;  %v6009_v13 = vld [vmem:[#allocation10 + $0x1bb8] sm:$0xff] }
 0x481   : > { %11514 = vmatpush1.bf16.msra.mxu1 %v11513_v38  ;;  %11388 = vmatprep.subr.bf16.mxu0 %v11387_v25  ;;  %v5955_v38 = vld [vmem:[#allocation10 + $0x1a08] sm:$0xff]  ;;  %v11559_v54 = vpack.c.bf16 %v6009_v13, %v6005_v57  ;;  %v6013_v56 = vld [vmem:[#allocation10 + $0x1bd8] sm:$0xff] }
 0x482   : > { %11516 = vmatprep.subr.bf16.mxu1 %v11515_v40  ;;  %v5959_v25 = vld [vmem:[#allocation10 + $0x1a28] sm:$0xff]  ;;  %v11533_v40 = vpack.c.bf16 %v5952_v51, %v5948_v30  ;;  %v11421_v30 = vpack.c.bf16 %v5982_v49, %v5978_v17  ;;  %v6017_v29 = vld [vmem:[#allocation10 + $0x1bf8] sm:$0xff]  ;;  %v5881_v17 = vld [vmem:[#allocation2] sm:$0xf8] }
 0x483   : > { %v11407_v53 = vpack.c.bf16 %v5959_v25, %v5955_v38  ;;  %v5986_v38 = vld [vmem:[#allocation10 + $0x1b00] sm:$0xff]  ;;  %v11563_v1 = vpack.c.bf16 %v6017_v29, %v6013_v56  ;;  %v6021_v49 = vld [vmem:[#allocation10 + $0x1c18] sm:$0xff]  ;;  %v6154_v36 = vrot.slane %v5881_v17, 3  ;;  %v6036_v29 = vld [vmem:[#allocation10 + $0x1c90] sm:$0xff] }
 0x484   : > { %11390 = vmatpush1.bf16.msra.mxu0 %v11389_v42  ;;  %v5960_v42 = vld [vmem:[#allocation10 + $0x1a30] sm:$0xff]  ;;  %v5990_v25 = vld [vmem:[#allocation10 + $0x1b20] sm:$0xff]  ;;  %v6029_v62 = vld [vmem:[#allocation10 + $0x1c58] sm:$0xff] }
 0x485   : > { %11518 = vmatpush1.bf16.msra.mxu1 %v11517_v44  ;;  %11392 = vmatprep.subr.bf16.mxu0 %v11391_v52  ;;  %v5963_v44 = vld [vmem:[#allocation10 + $0x1a48] sm:$0xff]  ;;  %v6033_v33 = vld [vmem:[#allocation10 + $0x1c78] sm:$0xff]  ;;  %v6038_v56 = vld [vmem:[#allocation10 + $0x1ca0] sm:$0xff] }
 0x486   : > { %11520 = vmatprep.subr.bf16.mxu1 %v11519_v3  ;;  %v5967_v52 = vld [vmem:[#allocation10 + $0x1a68] sm:$0xff]  ;;  %v11537_v3 = vpack.c.bf16 %v5960_v42, %v5956_v55  ;;  %v11425_v55 = vpack.c.bf16 %v5990_v25, %v5986_v38  ;;  %v6018_v38 = vld [vmem:[#allocation10 + $0x1c00] sm:$0xff]  ;;  %v11571_v57 = vpack.c.bf16 %v6033_v33, %v6029_v62  ;;  %v6061_v62 = vld [vmem:[#allocation10 + $0x1d58] sm:$0xff] }
 0x487   : > { %v11411_v9 = vpack.c.bf16 %v5967_v52, %v5963_v44  ;;  %v5994_v44 = vld [vmem:[#allocation10 + $0x1b40] sm:$0xff]  ;;  %v6065_v33 = vld [vmem:[#allocation10 + $0x1d78] sm:$0xff] }
 0x488   : > { %11394 = vmatpush1.bf16.msra.mxu0 %v11393_v45  ;;  %v5968_v45 = vld [vmem:[#allocation10 + $0x1a70] sm:$0xff]  ;;  %v5998_v52 = vld [vmem:[#allocation10 + $0x1b60] sm:$0xff] }
 0x489   : > { %11522 = vmatpush1.bf16.msra.mxu1 %v11521_v47  ;;  %11396 = vmatprep.subr.bf16.mxu0 %v11395_v60  ;;  %v5971_v47 = vld [vmem:[#allocation10 + $0x1a88] sm:$0xff]  ;;  %v6022_v25 = vld [vmem:[#allocation10 + $0x1c20] sm:$0xff] }
 0x48a   : > { %11524 = vmatprep.subr.bf16.mxu1 %v11523_v35  ;;  %v5975_v60 = vld [vmem:[#allocation10 + $0x1aa8] sm:$0xff]  ;;  %v11541_v35 = vpack.c.bf16 %v5968_v45, %v5964_v34  ;;  %v11429_v34 = vpack.c.bf16 %v5998_v52, %v5994_v44  ;;  %v6166_v52 = vrot.slane %v5885_v50, 3  ;;  %v6042_v17 = vld [vmem:[#allocation10 + $0x1cc0] sm:$0xff]  ;;  %v6053_v50 = vld [vmem:[#allocation10 + $0x1d18] sm:$0xff] }
 0x48b   : > { %v11415_v28 = vpack.c.bf16 %v5975_v60, %v5971_v47  ;;  %v6002_v47 = vld [vmem:[#allocation10 + $0x1b80] sm:$0xff] }
 0x48c   : > { %11398 = vmatpush1.bf16.msra.mxu0 %v11397_v6  ;;  %v5976_v6 = vld [vmem:[#allocation10 + $0x1ab0] sm:$0xff]  ;;  %v6006_v60 = vld [vmem:[#allocation10 + $0x1ba0] sm:$0xff] }
 0x48d   : > { %11526 = vmatpush1.bf16.msra.mxu1 %v11525_v4  ;;  %11400 = vmatprep.subr.bf16.mxu0 %v11399_v59  ;;  %v5979_v4 = vld [vmem:[#allocation10 + $0x1ac8] sm:$0xff] }
 0x48e   : > { %11528 = vmatprep.subr.bf16.mxu1 %v11527_v39  ;;  %v5983_v59 = vld [vmem:[#allocation10 + $0x1ae8] sm:$0xff]  ;;  %v11545_v39 = vpack.c.bf16 %v5976_v6, %v5972_v43  ;;  %v11433_v43 = vpack.c.bf16 %v6006_v60, %v6002_v47 }
 0x48f   : > { %v11419_v48 = vpack.c.bf16 %v5983_v59, %v5979_v4  ;;  %v6010_v4 = vld [vmem:[#allocation10 + $0x1bc0] sm:$0xff]  ;;  %v6035_v47 = vld [vmem:[#allocation10 + $0x1c88] sm:$0xff] }
 0x490   : > { %11402 = vmatpush1.bf16.msra.mxu0 %v11401_v11  ;;  %v5984_v11 = vld [vmem:[#allocation10 + $0x1af0] sm:$0xff]  ;;  %v6014_v59 = vld [vmem:[#allocation10 + $0x1be0] sm:$0xff]  ;;  %v6039_v60 = vld [vmem:[#allocation10 + $0x1ca8] sm:$0xff] }
 0x491   : > { %11530 = vmatpush1.bf16.msra.mxu1 %v11529_v27  ;;  %11404 = vmatprep.subr.bf16.mxu0 %v11403_v58  ;;  %v5987_v27 = vld [vmem:[#allocation10 + $0x1b08] sm:$0xff] }
 0x492   : > { %11532 = vmatprep.subr.bf16.mxu1 %v11531_v37  ;;  %v5991_v58 = vld [vmem:[#allocation10 + $0x1b28] sm:$0xff]  ;;  %v11549_v37 = vpack.c.bf16 %v5984_v11, %v5980_v26  ;;  %v6025_v26 = vld [vmem:[#allocation10 + $0x1c38] sm:$0xff] }
 0x493   : > { %v11423_v51 = vpack.c.bf16 %v5991_v58, %v5987_v27  ;;  %v5886_v11 = vld [vmem:[#allocation2 + $0x48] sm:$0x7] }
 0x494   : > { %11406 = vmatpush1.bf16.msra.mxu0 %v11405_v31  ;;  %v5992_v31 = vld [vmem:[#allocation10 + $0x1b30] sm:$0xff] }
 0x495   : > { %11534 = vmatpush1.bf16.msra.mxu1 %v11533_v40  ;;  %11408 = vmatprep.subr.bf16.mxu0 %v11407_v53  ;;  %v5995_v40 = vld [vmem:[#allocation10 + $0x1b48] sm:$0xff] }
 0x496   : > { %11536 = vmatprep.subr.bf16.mxu1 %v11535_v15  ;;  %v5999_v53 = vld [vmem:[#allocation10 + $0x1b68] sm:$0xff]  ;;  %v11553_v15 = vpack.c.bf16 %v5992_v31, %v5988_v63  ;;  %v6020_v63 = vld [vmem:[#allocation10 + $0x1c10] sm:$0xff] }
 0x497   : > { %v11427_v42 = vpack.c.bf16 %v5999_v53, %v5995_v40  ;;  %v6024_v31 = vld [vmem:[#allocation10 + $0x1c30] sm:$0xff]  ;;  %v6027_v40 = vld [vmem:[#allocation10 + $0x1c48] sm:$0xff] }
 0x498   : > { %11410 = vmatpush1.bf16.msra.mxu0 %v11409_v16  ;;  %v6000_v16 = vld [vmem:[#allocation10 + $0x1b70] sm:$0xff]  ;;  %v6031_v53 = vld [vmem:[#allocation10 + $0x1c68] sm:$0xff]  ;;  %v11569_v44 = vpack.c.bf16 %v6024_v31, %v6020_v63 }
 0x499   : > { %11538 = vmatpush1.bf16.msra.mxu1 %v11537_v3  ;;  %11412 = vmatprep.subr.bf16.mxu0 %v11411_v9  ;;  %v6003_v3 = vld [vmem:[#allocation10 + $0x1b88] sm:$0xff]  ;;  %v6052_v63 = vld [vmem:[#allocation10 + $0x1d10] sm:$0xff] }
 0x49a   : > { %11540 = vmatprep.subr.bf16.mxu1 %v11539_v21  ;;  %v6007_v9 = vld [vmem:[#allocation10 + $0x1ba8] sm:$0xff]  ;;  %v11557_v21 = vpack.c.bf16 %v6000_v16, %v5996_v20  ;;  %v11443_v20 = vpack.c.bf16 %v6031_v53, %v6027_v40  ;;  %v6030_v16 = vld [vmem:[#allocation10 + $0x1c60] sm:$0xff]  ;;  %v6056_v31 = vld [vmem:[#allocation10 + $0x1d30] sm:$0xff] }
 0x49b   : > { %v11431_v45 = vpack.c.bf16 %v6007_v9, %v6003_v3  ;;  %v6028_v3 = vld [vmem:[#allocation10 + $0x1c50] sm:$0xff]  ;;  %v6059_v40 = vld [vmem:[#allocation10 + $0x1d48] sm:$0xff] }
 0x49c   : > { %11414 = vmatpush1.bf16.msra.mxu0 %v11413_v61  ;;  %v6008_v61 = vld [vmem:[#allocation10 + $0x1bb0] sm:$0xff]  ;;  %v6063_v53 = vld [vmem:[#allocation10 + $0x1d68] sm:$0xff] }
 0x49d   : > { %11542 = vmatpush1.bf16.msra.mxu1 %v11541_v35  ;;  %11416 = vmatprep.subr.bf16.mxu0 %v11415_v28  ;;  %v6011_v35 = vld [vmem:[#allocation10 + $0x1bc8] sm:$0xff] }
 0x49e   : > { %11544 = vmatprep.subr.bf16.mxu1 %v11543_v7  ;;  %v6015_v28 = vld [vmem:[#allocation10 + $0x1be8] sm:$0xff]  ;;  %v11561_v7 = vpack.c.bf16 %v6008_v61, %v6004_v22  ;;  %v6037_v22 = vld [vmem:[#allocation10 + $0x1c98] sm:$0xff] }
 0x49f   : > { %v11435_v6 = vpack.c.bf16 %v6015_v28, %v6011_v35  ;;  %v11447_v35 = vpack.c.bf16 %v6039_v60, %v6035_v47  ;;  %v6034_v28 = vld [vmem:[#allocation10 + $0x1c80] sm:$0xff] }
 0x4a0   : > { %11418 = vmatpush1.bf16.msra.mxu0 %v11417_v23  ;;  %v6016_v23 = vld [vmem:[#allocation10 + $0x1bf0] sm:$0xff] }
 0x4a1   : > { %11546 = vmatpush1.bf16.msra.mxu1 %v11545_v39  ;;  %11420 = vmatprep.subr.bf16.mxu0 %v11419_v48  ;;  %v6019_v39 = vld [vmem:[#allocation10 + $0x1c08] sm:$0xff]  ;;  %v11565_v27 = vpack.c.bf16 %v6016_v23, %v6012_v41  ;;  %v6045_v41 = vld [vmem:[#allocation10 + $0x1cd8] sm:$0xff]  ;;  %v11449_v23 = vpack.c.bf16 %v6038_v56, %v6034_v28 }
 0x4a2   : > { %11548 = vmatprep.subr.bf16.mxu1 %v11547_v2  ;;  %v6023_v48 = vld [vmem:[#allocation10 + $0x1c28] sm:$0xff]  ;;  %v11437_v2 = vpack.c.bf16 %v6014_v59, %v6010_v4  ;;  %v6077_v56 = vld [vmem:[#allocation10 + $0x1dd8] sm:$0xff] }
 0x4a3   : > { %v11439_v58 = vpack.c.bf16 %v6023_v48, %v6019_v39  ;;  %v6043_v4 = vld [vmem:[#allocation10 + $0x1cc8] sm:$0xff] }
 0x4a4   : > { %11422 = vmatpush1.bf16.msra.mxu0 %v11421_v30  ;;  %v13027_v30 = vld [vmem:[#allocation2 + $0x20] sm:$0xff]  ;;  %v6047_v59 = vld [vmem:[#allocation10 + $0x1ce8] sm:$0xff] }
 0x4a5   : > { %11550 = vmatpush1.bf16.msra.mxu1 %v11549_v37  ;;  %11424 = vmatprep.subr.bf16.mxu0 %v11423_v51  ;;  %v6155_v37 = vrot.slane %v13027_v30, 3  ;;  %v11567_v51 = vpack.c.bf16 %v6025_v26, %v6021_v49  ;;  %v11451_v48 = vpack.c.bf16 %v6047_v59, %v6043_v4  ;;  %v6046_v49 = vld [vmem:[#allocation10 + $0x1ce0] sm:$0xff]  ;;  %v6044_v26 = vld [vmem:[#allocation10 + $0x1cd0] sm:$0xff]  ;;  %v6079_v28 = vld [vmem:[#allocation10 + $0x1de8] sm:$0xff] }
 0x4a6   : > { %11552 = vmatprep.subr.bf16.mxu1 %v11551_v0  ;;  %v6168_v0 = vrot.slane %v5886_v11, 3  ;;  %v6048_v11 = vld [vmem:[#allocation10 + $0x1cf0] sm:$0xff]  ;;  %v11453_v30 = vpack.c.bf16 %v6046_v49, %v6042_v17  ;;  %v6074_v4 = vld [vmem:[#allocation10 + $0x1dc0] sm:$0xff]  ;;  %v6085_v17 = vld [vmem:[#allocation10 + $0x1e18] sm:$0xff] }
 0x4a7   : > { %v6167_v14 = vsel %vm2182_vm6, %v6155_v37, %v6166_v52  ;;  %v6062_v52 = vld [vmem:[#allocation10 + $0x1d60] sm:$0xff]  ;;  %v6089_v49 = vld [vmem:[#allocation10 + $0x1e38] sm:$0xff] }
 0x4a8   : > { %11426 = vmatpush1.bf16.msra.mxu0 %v11425_v55  ;;  %v5884_v55 = vld [vmem:[#allocation2 + $0x18] sm:$0xf8]  ;;  %v6169_v9 = vsel %vm2182_vm6, %v6158_v19, %v6168_v0  ;;  %v6078_v59 = vld [vmem:[#allocation10 + $0x1de0] sm:$0xff] }
 0x4a9   : > { %11554 = vmatpush1.bf16.msra.mxu1 %v11553_v15  ;;  %11428 = vmatprep.subr.bf16.mxu0 %v11427_v42  ;;  %v11441_v15 = vpack.c.bf16 %v6022_v25, %v6018_v38  ;;  %v6156_v42 = vsel %vm2182_vm6, %v6154_v36, %v6155_v37  ;;  %v6163_v13 = vrot.slane %v5884_v55, 3  ;;  %v6057_v36 = vld [vmem:[#allocation10 + $0x1d38] sm:$0xff]  ;;  %v11581_v37 = vpack.c.bf16 %v6048_v11, %v6044_v26  ;;  %v6050_v38 = vld [vmem:[#allocation10 + $0x1d00] sm:$0xff] }
 0x4aa   : > { %11556 = vmatprep.subr.bf16.mxu1 %v11555_v18  ;;  %v6026_v18 = vld [vmem:[#allocation10 + $0x1c40] sm:$0xff]  ;;  %v11583_v0 = vpack.c.bf16 %v6057_v36, %v6053_v50  ;;  %v11469_v26 = vpack.c.bf16 %v6078_v59, %v6074_v4  ;;  %v6084_v50 = vld [vmem:[#allocation10 + $0x1e10] sm:$0xff]  ;;  %v11599_v36 = vpack.c.bf16 %v6089_v49, %v6085_v17  ;;  %v6117_v4 = vld [vmem:[#allocation10 + $0x1f18] sm:$0xff] }
 0x4ab   : > { %v11445_v61 = vpack.c.bf16 %v6030_v16, %v6026_v18  ;;  %v6054_v25 = vld [vmem:[#allocation10 + $0x1d20] sm:$0xff]  ;;  %v11587_v18 = vpack.c.bf16 %v6065_v33, %v6061_v62  ;;  %v6064_v16 = vld [vmem:[#allocation10 + $0x1d70] sm:$0xff]  ;;  %v6121_v59 = vld [vmem:[#allocation10 + $0x1f38] sm:$0xff] }
 0x4ac   : > { %11430 = vmatpush1.bf16.msra.mxu0 %v11429_v34  ;;  %v14544_v34 = vld [vmem:[#allocation2 + $0x38] sm:$0xff]  ;;  %v11457_v55 = vpack.c.bf16 %v6054_v25, %v6050_v38  ;;  %v6093_v38 = vld [vmem:[#allocation10 + $0x1e58] sm:$0xff]  ;;  %v6092_v62 = vld [vmem:[#allocation10 + $0x1e50] sm:$0xff]  ;;  %v11615_v49 = vpack.c.bf16 %v6121_v59, %v6117_v4 }
 0x4ad   : > { %11558 = vmatpush1.bf16.msra.mxu1 %v11557_v21  ;;  %11432 = vmatprep.subr.bf16.mxu0 %v11431_v45  ;;  %v6164_v21 = vrot.slane %v14544_v34, 3  ;;  %v6032_v45 = vld [vmem:[#allocation10 + $0x1c70] sm:$0xff]  ;;  %v6097_v25 = vld [vmem:[#allocation10 + $0x1e78] sm:$0xff]  ;;  %v5887_v4 = vld [vmem:[#allocation2 + $0x50] sm:$0x7] }
 0x4ae   : > { %11560 = vmatprep.subr.bf16.mxu1 %v11559_v54  ;;  %v6041_v54 = vld [vmem:[#allocation10 + $0x1cb8] sm:$0xff]  ;;  %v11573_v19 = vpack.c.bf16 %v6032_v45, %v6028_v3  ;;  %v6067_v3 = vld [vmem:[#allocation10 + $0x1d88] sm:$0xff]  ;;  %v11603_v33 = vpack.c.bf16 %v6097_v25, %v6093_v38  ;;  %v6116_v17 = vld [vmem:[#allocation10 + $0x1f10] sm:$0xff] }
 0x4af   : > { %v6124_v38 = vld [vmem:[#allocation10 + $0x1f50] sm:$0xff] }
 0x4b0   : > { %11434 = vmatpush1.bf16.msra.mxu0 %v11433_v43  ;;  %v6165_v43 = vsel %vm2182_vm6, %v6163_v13, %v6164_v21  ;;  %v6073_v13 = vld [vmem:[#allocation10 + $0x1db8] sm:$0xff] }
 0x4b1   : > { %11562 = vmatpush1.bf16.msra.mxu1 %v11561_v7  ;;  %11436 = vmatprep.subr.bf16.mxu0 %v11435_v6  ;;  %v11575_v7 = vpack.c.bf16 %v6041_v54, %v6037_v22  ;;  %v6040_v6 = vld [vmem:[#allocation10 + $0x1cb0] sm:$0xff]  ;;  %v6066_v22 = vld [vmem:[#allocation10 + $0x1d80] sm:$0xff] }
 0x4b2   : > { %11564 = vmatprep.subr.bf16.mxu1 %v11563_v1  ;;  %v6049_v1 = vld [vmem:[#allocation10 + $0x1cf8] sm:$0xff]  ;;  %v11577_v39 = vpack.c.bf16 %v6040_v6, %v6036_v29  ;;  %v6070_v54 = vld [vmem:[#allocation10 + $0x1da0] sm:$0xff] }
 0x4b3   : > { %v6081_v29 = vld [vmem:[#allocation10 + $0x1df8] sm:$0xff] }
 0x4b4   : > { %11438 = vmatpush1.bf16.msra.mxu0 %v11437_v2  ;;  %v11579_v2 = vpack.c.bf16 %v6049_v1, %v6045_v41  ;;  %v6076_v41 = vld [vmem:[#allocation10 + $0x1dd0] sm:$0xff]  ;;  %v11595_v1 = vpack.c.bf16 %v6081_v29, %v6077_v56 }
 0x4b5   : > { %11566 = vmatpush1.bf16.msra.mxu1 %v11565_v27  ;;  %11440 = vmatprep.subr.bf16.mxu0 %v11439_v58  ;;  %v6051_v27 = vld [vmem:[#allocation10 + $0x1d08] sm:$0xff]  ;;  %v6108_v56 = vld [vmem:[#allocation10 + $0x1ed0] sm:$0xff] }
 0x4b6   : > { %11568 = vmatprep.subr.bf16.mxu1 %v11567_v51  ;;  %v6055_v58 = vld [vmem:[#allocation10 + $0x1d28] sm:$0xff] }
 0x4b7   : > { %6247 = vmatmul.mubr.f32.vlgmr.msra.gmra.mrb[16].mxu0 %v6156_v42  ;;  %v11455_v51 = vpack.c.bf16 %v6055_v58, %v6051_v27  ;;  %v6082_v27 = vld [vmem:[#allocation10 + $0x1e00] sm:$0xff] }
 0x4b8   : > { %6401 = vmatmul.mubr.f32.vlgmr.msra.gmra.mrb[16].mxu1 %v6156_v42  ;;  %6252 = vmatprep.mubr.f32.mxu0 %v6169_v9  ;;  %v11459_v42 = vpack.c.bf16 %v6063_v53, %v6059_v40  ;;  %v6086_v58 = vld [vmem:[#allocation10 + $0x1e20] sm:$0xff] }
 0x4b9   : > { %11442 = vmatpush1.bf16.msra.mxu0 %v11441_v15  ;;  %6406 = vmatprep.mubr.f32.mxu1 %v6169_v9  ;;  %v11585_v15 = vpack.c.bf16 %v6056_v31, %v6052_v63  ;;  %v6071_v9 = vld [vmem:[#allocation10 + $0x1da8] sm:$0xff]  ;;  %v11473_v63 = vpack.c.bf16 %v6086_v58, %v6082_v27  ;;  %v6090_v40 = vld [vmem:[#allocation10 + $0x1e40] sm:$0xff]  ;;  %v6125_v27 = vld [vmem:[#allocation10 + $0x1f58] sm:$0xff] }
 0x4ba   : > { %11570 = vmatpush1.bf16.msra.mxu1 %v11569_v44  ;;  %11444 = vmatprep.subr.bf16.mxu0 %v11443_v20  ;;  %v6058_v44 = vld [vmem:[#allocation10 + $0x1d40] sm:$0xff]  ;;  %v6060_v20 = vld [vmem:[#allocation10 + $0x1d50] sm:$0xff]  ;;  %v11463_v60 = vpack.c.bf16 %v6071_v9, %v6067_v3  ;;  %v6129_v58 = vld [vmem:[#allocation10 + $0x1f78] sm:$0xff] }
 0x4bb   : > { %6253 = vmatmul.mubr.f32.gmra.mrb[18].mxu0 %v6167_v14  ;;  %11572 = vmatprep.subr.bf16.mxu1 %v11571_v57  ;;  %v6069_v57 = vld [vmem:[#allocation10 + $0x1d98] sm:$0xff]  ;;  %v11461_v45 = vpack.c.bf16 %v6062_v52, %v6058_v44  ;;  %v11589_v47 = vpack.c.bf16 %v6064_v16, %v6060_v20  ;;  %v6094_v53 = vld [vmem:[#allocation10 + $0x1e60] sm:$0xff]  ;;  %v11619_v25 = vpack.c.bf16 %v6129_v58, %v6125_v27 }
 0x4bc   : > { %6407 = vmatmul.mubr.f32.gmra.mrb[18].mxu1 %v6167_v14  ;;  %6323 = vmatprep.mubr.f32.mxu0 %v6165_v43  ;;  %v11591_v14 = vpack.c.bf16 %v6073_v13, %v6069_v57  ;;  %v6101_v44 = vld [vmem:[#allocation10 + $0x1e98] sm:$0xff]  ;;  %v11477_v20 = vpack.c.bf16 %v6094_v53, %v6090_v40  ;;  %v6098_v3 = vld [vmem:[#allocation10 + $0x1e80] sm:$0xff]  ;;  %v6100_v57 = vld [vmem:[#allocation10 + $0x1e90] sm:$0xff] }
 0x4bd   : > { %11446 = vmatpush1.bf16.msra.mxu0 %v11445_v61  ;;  %6477 = vmatprep.mubr.f32.mxu1 %v6165_v43  ;;  %v6068_v61 = vld [vmem:[#allocation10 + $0x1d90] sm:$0xff]  ;;  %v11465_v43 = vpack.c.bf16 %v6070_v54, %v6066_v22  ;;  %v6105_v52 = vld [vmem:[#allocation10 + $0x1eb8] sm:$0xff]  ;;  %v6102_v9 = vld [vmem:[#allocation10 + $0x1ea0] sm:$0xff] }
 0x4be   : > { %11574 = vmatpush1.bf16.msra.mxu1 %v11573_v19  ;;  %11448 = vmatprep.subr.bf16.mxu0 %v11447_v35  ;;  %v6072_v19 = vld [vmem:[#allocation10 + $0x1db0] sm:$0xff]  ;;  %v6075_v35 = vld [vmem:[#allocation10 + $0x1dc8] sm:$0xff]  ;;  %v11607_v13 = vpack.c.bf16 %v6105_v52, %v6101_v44  ;;  %v6109_v22 = vld [vmem:[#allocation10 + $0x1ed8] sm:$0xff] }
 0x4bf   : > { %11576 = vmatprep.subr.bf16.mxu1 %v11575_v7  ;;  %v11593_v7 = vpack.c.bf16 %v6072_v19, %v6068_v61  ;;  %v11467_v6 = vpack.c.bf16 %v6079_v28, %v6075_v35  ;;  %v6113_v54 = vld [vmem:[#allocation10 + $0x1ef8] sm:$0xff]  ;;  %v11481_v61 = vpack.c.bf16 %v6102_v9, %v6098_v3  ;;  %v6106_v35 = vld [vmem:[#allocation10 + $0x1ec0] sm:$0xff]  ;;  %v6132_v44 = vld [vmem:[#allocation10 + $0x1f90] sm:$0xff] }
 0x4c0   : > { %v6110_v28 = vld [vmem:[#allocation10 + $0x1ee0] sm:$0xff]  ;;  %v11611_v29 = vpack.c.bf16 %v6113_v54, %v6109_v22  ;;  %v6133_v40 = vld [vmem:[#allocation10 + $0x1f98] sm:$0xff]  ;;  %v6140_v22 = vld [vmem:[#allocation10 + $0x1fd0] sm:$0xff] }
 0x4c1   : > { %11450 = vmatpush1.bf16.msra.mxu0 %v11449_v23  ;;  %v6080_v23 = vld [vmem:[#allocation10 + $0x1df0] sm:$0xff]  ;;  %v6137_v53 = vld [vmem:[#allocation10 + $0x1fb8] sm:$0xff] }
 0x4c2   : > { %11578 = vmatpush1.bf16.msra.mxu1 %v11577_v39  ;;  %11452 = vmatprep.subr.bf16.mxu0 %v11451_v48  ;;  %v6083_v39 = vld [vmem:[#allocation10 + $0x1e08] sm:$0xff]  ;;  %v11623_v52 = vpack.c.bf16 %v6137_v53, %v6133_v40  ;;  %v6141_v3 = vld [vmem:[#allocation10 + $0x1fd8] sm:$0xff] }
 0x4c3   : > { %11580 = vmatprep.subr.bf16.mxu1 %v11579_v2  ;;  %v6087_v48 = vld [vmem:[#allocation10 + $0x1e28] sm:$0xff]  ;;  %v11597_v2 = vpack.c.bf16 %v6080_v23, %v6076_v41  ;;  %v11485_v41 = vpack.c.bf16 %v6110_v28, %v6106_v35  ;;  %v6145_v9 = vld [vmem:[#allocation10 + $0x1ff8] sm:$0xff]  ;;  %v5883_v35 = vld [vmem:[#allocation2 + $0x10] sm:$0xf8] }
 0x4c4   : > { %v11471_v11 = vpack.c.bf16 %v6087_v48, %v6083_v39  ;;  %v6114_v39 = vld [vmem:[#allocation10 + $0x1f00] sm:$0xff]  ;;  %v11627_v54 = vpack.c.bf16 %v6145_v9, %v6141_v3  ;;  %v6510_v28 = vld [vmem:[#allocation10 + $0x2018] sm:$0xff]  ;;  %v6160_v59 = vrot.slane %v5883_v35, 3  ;;  %v6525_v9 = vld [vmem:[#allocation10 + $0x2090] sm:$0xff] }
 0x4c5   : > { %11454 = vmatpush1.bf16.msra.mxu0 %v11453_v30  ;;  %v6088_v30 = vld [vmem:[#allocation10 + $0x1e30] sm:$0xff]  ;;  %v6118_v48 = vld [vmem:[#allocation10 + $0x1f20] sm:$0xff]  ;;  %v6518_v27 = vld [vmem:[#allocation10 + $0x2058] sm:$0xff] }
 0x4c6   : > { %11582 = vmatpush1.bf16.msra.mxu1 %v11581_v37  ;;  %11456 = vmatprep.subr.bf16.mxu0 %v11455_v51  ;;  %v6091_v37 = vld [vmem:[#allocation10 + $0x1e48] sm:$0xff]  ;;  %v6522_v58 = vld [vmem:[#allocation10 + $0x2078] sm:$0xff]  ;;  %v6527_v3 = vld [vmem:[#allocation10 + $0x20a0] sm:$0xff] }
 0x4c7   : > { %11584 = vmatprep.subr.bf16.mxu1 %v11583_v0  ;;  %v6095_v51 = vld [vmem:[#allocation10 + $0x1e68] sm:$0xff]  ;;  %v11601_v0 = vpack.c.bf16 %v6088_v30, %v6084_v50  ;;  %v11489_v50 = vpack.c.bf16 %v6118_v48, %v6114_v39  ;;  %v6507_v39 = vld [vmem:[#allocation10 + $0x2000] sm:$0xff]  ;;  %v11763_v40 = vpack.c.bf16 %v6522_v58, %v6518_v27  ;;  %v6550_v27 = vld [vmem:[#allocation10 + $0x2158] sm:$0xff] }
 0x4c8   : > { %v11475_v31 = vpack.c.bf16 %v6095_v51, %v6091_v37  ;;  %v6122_v37 = vld [vmem:[#allocation10 + $0x1f40] sm:$0xff]  ;;  %v6554_v58 = vld [vmem:[#allocation10 + $0x2178] sm:$0xff] }
 0x4c9   : > { %11458 = vmatpush1.bf16.msra.mxu0 %v11457_v55  ;;  %v6096_v55 = vld [vmem:[#allocation10 + $0x1e70] sm:$0xff]  ;;  %v6126_v51 = vld [vmem:[#allocation10 + $0x1f60] sm:$0xff] }
 0x4ca   : > { %11586 = vmatpush1.bf16.msra.mxu1 %v11585_v15  ;;  %11460 = vmatprep.subr.bf16.mxu0 %v11459_v42  ;;  %v6099_v15 = vld [vmem:[#allocation10 + $0x1e88] sm:$0xff]  ;;  %v6511_v48 = vld [vmem:[#allocation10 + $0x2020] sm:$0xff] }
 0x4cb   : > { %11588 = vmatprep.subr.bf16.mxu1 %v11587_v18  ;;  %v6103_v42 = vld [vmem:[#allocation10 + $0x1ea8] sm:$0xff]  ;;  %v11605_v18 = vpack.c.bf16 %v6096_v55, %v6092_v62  ;;  %v11493_v62 = vpack.c.bf16 %v6126_v51, %v6122_v37  ;;  %v6170_v51 = vrot.slane %v5887_v4, 3  ;;  %v6531_v35 = vld [vmem:[#allocation10 + $0x20c0] sm:$0xff]  ;;  %v6542_v4 = vld [vmem:[#allocation10 + $0x2118] sm:$0xff] }
 0x4cc   : > { %v11479_v16 = vpack.c.bf16 %v6103_v42, %v6099_v15  ;;  %v6130_v15 = vld [vmem:[#allocation10 + $0x1f80] sm:$0xff] }
 0x4cd   : > { %11462 = vmatpush1.bf16.msra.mxu0 %v11461_v45  ;;  %v6104_v45 = vld [vmem:[#allocation10 + $0x1eb0] sm:$0xff]  ;;  %v6134_v42 = vld [vmem:[#allocation10 + $0x1fa0] sm:$0xff] }
 0x4ce   : > { %11590 = vmatpush1.bf16.msra.mxu1 %v11589_v47  ;;  %11464 = vmatprep.subr.bf16.mxu0 %v11463_v60  ;;  %v6107_v47 = vld [vmem:[#allocation10 + $0x1ec8] sm:$0xff] }
 0x4cf   : > { %11592 = vmatprep.subr.bf16.mxu1 %v11591_v14  ;;  %v6111_v60 = vld [vmem:[#allocation10 + $0x1ee8] sm:$0xff]  ;;  %v11609_v14 = vpack.c.bf16 %v6104_v45, %v6100_v57  ;;  %v11497_v57 = vpack.c.bf16 %v6134_v42, %v6130_v15 }
 0x4d0   : > { %v11483_v19 = vpack.c.bf16 %v6111_v60, %v6107_v47  ;;  %v6138_v47 = vld [vmem:[#allocation10 + $0x1fc0] sm:$0xff]  ;;  %v6524_v15 = vld [vmem:[#allocation10 + $0x2088] sm:$0xff] }
 0x4d1   : > { %11466 = vmatpush1.bf16.msra.mxu0 %v11465_v43  ;;  %v6112_v43 = vld [vmem:[#allocation10 + $0x1ef0] sm:$0xff]  ;;  %v6142_v60 = vld [vmem:[#allocation10 + $0x1fe0] sm:$0xff]  ;;  %v6528_v42 = vld [vmem:[#allocation10 + $0x20a8] sm:$0xff] }
 0x4d2   : > { %11594 = vmatpush1.bf16.msra.mxu1 %v11593_v7  ;;  %11468 = vmatprep.subr.bf16.mxu0 %v11467_v6  ;;  %v6115_v7 = vld [vmem:[#allocation10 + $0x1f08] sm:$0xff] }
 0x4d3   : > { %11596 = vmatprep.subr.bf16.mxu1 %v11595_v1  ;;  %v6119_v6 = vld [vmem:[#allocation10 + $0x1f28] sm:$0xff]  ;;  %v11613_v1 = vpack.c.bf16 %v6112_v43, %v6108_v56  ;;  %v6514_v56 = vld [vmem:[#allocation10 + $0x2038] sm:$0xff] }
 0x4d4   : > { %v11487_v23 = vpack.c.bf16 %v6119_v6, %v6115_v7  ;;  %v5888_v43 = vld [vmem:[#allocation2 + $0x58] sm:$0x7] }
 0x4d5   : > { %11470 = vmatpush1.bf16.msra.mxu0 %v11469_v26  ;;  %v6120_v26 = vld [vmem:[#allocation10 + $0x1f30] sm:$0xff] }
 0x4d6   : > { %11598 = vmatpush1.bf16.msra.mxu1 %v11597_v2  ;;  %11472 = vmatprep.subr.bf16.mxu0 %v11471_v11  ;;  %v6123_v2 = vld [vmem:[#allocation10 + $0x1f48] sm:$0xff] }
 0x4d7   : > { %11600 = vmatprep.subr.bf16.mxu1 %v11599_v36  ;;  %v6127_v11 = vld [vmem:[#allocation10 + $0x1f68] sm:$0xff]  ;;  %v11617_v36 = vpack.c.bf16 %v6120_v26, %v6116_v17  ;;  %v6509_v17 = vld [vmem:[#allocation10 + $0x2010] sm:$0xff] }
 0x4d8   : > { %v11491_v30 = vpack.c.bf16 %v6127_v11, %v6123_v2  ;;  %v6513_v26 = vld [vmem:[#allocation10 + $0x2030] sm:$0xff]  ;;  %v6516_v2 = vld [vmem:[#allocation10 + $0x2048] sm:$0xff] }
 0x4d9   : > { %11474 = vmatpush1.bf16.msra.mxu0 %v11473_v63  ;;  %v6128_v63 = vld [vmem:[#allocation10 + $0x1f70] sm:$0xff]  ;;  %v6520_v11 = vld [vmem:[#allocation10 + $0x2068] sm:$0xff]  ;;  %v11761_v37 = vpack.c.bf16 %v6513_v26, %v6509_v17 }
 0x4da   : > { %11602 = vmatpush1.bf16.msra.mxu1 %v11601_v0  ;;  %11476 = vmatprep.subr.bf16.mxu0 %v11475_v31  ;;  %v6131_v0 = vld [vmem:[#allocation10 + $0x1f88] sm:$0xff]  ;;  %v6541_v17 = vld [vmem:[#allocation10 + $0x2110] sm:$0xff] }
 0x4db   : > { %11604 = vmatprep.subr.bf16.mxu1 %v11603_v33  ;;  %v6135_v31 = vld [vmem:[#allocation10 + $0x1fa8] sm:$0xff]  ;;  %v11621_v33 = vpack.c.bf16 %v6128_v63, %v6124_v38  ;;  %v11635_v38 = vpack.c.bf16 %v6520_v11, %v6516_v2  ;;  %v6519_v63 = vld [vmem:[#allocation10 + $0x2060] sm:$0xff]  ;;  %v6545_v26 = vld [vmem:[#allocation10 + $0x2130] sm:$0xff] }
 0x4dc   : > { %v11495_v55 = vpack.c.bf16 %v6135_v31, %v6131_v0  ;;  %v6517_v0 = vld [vmem:[#allocation10 + $0x2050] sm:$0xff]  ;;  %v6548_v2 = vld [vmem:[#allocation10 + $0x2148] sm:$0xff] }
 0x4dd   : > { %11478 = vmatpush1.bf16.msra.mxu0 %v11477_v20  ;;  %v6136_v20 = vld [vmem:[#allocation10 + $0x1fb0] sm:$0xff]  ;;  %v6552_v11 = vld [vmem:[#allocation10 + $0x2168] sm:$0xff] }
 0x4de   : > { %11606 = vmatpush1.bf16.msra.mxu1 %v11605_v18  ;;  %11480 = vmatprep.subr.bf16.mxu0 %v11479_v16  ;;  %v6139_v18 = vld [vmem:[#allocation10 + $0x1fc8] sm:$0xff] }
 0x4df   : > { %11608 = vmatprep.subr.bf16.mxu1 %v11607_v13  ;;  %v6143_v16 = vld [vmem:[#allocation10 + $0x1fe8] sm:$0xff]  ;;  %v11625_v13 = vpack.c.bf16 %v6136_v20, %v6132_v44  ;;  %v6526_v44 = vld [vmem:[#allocation10 + $0x2098] sm:$0xff] }
 0x4e0   : > { %v11499_v45 = vpack.c.bf16 %v6143_v16, %v6139_v18  ;;  %v11639_v18 = vpack.c.bf16 %v6528_v42, %v6524_v15  ;;  %v6523_v16 = vld [vmem:[#allocation10 + $0x2080] sm:$0xff] }
 0x4e1   : > { %11482 = vmatpush1.bf16.msra.mxu0 %v11481_v61  ;;  %v6144_v61 = vld [vmem:[#allocation10 + $0x1ff0] sm:$0xff] }
 0x4e2   : > { %11610 = vmatpush1.bf16.msra.mxu1 %v11609_v14  ;;  %11484 = vmatprep.subr.bf16.mxu0 %v11483_v19  ;;  %v6508_v14 = vld [vmem:[#allocation10 + $0x2008] sm:$0xff]  ;;  %v11629_v7 = vpack.c.bf16 %v6144_v61, %v6140_v22  ;;  %v6534_v22 = vld [vmem:[#allocation10 + $0x20d8] sm:$0xff]  ;;  %v11641_v61 = vpack.c.bf16 %v6527_v3, %v6523_v16 }
 0x4e3   : > { %11612 = vmatprep.subr.bf16.mxu1 %v11611_v29  ;;  %v6512_v19 = vld [vmem:[#allocation10 + $0x2028] sm:$0xff]  ;;  %v11501_v29 = vpack.c.bf16 %v6142_v60, %v6138_v47  ;;  %v6566_v3 = vld [vmem:[#allocation10 + $0x21d8] sm:$0xff] }
 0x4e4   : > { %v11631_v6 = vpack.c.bf16 %v6512_v19, %v6508_v14  ;;  %v6532_v47 = vld [vmem:[#allocation10 + $0x20c8] sm:$0xff] }
 0x4e5   : > { %11486 = vmatpush1.bf16.msra.mxu0 %v11485_v41  ;;  %v13029_v41 = vld [vmem:[#allocation2 + $0x30] sm:$0xff]  ;;  %v6536_v60 = vld [vmem:[#allocation10 + $0x20e8] sm:$0xff] }
 0x4e6   : > { %11614 = vmatpush1.bf16.msra.mxu1 %v11613_v1  ;;  %11488 = vmatprep.subr.bf16.mxu0 %v11487_v23  ;;  %v6161_v1 = vrot.slane %v13029_v41, 3  ;;  %v11759_v23 = vpack.c.bf16 %v6514_v56, %v6510_v28  ;;  %v11643_v19 = vpack.c.bf16 %v6536_v60, %v6532_v47  ;;  %v6535_v28 = vld [vmem:[#allocation10 + $0x20e0] sm:$0xff]  ;;  %v6533_v56 = vld [vmem:[#allocation10 + $0x20d0] sm:$0xff]  ;;  %v6568_v16 = vld [vmem:[#allocation10 + $0x21e8] sm:$0xff] }
 0x4e7   : > { %11616 = vmatprep.subr.bf16.mxu1 %v11615_v49  ;;  %v6172_v49 = vrot.slane %v5888_v43, 3  ;;  %v6537_v43 = vld [vmem:[#allocation10 + $0x20f0] sm:$0xff]  ;;  %v11645_v41 = vpack.c.bf16 %v6535_v28, %v6531_v35  ;;  %v6563_v47 = vld [vmem:[#allocation10 + $0x21c0] sm:$0xff]  ;;  %v6574_v35 = vld [vmem:[#allocation10 + $0x2218] sm:$0xff] }
 0x4e8   : > { %v6171_v34 = vsel %vm2182_vm6, %v6161_v1, %v6170_v51  ;;  %v6551_v51 = vld [vmem:[#allocation10 + $0x2160] sm:$0xff]  ;;  %v6578_v28 = vld [vmem:[#allocation10 + $0x2238] sm:$0xff] }
 0x4e9   : > { %11490 = vmatpush1.bf16.msra.mxu0 %v11489_v50  ;;  %v6499_v50 = vld [vmem:[#allocation2 + $0x8] sm:$0xf0]  ;;  %v6173_v31 = vsel %vm2182_vm6, %v6164_v21, %v6172_v49  ;;  %v6567_v60 = vld [vmem:[#allocation10 + $0x21e0] sm:$0xff] }
 0x4ea   : > { %11618 = vmatpush1.bf16.msra.mxu1 %v11617_v36  ;;  %11492 = vmatprep.subr.bf16.mxu0 %v11491_v30  ;;  %v11633_v36 = vpack.c.bf16 %v6511_v48, %v6507_v39  ;;  %v6162_v30 = vsel %vm2182_vm6, %v6160_v59, %v6161_v1  ;;  %v6774_v53 = vrot.slane %v6499_v50, 4  ;;  %v6546_v59 = vld [vmem:[#allocation10 + $0x2138] sm:$0xff]  ;;  %v11773_v1 = vpack.c.bf16 %v6537_v43, %v6533_v56  ;;  %v6539_v39 = vld [vmem:[#allocation10 + $0x2100] sm:$0xff] }
 0x4eb   : > { %11620 = vmatprep.subr.bf16.mxu1 %v11619_v25  ;;  %v6515_v25 = vld [vmem:[#allocation10 + $0x2040] sm:$0xff]  ;;  %v11775_v49 = vpack.c.bf16 %v6546_v59, %v6542_v4  ;;  %v11661_v56 = vpack.c.bf16 %v6567_v60, %v6563_v47  ;;  %v6573_v4 = vld [vmem:[#allocation10 + $0x2210] sm:$0xff]  ;;  %v11791_v59 = vpack.c.bf16 %v6578_v28, %v6574_v35  ;;  %v6606_v47 = vld [vmem:[#allocation10 + $0x2318] sm:$0xff] }
 0x4ec   : > { %v11637_v20 = vpack.c.bf16 %v6519_v63, %v6515_v25  ;;  %v6543_v48 = vld [vmem:[#allocation10 + $0x2120] sm:$0xff]  ;;  %v11779_v25 = vpack.c.bf16 %v6554_v58, %v6550_v27  ;;  %v6553_v63 = vld [vmem:[#allocation10 + $0x2170] sm:$0xff]  ;;  %v6610_v60 = vld [vmem:[#allocation10 + $0x2338] sm:$0xff] }
 0x4ed   : > { %11494 = vmatpush1.bf16.msra.mxu0 %v11493_v62  ;;  %v14555_v62 = vld [vmem:[#allocation2 + $0x28] sm:$0xff]  ;;  %v11649_v50 = vpack.c.bf16 %v6543_v48, %v6539_v39  ;;  %v6581_v27 = vld [vmem:[#allocation10 + $0x2250] sm:$0xff]  ;;  %v11807_v28 = vpack.c.bf16 %v6610_v60, %v6606_v47 }
 0x4ee   : > { %11622 = vmatpush1.bf16.msra.mxu1 %v11621_v33  ;;  %11496 = vmatprep.subr.bf16.mxu0 %v11495_v55  ;;  %v6775_v33 = vrot.slane %v14555_v62, 4  ;;  %v6521_v55 = vld [vmem:[#allocation10 + $0x2070] sm:$0xff]  ;;  %v6582_v39 = vld [vmem:[#allocation10 + $0x2258] sm:$0xff] }
 0x4ef   : > { %11624 = vmatprep.subr.bf16.mxu1 %v11623_v52  ;;  %v6530_v52 = vld [vmem:[#allocation10 + $0x20b8] sm:$0xff]  ;;  %v11765_v21 = vpack.c.bf16 %v6521_v55, %v6517_v0  ;;  %v6556_v0 = vld [vmem:[#allocation10 + $0x2188] sm:$0xff]  ;;  %v6605_v35 = vld [vmem:[#allocation10 + $0x2310] sm:$0xff] }
 0x4f0   : > { %v6586_v48 = vld [vmem:[#allocation10 + $0x2278] sm:$0xff]  ;;  %v6502_v47 = vld [vmem:[#allocation2 + $0x40] sm:$0xf] }
 0x4f1   : > { %11498 = vmatpush1.bf16.msra.mxu0 %v11497_v57  ;;  %v6776_v57 = vsel %vm757_vm0, %v6774_v53, %v6775_v33  ;;  %v6562_v53 = vld [vmem:[#allocation10 + $0x21b8] sm:$0xff]  ;;  %v11795_v58 = vpack.c.bf16 %v6586_v48, %v6582_v39  ;;  %v6613_v39 = vld [vmem:[#allocation10 + $0x2350] sm:$0xff] }
 0x4f2   : > { %11626 = vmatpush1.bf16.msra.mxu1 %v11625_v13  ;;  %11500 = vmatprep.subr.bf16.mxu0 %v11499_v45  ;;  %v11767_v13 = vpack.c.bf16 %v6530_v52, %v6526_v44  ;;  %v6529_v45 = vld [vmem:[#allocation10 + $0x20b0] sm:$0xff]  ;;  %v6555_v44 = vld [vmem:[#allocation10 + $0x2180] sm:$0xff] }
 0x4f3   : > { %11628 = vmatprep.subr.bf16.mxu1 %v11627_v54  ;;  %v6538_v54 = vld [vmem:[#allocation10 + $0x20f8] sm:$0xff]  ;;  %v11769_v14 = vpack.c.bf16 %v6529_v45, %v6525_v9  ;;  %v6559_v52 = vld [vmem:[#allocation10 + $0x21a0] sm:$0xff] }
 0x4f4   : > { %v6570_v9 = vld [vmem:[#allocation10 + $0x21f8] sm:$0xff] }
 0x4f5   : > { %11502 = vmatpush1.bf16.msra.mxu0 %v11501_v29  ;;  %v11771_v29 = vpack.c.bf16 %v6538_v54, %v6534_v22  ;;  %v6565_v22 = vld [vmem:[#allocation10 + $0x21d0] sm:$0xff]  ;;  %v11787_v54 = vpack.c.bf16 %v6570_v9, %v6566_v3 }
 0x4f6   : > { %11630 = vmatpush1.bf16.msra.mxu1 %v11629_v7  ;;  %11632 = vmatprep.subr.bf16.mxu0 %v11631_v6  ;;  %v6540_v7 = vld [vmem:[#allocation10 + $0x2108] sm:$0xff]  ;;  %v6597_v3 = vld [vmem:[#allocation10 + $0x22d0] sm:$0xff] }
 0x4f7   : > { %11760 = vmatprep.subr.bf16.mxu1 %v11759_v23  ;;  %v6544_v6 = vld [vmem:[#allocation10 + $0x2128] sm:$0xff] }
 0x4f8   : > { %6324 = vmatmul.mubr.f32.vlgmr.msra.gmra.mrb[16].mxu0 %v6162_v30  ;;  %v11647_v23 = vpack.c.bf16 %v6544_v6, %v6540_v7  ;;  %v6571_v7 = vld [vmem:[#allocation10 + $0x2200] sm:$0xff] }
 0x4f9   : > { %6478 = vmatmul.mubr.f32.vlgmr.msra.gmra.mrb[16].mxu1 %v6162_v30  ;;  %6329 = vmatprep.mubr.f32.mxu0 %v6173_v31  ;;  %v11651_v30 = vpack.c.bf16 %v6552_v11, %v6548_v2  ;;  %v6575_v6 = vld [vmem:[#allocation10 + $0x2220] sm:$0xff] }
 0x4fa   : > { %6483 = vmatprep.mubr.f32.mxu1 %v6173_v31  ;;  %11634 = vmatpush1.bf16.msra.mxu0 %v11633_v36  ;;  %v11777_v36 = vpack.c.bf16 %v6545_v26, %v6541_v17  ;;  %v6560_v31 = vld [vmem:[#allocation10 + $0x21a8] sm:$0xff]  ;;  %v11665_v17 = vpack.c.bf16 %v6575_v6, %v6571_v7  ;;  %v6579_v2 = vld [vmem:[#allocation10 + $0x2240] sm:$0xff]  ;;  %v6614_v7 = vld [vmem:[#allocation10 + $0x2358] sm:$0xff] }
 0x4fb   : > { %11762 = vmatpush1.bf16.msra.mxu1 %v11761_v37  ;;  %11636 = vmatprep.subr.bf16.mxu0 %v11635_v38  ;;  %v6547_v37 = vld [vmem:[#allocation10 + $0x2140] sm:$0xff]  ;;  %v6549_v38 = vld [vmem:[#allocation10 + $0x2150] sm:$0xff]  ;;  %v11655_v42 = vpack.c.bf16 %v6560_v31, %v6556_v0  ;;  %v6618_v6 = vld [vmem:[#allocation10 + $0x2378] sm:$0xff] }
 0x4fc   : > { %6330 = vmatmul.mubr.f32.gmra.mrb[18].mxu0 %v6171_v34  ;;  %11764 = vmatprep.subr.bf16.mxu1 %v11763_v40  ;;  %v6558_v40 = vld [vmem:[#allocation10 + $0x2198] sm:$0xff]  ;;  %v11653_v55 = vpack.c.bf16 %v6551_v51, %v6547_v37  ;;  %v11781_v15 = vpack.c.bf16 %v6553_v63, %v6549_v38  ;;  %v6583_v11 = vld [vmem:[#allocation10 + $0x2260] sm:$0xff]  ;;  %v11811_v48 = vpack.c.bf16 %v6618_v6, %v6614_v7 }
 0x4fd   : > { %6484 = vmatmul.mubr.f32.gmra.mrb[18].mxu1 %v6171_v34  ;;  %6863 = vmatprep.mubr.f32.mxu0 %v6776_v57  ;;  %v11783_v34 = vpack.c.bf16 %v6562_v53, %v6558_v40  ;;  %v6590_v37 = vld [vmem:[#allocation10 + $0x2298] sm:$0xff]  ;;  %v11669_v38 = vpack.c.bf16 %v6583_v11, %v6579_v2  ;;  %v6587_v0 = vld [vmem:[#allocation10 + $0x2280] sm:$0xff]  ;;  %v6589_v40 = vld [vmem:[#allocation10 + $0x2290] sm:$0xff] }
 0x4fe   : > { %11638 = vmatpush1.bf16.msra.mxu0 %v11637_v20  ;;  %7017 = vmatprep.mubr.f32.mxu1 %v6776_v57  ;;  %v6557_v20 = vld [vmem:[#allocation10 + $0x2190] sm:$0xff]  ;;  %v11657_v57 = vpack.c.bf16 %v6559_v52, %v6555_v44  ;;  %v6594_v51 = vld [vmem:[#allocation10 + $0x22b8] sm:$0xff]  ;;  %v6591_v31 = vld [vmem:[#allocation10 + $0x22a0] sm:$0xff] }
 0x4ff   : > { %11766 = vmatpush1.bf16.msra.mxu1 %v11765_v21  ;;  %11640 = vmatprep.subr.bf16.mxu0 %v11639_v18  ;;  %v6561_v21 = vld [vmem:[#allocation10 + $0x21b0] sm:$0xff]  ;;  %v6564_v18 = vld [vmem:[#allocation10 + $0x21c8] sm:$0xff]  ;;  %v11799_v53 = vpack.c.bf16 %v6594_v51, %v6590_v37  ;;  %v6598_v44 = vld [vmem:[#allocation10 + $0x22d8] sm:$0xff] }
 0x500   : > { %11768 = vmatprep.subr.bf16.mxu1 %v11767_v13  ;;  %v11785_v13 = vpack.c.bf16 %v6561_v21, %v6557_v20  ;;  %v11659_v45 = vpack.c.bf16 %v6568_v16, %v6564_v18  ;;  %v6602_v52 = vld [vmem:[#allocation10 + $0x22f8] sm:$0xff]  ;;  %v11673_v20 = vpack.c.bf16 %v6591_v31, %v6587_v0  ;;  %v6595_v18 = vld [vmem:[#allocation10 + $0x22c0] sm:$0xff]  ;;  %v6621_v37 = vld [vmem:[#allocation10 + $0x2390] sm:$0xff] }
 0x501   : > { %v6599_v16 = vld [vmem:[#allocation10 + $0x22e0] sm:$0xff]  ;;  %v11803_v9 = vpack.c.bf16 %v6602_v52, %v6598_v44  ;;  %v6622_v2 = vld [vmem:[#allocation10 + $0x2398] sm:$0xff]  ;;  %v6629_v44 = vld [vmem:[#allocation10 + $0x23d0] sm:$0xff] }
 0x502   : > { %11642 = vmatpush1.bf16.msra.mxu0 %v11641_v61  ;;  %v6569_v61 = vld [vmem:[#allocation10 + $0x21f0] sm:$0xff]  ;;  %v6626_v11 = vld [vmem:[#allocation10 + $0x23b8] sm:$0xff] }
 0x503   : > { %11770 = vmatpush1.bf16.msra.mxu1 %v11769_v14  ;;  %11644 = vmatprep.subr.bf16.mxu0 %v11643_v19  ;;  %v6572_v14 = vld [vmem:[#allocation10 + $0x2208] sm:$0xff]  ;;  %v11815_v51 = vpack.c.bf16 %v6626_v11, %v6622_v2  ;;  %v6630_v0 = vld [vmem:[#allocation10 + $0x23d8] sm:$0xff] }
 0x504   : > { %11772 = vmatprep.subr.bf16.mxu1 %v11771_v29  ;;  %v6576_v19 = vld [vmem:[#allocation10 + $0x2228] sm:$0xff]  ;;  %v11789_v29 = vpack.c.bf16 %v6569_v61, %v6565_v22  ;;  %v11677_v22 = vpack.c.bf16 %v6599_v16, %v6595_v18  ;;  %v6634_v31 = vld [vmem:[#allocation10 + $0x23f8] sm:$0xff]  ;;  %v6498_v18 = vld [vmem:[#allocation2] sm:$0xf0] }
 0x505   : > { %v11663_v43 = vpack.c.bf16 %v6576_v19, %v6572_v14  ;;  %v6603_v14 = vld [vmem:[#allocation10 + $0x2300] sm:$0xff]  ;;  %v11819_v52 = vpack.c.bf16 %v6634_v31, %v6630_v0  ;;  %v6638_v16 = vld [vmem:[#allocation10 + $0x2418] sm:$0xff]  ;;  %v6771_v60 = vrot.slane %v6498_v18, 4  ;;  %v6653_v31 = vld [vmem:[#allocation10 + $0x2490] sm:$0xff] }
 0x506   : > { %11646 = vmatpush1.bf16.msra.mxu0 %v11645_v41  ;;  %v6577_v41 = vld [vmem:[#allocation10 + $0x2230] sm:$0xff]  ;;  %v6607_v19 = vld [vmem:[#allocation10 + $0x2320] sm:$0xff]  ;;  %v6646_v7 = vld [vmem:[#allocation10 + $0x2458] sm:$0xff] }
 0x507   : > { %11774 = vmatpush1.bf16.msra.mxu1 %v11773_v1  ;;  %11648 = vmatprep.subr.bf16.mxu0 %v11647_v23  ;;  %v6580_v1 = vld [vmem:[#allocation10 + $0x2248] sm:$0xff]  ;;  %v6650_v6 = vld [vmem:[#allocation10 + $0x2478] sm:$0xff]  ;;  %v6655_v0 = vld [vmem:[#allocation10 + $0x24a0] sm:$0xff] }
 0x508   : > { %11776 = vmatprep.subr.bf16.mxu1 %v11775_v49  ;;  %v6584_v23 = vld [vmem:[#allocation10 + $0x2268] sm:$0xff]  ;;  %v11793_v49 = vpack.c.bf16 %v6577_v41, %v6573_v4  ;;  %v11681_v4 = vpack.c.bf16 %v6607_v19, %v6603_v14  ;;  %v6635_v14 = vld [vmem:[#allocation10 + $0x2400] sm:$0xff]  ;;  %v11827_v2 = vpack.c.bf16 %v6650_v6, %v6646_v7  ;;  %v6678_v7 = vld [vmem:[#allocation10 + $0x2558] sm:$0xff] }
 0x509   : > { %v11667_v26 = vpack.c.bf16 %v6584_v23, %v6580_v1  ;;  %v6611_v1 = vld [vmem:[#allocation10 + $0x2340] sm:$0xff]  ;;  %v6682_v6 = vld [vmem:[#allocation10 + $0x2578] sm:$0xff] }
 0x50a   : > { %11650 = vmatpush1.bf16.msra.mxu0 %v11649_v50  ;;  %v6585_v50 = vld [vmem:[#allocation10 + $0x2270] sm:$0xff]  ;;  %v6615_v23 = vld [vmem:[#allocation10 + $0x2360] sm:$0xff] }
 0x50b   : > { %11778 = vmatpush1.bf16.msra.mxu1 %v11777_v36  ;;  %11652 = vmatprep.subr.bf16.mxu0 %v11651_v30  ;;  %v6588_v36 = vld [vmem:[#allocation10 + $0x2288] sm:$0xff]  ;;  %v6639_v19 = vld [vmem:[#allocation10 + $0x2420] sm:$0xff] }
 0x50c   : > { %11780 = vmatprep.subr.bf16.mxu1 %v11779_v25  ;;  %v6592_v30 = vld [vmem:[#allocation10 + $0x22a8] sm:$0xff]  ;;  %v11797_v25 = vpack.c.bf16 %v6585_v50, %v6581_v27  ;;  %v11685_v27 = vpack.c.bf16 %v6615_v23, %v6611_v1  ;;  %v6783_v23 = vrot.slane %v6502_v47, 4  ;;  %v6659_v18 = vld [vmem:[#allocation10 + $0x24c0] sm:$0xff]  ;;  %v6670_v47 = vld [vmem:[#allocation10 + $0x2518] sm:$0xff] }
 0x50d   : > { %v11671_v63 = vpack.c.bf16 %v6592_v30, %v6588_v36  ;;  %v6619_v36 = vld [vmem:[#allocation10 + $0x2380] sm:$0xff] }
 0x50e   : > { %11654 = vmatpush1.bf16.msra.mxu0 %v11653_v55  ;;  %v6593_v55 = vld [vmem:[#allocation10 + $0x22b0] sm:$0xff]  ;;  %v6623_v30 = vld [vmem:[#allocation10 + $0x23a0] sm:$0xff] }
 0x50f   : > { %11782 = vmatpush1.bf16.msra.mxu1 %v11781_v15  ;;  %11656 = vmatprep.subr.bf16.mxu0 %v11655_v42  ;;  %v6596_v15 = vld [vmem:[#allocation10 + $0x22c8] sm:$0xff] }
 0x510   : > { %11784 = vmatprep.subr.bf16.mxu1 %v11783_v34  ;;  %v6600_v42 = vld [vmem:[#allocation10 + $0x22e8] sm:$0xff]  ;;  %v11801_v34 = vpack.c.bf16 %v6593_v55, %v6589_v40  ;;  %v11689_v40 = vpack.c.bf16 %v6623_v30, %v6619_v36 }
 0x511   : > { %v11675_v21 = vpack.c.bf16 %v6600_v42, %v6596_v15  ;;  %v6627_v15 = vld [vmem:[#allocation10 + $0x23c0] sm:$0xff]  ;;  %v6652_v36 = vld [vmem:[#allocation10 + $0x2488] sm:$0xff] }
 0x512   : > { %11658 = vmatpush1.bf16.msra.mxu0 %v11657_v57  ;;  %v6601_v57 = vld [vmem:[#allocation10 + $0x22f0] sm:$0xff]  ;;  %v6631_v42 = vld [vmem:[#allocation10 + $0x23e0] sm:$0xff]  ;;  %v6656_v30 = vld [vmem:[#allocation10 + $0x24a8] sm:$0xff] }
 0x513   : > { %11786 = vmatpush1.bf16.msra.mxu1 %v11785_v13  ;;  %11660 = vmatprep.subr.bf16.mxu0 %v11659_v45  ;;  %v6604_v13 = vld [vmem:[#allocation10 + $0x2308] sm:$0xff] }
 0x514   : > { %11788 = vmatprep.subr.bf16.mxu1 %v11787_v54  ;;  %v6608_v45 = vld [vmem:[#allocation10 + $0x2328] sm:$0xff]  ;;  %v11805_v54 = vpack.c.bf16 %v6601_v57, %v6597_v3  ;;  %v6642_v3 = vld [vmem:[#allocation10 + $0x2438] sm:$0xff] }
 0x515   : > { %v11679_v61 = vpack.c.bf16 %v6608_v45, %v6604_v13  ;;  %v6503_v57 = vld [vmem:[#allocation2 + $0x48] sm:$0xf] }
 0x516   : > { %11662 = vmatpush1.bf16.msra.mxu0 %v11661_v56  ;;  %v6609_v56 = vld [vmem:[#allocation10 + $0x2330] sm:$0xff] }
 0x517   : > { %11790 = vmatpush1.bf16.msra.mxu1 %v11789_v29  ;;  %11664 = vmatprep.subr.bf16.mxu0 %v11663_v43  ;;  %v6612_v29 = vld [vmem:[#allocation10 + $0x2348] sm:$0xff] }
 0x518   : > { %11792 = vmatprep.subr.bf16.mxu1 %v11791_v59  ;;  %v6616_v43 = vld [vmem:[#allocation10 + $0x2368] sm:$0xff]  ;;  %v11809_v59 = vpack.c.bf16 %v6609_v56, %v6605_v35  ;;  %v6637_v35 = vld [vmem:[#allocation10 + $0x2410] sm:$0xff] }
 0x519   : > { %v11683_v41 = vpack.c.bf16 %v6616_v43, %v6612_v29  ;;  %v6641_v56 = vld [vmem:[#allocation10 + $0x2430] sm:$0xff]  ;;  %v6644_v29 = vld [vmem:[#allocation10 + $0x2448] sm:$0xff] }
 0x51a   : > { %11666 = vmatpush1.bf16.msra.mxu0 %v11665_v17  ;;  %v6617_v17 = vld [vmem:[#allocation10 + $0x2370] sm:$0xff]  ;;  %v6648_v43 = vld [vmem:[#allocation10 + $0x2468] sm:$0xff]  ;;  %v11825_v1 = vpack.c.bf16 %v6641_v56, %v6637_v35 }
 0x51b   : > { %11794 = vmatpush1.bf16.msra.mxu1 %v11793_v49  ;;  %11668 = vmatprep.subr.bf16.mxu0 %v11667_v26  ;;  %v6620_v49 = vld [vmem:[#allocation10 + $0x2388] sm:$0xff]  ;;  %v6669_v35 = vld [vmem:[#allocation10 + $0x2510] sm:$0xff] }
 0x51c   : > { %11796 = vmatprep.subr.bf16.mxu1 %v11795_v58  ;;  %v6624_v26 = vld [vmem:[#allocation10 + $0x23a8] sm:$0xff]  ;;  %v11813_v58 = vpack.c.bf16 %v6617_v17, %v6613_v39  ;;  %v11699_v39 = vpack.c.bf16 %v6648_v43, %v6644_v29  ;;  %v6647_v17 = vld [vmem:[#allocation10 + $0x2460] sm:$0xff]  ;;  %v6673_v56 = vld [vmem:[#allocation10 + $0x2530] sm:$0xff] }
 0x51d   : > { %v11687_v50 = vpack.c.bf16 %v6624_v26, %v6620_v49  ;;  %v6645_v49 = vld [vmem:[#allocation10 + $0x2450] sm:$0xff]  ;;  %v6676_v29 = vld [vmem:[#allocation10 + $0x2548] sm:$0xff] }
 0x51e   : > { %11670 = vmatpush1.bf16.msra.mxu0 %v11669_v38  ;;  %v6625_v38 = vld [vmem:[#allocation10 + $0x23b0] sm:$0xff]  ;;  %v6680_v43 = vld [vmem:[#allocation10 + $0x2568] sm:$0xff] }
 0x51f   : > { %11798 = vmatpush1.bf16.msra.mxu1 %v11797_v25  ;;  %11672 = vmatprep.subr.bf16.mxu0 %v11671_v63  ;;  %v6628_v25 = vld [vmem:[#allocation10 + $0x23c8] sm:$0xff] }
 0x520   : > { %11800 = vmatprep.subr.bf16.mxu1 %v11799_v53  ;;  %v6632_v63 = vld [vmem:[#allocation10 + $0x23e8] sm:$0xff]  ;;  %v11817_v53 = vpack.c.bf16 %v6625_v38, %v6621_v37  ;;  %v6654_v37 = vld [vmem:[#allocation10 + $0x2498] sm:$0xff] }
 0x521   : > { %v11691_v55 = vpack.c.bf16 %v6632_v63, %v6628_v25  ;;  %v11703_v25 = vpack.c.bf16 %v6656_v30, %v6652_v36  ;;  %v6651_v63 = vld [vmem:[#allocation10 + $0x2480] sm:$0xff] }
 0x522   : > { %11674 = vmatpush1.bf16.msra.mxu0 %v11673_v20  ;;  %v6633_v20 = vld [vmem:[#allocation10 + $0x23f0] sm:$0xff] }
 0x523   : > { %11802 = vmatpush1.bf16.msra.mxu1 %v11801_v34  ;;  %11676 = vmatprep.subr.bf16.mxu0 %v11675_v21  ;;  %v6636_v34 = vld [vmem:[#allocation10 + $0x2408] sm:$0xff]  ;;  %v11821_v13 = vpack.c.bf16 %v6633_v20, %v6629_v44  ;;  %v6662_v44 = vld [vmem:[#allocation10 + $0x24d8] sm:$0xff]  ;;  %v11705_v20 = vpack.c.bf16 %v6655_v0, %v6651_v63 }
 0x524   : > { %11804 = vmatprep.subr.bf16.mxu1 %v11803_v9  ;;  %v6640_v21 = vld [vmem:[#allocation10 + $0x2428] sm:$0xff]  ;;  %v11693_v9 = vpack.c.bf16 %v6631_v42, %v6627_v15  ;;  %v6694_v0 = vld [vmem:[#allocation10 + $0x25d8] sm:$0xff] }
 0x525   : > { %v11695_v45 = vpack.c.bf16 %v6640_v21, %v6636_v34  ;;  %v6660_v15 = vld [vmem:[#allocation10 + $0x24c8] sm:$0xff] }
 0x526   : > { %11678 = vmatpush1.bf16.msra.mxu0 %v11677_v22  ;;  %v13031_v22 = vld [vmem:[#allocation2 + $0x20] sm:$0xff]  ;;  %v6664_v42 = vld [vmem:[#allocation10 + $0x24e8] sm:$0xff] }
 0x527   : > { %11806 = vmatpush1.bf16.msra.mxu1 %v11805_v54  ;;  %11680 = vmatprep.subr.bf16.mxu0 %v11679_v61  ;;  %v6772_v54 = vrot.slane %v13031_v22, 4  ;;  %v11823_v61 = vpack.c.bf16 %v6642_v3, %v6638_v16  ;;  %v11707_v21 = vpack.c.bf16 %v6664_v42, %v6660_v15  ;;  %v6663_v16 = vld [vmem:[#allocation10 + $0x24e0] sm:$0xff]  ;;  %v6661_v3 = vld [vmem:[#allocation10 + $0x24d0] sm:$0xff]  ;;  %v6696_v63 = vld [vmem:[#allocation10 + $0x25e8] sm:$0xff] }
 0x528   : > { %11808 = vmatprep.subr.bf16.mxu1 %v11807_v28  ;;  %v6785_v28 = vrot.slane %v6503_v57, 4  ;;  %v6665_v57 = vld [vmem:[#allocation10 + $0x24f0] sm:$0xff]  ;;  %v11709_v22 = vpack.c.bf16 %v6663_v16, %v6659_v18  ;;  %v6691_v15 = vld [vmem:[#allocation10 + $0x25c0] sm:$0xff]  ;;  %v6702_v18 = vld [vmem:[#allocation10 + $0x2618] sm:$0xff] }
 0x529   : > { %v6784_v62 = vsel %vm757_vm0, %v6772_v54, %v6783_v23  ;;  %v6679_v23 = vld [vmem:[#allocation10 + $0x2560] sm:$0xff]  ;;  %v6706_v16 = vld [vmem:[#allocation10 + $0x2638] sm:$0xff] }
 0x52a   : > { %11682 = vmatpush1.bf16.msra.mxu0 %v11681_v4  ;;  %v6501_v4 = vld [vmem:[#allocation2 + $0x18] sm:$0xf0]  ;;  %v6786_v26 = vsel %vm757_vm0, %v6775_v33, %v6785_v28  ;;  %v6695_v42 = vld [vmem:[#allocation10 + $0x25e0] sm:$0xff] }
 0x52b   : > { %11810 = vmatpush1.bf16.msra.mxu1 %v11809_v59  ;;  %11684 = vmatprep.subr.bf16.mxu0 %v11683_v41  ;;  %v11697_v59 = vpack.c.bf16 %v6639_v19, %v6635_v14  ;;  %v6773_v41 = vsel %vm757_vm0, %v6771_v60, %v6772_v54  ;;  %v6780_v11 = vrot.slane %v6501_v4, 4  ;;  %v6674_v60 = vld [vmem:[#allocation10 + $0x2538] sm:$0xff]  ;;  %v11837_v54 = vpack.c.bf16 %v6665_v57, %v6661_v3  ;;  %v6667_v14 = vld [vmem:[#allocation10 + $0x2500] sm:$0xff] }
 0x52c   : > { %11812 = vmatprep.subr.bf16.mxu1 %v11811_v48  ;;  %v6643_v48 = vld [vmem:[#allocation10 + $0x2440] sm:$0xff]  ;;  %v11839_v28 = vpack.c.bf16 %v6674_v60, %v6670_v47  ;;  %v11725_v3 = vpack.c.bf16 %v6695_v42, %v6691_v15  ;;  %v6701_v47 = vld [vmem:[#allocation10 + $0x2610] sm:$0xff]  ;;  %v11855_v60 = vpack.c.bf16 %v6706_v16, %v6702_v18  ;;  %v6734_v15 = vld [vmem:[#allocation10 + $0x2718] sm:$0xff] }
 0x52d   : > { %v11701_v38 = vpack.c.bf16 %v6647_v17, %v6643_v48  ;;  %v6671_v19 = vld [vmem:[#allocation10 + $0x2520] sm:$0xff]  ;;  %v11843_v48 = vpack.c.bf16 %v6682_v6, %v6678_v7  ;;  %v6681_v17 = vld [vmem:[#allocation10 + $0x2570] sm:$0xff]  ;;  %v6738_v42 = vld [vmem:[#allocation10 + $0x2738] sm:$0xff] }
 0x52e   : > { %11686 = vmatpush1.bf16.msra.mxu0 %v11685_v27  ;;  %v14566_v27 = vld [vmem:[#allocation2 + $0x38] sm:$0xff]  ;;  %v11713_v4 = vpack.c.bf16 %v6671_v19, %v6667_v14  ;;  %v6710_v14 = vld [vmem:[#allocation10 + $0x2658] sm:$0xff]  ;;  %v6709_v7 = vld [vmem:[#allocation10 + $0x2650] sm:$0xff]  ;;  %v11871_v16 = vpack.c.bf16 %v6738_v42, %v6734_v15 }
 0x52f   : > { %11814 = vmatpush1.bf16.msra.mxu1 %v11813_v58  ;;  %11688 = vmatprep.subr.bf16.mxu0 %v11687_v50  ;;  %v6781_v58 = vrot.slane %v14566_v27, 4  ;;  %v6649_v50 = vld [vmem:[#allocation10 + $0x2470] sm:$0xff]  ;;  %v6714_v19 = vld [vmem:[#allocation10 + $0x2678] sm:$0xff]  ;;  %v7540_v27 = vld [vmem:[#allocation13 + $0x480] sm:$0xff] }
 0x530   : > { %11816 = vmatprep.subr.bf16.mxu1 %v11815_v51  ;;  %v6658_v51 = vld [vmem:[#allocation10 + $0x24b8] sm:$0xff]  ;;  %v11829_v33 = vpack.c.bf16 %v6649_v50, %v6645_v49  ;;  %v6684_v49 = vld [vmem:[#allocation10 + $0x2588] sm:$0xff]  ;;  %v11859_v6 = vpack.c.bf16 %v6714_v19, %v6710_v14  ;;  %v6733_v18 = vld [vmem:[#allocation10 + $0x2710] sm:$0xff] }
 0x531   : > { %v6741_v14 = vld [vmem:[#allocation10 + $0x2750] sm:$0xff] }
 0x532   : > { %11690 = vmatpush1.bf16.msra.mxu0 %v11689_v40  ;;  %v6782_v40 = vsel %vm757_vm0, %v6780_v11, %v6781_v58  ;;  %v6690_v11 = vld [vmem:[#allocation10 + $0x25b8] sm:$0xff] }
 0x533   : > { %11818 = vmatpush1.bf16.msra.mxu1 %v11817_v53  ;;  %11692 = vmatprep.subr.bf16.mxu0 %v11691_v55  ;;  %v11831_v53 = vpack.c.bf16 %v6658_v51, %v6654_v37  ;;  %v6657_v55 = vld [vmem:[#allocation10 + $0x24b0] sm:$0xff]  ;;  %v6683_v37 = vld [vmem:[#allocation10 + $0x2580] sm:$0xff] }
 0x534   : > { %11820 = vmatprep.subr.bf16.mxu1 %v11819_v52  ;;  %v6666_v52 = vld [vmem:[#allocation10 + $0x24f8] sm:$0xff]  ;;  %v11833_v34 = vpack.c.bf16 %v6657_v55, %v6653_v31  ;;  %v6687_v51 = vld [vmem:[#allocation10 + $0x25a0] sm:$0xff] }
 0x535   : > { %v6698_v31 = vld [vmem:[#allocation10 + $0x25f8] sm:$0xff] }
 0x536   : > { %11694 = vmatpush1.bf16.msra.mxu0 %v11693_v9  ;;  %v11835_v9 = vpack.c.bf16 %v6666_v52, %v6662_v44  ;;  %v6693_v44 = vld [vmem:[#allocation10 + $0x25d0] sm:$0xff]  ;;  %v11851_v52 = vpack.c.bf16 %v6698_v31, %v6694_v0 }
 0x537   : > { %11822 = vmatpush1.bf16.msra.mxu1 %v11821_v13  ;;  %11696 = vmatprep.subr.bf16.mxu0 %v11695_v45  ;;  %v6668_v13 = vld [vmem:[#allocation10 + $0x2508] sm:$0xff]  ;;  %v6725_v0 = vld [vmem:[#allocation10 + $0x26d0] sm:$0xff] }
 0x538   : > { %11824 = vmatprep.subr.bf16.mxu1 %v11823_v61  ;;  %v6672_v45 = vld [vmem:[#allocation10 + $0x2528] sm:$0xff] }
 0x539   : > { %6864 = vmatmul.mubr.f32.vlgmr.msra.gmra.mrb[16].mxu0 %v6773_v41  ;;  %v11711_v61 = vpack.c.bf16 %v6672_v45, %v6668_v13  ;;  %v6699_v13 = vld [vmem:[#allocation10 + $0x2600] sm:$0xff] }
 0x53a   : > { %7018 = vmatmul.mubr.f32.vlgmr.msra.gmra.mrb[16].mxu1 %v6773_v41  ;;  %6869 = vmatprep.mubr.f32.mxu0 %v6786_v26  ;;  %v11715_v41 = vpack.c.bf16 %v6680_v43, %v6676_v29  ;;  %v6703_v45 = vld [vmem:[#allocation10 + $0x2620] sm:$0xff] }
 0x53b   : > { %11698 = vmatpush1.bf16.msra.mxu0 %v11697_v59  ;;  %7023 = vmatprep.mubr.f32.mxu1 %v6786_v26  ;;  %v11841_v59 = vpack.c.bf16 %v6673_v56, %v6669_v35  ;;  %v6688_v26 = vld [vmem:[#allocation10 + $0x25a8] sm:$0xff]  ;;  %v11729_v35 = vpack.c.bf16 %v6703_v45, %v6699_v13  ;;  %v6707_v29 = vld [vmem:[#allocation10 + $0x2640] sm:$0xff]  ;;  %v6742_v13 = vld [vmem:[#allocation10 + $0x2758] sm:$0xff] }
 0x53c   : > { %11826 = vmatpush1.bf16.msra.mxu1 %v11825_v1  ;;  %11700 = vmatprep.subr.bf16.mxu0 %v11699_v39  ;;  %v6675_v1 = vld [vmem:[#allocation10 + $0x2540] sm:$0xff]  ;;  %v6677_v39 = vld [vmem:[#allocation10 + $0x2550] sm:$0xff]  ;;  %v11719_v30 = vpack.c.bf16 %v6688_v26, %v6684_v49  ;;  %v6746_v45 = vld [vmem:[#allocation10 + $0x2778] sm:$0xff] }
 0x53d   : > { %6870 = vmatmul.mubr.f32.gmra.mrb[18].mxu0 %v6784_v62  ;;  %11828 = vmatprep.subr.bf16.mxu1 %v11827_v2  ;;  %v6686_v2 = vld [vmem:[#allocation10 + $0x2598] sm:$0xff]  ;;  %v11717_v50 = vpack.c.bf16 %v6679_v23, %v6675_v1  ;;  %v11845_v36 = vpack.c.bf16 %v6681_v17, %v6677_v39  ;;  %v6711_v43 = vld [vmem:[#allocation10 + $0x2660] sm:$0xff]  ;;  %v11875_v19 = vpack.c.bf16 %v6746_v45, %v6742_v13 }
 0x53e   : > { %7024 = vmatmul.mubr.f32.gmra.mrb[18].mxu1 %v6784_v62  ;;  %6940 = vmatprep.mubr.f32.mxu0 %v6782_v40  ;;  %v11847_v62 = vpack.c.bf16 %v6690_v11, %v6686_v2  ;;  %v6718_v1 = vld [vmem:[#allocation10 + $0x2698] sm:$0xff]  ;;  %v11733_v39 = vpack.c.bf16 %v6711_v43, %v6707_v29  ;;  %v6715_v49 = vld [vmem:[#allocation10 + $0x2680] sm:$0xff]  ;;  %v6717_v2 = vld [vmem:[#allocation10 + $0x2690] sm:$0xff] }
 0x53f   : > { %11702 = vmatpush1.bf16.msra.mxu0 %v11701_v38  ;;  %7094 = vmatprep.mubr.f32.mxu1 %v6782_v40  ;;  %v6685_v38 = vld [vmem:[#allocation10 + $0x2590] sm:$0xff]  ;;  %v11721_v40 = vpack.c.bf16 %v6687_v51, %v6683_v37  ;;  %v6722_v23 = vld [vmem:[#allocation10 + $0x26b8] sm:$0xff]  ;;  %v6719_v26 = vld [vmem:[#allocation10 + $0x26a0] sm:$0xff] }
 0x540   : > { %11830 = vmatpush1.bf16.msra.mxu1 %v11829_v33  ;;  %11704 = vmatprep.subr.bf16.mxu0 %v11703_v25  ;;  %v6689_v33 = vld [vmem:[#allocation10 + $0x25b0] sm:$0xff]  ;;  %v6692_v25 = vld [vmem:[#allocation10 + $0x25c8] sm:$0xff]  ;;  %v11863_v11 = vpack.c.bf16 %v6722_v23, %v6718_v1  ;;  %v6726_v37 = vld [vmem:[#allocation10 + $0x26d8] sm:$0xff] }
 0x541   : > { %11832 = vmatprep.subr.bf16.mxu1 %v11831_v53  ;;  %v11849_v53 = vpack.c.bf16 %v6689_v33, %v6685_v38  ;;  %v11723_v55 = vpack.c.bf16 %v6696_v63, %v6692_v25  ;;  %v6730_v51 = vld [vmem:[#allocation10 + $0x26f8] sm:$0xff]  ;;  %v11737_v38 = vpack.c.bf16 %v6719_v26, %v6715_v49  ;;  %v6723_v25 = vld [vmem:[#allocation10 + $0x26c0] sm:$0xff]  ;;  %v6749_v1 = vld [vmem:[#allocation10 + $0x2790] sm:$0xff] }
 0x542   : > { %v6727_v63 = vld [vmem:[#allocation10 + $0x26e0] sm:$0xff]  ;;  %v11867_v31 = vpack.c.bf16 %v6730_v51, %v6726_v37  ;;  %v6750_v29 = vld [vmem:[#allocation10 + $0x2798] sm:$0xff]  ;;  %v6757_v37 = vld [vmem:[#allocation10 + $0x27d0] sm:$0xff] }
 0x543   : > { %11706 = vmatpush1.bf16.msra.mxu0 %v11705_v20  ;;  %v6697_v20 = vld [vmem:[#allocation10 + $0x25f0] sm:$0xff]  ;;  %v6754_v43 = vld [vmem:[#allocation10 + $0x27b8] sm:$0xff] }
 0x544   : > { %11834 = vmatpush1.bf16.msra.mxu1 %v11833_v34  ;;  %11708 = vmatprep.subr.bf16.mxu0 %v11707_v21  ;;  %v6700_v34 = vld [vmem:[#allocation10 + $0x2608] sm:$0xff]  ;;  %v11879_v23 = vpack.c.bf16 %v6754_v43, %v6750_v29  ;;  %v6758_v49 = vld [vmem:[#allocation10 + $0x27d8] sm:$0xff] }
 0x545   : > { %11836 = vmatprep.subr.bf16.mxu1 %v11835_v9  ;;  %v6704_v21 = vld [vmem:[#allocation10 + $0x2628] sm:$0xff]  ;;  %v11853_v9 = vpack.c.bf16 %v6697_v20, %v6693_v44  ;;  %v11741_v44 = vpack.c.bf16 %v6727_v63, %v6723_v25  ;;  %v6762_v26 = vld [vmem:[#allocation10 + $0x27f8] sm:$0xff]  ;;  %v6500_v25 = vld [vmem:[#allocation2 + $0x10] sm:$0xf0] }
 0x546   : > { %v11727_v57 = vpack.c.bf16 %v6704_v21, %v6700_v34  ;;  %v6731_v34 = vld [vmem:[#allocation10 + $0x2700] sm:$0xff]  ;;  %v11883_v51 = vpack.c.bf16 %v6762_v26, %v6758_v49  ;;  %v6777_v42 = vrot.slane %v6500_v25, 4  ;;  %v7538_v29 = vld [vmem:[#allocation13 + $0x470] sm:$0xff]  ;;  %v7541_v43 = vld [vmem:[#allocation13 + $0x488] sm:$0xff] }
 0x547   : > { %11710 = vmatpush1.bf16.msra.mxu0 %v11709_v22  ;;  %v6705_v22 = vld [vmem:[#allocation10 + $0x2630] sm:$0xff]  ;;  %v6735_v21 = vld [vmem:[#allocation10 + $0x2720] sm:$0xff] }
 0x548   : > { %11838 = vmatpush1.bf16.msra.mxu1 %v11837_v54  ;;  %11712 = vmatprep.subr.bf16.mxu0 %v11711_v61  ;;  %v6708_v54 = vld [vmem:[#allocation10 + $0x2648] sm:$0xff]  ;;  %v7527_v63 = vld [vmem:[#allocation13 + $0x418] sm:$0xff] }
 0x549   : > { %11840 = vmatprep.subr.bf16.mxu1 %v11839_v28  ;;  %v6712_v61 = vld [vmem:[#allocation10 + $0x2668] sm:$0xff]  ;;  %v11857_v28 = vpack.c.bf16 %v6705_v22, %v6701_v47  ;;  %v11745_v47 = vpack.c.bf16 %v6735_v21, %v6731_v34  ;;  %v7535_v13 = vld [vmem:[#allocation13 + $0x458] sm:$0xff] }
 0x54a   : > { %v11731_v56 = vpack.c.bf16 %v6712_v61, %v6708_v54  ;;  %v6739_v54 = vld [vmem:[#allocation10 + $0x2740] sm:$0xff]  ;;  %v7549_v49 = vld [vmem:[#allocation13 + $0x4c8] sm:$0xff] }
 0x54b   : > { %11714 = vmatpush1.bf16.msra.mxu0 %v11713_v4  ;;  %v6713_v4 = vld [vmem:[#allocation10 + $0x2670] sm:$0xff]  ;;  %v6743_v61 = vld [vmem:[#allocation10 + $0x2760] sm:$0xff] }
 0x54c   : > { %11842 = vmatpush1.bf16.msra.mxu1 %v11841_v59  ;;  %11716 = vmatprep.subr.bf16.mxu0 %v11715_v41  ;;  %v6716_v59 = vld [vmem:[#allocation10 + $0x2688] sm:$0xff]  ;;  %v7539_v45 = vld [vmem:[#allocation13 + $0x478] sm:$0xff] }
 0x54d   : > { %11844 = vmatprep.subr.bf16.mxu1 %v11843_v48  ;;  %v6720_v41 = vld [vmem:[#allocation10 + $0x26a8] sm:$0xff]  ;;  %v11861_v48 = vpack.c.bf16 %v6713_v4, %v6709_v7  ;;  %v11749_v7 = vpack.c.bf16 %v6743_v61, %v6739_v54 }
 0x54e   : > { %v11735_v17 = vpack.c.bf16 %v6720_v41, %v6716_v59  ;;  %v6747_v59 = vld [vmem:[#allocation10 + $0x2780] sm:$0xff]  ;;  %v7553_v26 = vld [vmem:[#allocation13 + $0x4e8] sm:$0xff] }
 0x54f   : > { %11718 = vmatpush1.bf16.msra.mxu0 %v11717_v50  ;;  %v6721_v50 = vld [vmem:[#allocation10 + $0x26b0] sm:$0xff]  ;;  %v6751_v41 = vld [vmem:[#allocation10 + $0x27a0] sm:$0xff] }
 0x550   : > { %11846 = vmatpush1.bf16.msra.mxu1 %v11845_v36  ;;  %11720 = vmatprep.subr.bf16.mxu0 %v11719_v30  ;;  %v6724_v36 = vld [vmem:[#allocation10 + $0x26c8] sm:$0xff] }
 0x551   : > { %11848 = vmatprep.subr.bf16.mxu1 %v11847_v62  ;;  %v6728_v30 = vld [vmem:[#allocation10 + $0x26e8] sm:$0xff]  ;;  %v11865_v62 = vpack.c.bf16 %v6721_v50, %v6717_v2  ;;  %v11753_v2 = vpack.c.bf16 %v6751_v41, %v6747_v59 }
 0x552   : > { %v11739_v33 = vpack.c.bf16 %v6728_v30, %v6724_v36  ;;  %v6755_v36 = vld [vmem:[#allocation10 + $0x27c0] sm:$0xff]  ;;  %v7557_v25 = vld [vmem:[#allocation13 + $0x508] sm:$0xff] }
 0x553   : > { %11722 = vmatpush1.bf16.msra.mxu0 %v11721_v40  ;;  %v6729_v40 = vld [vmem:[#allocation10 + $0x26f0] sm:$0xff]  ;;  %v6759_v30 = vld [vmem:[#allocation10 + $0x27e0] sm:$0xff] }
 0x554   : > { %11850 = vmatpush1.bf16.msra.mxu1 %v11849_v53  ;;  %11724 = vmatprep.subr.bf16.mxu0 %v11723_v55  ;;  %v6732_v53 = vld [vmem:[#allocation10 + $0x2708] sm:$0xff] }
 0x555   : > { %11852 = vmatprep.subr.bf16.mxu1 %v11851_v52  ;;  %v6736_v55 = vld [vmem:[#allocation10 + $0x2728] sm:$0xff]  ;;  %v11869_v52 = vpack.c.bf16 %v6729_v40, %v6725_v0  ;;  %v7531_v0 = vld [vmem:[#allocation13 + $0x438] sm:$0xff] }
 0x556   : > { %v11743_v20 = vpack.c.bf16 %v6736_v55, %v6732_v53  ;;  %v6505_v40 = vld [vmem:[#allocation2 + $0x58] sm:$0xf]  ;;  %v6504_v55 = vld [vmem:[#allocation2 + $0x50] sm:$0xf] }
 0x557   : > { %11726 = vmatpush1.bf16.msra.mxu0 %v11725_v3  ;;  %v6737_v3 = vld [vmem:[#allocation10 + $0x2730] sm:$0xff]  ;;  %v7524_v34 = vld [vmem:[#allocation13 + $0x400] sm:$0xff] }
 0x558   : > { %11854 = vmatpush1.bf16.msra.mxu1 %v11853_v9  ;;  %11728 = vmatprep.subr.bf16.mxu0 %v11727_v57  ;;  %v6740_v9 = vld [vmem:[#allocation10 + $0x2748] sm:$0xff] }
 0x559   : > { %11856 = vmatprep.subr.bf16.mxu1 %v11855_v60  ;;  %v6744_v57 = vld [vmem:[#allocation10 + $0x2768] sm:$0xff]  ;;  %v11873_v60 = vpack.c.bf16 %v6737_v3, %v6733_v18  ;;  %v7526_v18 = vld [vmem:[#allocation13 + $0x410] sm:$0xff] }
 0x55a   : > { %v11747_v22 = vpack.c.bf16 %v6744_v57, %v6740_v9  ;;  %v7528_v21 = vld [vmem:[#allocation13 + $0x420] sm:$0xff]  ;;  %v7530_v3 = vld [vmem:[#allocation13 + $0x430] sm:$0xff]  ;;  %v7533_v9 = vld [vmem:[#allocation13 + $0x448] sm:$0xff] }
 0x55b   : > { %11730 = vmatpush1.bf16.msra.mxu0 %v11729_v35  ;;  %v6745_v35 = vld [vmem:[#allocation10 + $0x2770] sm:$0xff]  ;;  %v11953_v54 = vpack.c.bf16 %v7530_v3, %v7526_v18  ;;  %v7567_v18 = vld [vmem:[#allocation13 + $0x558] sm:$0xff] }
 0x55c   : > { %11858 = vmatpush1.bf16.msra.mxu1 %v11857_v28  ;;  %11732 = vmatprep.subr.bf16.mxu0 %v11731_v56  ;;  %v6748_v28 = vld [vmem:[#allocation10 + $0x2788] sm:$0xff] }
 0x55d   : > { %11860 = vmatprep.subr.bf16.mxu1 %v11859_v6  ;;  %v6752_v56 = vld [vmem:[#allocation10 + $0x27a8] sm:$0xff]  ;;  %v11877_v6 = vpack.c.bf16 %v6745_v35, %v6741_v14  ;;  %v7534_v35 = vld [vmem:[#allocation13 + $0x450] sm:$0xff] }
 0x55e   : > { %v11751_v4 = vpack.c.bf16 %v6752_v56, %v6748_v28  ;;  %v7537_v57 = vld [vmem:[#allocation13 + $0x468] sm:$0xff]  ;;  %v7532_v14 = vld [vmem:[#allocation13 + $0x440] sm:$0xff]  ;;  %v11955_v56 = vpack.c.bf16 %v7539_v45, %v7535_v13 }
 0x55f   : > { %11734 = vmatpush1.bf16.msra.mxu0 %v11733_v39  ;;  %v6753_v39 = vld [vmem:[#allocation10 + $0x27b0] sm:$0xff]  ;;  %v11891_v61 = vpack.c.bf16 %v7537_v57, %v7533_v9  ;;  %v7564_v13 = vld [vmem:[#allocation13 + $0x540] sm:$0xff] }
 0x560   : > { %11862 = vmatpush1.bf16.msra.mxu1 %v11861_v48  ;;  %11736 = vmatprep.subr.bf16.mxu0 %v11735_v17  ;;  %v6756_v48 = vld [vmem:[#allocation10 + $0x27c8] sm:$0xff] }
 0x561   : > { %11864 = vmatprep.subr.bf16.mxu1 %v11863_v11  ;;  %v6760_v17 = vld [vmem:[#allocation10 + $0x27e8] sm:$0xff]  ;;  %v11881_v11 = vpack.c.bf16 %v6753_v39, %v6749_v1  ;;  %v11957_v1 = vpack.c.bf16 %v7538_v29, %v7534_v35 }
 0x562   : > { %v11755_v50 = vpack.c.bf16 %v6760_v17, %v6756_v48  ;;  %v7544_v39 = vld [vmem:[#allocation13 + $0x4a0] sm:$0xff]  ;;  %v7546_v17 = vld [vmem:[#allocation13 + $0x4b0] sm:$0xff] }
 0x563   : > { %11738 = vmatpush1.bf16.msra.mxu0 %v11737_v38  ;;  %v6761_v38 = vld [vmem:[#allocation10 + $0x27f0] sm:$0xff]  ;;  %v7568_v45 = vld [vmem:[#allocation13 + $0x560] sm:$0xff] }
 0x564   : > { %11866 = vmatpush1.bf16.msra.mxu1 %v11865_v62  ;;  %11740 = vmatprep.subr.bf16.mxu0 %v11739_v33  ;;  %v7525_v62 = vld [vmem:[#allocation13 + $0x408] sm:$0xff]  ;;  %v11885_v53 = vpack.c.bf16 %v6761_v38, %v6757_v37  ;;  %v7548_v37 = vld [vmem:[#allocation13 + $0x4c0] sm:$0xff]  ;;  %v7550_v38 = vld [vmem:[#allocation13 + $0x4d0] sm:$0xff]  ;;  %v11909_v35 = vpack.c.bf16 %v7568_v45, %v7564_v13 }
 0x565   : > { %11868 = vmatprep.subr.bf16.mxu1 %v11867_v31  ;;  %v7529_v33 = vld [vmem:[#allocation13 + $0x428] sm:$0xff]  ;;  %v11757_v31 = vpack.c.bf16 %v6759_v30, %v6755_v36  ;;  %v11899_v30 = vpack.c.bf16 %v7553_v26, %v7549_v49  ;;  %v7572_v29 = vld [vmem:[#allocation13 + $0x580] sm:$0xff]  ;;  %v7607_v45 = vld [vmem:[#allocation13 + $0x698] sm:$0xff] }
 0x566   : > { %v11887_v15 = vpack.c.bf16 %v7529_v33, %v7525_v62  ;;  %v7554_v33 = vld [vmem:[#allocation13 + $0x4f0] sm:$0xff] }
 0x567   : > { %11742 = vmatpush1.bf16.msra.mxu0 %v11741_v44  ;;  %v13033_v44 = vld [vmem:[#allocation2 + $0x30] sm:$0xff] }
 0x568   : > { %11870 = vmatpush1.bf16.msra.mxu1 %v11869_v52  ;;  %11744 = vmatprep.subr.bf16.mxu0 %v11743_v20  ;;  %v6778_v52 = vrot.slane %v13033_v44, 4  ;;  %v11951_v20 = vpack.c.bf16 %v7531_v0, %v7527_v63  ;;  %v7561_v63 = vld [vmem:[#allocation13 + $0x528] sm:$0xff]  ;;  %v7559_v0 = vld [vmem:[#allocation13 + $0x518] sm:$0xff]  ;;  %v7558_v44 = vld [vmem:[#allocation13 + $0x510] sm:$0xff] }
 0x569   : > { %11872 = vmatprep.subr.bf16.mxu1 %v11871_v16  ;;  %v6789_v16 = vrot.slane %v6505_v40, 4 }
 0x56b   : > { %11746 = vmatpush1.bf16.msra.mxu0 %v11745_v47  ;;  %v11889_v47 = vpack.c.bf16 %v7528_v21, %v7524_v34  ;;  %v6790_v28 = vsel %vm757_vm0, %v6781_v58, %v6789_v16  ;;  %v7542_v58 = vld [vmem:[#allocation13 + $0x490] sm:$0xff]  ;;  %v7565_v34 = vld [vmem:[#allocation13 + $0x548] sm:$0xff]  ;;  %v7571_v16 = vld [vmem:[#allocation13 + $0x578] sm:$0xff] }
 0x56c   : > { %11874 = vmatpush1.bf16.msra.mxu1 %v11873_v60  ;;  %11748 = vmatprep.subr.bf16.mxu0 %v11747_v22  ;;  %v6779_v60 = vsel %vm757_vm0, %v6777_v42, %v6778_v52  ;;  %v6787_v22 = vrot.slane %v6504_v55, 4  ;;  %v11961_v36 = vpack.c.bf16 %v7546_v17, %v7542_v58  ;;  %v11903_v55 = vpack.c.bf16 %v7561_v63, %v7557_v25  ;;  %v7560_v42 = vld [vmem:[#allocation13 + $0x520] sm:$0xff]  ;;  %v7569_v21 = vld [vmem:[#allocation13 + $0x568] sm:$0xff]  ;;  %v7587_v58 = vld [vmem:[#allocation13 + $0x5f8] sm:$0xff] }
 0x56d   : > { %11876 = vmatprep.subr.bf16.mxu1 %v11875_v19  ;;  %v7536_v19 = vld [vmem:[#allocation13 + $0x460] sm:$0xff]  ;;  %v11907_v57 = vpack.c.bf16 %v7569_v21, %v7565_v34  ;;  %v7598_v21 = vld [vmem:[#allocation13 + $0x650] sm:$0xff] }
 0x56e   : > { %v11893_v59 = vpack.c.bf16 %v7536_v19, %v7532_v14  ;;  %v6788_v41 = vsel %vm757_vm0, %v6778_v52, %v6787_v22  ;;  %v7570_v22 = vld [vmem:[#allocation13 + $0x570] sm:$0xff]  ;;  %v7575_v14 = vld [vmem:[#allocation13 + $0x598] sm:$0xff]  ;;  %v7584_v17 = vld [vmem:[#allocation13 + $0x5e0] sm:$0xff] }
 0x56f   : > { %11750 = vmatpush1.bf16.msra.mxu0 %v11749_v7  ;;  %v7545_v7 = vld [vmem:[#allocation13 + $0x4a8] sm:$0xff]  ;;  %v7579_v19 = vld [vmem:[#allocation13 + $0x5b8] sm:$0xff]  ;;  %v7600_v34 = vld [vmem:[#allocation13 + $0x660] sm:$0xff] }
 0x570   : > { %11878 = vmatpush1.bf16.msra.mxu1 %v11877_v6  ;;  %11752 = vmatprep.subr.bf16.mxu0 %v11751_v4  ;;  %v7543_v6 = vld [vmem:[#allocation13 + $0x498] sm:$0xff] }
 0x571   : > { %11880 = vmatprep.subr.bf16.mxu1 %v11879_v23  ;;  %v7547_v4 = vld [vmem:[#allocation13 + $0x4b8] sm:$0xff]  ;;  %v11895_v23 = vpack.c.bf16 %v7545_v7, %v7541_v43  ;;  %v7576_v43 = vld [vmem:[#allocation13 + $0x5a0] sm:$0xff]  ;;  %v11975_v7 = vpack.c.bf16 %v7579_v19, %v7575_v14  ;;  %v7610_v14 = vld [vmem:[#allocation13 + $0x6b0] sm:$0xff] }
 0x572   : > { %v11959_v48 = vpack.c.bf16 %v7547_v4, %v7543_v6  ;;  %v7574_v6 = vld [vmem:[#allocation13 + $0x590] sm:$0xff] }
 0x573   : > { %11754 = vmatpush1.bf16.msra.mxu0 %v11753_v2  ;;  %v7551_v2 = vld [vmem:[#allocation13 + $0x4d8] sm:$0xff]  ;;  %v7578_v4 = vld [vmem:[#allocation13 + $0x5b0] sm:$0xff] }
 0x574   : > { %11882 = vmatpush1.bf16.msra.mxu1 %v11881_v11  ;;  %11756 = vmatprep.subr.bf16.mxu0 %v11755_v50  ;;  %v7555_v11 = vld [vmem:[#allocation13 + $0x4f8] sm:$0xff]  ;;  %v11897_v50 = vpack.c.bf16 %v7544_v39, %v7540_v27 }
 0x575   : > { %11884 = vmatprep.subr.bf16.mxu1 %v11883_v51  ;;  %v7552_v51 = vld [vmem:[#allocation13 + $0x4e0] sm:$0xff]  ;;  %v11963_v62 = vpack.c.bf16 %v7555_v11, %v7551_v2  ;;  %v7583_v27 = vld [vmem:[#allocation13 + $0x5d8] sm:$0xff]  ;;  %v7582_v2 = vld [vmem:[#allocation13 + $0x5d0] sm:$0xff] }
 0x576   : > { %v11901_v40 = vpack.c.bf16 %v7552_v51, %v7548_v37  ;;  %v11979_v49 = vpack.c.bf16 %v7587_v58, %v7583_v27  ;;  %v7586_v11 = vld [vmem:[#allocation13 + $0x5f0] sm:$0xff]  ;;  %v7591_v37 = vld [vmem:[#allocation13 + $0x618] sm:$0xff]  ;;  %v7625_v27 = vld [vmem:[#allocation13 + $0x728] sm:$0xff] }
 0x577   : > { %11758 = vmatpush1.bf16.msra.mxu0 %v11757_v31  ;;  %v7563_v31 = vld [vmem:[#allocation13 + $0x538] sm:$0xff] }
 0x578   : > { %11886 = vmatpush1.bf16.msra.mxu1 %v11885_v53  ;;  %11888 = vmatprep.subr.bf16.mxu0 %v11887_v15  ;;  %v11965_v53 = vpack.c.bf16 %v7554_v33, %v7550_v38  ;;  %v7556_v15 = vld [vmem:[#allocation13 + $0x500] sm:$0xff]  ;;  %v11967_v52 = vpack.c.bf16 %v7563_v31, %v7559_v0  ;;  %v7595_v38 = vld [vmem:[#allocation13 + $0x638] sm:$0xff]  ;;  %v7590_v0 = vld [vmem:[#allocation13 + $0x610] sm:$0xff] }
 0x579   : > { %11952 = vmatprep.subr.bf16.mxu1 %v11951_v20  ;;  %v7562_v20 = vld [vmem:[#allocation13 + $0x530] sm:$0xff]  ;;  %v11905_v3 = vpack.c.bf16 %v7560_v42, %v7556_v15  ;;  %v7592_v33 = vld [vmem:[#allocation13 + $0x620] sm:$0xff]  ;;  %v11983_v25 = vpack.c.bf16 %v7595_v38, %v7591_v37  ;;  %v7599_v15 = vld [vmem:[#allocation13 + $0x658] sm:$0xff] }
 0x57a   : > { %6941 = vmatmul.mubr.f32.vlgmr.msra.gmra.mrb[16].mxu0 %v6779_v60  ;;  %v11969_v9 = vpack.c.bf16 %v7562_v20, %v7558_v44  ;;  %v7594_v31 = vld [vmem:[#allocation13 + $0x630] sm:$0xff]  ;;  %v7603_v42 = vld [vmem:[#allocation13 + $0x678] sm:$0xff]  ;;  %v7596_v20 = vld [vmem:[#allocation13 + $0x640] sm:$0xff] }
 0x57b   : > { %7095 = vmatmul.mubr.f32.vlgmr.msra.gmra.mrb[16].mxu1 %v6779_v60  ;;  %6946 = vmatprep.mubr.f32.mxu0 %v6790_v28  ;;  %v11971_v60 = vpack.c.bf16 %v7571_v16, %v7567_v18  ;;  %v11925_v18 = vpack.c.bf16 %v7600_v34, %v7596_v20  ;;  %v7602_v16 = vld [vmem:[#allocation13 + $0x670] sm:$0xff]  ;;  %v7627_v58 = vld [vmem:[#allocation13 + $0x738] sm:$0xff]  ;;  %v7633_v37 = vld [vmem:[#allocation13 + $0x768] sm:$0xff] }
 0x57c   : > { %7100 = vmatprep.mubr.f32.mxu1 %v6790_v28  ;;  %11890 = vmatpush1.bf16.msra.mxu0 %v11889_v47  ;;  %v7566_v47 = vld [vmem:[#allocation13 + $0x550] sm:$0xff]  ;;  %v7635_v38 = vld [vmem:[#allocation13 + $0x778] sm:$0xff] }
 0x57d   : > { %11954 = vmatpush1.bf16.msra.mxu1 %v11953_v54  ;;  %11892 = vmatprep.subr.bf16.mxu0 %v11891_v61  ;;  %v7573_v54 = vld [vmem:[#allocation13 + $0x588] sm:$0xff]  ;;  %v11973_v28 = vpack.c.bf16 %v7570_v22, %v7566_v47  ;;  %v7611_v47 = vld [vmem:[#allocation13 + $0x6b8] sm:$0xff] }
 0x57e   : > { %6947 = vmatmul.mubr.f32.gmra.mrb[18].mxu0 %v6788_v41  ;;  %11956 = vmatprep.subr.bf16.mxu1 %v11955_v56  ;;  %v7577_v61 = vld [vmem:[#allocation13 + $0x5a8] sm:$0xff]  ;;  %v11991_v22 = vpack.c.bf16 %v7611_v47, %v7607_v45  ;;  %v7647_v45 = vld [vmem:[#allocation13 + $0x7d8] sm:$0xff] }
 0x57f   : > { %7101 = vmatmul.mubr.f32.gmra.mrb[18].mxu1 %v6788_v41  ;;  %v11911_v56 = vpack.c.bf16 %v7577_v61, %v7573_v54  ;;  %v11977_v41 = vpack.c.bf16 %v7578_v4, %v7574_v6  ;;  %v7608_v54 = vld [vmem:[#allocation13 + $0x6a0] sm:$0xff]  ;;  %v7606_v61 = vld [vmem:[#allocation13 + $0x690] sm:$0xff]  ;;  %v7651_v47 = vld [vmem:[#allocation13 + $0x7f8] sm:$0xff] }
 0x580   : > { %11894 = vmatpush1.bf16.msra.mxu0 %v11893_v59  ;;  %v11913_v59 = vpack.c.bf16 %v7576_v43, %v7572_v29  ;;  %v11993_v29 = vpack.c.bf16 %v7610_v14, %v7606_v61  ;;  %v7612_v6 = vld [vmem:[#allocation13 + $0x6c0] sm:$0xff] }
 0x581   : > { %11958 = vmatpush1.bf16.msra.mxu1 %v11957_v1  ;;  %11896 = vmatprep.subr.bf16.mxu0 %v11895_v23  ;;  %v7581_v1 = vld [vmem:[#allocation13 + $0x5c8] sm:$0xff]  ;;  %v7616_v4 = vld [vmem:[#allocation13 + $0x6e0] sm:$0xff] }
 0x582   : > { %11960 = vmatprep.subr.bf16.mxu1 %v11959_v48  ;;  %v7585_v23 = vld [vmem:[#allocation13 + $0x5e8] sm:$0xff]  ;;  %v7580_v48 = vld [vmem:[#allocation13 + $0x5c0] sm:$0xff] }
 0x583   : > { %v11915_v39 = vpack.c.bf16 %v7585_v23, %v7581_v1  ;;  %v11917_v26 = vpack.c.bf16 %v7584_v17, %v7580_v48  ;;  %v7618_v1 = vld [vmem:[#allocation13 + $0x6f0] sm:$0xff]  ;;  %v7621_v23 = vld [vmem:[#allocation13 + $0x708] sm:$0xff]  ;;  %v11933_v48 = vpack.c.bf16 %v7616_v4, %v7612_v6  ;;  %v7644_v61 = vld [vmem:[#allocation13 + $0x7c0] sm:$0xff] }
 0x584   : > { %11898 = vmatpush1.bf16.msra.mxu0 %v11897_v50  ;;  %v11981_v50 = vpack.c.bf16 %v7586_v11, %v7582_v2  ;;  %v7624_v2 = vld [vmem:[#allocation13 + $0x720] sm:$0xff]  ;;  %v7622_v11 = vld [vmem:[#allocation13 + $0x710] sm:$0xff] }
 0x585   : > { %11962 = vmatpush1.bf16.msra.mxu1 %v11961_v36  ;;  %11900 = vmatprep.subr.bf16.mxu0 %v11899_v30  ;;  %v7589_v36 = vld [vmem:[#allocation13 + $0x608] sm:$0xff]  ;;  %v7648_v14 = vld [vmem:[#allocation13 + $0x7e0] sm:$0xff] }
 0x586   : > { %11964 = vmatprep.subr.bf16.mxu1 %v11963_v62  ;;  %v7593_v30 = vld [vmem:[#allocation13 + $0x628] sm:$0xff]  ;;  %v7588_v62 = vld [vmem:[#allocation13 + $0x600] sm:$0xff]  ;;  %v11949_v6 = vpack.c.bf16 %v7648_v14, %v7644_v61 }
 0x587   : > { %v11919_v51 = vpack.c.bf16 %v7593_v30, %v7589_v36  ;;  %v11921_v63 = vpack.c.bf16 %v7592_v33, %v7588_v62  ;;  %v7626_v36 = vld [vmem:[#allocation13 + $0x730] sm:$0xff]  ;;  %v7629_v30 = vld [vmem:[#allocation13 + $0x748] sm:$0xff] }
 0x588   : > { %11902 = vmatpush1.bf16.msra.mxu0 %v11901_v40  ;;  %v7597_v40 = vld [vmem:[#allocation13 + $0x648] sm:$0xff]  ;;  %v12001_v33 = vpack.c.bf16 %v7626_v36, %v7622_v11 }
 0x589   : > { %11966 = vmatpush1.bf16.msra.mxu1 %v11965_v53  ;;  %11904 = vmatprep.subr.bf16.mxu0 %v11903_v55  ;;  %v11985_v53 = vpack.c.bf16 %v7594_v31, %v7590_v0  ;;  %v7601_v55 = vld [vmem:[#allocation13 + $0x668] sm:$0xff]  ;;  %v7632_v0 = vld [vmem:[#allocation13 + $0x760] sm:$0xff]  ;;  %v7630_v31 = vld [vmem:[#allocation13 + $0x750] sm:$0xff] }
 0x58a   : > { %11968 = vmatprep.subr.bf16.mxu1 %v11967_v52  ;;  %v11923_v44 = vpack.c.bf16 %v7601_v55, %v7597_v40  ;;  %v11987_v52 = vpack.c.bf16 %v7603_v42, %v7599_v15  ;;  %v7637_v55 = vld [vmem:[#allocation13 + $0x788] sm:$0xff]  ;;  %v7639_v42 = vld [vmem:[#allocation13 + $0x798] sm:$0xff] }
 0x58b   : > { %v7641_v15 = vld [vmem:[#allocation13 + $0x7a8] sm:$0xff] }
 0x58c   : > { %11906 = vmatpush1.bf16.msra.mxu0 %v11905_v3  ;;  %v7605_v3 = vld [vmem:[#allocation13 + $0x688] sm:$0xff]  ;;  %v11943_v34 = vpack.c.bf16 %v7641_v15, %v7637_v55 }
 0x58d   : > { %11970 = vmatpush1.bf16.msra.mxu1 %v11969_v9  ;;  %11908 = vmatprep.subr.bf16.mxu0 %v11907_v57  ;;  %v7609_v9 = vld [vmem:[#allocation13 + $0x6a8] sm:$0xff]  ;;  %v11989_v57 = vpack.c.bf16 %v7602_v16, %v7598_v21  ;;  %v7636_v21 = vld [vmem:[#allocation13 + $0x780] sm:$0xff]  ;;  %v7638_v16 = vld [vmem:[#allocation13 + $0x790] sm:$0xff] }
 0x58e   : > { %11972 = vmatprep.subr.bf16.mxu1 %v11971_v60  ;;  %v11927_v13 = vpack.c.bf16 %v7609_v9, %v7605_v3  ;;  %v7604_v60 = vld [vmem:[#allocation13 + $0x680] sm:$0xff]  ;;  %v7642_v9 = vld [vmem:[#allocation13 + $0x7b0] sm:$0xff] }
 0x58f   : > { %v11929_v19 = vpack.c.bf16 %v7608_v54, %v7604_v60 }
 0x590   : > { %11910 = vmatpush1.bf16.msra.mxu0 %v11909_v35  ;;  %v7613_v35 = vld [vmem:[#allocation13 + $0x6c8] sm:$0xff] }
 0x591   : > { %11974 = vmatpush1.bf16.msra.mxu1 %v11973_v28  ;;  %11912 = vmatprep.subr.bf16.mxu0 %v11911_v56  ;;  %v7617_v28 = vld [vmem:[#allocation13 + $0x6e8] sm:$0xff]  ;;  %v7615_v56 = vld [vmem:[#allocation13 + $0x6d8] sm:$0xff] }
 0x592   : > { %11976 = vmatprep.subr.bf16.mxu1 %v11975_v7  ;;  %v11931_v43 = vpack.c.bf16 %v7617_v28, %v7613_v35  ;;  %v7619_v7 = vld [vmem:[#allocation13 + $0x6f8] sm:$0xff]  ;;  %v12011_v35 = vpack.c.bf16 %v7651_v47, %v7647_v45  ;;  %v7650_v28 = vld [vmem:[#allocation13 + $0x7f0] sm:$0xff] }
 0x594   : > { %11914 = vmatpush1.bf16.msra.mxu0 %v11913_v59  ;;  %v11995_v59 = vpack.c.bf16 %v7619_v7, %v7615_v56  ;;  %v7392_v56 = vld [vmem:[#allocation13 + $0x8] sm:$0xff]  ;;  %v7398_v7 = vld [vmem:[#allocation13 + $0x38] sm:$0xff] }
 0x595   : > { %11978 = vmatpush1.bf16.msra.mxu1 %v11977_v41  ;;  %11916 = vmatprep.subr.bf16.mxu0 %v11915_v39  ;;  %v7614_v41 = vld [vmem:[#allocation13 + $0x6d0] sm:$0xff]  ;;  %v7623_v39 = vld [vmem:[#allocation13 + $0x718] sm:$0xff] }
 0x596   : > { %11980 = vmatprep.subr.bf16.mxu1 %v11979_v49  ;;  %v11997_v17 = vpack.c.bf16 %v7618_v1, %v7614_v41  ;;  %v11935_v49 = vpack.c.bf16 %v7625_v27, %v7621_v23  ;;  %v7115_v1 = vld [vmem:[#allocation11] sm:$0xf] }
 0x597   : > { %v7120_v23 = vrot.slane %v7115_v1, %v14116_v8  ;;  %v7128_v27 = vrot.slane %v7115_v1, %v14121_v10 }
 0x598   : > { %11918 = vmatpush1.bf16.msra.mxu0 %v11917_v26  ;;  %v7620_v26 = vld [vmem:[#allocation13 + $0x700] sm:$0xff] }
 0x599   : > { %11982 = vmatpush1.bf16.msra.mxu1 %v11981_v50  ;;  %11920 = vmatprep.subr.bf16.mxu0 %v11919_v51  ;;  %v11999_v50 = vpack.c.bf16 %v7627_v58, %v7623_v39  ;;  %v7631_v51 = vld [vmem:[#allocation13 + $0x758] sm:$0xff]  ;;  %v11937_v62 = vpack.c.bf16 %v7624_v2, %v7620_v26  ;;  %v7124_v39 = vrot.slane %v7115_v1, %v14124_v12 }
 0x59a   : > { %11984 = vmatprep.subr.bf16.mxu1 %v11983_v25  ;;  %v11939_v25 = vpack.c.bf16 %v7633_v37, %v7629_v30  ;;  %v12003_v40 = vpack.c.bf16 %v7635_v38, %v7631_v51  ;;  %v7132_v58 = vrot.slane %v7115_v1, %v14127_v24 }
 0x59c   : > { %11922 = vmatpush1.bf16.msra.mxu0 %v11921_v63  ;;  %v7628_v63 = vld [vmem:[#allocation13 + $0x740] sm:$0xff] }
 0x59d   : > { %11986 = vmatpush1.bf16.msra.mxu1 %v11985_v53  ;;  %11924 = vmatprep.subr.bf16.mxu0 %v11923_v44  ;;  %v7634_v53 = vld [vmem:[#allocation13 + $0x770] sm:$0xff]  ;;  %v7643_v44 = vld [vmem:[#allocation13 + $0x7b8] sm:$0xff] }
 0x59e   : > { %11988 = vmatprep.subr.bf16.mxu1 %v11987_v52  ;;  %v11941_v52 = vpack.c.bf16 %v7632_v0, %v7628_v63  ;;  %v12005_v20 = vpack.c.bf16 %v7634_v53, %v7630_v31  ;;  %v12007_v3 = vpack.c.bf16 %v7643_v44, %v7639_v42 }
 0x5a0   : > { %11926 = vmatpush1.bf16.msra.mxu0 %v11925_v18  ;;  %v7640_v18 = vld [vmem:[#allocation13 + $0x7a0] sm:$0xff] }
 0x5a1   : > { %11990 = vmatpush1.bf16.msra.mxu1 %v11989_v57  ;;  %11928 = vmatprep.subr.bf16.mxu0 %v11927_v13  ;;  %v7645_v57 = vld [vmem:[#allocation13 + $0x7c8] sm:$0xff]  ;;  %v11945_v60 = vpack.c.bf16 %v7640_v18, %v7636_v21 }
 0x5a2   : > { %11992 = vmatprep.subr.bf16.mxu1 %v11991_v22  ;;  %v7649_v13 = vld [vmem:[#allocation13 + $0x7e8] sm:$0xff]  ;;  %v12009_v22 = vpack.c.bf16 %v7642_v9, %v7638_v16 }
 0x5a3   : > { %v11947_v54 = vpack.c.bf16 %v7649_v13, %v7645_v57 }
 0x5a4   : > { %11930 = vmatpush1.bf16.msra.mxu0 %v11929_v19  ;;  %v7646_v19 = vld [vmem:[#allocation13 + $0x7d0] sm:$0xff] }
 0x5a5   : > { %11994 = vmatpush1.bf16.msra.mxu1 %v11993_v29  ;;  %11932 = vmatprep.subr.bf16.mxu0 %v11931_v43  ;;  %v7396_v29 = vld [vmem:[#allocation13 + $0x28] sm:$0xff]  ;;  %v7394_v43 = vld [vmem:[#allocation13 + $0x18] sm:$0xff]  ;;  %v12013_v4 = vpack.c.bf16 %v7650_v28, %v7646_v19 }
 0x5a6   : > { %11996 = vmatprep.subr.bf16.mxu1 %v11995_v59  ;;  %v12015_v59 = vpack.c.bf16 %v7396_v29, %v7392_v56  ;;  %v12079_v41 = vpack.c.bf16 %v7398_v7, %v7394_v43 }
 0x5a8   : > { %11934 = vmatpush1.bf16.msra.mxu0 %v11933_v48 }
 0x5a9   : > { %11998 = vmatpush1.bf16.msra.mxu1 %v11997_v17  ;;  %11936 = vmatprep.subr.bf16.mxu0 %v11935_v49 }
 0x5aa   : > { %12000 = vmatprep.subr.bf16.mxu1 %v11999_v50 }
 0x5ac   : > { %11938 = vmatpush1.bf16.msra.mxu0 %v11937_v62 }
 0x5ad   : > { %12002 = vmatpush1.bf16.msra.mxu1 %v12001_v33  ;;  %11940 = vmatprep.subr.bf16.mxu0 %v11939_v25 }
 0x5ae   : > { %12004 = vmatprep.subr.bf16.mxu1 %v12003_v40 }
 0x5b0   : > { %11942 = vmatpush1.bf16.msra.mxu0 %v11941_v52 }
 0x5b1   : > { %12006 = vmatpush1.bf16.msra.mxu1 %v12005_v20  ;;  %11944 = vmatprep.subr.bf16.mxu0 %v11943_v34 }
 0x5b2   : > { %12008 = vmatprep.subr.bf16.mxu1 %v12007_v3 }
 0x5b4   : > { %11946 = vmatpush1.bf16.msra.mxu0 %v11945_v60 }
 0x5b5   : > { %12010 = vmatpush1.bf16.msra.mxu1 %v12009_v22  ;;  %11948 = vmatprep.subr.bf16.mxu0 %v11947_v54 }
 0x5b6   : > { %12012 = vmatprep.subr.bf16.mxu1 %v12011_v35 }
 0x5b8   : > { %11950 = vmatpush1.bf16.msra.mxu0 %v11949_v6 }
 0x5b9   : > { %12014 = vmatpush1.bf16.msra.mxu1 %v12013_v4  ;;  %12016 = vmatprep.subr.bf16.mxu0 %v12015_v59 }
 0x5ba   : > { %12080 = vmatprep.subr.bf16.mxu1 %v12079_v41 }
 0x64d   : > { %v6942_v48 = vpop.f32.mrb[16].mxu0 }
 0x64e   : > { %v7137_v17 = vadd.f32 %v7120_v23, %v6942_v48  ;;  %v7096_v49 = vpop.f32.mrb[16].mxu1  ;;  %v6944_v26 = vpop.f32.mrb[17].mxu0 }
 0x64f   : > { %v7139_v2 = vadd.f32 %v7128_v27, %v7096_v49  ;;  %v7138_v11 = vadd.f32 %v7124_v39, %v6944_v26  ;;  %v7098_v50 = vpop.f32.mrb[17].mxu1 }
 0x650   : > { %v7140_v36 = vadd.f32 %v7132_v58, %v7098_v50 }
 0x651   : > { %v7153_v30 = vcombine.low %v7137_v17, %v7138_v11  ;;  %v7154_v37 = vcombine.high %v7137_v17, %v7138_v11  ;;  %v6948_v51 = vpop.f32.mrb[18].mxu0 }
 0x652   : > { %v7155_v38 = vcombine.low %v7139_v2, %v7140_v36  ;;  %v7156_v62 = vcombine.high %v7139_v2, %v7140_v36  ;;  %v7141_v33 = vadd.f32 %v7120_v23, %v6948_v51  ;;  %v7102_v25 = vpop.f32.mrb[18].mxu1  ;;  %v6950_v63 = vpop.f32.mrb[19].mxu0 }
 0x653   : > { %v7163_v0 = vrot.slane %v7153_v30, %v14149_v32  ;;  %v7170_v31 = vrot.slane %v7154_v37, %v14149_v32  ;;  %v7143_v40 = vadd.f32 %v7128_v27, %v7102_v25  ;;  %v7142_v53 = vadd.f32 %v7124_v39, %v6950_v63  ;;  %v7104_v55 = vpop.f32.mrb[19].mxu1 }
 0x654   : > { %v7177_v15 = vrot.slane %v7155_v38, %v14149_v32  ;;  %v7184_v42 = vrot.slane %v7156_v62, %v14149_v32  ;;  %v7144_v44 = vadd.f32 %v7132_v58, %v7104_v55 }
 0x655   : > { %v7189_v52 = vcombine.low %v7141_v33, %v7142_v53  ;;  %v7190_v20 = vcombine.high %v7141_v33, %v7142_v53 }
 0x656   : > { %v7185_v34 = vcombine.low %v7163_v0, %v7177_v15  ;;  %v7186_v21 = vcombine.high %v7163_v0, %v7177_v15  ;;  %v7187_v18 = vcombine.low %v7170_v31, %v7184_v42  ;;  %v7188_v16 = vcombine.high %v7170_v31, %v7184_v42 }
 0x657   : > { %v7199_v3 = vrot.slane %v7189_v52, %v14149_v32  ;;  %v7206_v9 = vrot.slane %v7190_v20, %v14149_v32  ;;  %v7191_v57 = vcombine.low %v7143_v40, %v7144_v44  ;;  %v7192_v13 = vcombine.high %v7143_v40, %v7144_v44 }
 0x658   : > { %v9823_v45 = vrot.slane %v7185_v34, 9  ;;  %v9824_v47 = vrot.slane %v7186_v21, 9  ;;  %v9825_v60 = vrot.slane %v7187_v18, 9  ;;  %v9826_v22 = vrot.slane %v7188_v16, 9 }
 0x659   : > { %v7213_v54 = vrot.slane %v7191_v57, %v14149_v32  ;;  %v7220_v61 = vrot.slane %v7192_v13, %v14149_v32 }
 0x65a   : > { %v7257_v14 = vmax.f32 %v7185_v34, %v9823_v45  ;;  %v7258_v19 = vmax.f32 %v7186_v21, %v9824_v47  ;;  %v7259_v35 = vmax.f32 %v7187_v18, %v9825_v60  ;;  %v7260_v28 = vmax.f32 %v7188_v16, %v9826_v22 }
 0x65b   : > { %v7221_v56 = vcombine.low %v7199_v3, %v7213_v54  ;;  %v7222_v29 = vcombine.high %v7199_v3, %v7213_v54  ;;  %v7223_v43 = vcombine.low %v7206_v9, %v7220_v61  ;;  %v7224_v7 = vcombine.high %v7206_v9, %v7220_v61 }
 0x65c   : > { %v7273_v6 = vrot.slane %v7257_v14, 4  ;;  %v7274_v4 = vrot.slane %v7258_v19, 4  ;;  %v7275_v59 = vrot.slane %v7259_v35, 4  ;;  %v7276_v41 = vrot.slane %v7260_v28, 4 }
 0x65d   : > { %v9827_v1 = vrot.slane %v7221_v56, 9  ;;  %v9828_v23 = vrot.slane %v7222_v29, 9  ;;  %v9829_v27 = vrot.slane %v7223_v43, 9  ;;  %v9830_v39 = vrot.slane %v7224_v7, 9 }
 0x65e   : > { %v7289_v58 = vmax.f32 %v7257_v14, %v7273_v6  ;;  %v7290_v48 = vmax.f32 %v7258_v19, %v7274_v4  ;;  %v7291_v17 = vmax.f32 %v7259_v35, %v7275_v59  ;;  %v7292_v49 = vmax.f32 %v7260_v28, %v7276_v41  ;;  %v7391_v28 = vld [vmem:[#allocation13] sm:$0xff]  ;;  %v7404_v6 = vld [vmem:[#allocation13 + $0x68] sm:$0xff]  ;;  %v7402_v4 = vld [vmem:[#allocation13 + $0x58] sm:$0xff] }
 0x65f   : > { %v7261_v26 = vmax.f32 %v7221_v56, %v9827_v1  ;;  %v7262_v2 = vmax.f32 %v7222_v29, %v9828_v23  ;;  %v7263_v11 = vmax.f32 %v7223_v43, %v9829_v27  ;;  %v7264_v50 = vmax.f32 %v7224_v7, %v9830_v39  ;;  %v7395_v56 = vld [vmem:[#allocation13 + $0x20] sm:$0xff]  ;;  %v7393_v29 = vld [vmem:[#allocation13 + $0x10] sm:$0xff]  ;;  %v7400_v7 = vld [vmem:[#allocation13 + $0x48] sm:$0xff] }
 0x660   : > { %v7308_v36 = vrot.slane %v7289_v58, %v14116_v8  ;;  %v7312_v30 = vrot.slane %v7289_v58, %v14121_v10  ;;  %v7316_v37 = vrot.slane %v7290_v48, %v14116_v8  ;;  %v7320_v51 = vrot.slane %v7290_v48, %v14121_v10  ;;  %v7397_v43 = vld [vmem:[#allocation13 + $0x30] sm:$0xff]  ;;  %v7406_v48 = vld [vmem:[#allocation13 + $0x78] sm:$0xff] }
 0x661   : > { %v7324_v38 = vrot.slane %v7291_v17, %v14116_v8  ;;  %v7328_v62 = vrot.slane %v7291_v17, %v14121_v10  ;;  %v7332_v33 = vrot.slane %v7292_v49, %v14116_v8  ;;  %v7336_v25 = vrot.slane %v7292_v49, %v14121_v10 }
 0x662   : > { %v7369_v63 = vsel %vm3996_vm7, %v7316_v37, %v7308_v36  ;;  %v7374_v0 = vsel %vm3996_vm7, %v7320_v51, %v7312_v30  ;;  %v7277_v31 = vrot.slane %v7261_v26, 4  ;;  %v7278_v40 = vrot.slane %v7262_v2, 4  ;;  %v7401_v36 = vld [vmem:[#allocation13 + $0x50] sm:$0xff]  ;;  %v7408_v37 = vld [vmem:[#allocation13 + $0x88] sm:$0xff] }
 0x663   : > { %v7370_v53 = vsel %vm3998_vm8, %v7324_v38, %v7369_v63  ;;  %v7375_v55 = vsel %vm3998_vm8, %v7328_v62, %v7374_v0  ;;  %v7279_v15 = vrot.slane %v7263_v11, 4  ;;  %v7280_v42 = vrot.slane %v7264_v50, 4  ;;  %v7405_v30 = vld [vmem:[#allocation13 + $0x70] sm:$0xff]  ;;  %v7414_v63 = vld [vmem:[#allocation13 + $0xb8] sm:$0xff] }
 0x664   : > { %v7371_v44 = vsel %vm4000_vm9, %v7332_v33, %v7370_v53  ;;  %v7376_v52 = vsel %vm4000_vm9, %v7336_v25, %v7375_v55  ;;  %v7293_v20 = vmax.f32 %v7261_v26, %v7277_v31  ;;  %v7294_v34 = vmax.f32 %v7262_v2, %v7278_v40  ;;  %v7399_v2 = vld [vmem:[#allocation13 + $0x40] sm:$0xff]  ;;  %v7412_v33 = vld [vmem:[#allocation13 + $0xa8] sm:$0xff]  ;;  %v7410_v25 = vld [vmem:[#allocation13 + $0x98] sm:$0xff] }
 0x665   : > { %v7295_v21 = vmax.f32 %v7263_v11, %v7279_v15  ;;  %v7296_v18 = vmax.f32 %v7264_v50, %v7280_v42  ;;  %v12017_v49 = vpack.c.bf16 %v7395_v56, %v7391_v28  ;;  %v12081_v26 = vpack.c.bf16 %v7397_v43, %v7393_v29  ;;  %v7403_v11 = vld [vmem:[#allocation13 + $0x60] sm:$0xff] }
 0x666   : > { %v7340_v16 = vrot.slane %v7293_v20, %v14116_v8  ;;  %v7344_v3 = vrot.slane %v7293_v20, %v14121_v10  ;;  %v7348_v9 = vrot.slane %v7294_v34, %v14116_v8  ;;  %v7352_v57 = vrot.slane %v7294_v34, %v14121_v10  ;;  %v7407_v53 = vld [vmem:[#allocation13 + $0x80] sm:$0xff]  ;;  %v7416_v20 = vld [vmem:[#allocation13 + $0xc8] sm:$0xff] }
 0x667   : > { %v7356_v13 = vrot.slane %v7295_v21, %v14116_v8  ;;  %v7360_v45 = vrot.slane %v7295_v21, %v14121_v10  ;;  %v7364_v47 = vrot.slane %v7296_v18, %v14116_v8  ;;  %v7368_v60 = vrot.slane %v7296_v18, %v14121_v10  ;;  %v7411_v55 = vld [vmem:[#allocation13 + $0xa0] sm:$0xff]  ;;  %v7420_v34 = vld [vmem:[#allocation13 + $0xe8] sm:$0xff]  ;;  %v7418_v21 = vld [vmem:[#allocation13 + $0xd8] sm:$0xff] }
 0x668   : > { %v7372_v22 = vsel %vm4002_vm10, %v7340_v16, %v7371_v44  ;;  %v7377_v54 = vsel %vm4002_vm10, %v7344_v3, %v7376_v52  ;;  %v12019_v38 = vpack.c.bf16 %v7404_v6, %v7400_v7  ;;  %v12083_v62 = vpack.c.bf16 %v7406_v48, %v7402_v4  ;;  %v7409_v44 = vld [vmem:[#allocation13 + $0x90] sm:$0xff]  ;;  %v7422_v18 = vld [vmem:[#allocation13 + $0xf8] sm:$0xff]  ;;  %v7423_v28 = vld [vmem:[#allocation13 + $0x100] sm:$0xff] }
 0x669   : > { %v7373_v61 = vsel %vm4004_vm11, %v7348_v9, %v7372_v22  ;;  %v7378_v14 = vsel %vm4004_vm11, %v7352_v57, %v7377_v54  ;;  %v7379_v19 = vsel %vm4021_vm12, %v7364_v47, %v7356_v13  ;;  %v7380_v35 = vsel %vm4021_vm12, %v7368_v60, %v7360_v45  ;;  %v7413_v52 = vld [vmem:[#allocation13 + $0xb0] sm:$0xff]  ;;  %v7415_v9 = vld [vmem:[#allocation13 + $0xc0] sm:$0xff]  ;;  %v7424_v22 = vld [vmem:[#allocation13 + $0x108] sm:$0xff] }
 0x66a   : > { %7385 = vst [vmem:[#allocation3] sm:$0xfc] %v7373_v61  ;;  %7386 = vst [vmem:[#allocation3 + $0x8] sm:$0xfc] %v7378_v14  ;;  %v12021_v31 = vpack.c.bf16 %v7403_v11, %v7399_v2  ;;  %v12085_v40 = vpack.c.bf16 %v7405_v30, %v7401_v36  ;;  %v12023_v15 = vpack.c.bf16 %v7412_v33, %v7408_v37  ;;  %v7419_v57 = vld [vmem:[#allocation13 + $0xe0] sm:$0xff]  ;;  %v7417_v47 = vld [vmem:[#allocation13 + $0xd0] sm:$0xff] }
 0x66b   : > { %7387 = vst [vmem:[#allocation3 + $0x10] sm:$0x3] %v7379_v19  ;;  %7388 = vst [vmem:[#allocation3 + $0x18] sm:$0x3] %v7380_v35  ;;  %v12087_v42 = vpack.c.bf16 %v7414_v63, %v7410_v25  ;;  %v12025_v16 = vpack.c.bf16 %v7411_v55, %v7407_v53  ;;  %v12089_v3 = vpack.c.bf16 %v7413_v52, %v7409_v44  ;;  %v7421_v60 = vld [vmem:[#allocation13 + $0xf0] sm:$0xff]  ;;  %v7428_v54 = vld [vmem:[#allocation13 + $0x128] sm:$0xff] }
 0x66c   : > { %v12027_v13 = vpack.c.bf16 %v7420_v34, %v7416_v20  ;;  %v12091_v45 = vpack.c.bf16 %v7422_v18, %v7418_v21  ;;  %v7426_v61 = vld [vmem:[#allocation13 + $0x118] sm:$0xff]  ;;  %v12029_v19 = vpack.c.bf16 %v7419_v57, %v7415_v9  ;;  %v12093_v35 = vpack.c.bf16 %v7421_v60, %v7417_v47  ;;  %v7427_v56 = vld [vmem:[#allocation13 + $0x120] sm:$0xff]  ;;  %v7425_v7 = vld [vmem:[#allocation13 + $0x110] sm:$0xff] }
 0x66d   : > { %v7430_v14 = vld [vmem:[#allocation13 + $0x138] sm:$0xff]  ;;  %v12031_v29 = vpack.c.bf16 %v7428_v54, %v7424_v22  ;;  %v7429_v6 = vld [vmem:[#allocation13 + $0x130] sm:$0xff]  ;;  %v7432_v4 = vld [vmem:[#allocation13 + $0x148] sm:$0xff] }
 0x66e   : > { %v12095_v43 = vpack.c.bf16 %v7430_v14, %v7426_v61  ;;  %v7440_v2 = vld [vmem:[#allocation13 + $0x188] sm:$0xff]  ;;  %v7446_v36 = vld [vmem:[#allocation13 + $0x1b8] sm:$0xff]  ;;  %v7441_v25 = vld [vmem:[#allocation13 + $0x190] sm:$0xff] }
 0x66f   : > { %v7444_v11 = vld [vmem:[#allocation13 + $0x1a8] sm:$0xff]  ;;  %v7445_v63 = vld [vmem:[#allocation13 + $0x1b0] sm:$0xff]  ;;  %v7454_v53 = vld [vmem:[#allocation13 + $0x1f8] sm:$0xff] }
 0x670   : > { %v7451_v44 = vld [vmem:[#allocation13 + $0x1e0] sm:$0xff]  ;;  %v7449_v34 = vld [vmem:[#allocation13 + $0x1d0] sm:$0xff]  ;;  %v7456_v18 = vld [vmem:[#allocation13 + $0x208] sm:$0xff] }
 0x671   : > { %v7520_v59 = vld [vmem:[#allocation3 + $0x8] sm:$0xfe]  ;;  %v7519_v1 = vld [vmem:[#allocation3] sm:$0xfe]  ;;  %v7459_v47 = vld [vmem:[#allocation13 + $0x220] sm:$0xff] }
 0x672   : > { %v7522_v41 = vld [vmem:[#allocation3 + $0x18] sm:$0x1]  ;;  %v7659_v23 = vrot.slane %v7520_v59, 1  ;;  %v7521_v39 = vld [vmem:[#allocation3 + $0x10] sm:$0x1]  ;;  %v7656_v58 = vrot.slane %v7519_v1, 1 }
 0x673   : > { %v7660_v27 = vrot.slane %v7522_v41, 1  ;;  %v7657_v17 = vrot.slane %v7521_v39, 1  ;;  %v7390_v0 = vld [vmem:[#allocation3 + $0x8] sm:$0xff]  ;;  %v7436_v59 = vld [vmem:[#allocation13 + $0x168] sm:$0xff]  ;;  %v7431_v39 = vld [vmem:[#allocation13 + $0x140] sm:$0xff] }
 0x674   : > { %v7434_v41 = vld [vmem:[#allocation13 + $0x158] sm:$0xff]  ;;  %v12035_v48 = vpack.c.bf16 %v7436_v59, %v7432_v4  ;;  %v7453_v21 = vld [vmem:[#allocation13 + $0x1f0] sm:$0xff]  ;;  %v7464_v14 = vld [vmem:[#allocation13 + $0x248] sm:$0xff] }
 0x675   : > { %v7661_v50 = vsel %vm738_vm3, %v7659_v23, %v7660_v27  ;;  %v7658_v51 = vsel %vm738_vm3, %v7656_v58, %v7657_v17  ;;  %v7438_v1 = vld [vmem:[#allocation13 + $0x178] sm:$0xff]  ;;  %v12033_v23 = vpack.c.bf16 %v7427_v56, %v7423_v28  ;;  %v12097_v27 = vpack.c.bf16 %v7429_v6, %v7425_v7  ;;  %v7435_v58 = vld [vmem:[#allocation13 + $0x160] sm:$0xff]  ;;  %v7457_v54 = vld [vmem:[#allocation13 + $0x210] sm:$0xff] }
 0x676   : > { %7728 = vmatprep.mubr.f32.mxu0 %v7661_v50  ;;  %7799 = vmatprep.mubr.f32.mxu1 %v7661_v50  ;;  %v12099_v17 = vpack.c.bf16 %v7438_v1, %v7434_v41  ;;  %v7442_v50 = vld [vmem:[#allocation13 + $0x198] sm:$0xff]  ;;  %v12037_v30 = vpack.c.bf16 %v7435_v58, %v7431_v39  ;;  %v7461_v61 = vld [vmem:[#allocation13 + $0x230] sm:$0xff]  ;;  %v7467_v7 = vld [vmem:[#allocation13 + $0x260] sm:$0xff] }
 0x677   : > { %7729 = vmatmul.mubr.f32.vlgmr.msra.gmra.mrb[20].mxu0 %v7658_v51  ;;  %7800 = vmatmul.mubr.f32.vlgmr.msra.gmra.mrb[20].mxu1 %v7658_v51  ;;  %v7439_v51 = vld [vmem:[#allocation13 + $0x180] sm:$0xff]  ;;  %v12103_v33 = vpack.c.bf16 %v7446_v36, %v7442_v50  ;;  %v7462_v9 = vld [vmem:[#allocation13 + $0x238] sm:$0xff]  ;;  %v7465_v59 = vld [vmem:[#allocation13 + $0x250] sm:$0xff] }
 0x678   : > { %12018 = vmatpush1.bf16.msra.mxu0 %v12017_v49  ;;  %12082 = vmatpush1.bf16.msra.mxu1 %v12081_v26  ;;  %v7433_v49 = vld [vmem:[#allocation13 + $0x150] sm:$0xff]  ;;  %v7470_v28 = vld [vmem:[#allocation13 + $0x278] sm:$0xff]  ;;  %v7472_v1 = vld [vmem:[#allocation13 + $0x288] sm:$0xff] }
 0x679   : > { %7870 = vmatprep.mubr.f32.mxu0 %v7390_v0  ;;  %7941 = vmatprep.mubr.f32.mxu1 %v7390_v0  ;;  %v7437_v26 = vld [vmem:[#allocation13 + $0x170] sm:$0xff]  ;;  %v7448_v0 = vld [vmem:[#allocation13 + $0x1c8] sm:$0xff]  ;;  %v7478_v39 = vld [vmem:[#allocation13 + $0x2b8] sm:$0xff] }
 0x67a   : > { %12020 = vmatprep.subr.bf16.mxu0 %v12019_v38  ;;  %12084 = vmatprep.subr.bf16.mxu1 %v12083_v62  ;;  %v12101_v37 = vpack.c.bf16 %v7437_v26, %v7433_v49  ;;  %v7443_v38 = vld [vmem:[#allocation13 + $0x1a0] sm:$0xff]  ;;  %v12039_v62 = vpack.c.bf16 %v7444_v11, %v7440_v2  ;;  %v7469_v41 = vld [vmem:[#allocation13 + $0x270] sm:$0xff]  ;;  %v7480_v36 = vld [vmem:[#allocation13 + $0x2c8] sm:$0xff] }
 0x67b   : > { %v12041_v55 = vpack.c.bf16 %v7443_v38, %v7439_v51  ;;  %v7475_v49 = vld [vmem:[#allocation13 + $0x2a0] sm:$0xff]  ;;  %v7473_v11 = vld [vmem:[#allocation13 + $0x290] sm:$0xff]  ;;  %v7486_v51 = vld [vmem:[#allocation13 + $0x2f8] sm:$0xff] }
 0x67c   : > { %12022 = vmatpush1.bf16.msra.mxu0 %v12021_v31  ;;  %12086 = vmatpush1.bf16.msra.mxu1 %v12085_v40  ;;  %v7452_v31 = vld [vmem:[#allocation13 + $0x1e8] sm:$0xff]  ;;  %v7450_v40 = vld [vmem:[#allocation13 + $0x1d8] sm:$0xff]  ;;  %v7477_v50 = vld [vmem:[#allocation13 + $0x2b0] sm:$0xff] }
 0x67d   : > { %12024 = vmatprep.subr.bf16.mxu0 %v12023_v15  ;;  %12088 = vmatprep.subr.bf16.mxu1 %v12087_v42  ;;  %v12105_v15 = vpack.c.bf16 %v7445_v63, %v7441_v25  ;;  %v7447_v42 = vld [vmem:[#allocation13 + $0x1c0] sm:$0xff]  ;;  %v12043_v52 = vpack.c.bf16 %v7452_v31, %v7448_v0  ;;  %v12107_v20 = vpack.c.bf16 %v7454_v53, %v7450_v40  ;;  %v7481_v31 = vld [vmem:[#allocation13 + $0x2d0] sm:$0xff]  ;;  %v7488_v53 = vld [vmem:[#allocation13 + $0x308] sm:$0xff] }
 0x67e   : > { %v12045_v57 = vpack.c.bf16 %v7451_v44, %v7447_v42  ;;  %v7483_v25 = vld [vmem:[#allocation13 + $0x2e0] sm:$0xff]  ;;  %v7485_v40 = vld [vmem:[#allocation13 + $0x2f0] sm:$0xff]  ;;  %v7494_v42 = vld [vmem:[#allocation13 + $0x338] sm:$0xff] }
 0x680   : > { %12026 = vmatpush1.bf16.msra.mxu0 %v12025_v16  ;;  %12090 = vmatpush1.bf16.msra.mxu1 %v12089_v3  ;;  %v7460_v16 = vld [vmem:[#allocation13 + $0x228] sm:$0xff]  ;;  %v7458_v3 = vld [vmem:[#allocation13 + $0x218] sm:$0xff] }
 0x681   : > { %12028 = vmatprep.subr.bf16.mxu0 %v12027_v13  ;;  %12092 = vmatprep.subr.bf16.mxu1 %v12091_v45  ;;  %v12109_v13 = vpack.c.bf16 %v7453_v21, %v7449_v34  ;;  %v7455_v45 = vld [vmem:[#allocation13 + $0x200] sm:$0xff]  ;;  %v12047_v60 = vpack.c.bf16 %v7460_v16, %v7456_v18  ;;  %v12111_v22 = vpack.c.bf16 %v7462_v9, %v7458_v3  ;;  %v7489_v16 = vld [vmem:[#allocation13 + $0x310] sm:$0xff]  ;;  %v7496_v9 = vld [vmem:[#allocation13 + $0x348] sm:$0xff] }
 0x682   : > { %v12049_v56 = vpack.c.bf16 %v7459_v47, %v7455_v45  ;;  %v7491_v34 = vld [vmem:[#allocation13 + $0x320] sm:$0xff]  ;;  %v7493_v3 = vld [vmem:[#allocation13 + $0x330] sm:$0xff]  ;;  %v7502_v45 = vld [vmem:[#allocation13 + $0x378] sm:$0xff] }
 0x684   : > { %12030 = vmatpush1.bf16.msra.mxu0 %v12029_v19  ;;  %12094 = vmatpush1.bf16.msra.mxu1 %v12093_v35  ;;  %v7468_v19 = vld [vmem:[#allocation13 + $0x268] sm:$0xff]  ;;  %v7466_v35 = vld [vmem:[#allocation13 + $0x258] sm:$0xff] }
 0x685   : > { %12032 = vmatprep.subr.bf16.mxu0 %v12031_v29  ;;  %12096 = vmatprep.subr.bf16.mxu1 %v12095_v43  ;;  %v12113_v29 = vpack.c.bf16 %v7461_v61, %v7457_v54  ;;  %v7463_v43 = vld [vmem:[#allocation13 + $0x240] sm:$0xff]  ;;  %v12051_v6 = vpack.c.bf16 %v7468_v19, %v7464_v14  ;;  %v12115_v4 = vpack.c.bf16 %v7470_v28, %v7466_v35  ;;  %v7497_v19 = vld [vmem:[#allocation13 + $0x350] sm:$0xff]  ;;  %v7504_v28 = vld [vmem:[#allocation13 + $0x388] sm:$0xff] }
 0x686   : > { %v12053_v58 = vpack.c.bf16 %v7467_v7, %v7463_v43  ;;  %v7499_v54 = vld [vmem:[#allocation13 + $0x360] sm:$0xff]  ;;  %v7501_v35 = vld [vmem:[#allocation13 + $0x370] sm:$0xff]  ;;  %v7510_v43 = vld [vmem:[#allocation13 + $0x3b8] sm:$0xff] }
 0x688   : > { %12034 = vmatpush1.bf16.msra.mxu0 %v12033_v23  ;;  %12098 = vmatpush1.bf16.msra.mxu1 %v12097_v27  ;;  %v7476_v23 = vld [vmem:[#allocation13 + $0x2a8] sm:$0xff]  ;;  %v7474_v27 = vld [vmem:[#allocation13 + $0x298] sm:$0xff] }
 0x689   : > { %12036 = vmatprep.subr.bf16.mxu0 %v12035_v48  ;;  %12100 = vmatprep.subr.bf16.mxu1 %v12099_v17  ;;  %v12117_v48 = vpack.c.bf16 %v7469_v41, %v7465_v59  ;;  %v7471_v17 = vld [vmem:[#allocation13 + $0x280] sm:$0xff]  ;;  %v12055_v26 = vpack.c.bf16 %v7476_v23, %v7472_v1  ;;  %v12119_v2 = vpack.c.bf16 %v7478_v39, %v7474_v27  ;;  %v7505_v23 = vld [vmem:[#allocation13 + $0x390] sm:$0xff]  ;;  %v7512_v39 = vld [vmem:[#allocation13 + $0x3c8] sm:$0xff] }
 0x68a   : > { %v12057_v38 = vpack.c.bf16 %v7475_v49, %v7471_v17  ;;  %v7507_v59 = vld [vmem:[#allocation13 + $0x3a0] sm:$0xff]  ;;  %v7509_v27 = vld [vmem:[#allocation13 + $0x3b0] sm:$0xff]  ;;  %v7518_v17 = vld [vmem:[#allocation13 + $0x3f8] sm:$0xff] }
 0x68c   : > { %12038 = vmatpush1.bf16.msra.mxu0 %v12037_v30  ;;  %12102 = vmatpush1.bf16.msra.mxu1 %v12101_v37  ;;  %v7484_v30 = vld [vmem:[#allocation13 + $0x2e8] sm:$0xff]  ;;  %v7482_v37 = vld [vmem:[#allocation13 + $0x2d8] sm:$0xff] }
 0x68d   : > { %12040 = vmatprep.subr.bf16.mxu0 %v12039_v62  ;;  %12104 = vmatprep.subr.bf16.mxu1 %v12103_v33  ;;  %v12121_v62 = vpack.c.bf16 %v7477_v50, %v7473_v11  ;;  %v7479_v33 = vld [vmem:[#allocation13 + $0x2c0] sm:$0xff]  ;;  %v12059_v63 = vpack.c.bf16 %v7484_v30, %v7480_v36  ;;  %v12123_v0 = vpack.c.bf16 %v7486_v51, %v7482_v37  ;;  %v7513_v30 = vld [vmem:[#allocation13 + $0x3d0] sm:$0xff]  ;;  %v7954_v51 = vld [vmem:[#allocation13 + $0x808] sm:$0xff] }
 0x68e   : > { %v12061_v44 = vpack.c.bf16 %v7483_v25, %v7479_v33  ;;  %v7515_v11 = vld [vmem:[#allocation13 + $0x3e0] sm:$0xff]  ;;  %v7517_v37 = vld [vmem:[#allocation13 + $0x3f0] sm:$0xff]  ;;  %v7960_v33 = vld [vmem:[#allocation13 + $0x838] sm:$0xff] }
 0x690   : > { %12042 = vmatpush1.bf16.msra.mxu0 %v12041_v55  ;;  %12106 = vmatpush1.bf16.msra.mxu1 %v12105_v15  ;;  %v7492_v55 = vld [vmem:[#allocation13 + $0x328] sm:$0xff]  ;;  %v7490_v15 = vld [vmem:[#allocation13 + $0x318] sm:$0xff] }
 0x691   : > { %12044 = vmatprep.subr.bf16.mxu0 %v12043_v52  ;;  %12108 = vmatprep.subr.bf16.mxu1 %v12107_v20  ;;  %v12125_v52 = vpack.c.bf16 %v7485_v40, %v7481_v31  ;;  %v7487_v20 = vld [vmem:[#allocation13 + $0x300] sm:$0xff]  ;;  %v12063_v21 = vpack.c.bf16 %v7492_v55, %v7488_v53  ;;  %v12127_v18 = vpack.c.bf16 %v7494_v42, %v7490_v15  ;;  %v7955_v42 = vld [vmem:[#allocation13 + $0x810] sm:$0xff] }
 0x692   : > { %v12065_v47 = vpack.c.bf16 %v7491_v34, %v7487_v20  ;;  %v7951_v31 = vld [vmem:[#allocation3 + $0x18] sm:$0x3] }
 0x693   : > { %v7953_v55 = vld [vmem:[#allocation13 + $0x800] sm:$0xff]  ;;  %v8089_v34 = vrot.slane %v7951_v31, 2 }
 0x694   : > { %12046 = vmatpush1.bf16.msra.mxu0 %v12045_v57  ;;  %12110 = vmatpush1.bf16.msra.mxu1 %v12109_v13  ;;  %v7500_v57 = vld [vmem:[#allocation13 + $0x368] sm:$0xff]  ;;  %v7498_v13 = vld [vmem:[#allocation13 + $0x358] sm:$0xff]  ;;  %v7957_v15 = vld [vmem:[#allocation13 + $0x820] sm:$0xff] }
 0x695   : > { %12048 = vmatprep.subr.bf16.mxu0 %v12047_v60  ;;  %12112 = vmatprep.subr.bf16.mxu1 %v12111_v22  ;;  %v12129_v60 = vpack.c.bf16 %v7493_v3, %v7489_v16  ;;  %v7495_v22 = vld [vmem:[#allocation13 + $0x340] sm:$0xff]  ;;  %v12067_v61 = vpack.c.bf16 %v7500_v57, %v7496_v9  ;;  %v12131_v14 = vpack.c.bf16 %v7502_v45, %v7498_v13  ;;  %v7968_v16 = vld [vmem:[#allocation13 + $0x878] sm:$0xff]  ;;  %v7963_v45 = vld [vmem:[#allocation13 + $0x850] sm:$0xff] }
 0x696   : > { %v12069_v7 = vpack.c.bf16 %v7499_v54, %v7495_v22  ;;  %v12145_v3 = vpack.c.bf16 %v7957_v15, %v7953_v55  ;;  %v7961_v9 = vld [vmem:[#allocation13 + $0x840] sm:$0xff]  ;;  %v7998_v55 = vld [vmem:[#allocation13 + $0x968] sm:$0xff]  ;;  %v7996_v15 = vld [vmem:[#allocation13 + $0x958] sm:$0xff] }
 0x697   : > { %v7965_v13 = vld [vmem:[#allocation13 + $0x860] sm:$0xff] }
 0x698   : > { %12050 = vmatpush1.bf16.msra.mxu0 %v12049_v56  ;;  %12114 = vmatpush1.bf16.msra.mxu1 %v12113_v29  ;;  %v7508_v56 = vld [vmem:[#allocation13 + $0x3a8] sm:$0xff]  ;;  %v7506_v29 = vld [vmem:[#allocation13 + $0x398] sm:$0xff] }
 0x699   : > { %12052 = vmatprep.subr.bf16.mxu0 %v12051_v6  ;;  %12116 = vmatprep.subr.bf16.mxu1 %v12115_v4  ;;  %v12133_v6 = vpack.c.bf16 %v7501_v35, %v7497_v19  ;;  %v7503_v4 = vld [vmem:[#allocation13 + $0x380] sm:$0xff]  ;;  %v12071_v41 = vpack.c.bf16 %v7508_v56, %v7504_v28  ;;  %v12135_v1 = vpack.c.bf16 %v7510_v43, %v7506_v29  ;;  %v7972_v35 = vld [vmem:[#allocation13 + $0x898] sm:$0xff] }
 0x69a   : > { %v12073_v49 = vpack.c.bf16 %v7507_v59, %v7503_v4  ;;  %v7976_v28 = vld [vmem:[#allocation13 + $0x8b8] sm:$0xff]  ;;  %v12149_v56 = vpack.c.bf16 %v7965_v13, %v7961_v9  ;;  %v7971_v4 = vld [vmem:[#allocation13 + $0x890] sm:$0xff]  ;;  %v8002_v9 = vld [vmem:[#allocation13 + $0x988] sm:$0xff] }
 0x69b   : > { %v12215_v59 = vpack.c.bf16 %v7976_v28, %v7972_v35  ;;  %v8004_v13 = vld [vmem:[#allocation13 + $0x998] sm:$0xff]  ;;  %v8007_v35 = vld [vmem:[#allocation13 + $0x9b0] sm:$0xff]  ;;  %v8010_v28 = vld [vmem:[#allocation13 + $0x9c8] sm:$0xff] }
 0x69c   : > { %12054 = vmatpush1.bf16.msra.mxu0 %v12053_v58  ;;  %12118 = vmatpush1.bf16.msra.mxu1 %v12117_v48  ;;  %v7516_v58 = vld [vmem:[#allocation13 + $0x3e8] sm:$0xff]  ;;  %v7514_v48 = vld [vmem:[#allocation13 + $0x3d8] sm:$0xff] }
 0x69d   : > { %12056 = vmatprep.subr.bf16.mxu0 %v12055_v26  ;;  %12120 = vmatprep.subr.bf16.mxu1 %v12119_v2  ;;  %v12137_v26 = vpack.c.bf16 %v7509_v27, %v7505_v23  ;;  %v7511_v2 = vld [vmem:[#allocation13 + $0x3c0] sm:$0xff]  ;;  %v12075_v50 = vpack.c.bf16 %v7516_v58, %v7512_v39  ;;  %v12139_v36 = vpack.c.bf16 %v7518_v17, %v7514_v48  ;;  %v7982_v23 = vld [vmem:[#allocation13 + $0x8e8] sm:$0xff]  ;;  %v7980_v27 = vld [vmem:[#allocation13 + $0x8d8] sm:$0xff] }
 0x69e   : > { %v12077_v25 = vpack.c.bf16 %v7515_v11, %v7511_v2  ;;  %v7984_v39 = vld [vmem:[#allocation13 + $0x8f8] sm:$0xff]  ;;  %v7979_v2 = vld [vmem:[#allocation13 + $0x8d0] sm:$0xff] }
 0x69f   : > { %v12219_v11 = vpack.c.bf16 %v7984_v39, %v7980_v27  ;;  %v8015_v27 = vld [vmem:[#allocation13 + $0x9f0] sm:$0xff]  ;;  %v8018_v39 = vld [vmem:[#allocation13 + $0xa08] sm:$0xff] }
 0x6a0   : > { %12058 = vmatpush1.bf16.msra.mxu0 %v12057_v38  ;;  %12122 = vmatpush1.bf16.msra.mxu1 %v12121_v62  ;;  %v7958_v38 = vld [vmem:[#allocation13 + $0x828] sm:$0xff]  ;;  %v7956_v62 = vld [vmem:[#allocation13 + $0x818] sm:$0xff] }
 0x6a1   : > { %12060 = vmatprep.subr.bf16.mxu0 %v12059_v63  ;;  %12124 = vmatprep.subr.bf16.mxu1 %v12123_v0  ;;  %v12141_v63 = vpack.c.bf16 %v7517_v37, %v7513_v30  ;;  %v7949_v0 = vld [vmem:[#allocation3 + $0x8] sm:$0xfc]  ;;  %v12143_v40 = vpack.c.bf16 %v7958_v38, %v7954_v51  ;;  %v12207_v53 = vpack.c.bf16 %v7960_v33, %v7956_v62  ;;  %v7990_v30 = vld [vmem:[#allocation13 + $0x928] sm:$0xff] }
 0x6a2   : > { %v8088_v20 = vrot.slane %v7949_v0, 2  ;;  %v7988_v37 = vld [vmem:[#allocation13 + $0x918] sm:$0xff]  ;;  %v7987_v0 = vld [vmem:[#allocation13 + $0x910] sm:$0xff] }
 0x6a3   : > { %v7992_v51 = vld [vmem:[#allocation13 + $0x938] sm:$0xff] }
 0x6a4   : > { %12062 = vmatpush1.bf16.msra.mxu0 %v12061_v44  ;;  %12126 = vmatpush1.bf16.msra.mxu1 %v12125_v52  ;;  %v7959_v44 = vld [vmem:[#allocation13 + $0x830] sm:$0xff]  ;;  %v7962_v52 = vld [vmem:[#allocation13 + $0x848] sm:$0xff]  ;;  %v8090_v19 = vsel %vm1639_vm5, %v8088_v20, %v8089_v34  ;;  %v12223_v31 = vpack.c.bf16 %v7992_v51, %v7988_v37  ;;  %v7993_v34 = vld [vmem:[#allocation13 + $0x940] sm:$0xff] }
 0x6a5   : > { %12064 = vmatprep.subr.bf16.mxu0 %v12063_v21  ;;  %12128 = vmatprep.subr.bf16.mxu1 %v12127_v18  ;;  %v7966_v21 = vld [vmem:[#allocation13 + $0x868] sm:$0xff]  ;;  %v7964_v18 = vld [vmem:[#allocation13 + $0x858] sm:$0xff]  ;;  %v12209_v57 = vpack.c.bf16 %v7959_v44, %v7955_v42  ;;  %v8023_v37 = vld [vmem:[#allocation13 + $0xa30] sm:$0xff] }
 0x6a6   : > { %v12147_v22 = vpack.c.bf16 %v7966_v21, %v7962_v52  ;;  %v12211_v54 = vpack.c.bf16 %v7968_v16, %v7964_v18  ;;  %v8000_v42 = vld [vmem:[#allocation13 + $0x978] sm:$0xff]  ;;  %v7997_v21 = vld [vmem:[#allocation13 + $0x960] sm:$0xff]  ;;  %v7995_v18 = vld [vmem:[#allocation13 + $0x950] sm:$0xff] }
 0x6a7   : > { %v12227_v16 = vpack.c.bf16 %v8000_v42, %v7996_v15  ;;  %v8026_v51 = vld [vmem:[#allocation13 + $0xa48] sm:$0xff]  ;;  %v8031_v15 = vld [vmem:[#allocation13 + $0xa70] sm:$0xff] }
 0x6a8   : > { %12066 = vmatpush1.bf16.msra.mxu0 %v12065_v47  ;;  %12130 = vmatpush1.bf16.msra.mxu1 %v12129_v60  ;;  %v7967_v47 = vld [vmem:[#allocation13 + $0x870] sm:$0xff]  ;;  %v8034_v42 = vld [vmem:[#allocation13 + $0xa88] sm:$0xff] }
 0x6a9   : > { %12068 = vmatprep.subr.bf16.mxu0 %v12067_v61  ;;  %12132 = vmatprep.subr.bf16.mxu1 %v12131_v14  ;;  %v7389_v60 = vld [vmem:[#allocation3] sm:$0xff]  ;;  %v12213_v29 = vpack.c.bf16 %v7967_v47, %v7963_v45  ;;  %v8008_v45 = vld [vmem:[#allocation13 + $0x9b8] sm:$0xff]  ;;  %v12165_v47 = vpack.c.bf16 %v7997_v21, %v7993_v34 }
 0x6aa   : > { %v7970_v61 = vld [vmem:[#allocation13 + $0x888] sm:$0xff] }
 0x6ab   : > { %v7974_v14 = vld [vmem:[#allocation13 + $0x8a8] sm:$0xff] }
 0x6ac   : > { %12070 = vmatpush1.bf16.msra.mxu0 %v12069_v7  ;;  %12134 = vmatpush1.bf16.msra.mxu1 %v12133_v6  ;;  %v12151_v43 = vpack.c.bf16 %v7974_v14, %v7970_v61  ;;  %v7969_v7 = vld [vmem:[#allocation13 + $0x880] sm:$0xff]  ;;  %v8003_v14 = vld [vmem:[#allocation13 + $0x990] sm:$0xff] }
 0x6ad   : > { %12072 = vmatprep.subr.bf16.mxu0 %v12071_v41  ;;  %12136 = vmatprep.subr.bf16.mxu1 %v12135_v1  ;;  %v7973_v6 = vld [vmem:[#allocation13 + $0x8a0] sm:$0xff]  ;;  %v7975_v41 = vld [vmem:[#allocation13 + $0x8b0] sm:$0xff]  ;;  %v7978_v1 = vld [vmem:[#allocation13 + $0x8c8] sm:$0xff] }
 0x6ae   : > { %v12153_v58 = vpack.c.bf16 %v7973_v6, %v7969_v7  ;;  %v12217_v48 = vpack.c.bf16 %v7975_v41, %v7971_v4  ;;  %v12155_v17 = vpack.c.bf16 %v7982_v23, %v7978_v1  ;;  %v8005_v61 = vld [vmem:[#allocation13 + $0x9a0] sm:$0xff]  ;;  %v12233_v6 = vpack.c.bf16 %v8007_v35, %v8003_v14  ;;  %v8011_v1 = vld [vmem:[#allocation13 + $0x9d0] sm:$0xff] }
 0x6af   : > { %v8013_v41 = vld [vmem:[#allocation13 + $0x9e0] sm:$0xff] }
 0x6b0   : > { %12074 = vmatpush1.bf16.msra.mxu0 %v12073_v49  ;;  %12138 = vmatpush1.bf16.msra.mxu1 %v12137_v26  ;;  %v7977_v49 = vld [vmem:[#allocation13 + $0x8c0] sm:$0xff] }
 0x6b1   : > { %12076 = vmatprep.subr.bf16.mxu0 %v12075_v50  ;;  %12140 = vmatprep.subr.bf16.mxu1 %v12139_v36  ;;  %v7981_v26 = vld [vmem:[#allocation13 + $0x8e0] sm:$0xff]  ;;  %v7983_v50 = vld [vmem:[#allocation13 + $0x8f0] sm:$0xff]  ;;  %v7986_v36 = vld [vmem:[#allocation13 + $0x908] sm:$0xff] }
 0x6b2   : > { %v12157_v38 = vpack.c.bf16 %v7981_v26, %v7977_v49  ;;  %v12221_v62 = vpack.c.bf16 %v7983_v50, %v7979_v2  ;;  %v12159_v33 = vpack.c.bf16 %v7990_v30, %v7986_v36  ;;  %v12237_v26 = vpack.c.bf16 %v8015_v27, %v8011_v1  ;;  %v8021_v50 = vld [vmem:[#allocation13 + $0xa20] sm:$0xff]  ;;  %v8019_v36 = vld [vmem:[#allocation13 + $0xa10] sm:$0xff] }
 0x6b3   : > { %v8045_v35 = vld [vmem:[#allocation13 + $0xae0] sm:$0xff] }
 0x6b4   : > { %12078 = vmatpush1.bf16.msra.mxu0 %v12077_v25  ;;  %12142 = vmatpush1.bf16.msra.mxu1 %v12141_v63  ;;  %v7985_v25 = vld [vmem:[#allocation13 + $0x900] sm:$0xff] }
 0x6b5   : > { %12144 = vmatprep.subr.bf16.mxu0 %v12143_v40  ;;  %12208 = vmatprep.subr.bf16.mxu1 %v12207_v53  ;;  %v7989_v63 = vld [vmem:[#allocation13 + $0x920] sm:$0xff]  ;;  %v7991_v40 = vld [vmem:[#allocation13 + $0x930] sm:$0xff]  ;;  %v7994_v53 = vld [vmem:[#allocation13 + $0x948] sm:$0xff] }
 0x6b6   : > { %v12161_v44 = vpack.c.bf16 %v7989_v63, %v7985_v25  ;;  %v12225_v52 = vpack.c.bf16 %v7991_v40, %v7987_v0  ;;  %v12163_v20 = vpack.c.bf16 %v7998_v55, %v7994_v53  ;;  %v12241_v63 = vpack.c.bf16 %v8023_v37, %v8019_v36  ;;  %v8029_v40 = vld [vmem:[#allocation13 + $0xa60] sm:$0xff]  ;;  %v8027_v53 = vld [vmem:[#allocation13 + $0xa50] sm:$0xff] }
 0x6b7   : > { %7871 = vmatmul.mubr.f32.vlgmr.msra.gmra.mrb[20].mxu0 %v7389_v60  ;;  %7942 = vmatmul.mubr.f32.vlgmr.msra.gmra.mrb[20].mxu1 %v7389_v60  ;;  %v12245_v21 = vpack.c.bf16 %v8031_v15, %v8027_v53  ;;  %v8053_v27 = vld [vmem:[#allocation13 + $0xb20] sm:$0xff] }
 0x6b8   : > { %12146 = vmatpush1.bf16.msra.mxu0 %v12145_v3  ;;  %8157 = vmatprep.mubr.f32.mxu0 %v8090_v19  ;;  %v7999_v3 = vld [vmem:[#allocation13 + $0x970] sm:$0xff]  ;;  %v8061_v37 = vld [vmem:[#allocation13 + $0xb60] sm:$0xff] }
 0x6b9   : > { %12210 = vmatpush1.bf16.msra.mxu1 %v12209_v57  ;;  %8228 = vmatprep.mubr.f32.mxu1 %v8090_v19  ;;  %v8006_v57 = vld [vmem:[#allocation13 + $0x9a8] sm:$0xff]  ;;  %v12229_v60 = vpack.c.bf16 %v7999_v3, %v7995_v18  ;;  %v12231_v19 = vpack.c.bf16 %v8008_v45, %v8004_v13  ;;  %v8037_v3 = vld [vmem:[#allocation13 + $0xaa0] sm:$0xff]  ;;  %v8039_v13 = vld [vmem:[#allocation13 + $0xab0] sm:$0xff] }
 0x6ba   : > { %12148 = vmatprep.subr.bf16.mxu0 %v12147_v22  ;;  %12212 = vmatprep.subr.bf16.mxu1 %v12211_v54  ;;  %v12167_v22 = vpack.c.bf16 %v8006_v57, %v8002_v9  ;;  %v8001_v54 = vld [vmem:[#allocation13 + $0x980] sm:$0xff]  ;;  %v8035_v9 = vld [vmem:[#allocation13 + $0xa90] sm:$0xff]  ;;  %v8042_v45 = vld [vmem:[#allocation13 + $0xac8] sm:$0xff] }
 0x6bb   : > { %v12169_v7 = vpack.c.bf16 %v8005_v61, %v8001_v54  ;;  %v12249_v61 = vpack.c.bf16 %v8039_v13, %v8035_v9  ;;  %v8069_v15 = vld [vmem:[#allocation13 + $0xba0] sm:$0xff] }
 0x6bc   : > { %12150 = vmatpush1.bf16.msra.mxu0 %v12149_v56  ;;  %v8014_v56 = vld [vmem:[#allocation13 + $0x9e8] sm:$0xff]  ;;  %v8077_v13 = vld [vmem:[#allocation13 + $0xbe0] sm:$0xff] }
 0x6bd   : > { %12214 = vmatpush1.bf16.msra.mxu1 %v12213_v29  ;;  %12152 = vmatprep.subr.bf16.mxu0 %v12151_v43  ;;  %v8012_v29 = vld [vmem:[#allocation13 + $0x9d8] sm:$0xff]  ;;  %v12171_v4 = vpack.c.bf16 %v8014_v56, %v8010_v28  ;;  %v8043_v28 = vld [vmem:[#allocation13 + $0xad0] sm:$0xff] }
 0x6be   : > { %12216 = vmatprep.subr.bf16.mxu1 %v12215_v59  ;;  %v8016_v43 = vld [vmem:[#allocation13 + $0x9f8] sm:$0xff]  ;;  %v8009_v59 = vld [vmem:[#allocation13 + $0x9c0] sm:$0xff] }
 0x6bf   : > { %v12235_v23 = vpack.c.bf16 %v8016_v43, %v8012_v29  ;;  %v12173_v49 = vpack.c.bf16 %v8013_v41, %v8009_v59  ;;  %v8047_v29 = vld [vmem:[#allocation13 + $0xaf0] sm:$0xff]  ;;  %v8050_v43 = vld [vmem:[#allocation13 + $0xb08] sm:$0xff] }
 0x6c0   : > { %12154 = vmatpush1.bf16.msra.mxu0 %v12153_v58  ;;  %v8022_v58 = vld [vmem:[#allocation13 + $0xa28] sm:$0xff]  ;;  %v12253_v41 = vpack.c.bf16 %v8047_v29, %v8043_v28 }
 0x6c1   : > { %12218 = vmatpush1.bf16.msra.mxu1 %v12217_v48  ;;  %12156 = vmatprep.subr.bf16.mxu0 %v12155_v17  ;;  %v8020_v48 = vld [vmem:[#allocation13 + $0xa18] sm:$0xff]  ;;  %v12175_v2 = vpack.c.bf16 %v8022_v58, %v8018_v39  ;;  %v8051_v39 = vld [vmem:[#allocation13 + $0xb10] sm:$0xff] }
 0x6c2   : > { %12220 = vmatprep.subr.bf16.mxu1 %v12219_v11  ;;  %v8024_v17 = vld [vmem:[#allocation13 + $0xa38] sm:$0xff]  ;;  %v8017_v11 = vld [vmem:[#allocation13 + $0xa00] sm:$0xff] }
 0x6c3   : > { %v12239_v30 = vpack.c.bf16 %v8024_v17, %v8020_v48  ;;  %v12177_v25 = vpack.c.bf16 %v8021_v50, %v8017_v11  ;;  %v8055_v48 = vld [vmem:[#allocation13 + $0xb30] sm:$0xff]  ;;  %v8058_v17 = vld [vmem:[#allocation13 + $0xb48] sm:$0xff] }
 0x6c4   : > { %12158 = vmatpush1.bf16.msra.mxu0 %v12157_v38  ;;  %v8030_v38 = vld [vmem:[#allocation13 + $0xa68] sm:$0xff]  ;;  %v12257_v50 = vpack.c.bf16 %v8055_v48, %v8051_v39 }
 0x6c5   : > { %12222 = vmatpush1.bf16.msra.mxu1 %v12221_v62  ;;  %12160 = vmatprep.subr.bf16.mxu0 %v12159_v33  ;;  %v8028_v62 = vld [vmem:[#allocation13 + $0xa58] sm:$0xff]  ;;  %v12179_v0 = vpack.c.bf16 %v8030_v38, %v8026_v51  ;;  %v8059_v51 = vld [vmem:[#allocation13 + $0xb50] sm:$0xff]  ;;  %v8253_v39 = vld [vmem:[#allocation13 + $0xc48] sm:$0xff] }
 0x6c6   : > { %12224 = vmatprep.subr.bf16.mxu1 %v12223_v31  ;;  %v8032_v33 = vld [vmem:[#allocation13 + $0xa78] sm:$0xff]  ;;  %v8025_v31 = vld [vmem:[#allocation13 + $0xa40] sm:$0xff] }
 0x6c7   : > { %v12243_v55 = vpack.c.bf16 %v8032_v33, %v8028_v62  ;;  %v12181_v34 = vpack.c.bf16 %v8029_v40, %v8025_v31  ;;  %v8063_v62 = vld [vmem:[#allocation13 + $0xb70] sm:$0xff]  ;;  %v8066_v33 = vld [vmem:[#allocation13 + $0xb88] sm:$0xff] }
 0x6c8   : > { %12162 = vmatpush1.bf16.msra.mxu0 %v12161_v44  ;;  %v8038_v44 = vld [vmem:[#allocation13 + $0xaa8] sm:$0xff]  ;;  %v12261_v40 = vpack.c.bf16 %v8063_v62, %v8059_v51 }
 0x6c9   : > { %12226 = vmatpush1.bf16.msra.mxu1 %v12225_v52  ;;  %12164 = vmatprep.subr.bf16.mxu0 %v12163_v20  ;;  %v8036_v52 = vld [vmem:[#allocation13 + $0xa98] sm:$0xff]  ;;  %v12183_v18 = vpack.c.bf16 %v8038_v44, %v8034_v42  ;;  %v8067_v42 = vld [vmem:[#allocation13 + $0xb90] sm:$0xff]  ;;  %v8261_v62 = vld [vmem:[#allocation13 + $0xc88] sm:$0xff] }
 0x6ca   : > { %12228 = vmatprep.subr.bf16.mxu1 %v12227_v16  ;;  %v8040_v20 = vld [vmem:[#allocation13 + $0xab8] sm:$0xff]  ;;  %v8033_v16 = vld [vmem:[#allocation13 + $0xa80] sm:$0xff] }
 0x6cb   : > { %v12247_v57 = vpack.c.bf16 %v8040_v20, %v8036_v52  ;;  %v12185_v54 = vpack.c.bf16 %v8037_v3, %v8033_v16  ;;  %v8071_v52 = vld [vmem:[#allocation13 + $0xbb0] sm:$0xff]  ;;  %v8074_v20 = vld [vmem:[#allocation13 + $0xbc8] sm:$0xff]  ;;  %v8073_v3 = vld [vmem:[#allocation13 + $0xbc0] sm:$0xff] }
 0x6cc   : > { %12166 = vmatpush1.bf16.msra.mxu0 %v12165_v47  ;;  %v8046_v47 = vld [vmem:[#allocation13 + $0xae8] sm:$0xff]  ;;  %v12265_v9 = vpack.c.bf16 %v8071_v52, %v8067_v42  ;;  %v12205_v28 = vpack.c.bf16 %v8077_v13, %v8073_v3  ;;  %v8264_v42 = vld [vmem:[#allocation13 + $0xca0] sm:$0xff] }
 0x6cd   : > { %12230 = vmatpush1.bf16.msra.mxu1 %v12229_v60  ;;  %12168 = vmatprep.subr.bf16.mxu0 %v12167_v22  ;;  %v8044_v60 = vld [vmem:[#allocation13 + $0xad8] sm:$0xff]  ;;  %v12187_v14 = vpack.c.bf16 %v8046_v47, %v8042_v45  ;;  %v8075_v45 = vld [vmem:[#allocation13 + $0xbd0] sm:$0xff]  ;;  %v8268_v13 = vld [vmem:[#allocation13 + $0xcc0] sm:$0xff] }
 0x6ce   : > { %12232 = vmatprep.subr.bf16.mxu1 %v12231_v19  ;;  %v8048_v22 = vld [vmem:[#allocation13 + $0xaf8] sm:$0xff]  ;;  %v8041_v19 = vld [vmem:[#allocation13 + $0xac0] sm:$0xff]  ;;  %v8079_v47 = vld [vmem:[#allocation13 + $0xbf0] sm:$0xff] }
 0x6cf   : > { %v12251_v56 = vpack.c.bf16 %v8048_v22, %v8044_v60  ;;  %v12189_v59 = vpack.c.bf16 %v8045_v35, %v8041_v19  ;;  %v7948_v22 = vld [vmem:[#allocation3] sm:$0xfc]  ;;  %v8247_v19 = vld [vmem:[#allocation13 + $0xc18] sm:$0xff]  ;;  %v12269_v29 = vpack.c.bf16 %v8079_v47, %v8075_v45  ;;  %v8272_v45 = vld [vmem:[#allocation13 + $0xce0] sm:$0xff] }
 0x6d0   : > { %12170 = vmatpush1.bf16.msra.mxu0 %v12169_v7  ;;  %v8054_v7 = vld [vmem:[#allocation13 + $0xb28] sm:$0xff]  ;;  %v8251_v35 = vld [vmem:[#allocation13 + $0xc38] sm:$0xff]  ;;  %v8270_v47 = vld [vmem:[#allocation13 + $0xcd0] sm:$0xff] }
 0x6d1   : > { %12234 = vmatpush1.bf16.msra.mxu1 %v12233_v6  ;;  %12172 = vmatprep.subr.bf16.mxu0 %v12171_v4  ;;  %v8052_v6 = vld [vmem:[#allocation13 + $0xb18] sm:$0xff]  ;;  %v12191_v1 = vpack.c.bf16 %v8054_v7, %v8050_v43  ;;  %v8244_v7 = vld [vmem:[#allocation13 + $0xc00] sm:$0xff] }
 0x6d2   : > { %12236 = vmatprep.subr.bf16.mxu1 %v12235_v23  ;;  %v8056_v4 = vld [vmem:[#allocation13 + $0xb38] sm:$0xff]  ;;  %v8049_v23 = vld [vmem:[#allocation13 + $0xb00] sm:$0xff] }
 0x6d3   : > { %v12255_v58 = vpack.c.bf16 %v8056_v4, %v8052_v6  ;;  %v12193_v11 = vpack.c.bf16 %v8053_v27, %v8049_v23  ;;  %v8248_v6 = vld [vmem:[#allocation13 + $0xc20] sm:$0xff]  ;;  %v8246_v23 = vld [vmem:[#allocation13 + $0xc10] sm:$0xff] }
 0x6d4   : > { %12174 = vmatpush1.bf16.msra.mxu0 %v12173_v49  ;;  %v8062_v49 = vld [vmem:[#allocation13 + $0xb68] sm:$0xff]  ;;  %v8242_v4 = vld [vmem:[#allocation3 + $0x18] sm:$0x7]  ;;  %v8250_v27 = vld [vmem:[#allocation13 + $0xc30] sm:$0xff]  ;;  %v12273_v48 = vpack.c.bf16 %v8248_v6, %v8244_v7 }
 0x6d5   : > { %12238 = vmatpush1.bf16.msra.mxu1 %v12237_v26  ;;  %12176 = vmatprep.subr.bf16.mxu0 %v12175_v2  ;;  %v8060_v26 = vld [vmem:[#allocation13 + $0xb58] sm:$0xff]  ;;  %v12195_v36 = vpack.c.bf16 %v8062_v49, %v8058_v17  ;;  %v8380_v49 = vrot.slane %v8242_v4, 3  ;;  %v8278_v7 = vld [vmem:[#allocation13 + $0xd10] sm:$0xff] }
 0x6d6   : > { %12240 = vmatprep.subr.bf16.mxu1 %v12239_v30  ;;  %v8064_v2 = vld [vmem:[#allocation13 + $0xb78] sm:$0xff]  ;;  %v8057_v30 = vld [vmem:[#allocation13 + $0xb40] sm:$0xff]  ;;  %v8282_v4 = vld [vmem:[#allocation13 + $0xd30] sm:$0xff] }
 0x6d7   : > { %v12259_v38 = vpack.c.bf16 %v8064_v2, %v8060_v26  ;;  %v12197_v31 = vpack.c.bf16 %v8061_v37, %v8057_v30  ;;  %v8255_v26 = vld [vmem:[#allocation13 + $0xc58] sm:$0xff]  ;;  %v8254_v30 = vld [vmem:[#allocation13 + $0xc50] sm:$0xff] }
 0x6d8   : > { %12178 = vmatpush1.bf16.msra.mxu0 %v12177_v25  ;;  %v8070_v25 = vld [vmem:[#allocation13 + $0xba8] sm:$0xff]  ;;  %v8259_v2 = vld [vmem:[#allocation13 + $0xc78] sm:$0xff] }
 0x6d9   : > { %12242 = vmatpush1.bf16.msra.mxu1 %v12241_v63  ;;  %12180 = vmatprep.subr.bf16.mxu0 %v12179_v0  ;;  %v8068_v63 = vld [vmem:[#allocation13 + $0xb98] sm:$0xff]  ;;  %v12199_v53 = vpack.c.bf16 %v8070_v25, %v8066_v33  ;;  %v8265_v33 = vld [vmem:[#allocation13 + $0xca8] sm:$0xff]  ;;  %v12339_v25 = vpack.c.bf16 %v8259_v2, %v8255_v26  ;;  %v8290_v2 = vld [vmem:[#allocation13 + $0xd70] sm:$0xff] }
 0x6da   : > { %12244 = vmatprep.subr.bf16.mxu1 %v12243_v55  ;;  %v8072_v0 = vld [vmem:[#allocation13 + $0xbb8] sm:$0xff]  ;;  %v8065_v55 = vld [vmem:[#allocation13 + $0xb80] sm:$0xff] }
 0x6db   : > { %v12263_v44 = vpack.c.bf16 %v8072_v0, %v8068_v63  ;;  %v12201_v16 = vpack.c.bf16 %v8069_v15, %v8065_v55  ;;  %v8263_v63 = vld [vmem:[#allocation13 + $0xc98] sm:$0xff]  ;;  %v12279_v55 = vpack.c.bf16 %v8265_v33, %v8261_v62  ;;  %v8260_v15 = vld [vmem:[#allocation13 + $0xc80] sm:$0xff] }
 0x6dc   : > { %12182 = vmatpush1.bf16.msra.mxu0 %v12181_v34  ;;  %v8078_v34 = vld [vmem:[#allocation13 + $0xbe8] sm:$0xff]  ;;  %v8267_v0 = vld [vmem:[#allocation13 + $0xcb8] sm:$0xff]  ;;  %v12281_v3 = vpack.c.bf16 %v8264_v42, %v8260_v15  ;;  %v8292_v62 = vld [vmem:[#allocation13 + $0xd80] sm:$0xff] }
 0x6dd   : > { %12246 = vmatpush1.bf16.msra.mxu1 %v12245_v21  ;;  %12184 = vmatprep.subr.bf16.mxu0 %v12183_v18  ;;  %v8076_v21 = vld [vmem:[#allocation13 + $0xbd8] sm:$0xff]  ;;  %v12343_v52 = vpack.c.bf16 %v8267_v0, %v8263_v63  ;;  %v8296_v33 = vld [vmem:[#allocation13 + $0xda0] sm:$0xff]  ;;  %v8298_v0 = vld [vmem:[#allocation13 + $0xdb0] sm:$0xff] }
 0x6de   : > { %12248 = vmatprep.subr.bf16.mxu1 %v12247_v57  ;;  %v8080_v18 = vld [vmem:[#allocation13 + $0xbf8] sm:$0xff]  ;;  %v12203_v57 = vpack.c.bf16 %v8078_v34, %v8074_v20  ;;  %v8266_v20 = vld [vmem:[#allocation13 + $0xcb0] sm:$0xff]  ;;  %v8269_v34 = vld [vmem:[#allocation13 + $0xcc8] sm:$0xff]  ;;  %v12297_v15 = vpack.c.bf16 %v8296_v33, %v8292_v62 }
 0x6df   : > { %v12267_v60 = vpack.c.bf16 %v8080_v18, %v8076_v21  ;;  %v8273_v21 = vld [vmem:[#allocation13 + $0xce8] sm:$0xff]  ;;  %v8271_v18 = vld [vmem:[#allocation13 + $0xcd8] sm:$0xff] }
 0x6e0   : > { %12186 = vmatpush1.bf16.msra.mxu0 %v12185_v54  ;;  %v8245_v54 = vld [vmem:[#allocation13 + $0xc08] sm:$0xff] }
 0x6e1   : > { %12250 = vmatpush1.bf16.msra.mxu1 %v12249_v61  ;;  %12188 = vmatprep.subr.bf16.mxu0 %v12187_v14  ;;  %v8249_v61 = vld [vmem:[#allocation13 + $0xc28] sm:$0xff]  ;;  %v7950_v14 = vld [vmem:[#allocation3 + $0x10] sm:$0x3] }
 0x6e2   : > { %12252 = vmatprep.subr.bf16.mxu1 %v12251_v56  ;;  %v8240_v56 = vld [vmem:[#allocation3 + $0x8] sm:$0xf8]  ;;  %v12271_v43 = vpack.c.bf16 %v8249_v61, %v8245_v54  ;;  %v8277_v54 = vld [vmem:[#allocation13 + $0xd08] sm:$0xff] }
 0x6e3   : > { %v8379_v17 = vrot.slane %v8240_v56, 3  ;;  %v8281_v61 = vld [vmem:[#allocation13 + $0xd28] sm:$0xff] }
 0x6e4   : > { %12190 = vmatpush1.bf16.msra.mxu0 %v12189_v59  ;;  %v8085_v59 = vrot.slane %v7948_v22, 2  ;;  %v8274_v22 = vld [vmem:[#allocation13 + $0xcf0] sm:$0xff]  ;;  %v12287_v56 = vpack.c.bf16 %v8281_v61, %v8277_v54 }
 0x6e5   : > { %12254 = vmatpush1.bf16.msra.mxu1 %v12253_v41  ;;  %12192 = vmatprep.subr.bf16.mxu0 %v12191_v1  ;;  %v8086_v41 = vrot.slane %v7950_v14, 2  ;;  %v12335_v1 = vpack.c.bf16 %v8251_v35, %v8247_v19  ;;  %v8279_v14 = vld [vmem:[#allocation13 + $0xd18] sm:$0xff]  ;;  %v12285_v35 = vpack.c.bf16 %v8272_v45, %v8268_v13  ;;  %v8310_v54 = vld [vmem:[#allocation13 + $0xe10] sm:$0xff] }
 0x6e6   : > { %12256 = vmatprep.subr.bf16.mxu1 %v12255_v58  ;;  %v8257_v58 = vld [vmem:[#allocation13 + $0xc68] sm:$0xff]  ;;  %v8283_v19 = vld [vmem:[#allocation13 + $0xd38] sm:$0xff] }
 0x6e7   : > { %v8087_v37 = vsel %vm1639_vm5, %v8085_v59, %v8086_v41  ;;  %v12275_v51 = vpack.c.bf16 %v8257_v58, %v8253_v39  ;;  %v12351_v6 = vpack.c.bf16 %v8283_v19, %v8279_v14  ;;  %v8285_v59 = vld [vmem:[#allocation13 + $0xd48] sm:$0xff]  ;;  %v12353_v39 = vpack.c.bf16 %v8282_v4, %v8278_v7  ;;  %v8314_v14 = vld [vmem:[#allocation13 + $0xe30] sm:$0xff]  ;;  %v8320_v4 = vld [vmem:[#allocation13 + $0xe60] sm:$0xff] }
 0x6e8   : > { %12194 = vmatpush1.bf16.msra.mxu0 %v12193_v11  ;;  %v12337_v11 = vpack.c.bf16 %v8250_v27, %v8246_v23  ;;  %v8289_v41 = vld [vmem:[#allocation13 + $0xd68] sm:$0xff]  ;;  %v8291_v23 = vld [vmem:[#allocation13 + $0xd78] sm:$0xff] }
 0x6e9   : > { %12258 = vmatpush1.bf16.msra.mxu1 %v12257_v50  ;;  %12196 = vmatprep.subr.bf16.mxu0 %v12195_v36  ;;  %v8252_v50 = vld [vmem:[#allocation13 + $0xc40] sm:$0xff]  ;;  %v12291_v58 = vpack.c.bf16 %v8289_v41, %v8285_v59  ;;  %v8317_v19 = vld [vmem:[#allocation13 + $0xe48] sm:$0xff]  ;;  %v8318_v59 = vld [vmem:[#allocation13 + $0xe50] sm:$0xff] }
 0x6ea   : > { %12260 = vmatprep.subr.bf16.mxu1 %v12259_v38  ;;  %v8256_v36 = vld [vmem:[#allocation13 + $0xc60] sm:$0xff]  ;;  %v8258_v38 = vld [vmem:[#allocation13 + $0xc70] sm:$0xff] }
 0x6ec   : > { %12198 = vmatpush1.bf16.msra.mxu0 %v12197_v31  ;;  %v8381_v31 = vsel %vm2182_vm6, %v8379_v17, %v8380_v49  ;;  %v8288_v17 = vld [vmem:[#allocation13 + $0xd60] sm:$0xff]  ;;  %v8286_v49 = vld [vmem:[#allocation13 + $0xd50] sm:$0xff] }
 0x6ed   : > { %12262 = vmatpush1.bf16.msra.mxu1 %v12261_v40  ;;  %12200 = vmatprep.subr.bf16.mxu0 %v12199_v53  ;;  %v12277_v40 = vpack.c.bf16 %v8256_v36, %v8252_v50  ;;  %v12341_v53 = vpack.c.bf16 %v8258_v38, %v8254_v30  ;;  %v8297_v50 = vld [vmem:[#allocation13 + $0xda8] sm:$0xff]  ;;  %v8295_v36 = vld [vmem:[#allocation13 + $0xd98] sm:$0xff] }
 0x6ee   : > { %12264 = vmatprep.subr.bf16.mxu1 %v12263_v44  ;;  %v8262_v44 = vld [vmem:[#allocation13 + $0xc90] sm:$0xff]  ;;  %v8299_v30 = vld [vmem:[#allocation13 + $0xdb8] sm:$0xff] }
 0x6ef   : > { %v12359_v63 = vpack.c.bf16 %v8299_v30, %v8295_v36  ;;  %v8330_v36 = vld [vmem:[#allocation13 + $0xeb0] sm:$0xff]  ;;  %v8333_v30 = vld [vmem:[#allocation13 + $0xec8] sm:$0xff] }
 0x6f0   : > { %12202 = vmatpush1.bf16.msra.mxu0 %v12201_v16  ;;  %v8275_v16 = vld [vmem:[#allocation13 + $0xcf8] sm:$0xff] }
 0x6f1   : > { %12266 = vmatpush1.bf16.msra.mxu1 %v12265_v9  ;;  %12204 = vmatprep.subr.bf16.mxu0 %v12203_v57  ;;  %v12345_v9 = vpack.c.bf16 %v8266_v20, %v8262_v44  ;;  %v12283_v57 = vpack.c.bf16 %v8273_v21, %v8269_v34  ;;  %v8304_v20 = vld [vmem:[#allocation13 + $0xde0] sm:$0xff]  ;;  %v8302_v34 = vld [vmem:[#allocation13 + $0xdd0] sm:$0xff] }
 0x6f2   : > { %12268 = vmatprep.subr.bf16.mxu1 %v12267_v60  ;;  %v12347_v60 = vpack.c.bf16 %v8275_v16, %v8271_v18  ;;  %v8306_v18 = vld [vmem:[#allocation13 + $0xdf0] sm:$0xff]  ;;  %v8309_v16 = vld [vmem:[#allocation13 + $0xe08] sm:$0xff] }
 0x6f3   : > { %v12365_v45 = vpack.c.bf16 %v8306_v18, %v8302_v34  ;;  %v8344_v18 = vld [vmem:[#allocation13 + $0xf20] sm:$0xff] }
 0x6f4   : > { %12206 = vmatpush1.bf16.msra.mxu0 %v12205_v28  ;;  %v12349_v28 = vpack.c.bf16 %v8274_v22, %v8270_v47  ;;  %v8312_v22 = vld [vmem:[#allocation13 + $0xe20] sm:$0xff] }
 0x6f5   : > { %12270 = vmatpush1.bf16.msra.mxu1 %v12269_v29  ;;  %12272 = vmatprep.subr.bf16.mxu0 %v12271_v43  ;;  %v8276_v29 = vld [vmem:[#allocation13 + $0xd00] sm:$0xff] }
 0x6f6   : > { %12336 = vmatprep.subr.bf16.mxu1 %v12335_v1  ;;  %v8280_v43 = vld [vmem:[#allocation13 + $0xd20] sm:$0xff]  ;;  %v8287_v1 = vld [vmem:[#allocation13 + $0xd58] sm:$0xff] }
 0x6f7   : > { %8158 = vmatmul.mubr.f32.vlgmr.msra.gmra.mrb[20].mxu0 %v8087_v37  ;;  %v12289_v27 = vpack.c.bf16 %v8280_v43, %v8276_v29  ;;  %v12355_v26 = vpack.c.bf16 %v8291_v23, %v8287_v1  ;;  %v12369_v43 = vpack.c.bf16 %v8314_v14, %v8310_v54  ;;  %v8322_v1 = vld [vmem:[#allocation13 + $0xe70] sm:$0xff]  ;;  %v8325_v23 = vld [vmem:[#allocation13 + $0xe88] sm:$0xff]  ;;  %v8352_v14 = vld [vmem:[#allocation13 + $0xf60] sm:$0xff] }
 0x6f8   : > { %8229 = vmatmul.mubr.f32.vlgmr.msra.gmra.mrb[20].mxu1 %v8087_v37  ;;  %12274 = vmatpush1.bf16.msra.mxu0 %v12273_v48  ;;  %v8284_v48 = vld [vmem:[#allocation13 + $0xd40] sm:$0xff] }
 0x6f9   : > { %8448 = vmatprep.mubr.f32.mxu0 %v8381_v31  ;;  %12338 = vmatpush1.bf16.msra.mxu1 %v12337_v11  ;;  %v8293_v11 = vld [vmem:[#allocation13 + $0xd88] sm:$0xff]  ;;  %v12293_v37 = vpack.c.bf16 %v8288_v17, %v8284_v48  ;;  %v12373_v17 = vpack.c.bf16 %v8322_v1, %v8318_v59  ;;  %v8360_v1 = vld [vmem:[#allocation13 + $0xfa0] sm:$0xff] }
 0x6fa   : > { %8519 = vmatprep.mubr.f32.mxu1 %v8381_v31  ;;  %12276 = vmatprep.subr.bf16.mxu0 %v12275_v51  ;;  %v12357_v51 = vpack.c.bf16 %v8290_v2, %v8286_v49  ;;  %v12295_v38 = vpack.c.bf16 %v8297_v50, %v8293_v11  ;;  %v8301_v31 = vld [vmem:[#allocation13 + $0xdc8] sm:$0xff]  ;;  %v8328_v2 = vld [vmem:[#allocation13 + $0xea0] sm:$0xff]  ;;  %v8326_v11 = vld [vmem:[#allocation13 + $0xe90] sm:$0xff] }
 0x6fb   : > { %12340 = vmatprep.subr.bf16.mxu1 %v12339_v25  ;;  %v8294_v25 = vld [vmem:[#allocation13 + $0xd90] sm:$0xff]  ;;  %v12377_v33 = vpack.c.bf16 %v8330_v36, %v8326_v11  ;;  %v8368_v36 = vld [vmem:[#allocation13 + $0xfe0] sm:$0xff] }
 0x6fc   : > { %12278 = vmatpush1.bf16.msra.mxu0 %v12277_v40  ;;  %v8305_v40 = vld [vmem:[#allocation13 + $0xde8] sm:$0xff]  ;;  %v12361_v42 = vpack.c.bf16 %v8298_v0, %v8294_v25  ;;  %v8336_v0 = vld [vmem:[#allocation13 + $0xee0] sm:$0xff] }
 0x6fd   : > { %12342 = vmatpush1.bf16.msra.mxu1 %v12341_v53  ;;  %12280 = vmatprep.subr.bf16.mxu0 %v12279_v55  ;;  %v8303_v53 = vld [vmem:[#allocation13 + $0xdd8] sm:$0xff]  ;;  %v12299_v44 = vpack.c.bf16 %v8305_v40, %v8301_v31  ;;  %v8334_v31 = vld [vmem:[#allocation13 + $0xed0] sm:$0xff] }
 0x6fe   : > { %12344 = vmatprep.subr.bf16.mxu1 %v12343_v52  ;;  %v8307_v55 = vld [vmem:[#allocation13 + $0xdf8] sm:$0xff]  ;;  %v8300_v52 = vld [vmem:[#allocation13 + $0xdc0] sm:$0xff] }
 0x6ff   : > { %v12363_v21 = vpack.c.bf16 %v8307_v55, %v8303_v53  ;;  %v12301_v13 = vpack.c.bf16 %v8304_v20, %v8300_v52  ;;  %v8338_v53 = vld [vmem:[#allocation13 + $0xef0] sm:$0xff]  ;;  %v8341_v55 = vld [vmem:[#allocation13 + $0xf08] sm:$0xff] }
 0x700   : > { %12282 = vmatpush1.bf16.msra.mxu0 %v12281_v3  ;;  %v8313_v3 = vld [vmem:[#allocation13 + $0xe28] sm:$0xff]  ;;  %v12381_v20 = vpack.c.bf16 %v8338_v53, %v8334_v31 }
 0x701   : > { %12346 = vmatpush1.bf16.msra.mxu1 %v12345_v9  ;;  %12284 = vmatprep.subr.bf16.mxu0 %v12283_v57  ;;  %v8311_v9 = vld [vmem:[#allocation13 + $0xe18] sm:$0xff]  ;;  %v12303_v47 = vpack.c.bf16 %v8313_v3, %v8309_v16  ;;  %v8342_v16 = vld [vmem:[#allocation13 + $0xf10] sm:$0xff] }
 0x702   : > { %12348 = vmatprep.subr.bf16.mxu1 %v12347_v60  ;;  %v8315_v57 = vld [vmem:[#allocation13 + $0xe38] sm:$0xff]  ;;  %v8308_v60 = vld [vmem:[#allocation13 + $0xe00] sm:$0xff] }
 0x703   : > { %v12367_v61 = vpack.c.bf16 %v8315_v57, %v8311_v9  ;;  %v12305_v29 = vpack.c.bf16 %v8312_v22, %v8308_v60  ;;  %v8346_v9 = vld [vmem:[#allocation13 + $0xf30] sm:$0xff]  ;;  %v8349_v57 = vld [vmem:[#allocation13 + $0xf48] sm:$0xff] }
 0x704   : > { %12286 = vmatpush1.bf16.msra.mxu0 %v12285_v35  ;;  %v8321_v35 = vld [vmem:[#allocation13 + $0xe68] sm:$0xff]  ;;  %v12385_v22 = vpack.c.bf16 %v8346_v9, %v8342_v16 }
 0x705   : > { %12350 = vmatpush1.bf16.msra.mxu1 %v12349_v28  ;;  %12288 = vmatprep.subr.bf16.mxu0 %v12287_v56  ;;  %v8319_v28 = vld [vmem:[#allocation13 + $0xe58] sm:$0xff]  ;;  %v12307_v7 = vpack.c.bf16 %v8321_v35, %v8317_v19  ;;  %v8350_v19 = vld [vmem:[#allocation13 + $0xf50] sm:$0xff]  ;;  %v8544_v16 = vld [vmem:[#allocation13 + $0x1048] sm:$0xff] }
 0x706   : > { %12352 = vmatprep.subr.bf16.mxu1 %v12351_v6  ;;  %v8323_v56 = vld [vmem:[#allocation13 + $0xe78] sm:$0xff]  ;;  %v8316_v6 = vld [vmem:[#allocation13 + $0xe40] sm:$0xff] }
 0x707   : > { %v12371_v41 = vpack.c.bf16 %v8323_v56, %v8319_v28  ;;  %v12309_v48 = vpack.c.bf16 %v8320_v4, %v8316_v6  ;;  %v8354_v28 = vld [vmem:[#allocation13 + $0xf70] sm:$0xff]  ;;  %v8357_v56 = vld [vmem:[#allocation13 + $0xf88] sm:$0xff] }
 0x708   : > { %12290 = vmatpush1.bf16.msra.mxu0 %v12289_v27  ;;  %v8329_v27 = vld [vmem:[#allocation13 + $0xea8] sm:$0xff]  ;;  %v12389_v4 = vpack.c.bf16 %v8354_v28, %v8350_v19 }
 0x709   : > { %12354 = vmatpush1.bf16.msra.mxu1 %v12353_v39  ;;  %12292 = vmatprep.subr.bf16.mxu0 %v12291_v58  ;;  %v8327_v39 = vld [vmem:[#allocation13 + $0xe98] sm:$0xff]  ;;  %v12311_v49 = vpack.c.bf16 %v8329_v27, %v8325_v23  ;;  %v8358_v23 = vld [vmem:[#allocation13 + $0xf90] sm:$0xff]  ;;  %v8552_v28 = vld [vmem:[#allocation13 + $0x1088] sm:$0xff] }
 0x70a   : > { %12356 = vmatprep.subr.bf16.mxu1 %v12355_v26  ;;  %v8331_v58 = vld [vmem:[#allocation13 + $0xeb8] sm:$0xff]  ;;  %v8324_v26 = vld [vmem:[#allocation13 + $0xe80] sm:$0xff] }
 0x70b   : > { %v12375_v50 = vpack.c.bf16 %v8331_v58, %v8327_v39  ;;  %v12313_v62 = vpack.c.bf16 %v8328_v2, %v8324_v26  ;;  %v8362_v39 = vld [vmem:[#allocation13 + $0xfb0] sm:$0xff]  ;;  %v8365_v58 = vld [vmem:[#allocation13 + $0xfc8] sm:$0xff] }
 0x70c   : > { %12294 = vmatpush1.bf16.msra.mxu0 %v12293_v37  ;;  %v8337_v37 = vld [vmem:[#allocation13 + $0xee8] sm:$0xff]  ;;  %v12393_v2 = vpack.c.bf16 %v8362_v39, %v8358_v23  ;;  %v8555_v23 = vld [vmem:[#allocation13 + $0x10a0] sm:$0xff] }
 0x70d   : > { %12358 = vmatpush1.bf16.msra.mxu1 %v12357_v51  ;;  %12296 = vmatprep.subr.bf16.mxu0 %v12295_v38  ;;  %v8335_v51 = vld [vmem:[#allocation13 + $0xed8] sm:$0xff]  ;;  %v12315_v25 = vpack.c.bf16 %v8337_v37, %v8333_v30  ;;  %v8366_v30 = vld [vmem:[#allocation13 + $0xfd0] sm:$0xff] }
 0x70e   : > { %12360 = vmatprep.subr.bf16.mxu1 %v12359_v63  ;;  %v8339_v38 = vld [vmem:[#allocation13 + $0xef8] sm:$0xff]  ;;  %v8332_v63 = vld [vmem:[#allocation13 + $0xec0] sm:$0xff]  ;;  %v8239_v37 = vld [vmem:[#allocation3] sm:$0xf8] }
 0x70f   : > { %v12379_v40 = vpack.c.bf16 %v8339_v38, %v8335_v51  ;;  %v12317_v52 = vpack.c.bf16 %v8336_v0, %v8332_v63  ;;  %v8370_v38 = vld [vmem:[#allocation13 + $0xff0] sm:$0xff]  ;;  %v8538_v63 = vld [vmem:[#allocation13 + $0x1018] sm:$0xff] }
 0x710   : > { %12298 = vmatpush1.bf16.msra.mxu0 %v12297_v15  ;;  %v8345_v15 = vld [vmem:[#allocation13 + $0xf28] sm:$0xff]  ;;  %v8542_v0 = vld [vmem:[#allocation13 + $0x1038] sm:$0xff]  ;;  %v12397_v53 = vpack.c.bf16 %v8370_v38, %v8366_v30  ;;  %v8563_v30 = vld [vmem:[#allocation13 + $0x10e0] sm:$0xff] }
 0x711   : > { %12362 = vmatpush1.bf16.msra.mxu1 %v12361_v42  ;;  %12300 = vmatprep.subr.bf16.mxu0 %v12299_v44  ;;  %v8343_v42 = vld [vmem:[#allocation13 + $0xf18] sm:$0xff]  ;;  %v12319_v34 = vpack.c.bf16 %v8345_v15, %v8341_v55  ;;  %v8535_v15 = vld [vmem:[#allocation13 + $0x1000] sm:$0xff]  ;;  %v8565_v38 = vld [vmem:[#allocation13 + $0x10f0] sm:$0xff] }
 0x712   : > { %12364 = vmatprep.subr.bf16.mxu1 %v12363_v21  ;;  %v8347_v44 = vld [vmem:[#allocation13 + $0xf38] sm:$0xff]  ;;  %v8340_v21 = vld [vmem:[#allocation13 + $0xf00] sm:$0xff] }
 0x713   : > { %v12383_v3 = vpack.c.bf16 %v8347_v44, %v8343_v42  ;;  %v12321_v60 = vpack.c.bf16 %v8344_v18, %v8340_v21  ;;  %v8539_v42 = vld [vmem:[#allocation13 + $0x1020] sm:$0xff]  ;;  %v8537_v21 = vld [vmem:[#allocation13 + $0x1010] sm:$0xff] }
 0x714   : > { %12302 = vmatpush1.bf16.msra.mxu0 %v12301_v13  ;;  %v8353_v13 = vld [vmem:[#allocation13 + $0xf68] sm:$0xff]  ;;  %v8533_v44 = vld [vmem:[#allocation3 + $0x18] sm:$0xf]  ;;  %v8541_v18 = vld [vmem:[#allocation13 + $0x1030] sm:$0xff]  ;;  %v12401_v9 = vpack.c.bf16 %v8539_v42, %v8535_v15 }
 0x715   : > { %12366 = vmatpush1.bf16.msra.mxu1 %v12365_v45  ;;  %12304 = vmatprep.subr.bf16.mxu0 %v12303_v47  ;;  %v8351_v45 = vld [vmem:[#allocation13 + $0xf58] sm:$0xff]  ;;  %v12323_v54 = vpack.c.bf16 %v8353_v13, %v8349_v57  ;;  %v8671_v13 = vrot.slane %v8533_v44, 4  ;;  %v8569_v15 = vld [vmem:[#allocation13 + $0x1110] sm:$0xff] }
 0x716   : > { %12368 = vmatprep.subr.bf16.mxu1 %v12367_v61  ;;  %v8355_v47 = vld [vmem:[#allocation13 + $0xf78] sm:$0xff]  ;;  %v8348_v61 = vld [vmem:[#allocation13 + $0xf40] sm:$0xff]  ;;  %v8573_v44 = vld [vmem:[#allocation13 + $0x1130] sm:$0xff] }
 0x717   : > { %v12387_v35 = vpack.c.bf16 %v8355_v47, %v8351_v45  ;;  %v12325_v6 = vpack.c.bf16 %v8352_v14, %v8348_v61  ;;  %v8546_v45 = vld [vmem:[#allocation13 + $0x1058] sm:$0xff]  ;;  %v8545_v61 = vld [vmem:[#allocation13 + $0x1050] sm:$0xff] }
 0x718   : > { %12306 = vmatpush1.bf16.msra.mxu0 %v12305_v29  ;;  %v8361_v29 = vld [vmem:[#allocation13 + $0xfa8] sm:$0xff]  ;;  %v8550_v47 = vld [vmem:[#allocation13 + $0x1078] sm:$0xff] }
 0x719   : > { %12370 = vmatpush1.bf16.msra.mxu1 %v12369_v43  ;;  %12308 = vmatprep.subr.bf16.mxu0 %v12307_v7  ;;  %v8359_v43 = vld [vmem:[#allocation13 + $0xf98] sm:$0xff]  ;;  %v12327_v59 = vpack.c.bf16 %v8361_v29, %v8357_v56  ;;  %v8556_v56 = vld [vmem:[#allocation13 + $0x10a8] sm:$0xff]  ;;  %v12467_v29 = vpack.c.bf16 %v8550_v47, %v8546_v45  ;;  %v8581_v47 = vld [vmem:[#allocation13 + $0x1170] sm:$0xff] }
 0x71a   : > { %12372 = vmatprep.subr.bf16.mxu1 %v12371_v41  ;;  %v8363_v7 = vld [vmem:[#allocation13 + $0xfb8] sm:$0xff]  ;;  %v8356_v41 = vld [vmem:[#allocation13 + $0xf80] sm:$0xff] }
 0x71b   : > { %v12391_v27 = vpack.c.bf16 %v8363_v7, %v8359_v43  ;;  %v12329_v26 = vpack.c.bf16 %v8360_v1, %v8356_v41  ;;  %v8554_v43 = vld [vmem:[#allocation13 + $0x1098] sm:$0xff]  ;;  %v12407_v41 = vpack.c.bf16 %v8556_v56, %v8552_v28  ;;  %v8551_v1 = vld [vmem:[#allocation13 + $0x1080] sm:$0xff] }
 0x71c   : > { %12310 = vmatpush1.bf16.msra.mxu0 %v12309_v48  ;;  %v8369_v48 = vld [vmem:[#allocation13 + $0xfe8] sm:$0xff]  ;;  %v8558_v7 = vld [vmem:[#allocation13 + $0x10b8] sm:$0xff]  ;;  %v8583_v28 = vld [vmem:[#allocation13 + $0x1180] sm:$0xff] }
 0x71d   : > { %12374 = vmatpush1.bf16.msra.mxu1 %v12373_v17  ;;  %12312 = vmatprep.subr.bf16.mxu0 %v12311_v49  ;;  %v8367_v17 = vld [vmem:[#allocation13 + $0xfd8] sm:$0xff]  ;;  %v12331_v11 = vpack.c.bf16 %v8369_v48, %v8365_v58  ;;  %v12471_v39 = vpack.c.bf16 %v8558_v7, %v8554_v43  ;;  %v8557_v58 = vld [vmem:[#allocation13 + $0x10b0] sm:$0xff]  ;;  %v8560_v48 = vld [vmem:[#allocation13 + $0x10c8] sm:$0xff] }
 0x71e   : > { %12376 = vmatprep.subr.bf16.mxu1 %v12375_v50  ;;  %v8371_v49 = vld [vmem:[#allocation13 + $0xff8] sm:$0xff]  ;;  %v8364_v50 = vld [vmem:[#allocation13 + $0xfc0] sm:$0xff]  ;;  %v8589_v7 = vld [vmem:[#allocation13 + $0x11b0] sm:$0xff] }
 0x71f   : > { %v12395_v51 = vpack.c.bf16 %v8371_v49, %v8367_v17  ;;  %v12333_v31 = vpack.c.bf16 %v8368_v36, %v8364_v50  ;;  %v8564_v17 = vld [vmem:[#allocation13 + $0x10e8] sm:$0xff]  ;;  %v8562_v49 = vld [vmem:[#allocation13 + $0x10d8] sm:$0xff]  ;;  %v8559_v36 = vld [vmem:[#allocation13 + $0x10c0] sm:$0xff] }
 0x720   : > { %12314 = vmatpush1.bf16.msra.mxu0 %v12313_v62  ;;  %v8536_v62 = vld [vmem:[#allocation13 + $0x1008] sm:$0xff]  ;;  %v12411_v50 = vpack.c.bf16 %v8564_v17, %v8560_v48  ;;  %v8587_v56 = vld [vmem:[#allocation13 + $0x11a0] sm:$0xff]  ;;  %v8593_v48 = vld [vmem:[#allocation13 + $0x11d0] sm:$0xff] }
 0x721   : > { %12378 = vmatpush1.bf16.msra.mxu1 %v12377_v33  ;;  %12316 = vmatprep.subr.bf16.mxu0 %v12315_v25  ;;  %v8540_v33 = vld [vmem:[#allocation13 + $0x1028] sm:$0xff]  ;;  %v8241_v25 = vld [vmem:[#allocation3 + $0x10] sm:$0x7] }
 0x722   : > { %12380 = vmatprep.subr.bf16.mxu1 %v12379_v40  ;;  %v8531_v40 = vld [vmem:[#allocation3 + $0x8] sm:$0xf0]  ;;  %v12399_v55 = vpack.c.bf16 %v8540_v33, %v8536_v62  ;;  %v8568_v62 = vld [vmem:[#allocation13 + $0x1108] sm:$0xff] }
 0x723   : > { %v8670_v57 = vrot.slane %v8531_v40, 4  ;;  %v8572_v33 = vld [vmem:[#allocation13 + $0x1128] sm:$0xff] }
 0x724   : > { %12318 = vmatpush1.bf16.msra.mxu0 %v12317_v52  ;;  %v8376_v52 = vrot.slane %v8239_v37, 3  ;;  %v8561_v37 = vld [vmem:[#allocation13 + $0x10d0] sm:$0xff]  ;;  %v12415_v40 = vpack.c.bf16 %v8572_v33, %v8568_v62 }
 0x725   : > { %12382 = vmatpush1.bf16.msra.mxu1 %v12381_v20  ;;  %12320 = vmatprep.subr.bf16.mxu0 %v12319_v34  ;;  %v8377_v20 = vrot.slane %v8241_v25, 3  ;;  %v12463_v34 = vpack.c.bf16 %v8542_v0, %v8538_v63  ;;  %v8570_v25 = vld [vmem:[#allocation13 + $0x1118] sm:$0xff]  ;;  %v12413_v0 = vpack.c.bf16 %v8563_v30, %v8559_v36  ;;  %v8601_v62 = vld [vmem:[#allocation13 + $0x1210] sm:$0xff] }
 0x726   : > { %12384 = vmatprep.subr.bf16.mxu1 %v12383_v3  ;;  %v8548_v3 = vld [vmem:[#allocation13 + $0x1068] sm:$0xff]  ;;  %v8574_v63 = vld [vmem:[#allocation13 + $0x1138] sm:$0xff] }
 0x727   : > { %v8378_v14 = vsel %vm2182_vm6, %v8376_v52, %v8377_v20  ;;  %v12403_v19 = vpack.c.bf16 %v8548_v3, %v8544_v16  ;;  %v12479_v42 = vpack.c.bf16 %v8574_v63, %v8570_v25  ;;  %v8576_v52 = vld [vmem:[#allocation13 + $0x1148] sm:$0xff]  ;;  %v12481_v16 = vpack.c.bf16 %v8573_v44, %v8569_v15  ;;  %v8605_v25 = vld [vmem:[#allocation13 + $0x1230] sm:$0xff]  ;;  %v8611_v44 = vld [vmem:[#allocation13 + $0x1260] sm:$0xff] }
 0x728   : > { %12322 = vmatpush1.bf16.msra.mxu0 %v12321_v60  ;;  %v12465_v60 = vpack.c.bf16 %v8541_v18, %v8537_v21  ;;  %v8580_v20 = vld [vmem:[#allocation13 + $0x1168] sm:$0xff]  ;;  %v8582_v21 = vld [vmem:[#allocation13 + $0x1178] sm:$0xff] }
 0x729   : > { %12386 = vmatpush1.bf16.msra.mxu1 %v12385_v22  ;;  %12324 = vmatprep.subr.bf16.mxu0 %v12323_v54  ;;  %v8543_v22 = vld [vmem:[#allocation13 + $0x1040] sm:$0xff]  ;;  %v12419_v3 = vpack.c.bf16 %v8580_v20, %v8576_v52  ;;  %v8608_v63 = vld [vmem:[#allocation13 + $0x1248] sm:$0xff]  ;;  %v8609_v52 = vld [vmem:[#allocation13 + $0x1250] sm:$0xff] }
 0x72a   : > { %12388 = vmatprep.subr.bf16.mxu1 %v12387_v35  ;;  %v8547_v54 = vld [vmem:[#allocation13 + $0x1060] sm:$0xff]  ;;  %v8549_v35 = vld [vmem:[#allocation13 + $0x1070] sm:$0xff] }
 0x72c   : > { %12326 = vmatpush1.bf16.msra.mxu0 %v12325_v6  ;;  %v8672_v6 = vsel %vm757_vm0, %v8670_v57, %v8671_v13  ;;  %v8579_v57 = vld [vmem:[#allocation13 + $0x1160] sm:$0xff]  ;;  %v8577_v13 = vld [vmem:[#allocation13 + $0x1150] sm:$0xff] }
 0x72d   : > { %12390 = vmatpush1.bf16.msra.mxu1 %v12389_v4  ;;  %12328 = vmatprep.subr.bf16.mxu0 %v12327_v59  ;;  %v12405_v4 = vpack.c.bf16 %v8547_v54, %v8543_v22  ;;  %v12469_v59 = vpack.c.bf16 %v8549_v35, %v8545_v61  ;;  %v8588_v22 = vld [vmem:[#allocation13 + $0x11a8] sm:$0xff]  ;;  %v8586_v54 = vld [vmem:[#allocation13 + $0x1198] sm:$0xff] }
 0x72e   : > { %12392 = vmatprep.subr.bf16.mxu1 %v12391_v27  ;;  %v8553_v27 = vld [vmem:[#allocation13 + $0x1090] sm:$0xff]  ;;  %v8590_v61 = vld [vmem:[#allocation13 + $0x11b8] sm:$0xff] }
 0x72f   : > { %v12487_v43 = vpack.c.bf16 %v8590_v61, %v8586_v54  ;;  %v8621_v54 = vld [vmem:[#allocation13 + $0x12b0] sm:$0xff]  ;;  %v8624_v61 = vld [vmem:[#allocation13 + $0x12c8] sm:$0xff] }
 0x730   : > { %12330 = vmatpush1.bf16.msra.mxu0 %v12329_v26  ;;  %v8566_v26 = vld [vmem:[#allocation13 + $0x10f8] sm:$0xff] }
 0x731   : > { %12394 = vmatpush1.bf16.msra.mxu1 %v12393_v2  ;;  %12332 = vmatprep.subr.bf16.mxu0 %v12331_v11  ;;  %v12409_v2 = vpack.c.bf16 %v8555_v23, %v8551_v1  ;;  %v12473_v11 = vpack.c.bf16 %v8557_v58, %v8553_v27  ;;  %v12425_v1 = vpack.c.bf16 %v8587_v56, %v8583_v28  ;;  %v8595_v58 = vld [vmem:[#allocation13 + $0x11e0] sm:$0xff] }
 0x732   : > { %12396 = vmatprep.subr.bf16.mxu1 %v12395_v51  ;;  %v12475_v51 = vpack.c.bf16 %v8566_v26, %v8562_v49  ;;  %v8597_v49 = vld [vmem:[#allocation13 + $0x11f0] sm:$0xff]  ;;  %v8600_v26 = vld [vmem:[#allocation13 + $0x1208] sm:$0xff] }
 0x733   : > { %v12493_v30 = vpack.c.bf16 %v8597_v49, %v8593_v48  ;;  %v8635_v49 = vld [vmem:[#allocation13 + $0x1320] sm:$0xff] }
 0x734   : > { %12334 = vmatpush1.bf16.msra.mxu0 %v12333_v31  ;;  %v12477_v31 = vpack.c.bf16 %v8565_v38, %v8561_v37  ;;  %v8603_v38 = vld [vmem:[#allocation13 + $0x1220] sm:$0xff] }
 0x735   : > { %12398 = vmatpush1.bf16.msra.mxu1 %v12397_v53  ;;  %12400 = vmatprep.subr.bf16.mxu0 %v12399_v55  ;;  %v8567_v53 = vld [vmem:[#allocation13 + $0x1100] sm:$0xff] }
 0x736   : > { %12464 = vmatprep.subr.bf16.mxu1 %v12463_v34  ;;  %v8571_v55 = vld [vmem:[#allocation13 + $0x1120] sm:$0xff]  ;;  %v8578_v34 = vld [vmem:[#allocation13 + $0x1158] sm:$0xff] }
 0x737   : > { %8449 = vmatmul.mubr.f32.vlgmr.msra.gmra.mrb[20].mxu0 %v8378_v14  ;;  %v12417_v18 = vpack.c.bf16 %v8571_v55, %v8567_v53  ;;  %v12483_v45 = vpack.c.bf16 %v8582_v21, %v8578_v34  ;;  %v12497_v55 = vpack.c.bf16 %v8605_v25, %v8601_v62  ;;  %v8613_v34 = vld [vmem:[#allocation13 + $0x1270] sm:$0xff]  ;;  %v8616_v21 = vld [vmem:[#allocation13 + $0x1288] sm:$0xff]  ;;  %v8643_v25 = vld [vmem:[#allocation13 + $0x1360] sm:$0xff] }
 0x738   : > { %8520 = vmatmul.mubr.f32.vlgmr.msra.gmra.mrb[20].mxu1 %v8378_v14  ;;  %12402 = vmatpush1.bf16.msra.mxu0 %v12401_v9  ;;  %v8575_v9 = vld [vmem:[#allocation13 + $0x1140] sm:$0xff] }
 0x739   : > { %8739 = vmatprep.mubr.f32.mxu0 %v8672_v6  ;;  %12466 = vmatpush1.bf16.msra.mxu1 %v12465_v60  ;;  %v8584_v60 = vld [vmem:[#allocation13 + $0x1188] sm:$0xff]  ;;  %v12421_v14 = vpack.c.bf16 %v8579_v57, %v8575_v9  ;;  %v12501_v57 = vpack.c.bf16 %v8613_v34, %v8609_v52  ;;  %v8651_v34 = vld [vmem:[#allocation13 + $0x13a0] sm:$0xff] }
 0x73a   : > { %8810 = vmatprep.mubr.f32.mxu1 %v8672_v6  ;;  %12404 = vmatprep.subr.bf16.mxu0 %v12403_v19  ;;  %v12485_v19 = vpack.c.bf16 %v8581_v47, %v8577_v13  ;;  %v12423_v35 = vpack.c.bf16 %v8588_v22, %v8584_v60  ;;  %v8592_v6 = vld [vmem:[#allocation13 + $0x11c8] sm:$0xff]  ;;  %v8619_v47 = vld [vmem:[#allocation13 + $0x12a0] sm:$0xff]  ;;  %v8617_v60 = vld [vmem:[#allocation13 + $0x1290] sm:$0xff] }
 0x73b   : > { %12468 = vmatprep.subr.bf16.mxu1 %v12467_v29  ;;  %v8585_v29 = vld [vmem:[#allocation13 + $0x1190] sm:$0xff]  ;;  %v12505_v56 = vpack.c.bf16 %v8621_v54, %v8617_v60  ;;  %v8659_v54 = vld [vmem:[#allocation13 + $0x13e0] sm:$0xff] }
 0x73c   : > { %12406 = vmatpush1.bf16.msra.mxu0 %v12405_v4  ;;  %v8596_v4 = vld [vmem:[#allocation13 + $0x11e8] sm:$0xff]  ;;  %v12489_v23 = vpack.c.bf16 %v8589_v7, %v8585_v29  ;;  %v8627_v7 = vld [vmem:[#allocation13 + $0x12e0] sm:$0xff] }
 0x73d   : > { %12470 = vmatpush1.bf16.msra.mxu1 %v12469_v59  ;;  %12408 = vmatprep.subr.bf16.mxu0 %v12407_v41  ;;  %v8594_v59 = vld [vmem:[#allocation13 + $0x11d8] sm:$0xff]  ;;  %v12427_v27 = vpack.c.bf16 %v8596_v4, %v8592_v6  ;;  %v8625_v6 = vld [vmem:[#allocation13 + $0x12d0] sm:$0xff] }
 0x73e   : > { %12472 = vmatprep.subr.bf16.mxu1 %v12471_v39  ;;  %v8598_v41 = vld [vmem:[#allocation13 + $0x11f8] sm:$0xff]  ;;  %v8591_v39 = vld [vmem:[#allocation13 + $0x11c0] sm:$0xff] }
 0x73f   : > { %v12491_v17 = vpack.c.bf16 %v8598_v41, %v8594_v59  ;;  %v12429_v36 = vpack.c.bf16 %v8595_v58, %v8591_v39  ;;  %v8629_v59 = vld [vmem:[#allocation13 + $0x12f0] sm:$0xff]  ;;  %v8632_v41 = vld [vmem:[#allocation13 + $0x1308] sm:$0xff] }
 0x740   : > { %12410 = vmatpush1.bf16.msra.mxu0 %v12409_v2  ;;  %v8604_v2 = vld [vmem:[#allocation13 + $0x1228] sm:$0xff]  ;;  %v12509_v58 = vpack.c.bf16 %v8629_v59, %v8625_v6 }
 0x741   : > { %12474 = vmatpush1.bf16.msra.mxu1 %v12473_v11  ;;  %12412 = vmatprep.subr.bf16.mxu0 %v12411_v50  ;;  %v8602_v11 = vld [vmem:[#allocation13 + $0x1218] sm:$0xff]  ;;  %v12431_v37 = vpack.c.bf16 %v8604_v2, %v8600_v26  ;;  %v8633_v26 = vld [vmem:[#allocation13 + $0x1310] sm:$0xff] }
 0x742   : > { %12476 = vmatprep.subr.bf16.mxu1 %v12475_v51  ;;  %v8606_v50 = vld [vmem:[#allocation13 + $0x1238] sm:$0xff]  ;;  %v8599_v51 = vld [vmem:[#allocation13 + $0x1200] sm:$0xff] }
 0x743   : > { %v12495_v33 = vpack.c.bf16 %v8606_v50, %v8602_v11  ;;  %v12433_v53 = vpack.c.bf16 %v8603_v38, %v8599_v51  ;;  %v8637_v11 = vld [vmem:[#allocation13 + $0x1330] sm:$0xff]  ;;  %v8640_v50 = vld [vmem:[#allocation13 + $0x1348] sm:$0xff] }
 0x744   : > { %12414 = vmatpush1.bf16.msra.mxu0 %v12413_v0  ;;  %v8612_v0 = vld [vmem:[#allocation13 + $0x1268] sm:$0xff]  ;;  %v12513_v38 = vpack.c.bf16 %v8637_v11, %v8633_v26 }
 0x745   : > { %12478 = vmatpush1.bf16.msra.mxu1 %v12477_v31  ;;  %12416 = vmatprep.subr.bf16.mxu0 %v12415_v40  ;;  %v8610_v31 = vld [vmem:[#allocation13 + $0x1258] sm:$0xff]  ;;  %v12435_v15 = vpack.c.bf16 %v8612_v0, %v8608_v63  ;;  %v8641_v63 = vld [vmem:[#allocation13 + $0x1350] sm:$0xff]  ;;  %v8987_v11 = vld [vmem:[%s15119_s7 + $0x98] sm:$0xff] }
 0x746   : > { %12480 = vmatprep.subr.bf16.mxu1 %v12479_v42  ;;  %v8614_v40 = vld [vmem:[#allocation13 + $0x1278] sm:$0xff]  ;;  %v8607_v42 = vld [vmem:[#allocation13 + $0x1240] sm:$0xff] }
 0x747   : > { %v12499_v20 = vpack.c.bf16 %v8614_v40, %v8610_v31  ;;  %v12437_v9 = vpack.c.bf16 %v8611_v44, %v8607_v42  ;;  %v8645_v31 = vld [vmem:[#allocation13 + $0x1370] sm:$0xff]  ;;  %v8648_v40 = vld [vmem:[#allocation13 + $0x1388] sm:$0xff] }
 0x748   : > { %12418 = vmatpush1.bf16.msra.mxu0 %v12417_v18  ;;  %v8620_v18 = vld [vmem:[#allocation13 + $0x12a8] sm:$0xff]  ;;  %v12517_v44 = vpack.c.bf16 %v8645_v31, %v8641_v63  ;;  %v8989_v31 = vld [vmem:[%s15119_s7 + $0xa8] sm:$0xff] }
 0x749   : > { %12482 = vmatpush1.bf16.msra.mxu1 %v12481_v16  ;;  %12420 = vmatprep.subr.bf16.mxu0 %v12419_v3  ;;  %v8618_v16 = vld [vmem:[#allocation13 + $0x1298] sm:$0xff]  ;;  %v12439_v13 = vpack.c.bf16 %v8620_v18, %v8616_v21  ;;  %v8649_v21 = vld [vmem:[#allocation13 + $0x1390] sm:$0xff] }
 0x74a   : > { %12484 = vmatprep.subr.bf16.mxu1 %v12483_v45  ;;  %v8622_v3 = vld [vmem:[#allocation13 + $0x12b8] sm:$0xff]  ;;  %v8615_v45 = vld [vmem:[#allocation13 + $0x1280] sm:$0xff]  ;;  %v8988_v63 = vld [vmem:[%s15119_s7 + $0xa0] sm:$0xff] }
 0x74b   : > { %v12503_v22 = vpack.c.bf16 %v8622_v3, %v8618_v16  ;;  %v12441_v28 = vpack.c.bf16 %v8619_v47, %v8615_v45  ;;  %v8653_v16 = vld [vmem:[#allocation13 + $0x13b0] sm:$0xff]  ;;  %v8656_v3 = vld [vmem:[#allocation13 + $0x13c8] sm:$0xff] }
 0x74c   : > { %12422 = vmatpush1.bf16.msra.mxu0 %v12421_v14  ;;  %v8628_v14 = vld [vmem:[#allocation13 + $0x12e8] sm:$0xff]  ;;  %v12521_v47 = vpack.c.bf16 %v8653_v16, %v8649_v21  ;;  %v8990_v21 = vld [vmem:[%s15119_s7 + $0xb0] sm:$0xff] }
 0x74d   : > { %12486 = vmatpush1.bf16.msra.mxu1 %v12485_v19  ;;  %12424 = vmatprep.subr.bf16.mxu0 %v12423_v35  ;;  %v8626_v19 = vld [vmem:[#allocation13 + $0x12d8] sm:$0xff]  ;;  %v12443_v29 = vpack.c.bf16 %v8628_v14, %v8624_v61  ;;  %v8657_v61 = vld [vmem:[#allocation13 + $0x13d0] sm:$0xff] }
 0x74e   : > { %12488 = vmatprep.subr.bf16.mxu1 %v12487_v43  ;;  %v8630_v35 = vld [vmem:[#allocation13 + $0x12f8] sm:$0xff]  ;;  %v8623_v43 = vld [vmem:[#allocation13 + $0x12c0] sm:$0xff]  ;;  %v8530_v14 = vld [vmem:[#allocation3] sm:$0xf0] }
 0x74f   : > { %v12507_v4 = vpack.c.bf16 %v8630_v35, %v8626_v19  ;;  %v12445_v39 = vpack.c.bf16 %v8627_v7, %v8623_v43  ;;  %v8661_v35 = vld [vmem:[#allocation13 + $0x13f0] sm:$0xff] }
 0x750   : > { %12426 = vmatpush1.bf16.msra.mxu0 %v12425_v1  ;;  %v8636_v1 = vld [vmem:[#allocation13 + $0x1328] sm:$0xff]  ;;  %v9017_v7 = vld [vmem:[%s15119_s7 + $0x188] sm:$0xff] }
 0x751   : > { %12490 = vmatpush1.bf16.msra.mxu1 %v12489_v23  ;;  %12428 = vmatprep.subr.bf16.mxu0 %v12427_v27  ;;  %v8634_v23 = vld [vmem:[#allocation13 + $0x1318] sm:$0xff]  ;;  %v12447_v48 = vpack.c.bf16 %v8636_v1, %v8632_v41  ;;  %v9016_v43 = vld [vmem:[%s15119_s7 + $0x180] sm:$0xff] }
 0x752   : > { %12492 = vmatprep.subr.bf16.mxu1 %v12491_v17  ;;  %v8638_v27 = vld [vmem:[#allocation13 + $0x1338] sm:$0xff]  ;;  %v8631_v17 = vld [vmem:[#allocation13 + $0x1300] sm:$0xff]  ;;  %v8968_v41 = vld [vmem:[%s15119_s7] sm:$0xff] }
 0x753   : > { %v12511_v2 = vpack.c.bf16 %v8638_v27, %v8634_v23  ;;  %v12449_v51 = vpack.c.bf16 %v8635_v49, %v8631_v17  ;;  %v8969_v1 = vld [vmem:[%s15119_s7 + $0x8] sm:$0xff]  ;;  %v8667_v23 = vrot.slane %v8530_v14, 4 }
 0x754   : > { %12430 = vmatpush1.bf16.msra.mxu0 %v12429_v36  ;;  %v8644_v36 = vld [vmem:[#allocation13 + $0x1368] sm:$0xff]  ;;  %v12529_v17 = vpack.c.bf16 %v8969_v1, %v8968_v41  ;;  %v8993_v14 = vld [vmem:[%s15119_s7 + $0xc8] sm:$0xff]  ;;  %v9026_v1 = vld [vmem:[%s15119_s7 + $0x1d0] sm:$0xff] }
 0x755   : > { %12494 = vmatpush1.bf16.msra.mxu1 %v12493_v30  ;;  %12432 = vmatprep.subr.bf16.mxu0 %v12431_v37  ;;  %v8642_v30 = vld [vmem:[#allocation13 + $0x1358] sm:$0xff]  ;;  %v12451_v62 = vpack.c.bf16 %v8644_v36, %v8640_v50  ;;  %v8995_v41 = vld [vmem:[%s15119_s7 + $0xd8] sm:$0xff] }
 0x756   : > { %12496 = vmatprep.subr.bf16.mxu1 %v12495_v33  ;;  %v8646_v37 = vld [vmem:[#allocation13 + $0x1378] sm:$0xff]  ;;  %v8639_v33 = vld [vmem:[#allocation13 + $0x1340] sm:$0xff] }
 0x757   : > { %v12515_v0 = vpack.c.bf16 %v8646_v37, %v8642_v30  ;;  %v12453_v42 = vpack.c.bf16 %v8643_v25, %v8639_v33  ;;  %v9018_v50 = vld [vmem:[%s15119_s7 + $0x190] sm:$0xff]  ;;  %v9019_v30 = vld [vmem:[%s15119_s7 + $0x198] sm:$0xff] }
 0x758   : > { %12434 = vmatpush1.bf16.msra.mxu0 %v12433_v53  ;;  %v8652_v53 = vld [vmem:[#allocation13 + $0x13a8] sm:$0xff]  ;;  %v8970_v37 = vld [vmem:[%s15119_s7 + $0x10] sm:$0xff] }
 0x759   : > { %12498 = vmatpush1.bf16.msra.mxu1 %v12497_v55  ;;  %12436 = vmatprep.subr.bf16.mxu0 %v12435_v15  ;;  %v8650_v55 = vld [vmem:[#allocation13 + $0x1398] sm:$0xff]  ;;  %v12455_v52 = vpack.c.bf16 %v8652_v53, %v8648_v40  ;;  %v9003_v25 = vld [vmem:[%s15119_s7 + $0x118] sm:$0xff]  ;;  %v9020_v40 = vld [vmem:[%s15119_s7 + $0x1a0] sm:$0xff] }
 0x75a   : > { %12500 = vmatprep.subr.bf16.mxu1 %v12499_v20  ;;  %v8654_v15 = vld [vmem:[#allocation13 + $0x13b8] sm:$0xff]  ;;  %v8647_v20 = vld [vmem:[#allocation13 + $0x1380] sm:$0xff] }
 0x75b   : > { %v12519_v18 = vpack.c.bf16 %v8654_v15, %v8650_v55  ;;  %v12457_v45 = vpack.c.bf16 %v8651_v34, %v8647_v20  ;;  %v9002_v33 = vld [vmem:[%s15119_s7 + $0x110] sm:$0xff]  ;;  %v9021_v53 = vld [vmem:[%s15119_s7 + $0x1a8] sm:$0xff]  ;;  %v12535_v55 = vpack.c.bf16 %v8989_v31, %v8988_v63 }
 0x75c   : > { %12438 = vmatpush1.bf16.msra.mxu0 %v12437_v9  ;;  %v8660_v9 = vld [vmem:[#allocation13 + $0x13e8] sm:$0xff]  ;;  %v12567_v15 = vpack.c.bf16 %v9021_v53, %v9020_v40  ;;  %v9005_v34 = vld [vmem:[%s15119_s7 + $0x128] sm:$0xff]  ;;  %v8998_v31 = vld [vmem:[%s15119_s7 + $0xf0] sm:$0xff] }
 0x75d   : > { %12502 = vmatpush1.bf16.msra.mxu1 %v12501_v57  ;;  %12440 = vmatprep.subr.bf16.mxu0 %v12439_v13  ;;  %v8658_v57 = vld [vmem:[#allocation13 + $0x13d8] sm:$0xff]  ;;  %v12459_v60 = vpack.c.bf16 %v8660_v9, %v8656_v3  ;;  %v8999_v40 = vld [vmem:[%s15119_s7 + $0xf8] sm:$0xff] }
 0x75e   : > { %12504 = vmatprep.subr.bf16.mxu1 %v12503_v22  ;;  %v8662_v13 = vld [vmem:[#allocation13 + $0x13f8] sm:$0xff]  ;;  %v8655_v22 = vld [vmem:[#allocation13 + $0x13c0] sm:$0xff] }
 0x75f   : > { %v12523_v19 = vpack.c.bf16 %v8662_v13, %v8658_v57  ;;  %v12461_v6 = vpack.c.bf16 %v8659_v54, %v8655_v22  ;;  %v9022_v9 = vld [vmem:[%s15119_s7 + $0x1b0] sm:$0xff]  ;;  %v9023_v57 = vld [vmem:[%s15119_s7 + $0x1b8] sm:$0xff] }
 0x760   : > { %12442 = vmatpush1.bf16.msra.mxu0 %v12441_v28  ;;  %v8984_v28 = vld [vmem:[%s15119_s7 + $0x80] sm:$0xff]  ;;  %v8974_v13 = vld [vmem:[%s15119_s7 + $0x30] sm:$0xff]  ;;  %v9007_v22 = vld [vmem:[%s15119_s7 + $0x138] sm:$0xff] }
 0x761   : > { %12506 = vmatpush1.bf16.msra.mxu1 %v12505_v56  ;;  %12444 = vmatprep.subr.bf16.mxu0 %v12443_v29  ;;  %v8985_v56 = vld [vmem:[%s15119_s7 + $0x88] sm:$0xff]  ;;  %v8532_v29 = vld [vmem:[#allocation3 + $0x10] sm:$0xf] }
 0x762   : > { %12508 = vmatprep.subr.bf16.mxu1 %v12507_v4  ;;  %v12525_v4 = vpack.c.bf16 %v8661_v35, %v8657_v61  ;;  %v12527_v59 = vpack.c.bf16 %v8985_v56, %v8984_v28  ;;  %v8668_v27 = vrot.slane %v8532_v29, 4  ;;  %v8992_v61 = vld [vmem:[%s15119_s7 + $0xc0] sm:$0xff]  ;;  %v9025_v56 = vld [vmem:[%s15119_s7 + $0x1c8] sm:$0xff]  ;;  %v9030_v53 = vld [vmem:[%s15119_s7 + $0x1f0] sm:$0xff] }
 0x763   : > { %v12543_v28 = vpack.c.bf16 %v8993_v14, %v8992_v61  ;;  %v8976_v29 = vld [vmem:[%s15119_s7 + $0x40] sm:$0xff] }
 0x764   : > { %12446 = vmatpush1.bf16.msra.mxu0 %v12445_v39  ;;  %v12559_v39 = vpack.c.bf16 %v9017_v7, %v9016_v43  ;;  %v8669_v26 = vsel %vm757_vm0, %v8667_v23, %v8668_v27  ;;  %v8977_v43 = vld [vmem:[%s15119_s7 + $0x48] sm:$0xff]  ;;  %v9027_v23 = vld [vmem:[%s15119_s7 + $0x1d8] sm:$0xff]  ;;  %vm9427_vm0 = vcmask 523264  }
 0x765   : > { %12510 = vmatpush1.bf16.msra.mxu1 %v12509_v58  ;;  %12448 = vmatprep.subr.bf16.mxu0 %v12447_v48  ;;  %v9000_v58 = vld [vmem:[%s15119_s7 + $0x100] sm:$0xff]  ;;  %v9001_v48 = vld [vmem:[%s15119_s7 + $0x108] sm:$0xff]  ;;  %v12545_v27 = vpack.c.bf16 %v8977_v43, %v8976_v29 }
 0x766   : > { %12512 = vmatprep.subr.bf16.mxu1 %v12511_v2  ;;  %v12561_v49 = vpack.c.bf16 %v9001_v48, %v9000_v58  ;;  %v8986_v2 = vld [vmem:[%s15119_s7 + $0x90] sm:$0xff] }
 0x767   : > { %v12531_v36 = vpack.c.bf16 %v8987_v11, %v8986_v2  ;;  %v8978_v48 = vld [vmem:[%s15119_s7 + $0x50] sm:$0xff]  ;;  %v9011_v2 = vld [vmem:[%s15119_s7 + $0x158] sm:$0xff]  ;;  %v8996_v11 = vld [vmem:[%s15119_s7 + $0xe0] sm:$0xff] }
 0x768   : > { %12450 = vmatpush1.bf16.msra.mxu0 %v12449_v51  ;;  %v8971_v51 = vld [vmem:[%s15119_s7 + $0x18] sm:$0xff] }
 0x769   : > { %12514 = vmatpush1.bf16.msra.mxu1 %v12513_v38  ;;  %12452 = vmatprep.subr.bf16.mxu0 %v12451_v62  ;;  %v12563_v38 = vpack.c.bf16 %v9019_v30, %v9018_v50  ;;  %v12533_v62 = vpack.c.bf16 %v8971_v51, %v8970_v37  ;;  %v8997_v50 = vld [vmem:[%s15119_s7 + $0xe8] sm:$0xff] }
 0x76a   : > { %12516 = vmatprep.subr.bf16.mxu1 %v12515_v0  ;;  %v12565_v0 = vpack.c.bf16 %v9003_v25, %v9002_v33  ;;  %v9029_v30 = vld [vmem:[%s15119_s7 + $0x1e8] sm:$0xff]  ;;  %v9012_v25 = vld [vmem:[%s15119_s7 + $0x160] sm:$0xff] }
 0x76b   : > { %v8981_v33 = vld [vmem:[%s15119_s7 + $0x68] sm:$0xff] }
 0x76c   : > { %12454 = vmatpush1.bf16.msra.mxu0 %v12453_v42  ;;  %v8972_v42 = vld [vmem:[%s15119_s7 + $0x20] sm:$0xff] }
 0x76d   : > { %12518 = vmatpush1.bf16.msra.mxu1 %v12517_v44  ;;  %12456 = vmatprep.subr.bf16.mxu0 %v12455_v52  ;;  %v8973_v44 = vld [vmem:[%s15119_s7 + $0x28] sm:$0xff]  ;;  %v9004_v52 = vld [vmem:[%s15119_s7 + $0x120] sm:$0xff] }
 0x76e   : > { %12520 = vmatprep.subr.bf16.mxu1 %v12519_v18  ;;  %v12537_v20 = vpack.c.bf16 %v8973_v44, %v8972_v42  ;;  %v8991_v18 = vld [vmem:[%s15119_s7 + $0xb8] sm:$0xff]  ;;  %v12569_v16 = vpack.c.bf16 %v9005_v34, %v9004_v52  ;;  %v12555_v44 = vpack.c.bf16 %v8999_v40, %v8998_v31  ;;  %v8982_v52 = vld [vmem:[%s15119_s7 + $0x70] sm:$0xff] }
 0x76f   : > { %v12539_v3 = vpack.c.bf16 %v8991_v18, %v8990_v21  ;;  %v9014_v34 = vld [vmem:[%s15119_s7 + $0x170] sm:$0xff]  ;;  %v9015_v18 = vld [vmem:[%s15119_s7 + $0x178] sm:$0xff] }
 0x770   : > { %12458 = vmatpush1.bf16.msra.mxu0 %v12457_v45  ;;  %v12571_v45 = vpack.c.bf16 %v9023_v57, %v9022_v9  ;;  %v9080_v9 = vld [vmem:[%s15119_s7 + $0x380] sm:$0xff]  ;;  %v9081_v57 = vld [vmem:[%s15119_s7 + $0x388] sm:$0xff] }
 0x771   : > { %12522 = vmatpush1.bf16.msra.mxu1 %v12521_v47  ;;  %12460 = vmatprep.subr.bf16.mxu0 %v12459_v60  ;;  %v8975_v47 = vld [vmem:[%s15119_s7 + $0x38] sm:$0xff]  ;;  %v9006_v60 = vld [vmem:[%s15119_s7 + $0x130] sm:$0xff] }
 0x772   : > { %12524 = vmatprep.subr.bf16.mxu1 %v12523_v19  ;;  %v12541_v54 = vpack.c.bf16 %v8975_v47, %v8974_v13  ;;  %v9024_v19 = vld [vmem:[%s15119_s7 + $0x1c0] sm:$0xff]  ;;  %v12573_v35 = vpack.c.bf16 %v9007_v22, %v9006_v60  ;;  %v12623_v60 = vpack.c.bf16 %v9081_v57, %v9080_v9  ;;  %v8821_v22 = vld [vmem:[#allocation14] sm:$0xf]  ;;  %v9033_v9 = vld [vmem:[%s15119_s7 + $0x208] sm:$0xff] }
 0x773   : > { %v12575_v7 = vpack.c.bf16 %v9025_v56, %v9024_v19  ;;  %v8834_v61 = vrot.slane %v8821_v22, %v14121_v10  ;;  %v8830_v14 = vrot.slane %v8821_v22, %v14124_v12  ;;  %v8838_v19 = vrot.slane %v8821_v22, %v14127_v24  ;;  %v9064_v57 = vld [vmem:[%s15119_s7 + $0x300] sm:$0xff] }
 0x774   : > { %12462 = vmatpush1.bf16.msra.mxu0 %v12461_v6  ;;  %v9008_v6 = vld [vmem:[%s15119_s7 + $0x140] sm:$0xff] }
 0x775   : > { %12526 = vmatpush1.bf16.msra.mxu1 %v12525_v4  ;;  %12528 = vmatprep.subr.bf16.mxu0 %v12527_v59  ;;  %v9009_v4 = vld [vmem:[%s15119_s7 + $0x148] sm:$0xff]  ;;  %v8994_v59 = vld [vmem:[%s15119_s7 + $0xd0] sm:$0xff] }
 0x776   : > { %12560 = vmatprep.subr.bf16.mxu1 %v12559_v39  ;;  %v12577_v39 = vpack.c.bf16 %v9009_v4, %v9008_v6  ;;  %v12547_v58 = vpack.c.bf16 %v8995_v41, %v8994_v59 }
 0x777   : > { %8740 = vmatmul.mubr.f32.vlgmr.msra.gmra.mrb[20].mxu0 %v8669_v26 }
 0x778   : > { %8811 = vmatmul.mubr.f32.vlgmr.msra.gmra.mrb[20].mxu1 %v8669_v26  ;;  %12530 = vmatpush3.bf16.msra.mxu0 %v12529_v17  ;;  %v8979_v17 = vld [vmem:[%s15119_s7 + $0x58] sm:$0xff]  ;;  %v12579_v26 = vpack.c.bf16 %v9027_v23, %v9026_v1 }
 0x779   : > { %12562 = vmatpush3.bf16.msra.mxu1 %v12561_v49  ;;  %12532 = vmatprep.subr.bf16.mxu0 %v12531_v36  ;;  %v9010_v49 = vld [vmem:[%s15119_s7 + $0x150] sm:$0xff]  ;;  %v9028_v36 = vld [vmem:[%s15119_s7 + $0x1e0] sm:$0xff]  ;;  %v12549_v37 = vpack.c.bf16 %v8979_v17, %v8978_v48 }
 0x77a   : > { %12564 = vmatprep.subr.bf16.mxu1 %v12563_v38  ;;  %v12581_v51 = vpack.c.bf16 %v9011_v2, %v9010_v49  ;;  %v12551_v38 = vpack.c.bf16 %v8997_v50, %v8996_v11  ;;  %v12583_v63 = vpack.c.bf16 %v9029_v30, %v9028_v36 }
 0x77c   : > { %12534 = vmatpush3.bf16.msra.mxu0 %v12533_v62  ;;  %v8980_v62 = vld [vmem:[%s15119_s7 + $0x60] sm:$0xff] }
 0x77d   : > { %12566 = vmatpush3.bf16.msra.mxu1 %v12565_v0  ;;  %12536 = vmatprep.subr.bf16.mxu0 %v12535_v55  ;;  %v9013_v0 = vld [vmem:[%s15119_s7 + $0x168] sm:$0xff]  ;;  %v9031_v55 = vld [vmem:[%s15119_s7 + $0x1f8] sm:$0xff] }
 0x77e   : > { %12568 = vmatprep.subr.bf16.mxu1 %v12567_v15  ;;  %v12553_v15 = vpack.c.bf16 %v8981_v33, %v8980_v62  ;;  %v12585_v42 = vpack.c.bf16 %v9013_v0, %v9012_v25  ;;  %v12587_v21 = vpack.c.bf16 %v9031_v55, %v9030_v53  ;;  %v15172_v0 = vld [vmem:[#allocation31_spill] sm:$0xff] }
 0x780   : > { %12538 = vmatpush3.bf16.msra.mxu0 %v12537_v20  ;;  %v8983_v20 = vld [vmem:[%s15119_s7 + $0x78] sm:$0xff] }
 0x781   : > { %12570 = vmatpush3.bf16.msra.mxu1 %v12569_v16  ;;  %12540 = vmatprep.subr.bf16.mxu0 %v12539_v3  ;;  %v9048_v16 = vld [vmem:[%s15119_s7 + $0x280] sm:$0xff]  ;;  %v9049_v3 = vld [vmem:[%s15119_s7 + $0x288] sm:$0xff]  ;;  %v12557_v13 = vpack.c.bf16 %v8983_v20, %v8982_v52  ;;  %v15173_v20 = vlaneseq }
 0x782   : > { %12572 = vmatprep.subr.bf16.mxu1 %v12571_v45  ;;  %v12589_v45 = vpack.c.bf16 %v9015_v18, %v9014_v34  ;;  %v12591_v47 = vpack.c.bf16 %v9049_v3, %v9048_v16  ;;  %v9032_v3 = vld [vmem:[%s15119_s7 + $0x200] sm:$0xff] }
 0x783   : > { %vm8934_vm14 = vcmp.lt.s32.totalorder %v15173_v20, 256 }
 0x784   : > { %12542 = vmatpush3.bf16.msra.mxu0 %v12541_v54  ;;  %v8826_v54 = vrot.slane %v8821_v22, %v14116_v8  ;;  %v12593_v22 = vpack.c.bf16 %v9033_v9, %v9032_v3  ;;  %v9059_v3 = vld [vmem:[%s15119_s7 + $0x2d8] sm:$0xff]  ;;  %v9090_v9 = vld [vmem:[%s15119_s7 + $0x3d0] sm:$0xff] }
 0x785   : > { %12574 = vmatpush3.bf16.msra.mxu1 %v12573_v35  ;;  %12544 = vmatprep.subr.bf16.mxu0 %v12543_v28 }
 0x786   : > { %12576 = vmatprep.subr.bf16.mxu1 %v12575_v7 }
 0x788   : > { %12546 = vmatpush3.bf16.msra.mxu0 %v12545_v27 }
 0x789   : > { %12578 = vmatpush3.bf16.msra.mxu1 %v12577_v39  ;;  %12548 = vmatprep.subr.bf16.mxu0 %v12547_v58  ;;  %v13357_v58 = vmov 1966171168  }
 0x78a   : > { %12580 = vmatprep.subr.bf16.mxu1 %v12579_v26  ;;  %v8925_v48 = vunpack.c.l.s4 %v13357_v58 }
 0x78c   : > { %12550 = vmatpush3.bf16.msra.mxu0 %v12549_v37  ;;  %v8926_v36 = vunpack.c.0.s8 %v8925_v48  ;;  %v9036_v48 = vld [vmem:[%s15119_s7 + $0x220] sm:$0xff] }
 0x78d   : > { %12582 = vmatpush3.bf16.msra.mxu1 %v12581_v51  ;;  %12552 = vmatprep.subr.bf16.mxu0 %v12551_v38 }
 0x78e   : > { %12584 = vmatprep.subr.bf16.mxu1 %v12583_v63  ;;  %v8929_v31 = vsub.s32 %v8926_v36, %v15172_v0  ;;  %v9055_v36 = vld [vmem:[%s15119_s7 + $0x2b8] sm:$0xff] }
 0x790   : > { %12554 = vmatpush3.bf16.msra.mxu0 %v12553_v15 }
 0x791   : > { %12586 = vmatpush3.bf16.msra.mxu1 %v12585_v42  ;;  %12556 = vmatprep.subr.bf16.mxu0 %v12555_v44 }
 0x792   : > { %12588 = vmatprep.subr.bf16.mxu1 %v12587_v21 }
 0x794   : > { %12558 = vmatpush3.bf16.msra.mxu0 %v12557_v13  ;;  %v9065_v13 = vld [vmem:[%s15119_s7 + $0x308] sm:$0xff] }
 0x795   : > { %12590 = vmatpush3.bf16.msra.mxu1 %v12589_v45  ;;  %12592 = vmatprep.subr.bf16.mxu0 %v12591_v47  ;;  %v9050_v45 = vld [vmem:[%s15119_s7 + $0x290] sm:$0xff]  ;;  %v9051_v47 = vld [vmem:[%s15119_s7 + $0x298] sm:$0xff] }
 0x796   : > { %12624 = vmatprep.subr.bf16.mxu1 %v12623_v60 }
 0x84a   : > { %v8741_v35 = vpop.f32.mrb[20].mxu0 }
 0x84b   : > { %v8843_v28 = vadd.f32 %v8826_v54, %v8741_v35  ;;  %v8812_v56 = vpop.f32.mrb[20].mxu1  ;;  %v8743_v29 = vpop.f32.mrb[21].mxu0  ;;  %v12625_v54 = vpack.c.bf16 %v9065_v13, %v9064_v57  ;;  %v9091_v57 = vld [vmem:[%s15119_s7 + $0x3d8] sm:$0xff] }
 0x84c   : > { %v8845_v43 = vadd.f32 %v8834_v61, %v8812_v56  ;;  %v8844_v7 = vadd.f32 %v8830_v14, %v8743_v29  ;;  %v8814_v6 = vpop.f32.mrb[21].mxu1  ;;  %v9082_v61 = vld [vmem:[%s15119_s7 + $0x390] sm:$0xff]  ;;  %v9083_v14 = vld [vmem:[%s15119_s7 + $0x398] sm:$0xff] }
 0x84d   : > { %v8846_v4 = vadd.f32 %v8838_v19, %v8814_v6  ;;  %v9034_v29 = vld [vmem:[%s15119_s7 + $0x210] sm:$0xff]  ;;  %v9053_v6 = vld [vmem:[%s15119_s7 + $0x2a8] sm:$0xff] }
 0x84e   : > { %v8851_v59 = vcombine.low %v8843_v28, %v8844_v7  ;;  %v8852_v41 = vcombine.high %v8843_v28, %v8844_v7  ;;  %v12627_v7 = vpack.c.bf16 %v9083_v14, %v9082_v61  ;;  %v12643_v61 = vpack.c.bf16 %v9091_v57, %v9090_v9  ;;  %v9074_v14 = vld [vmem:[%s15119_s7 + $0x350] sm:$0xff] }
 0x84f   : > { %v8853_v1 = vcombine.low %v8845_v43, %v8846_v4  ;;  %v8854_v23 = vcombine.high %v8845_v43, %v8846_v4  ;;  %v9035_v43 = vld [vmem:[%s15119_s7 + $0x218] sm:$0xff]  ;;  %v9084_v4 = vld [vmem:[%s15119_s7 + $0x3a0] sm:$0xff] }
 0x850   : > { %v8861_v27 = vrot.slane %v8851_v59, %v14149_v32  ;;  %v8868_v39 = vrot.slane %v8852_v41, %v14149_v32  ;;  %v9085_v59 = vld [vmem:[%s15119_s7 + $0x3a8] sm:$0xff]  ;;  %v15174_v41 = vsub.s32 5, %v15172_v0 }
 0x851   : > { %v8875_v17 = vrot.slane %v8853_v1, %v14149_v32  ;;  %v8882_v49 = vrot.slane %v8854_v23, %v14149_v32  ;;  %v15175_v23 = vsub.s32 7, %v15172_v0  ;;  %v9070_v0 = vld [vmem:[%s15119_s7 + $0x330] sm:$0xff] }
 0x853   : > { %v8883_v26 = vcombine.low %v8861_v27, %v8875_v17  ;;  %v8884_v2 = vcombine.high %v8861_v27, %v8875_v17  ;;  %v8885_v11 = vcombine.low %v8868_v39, %v8882_v49  ;;  %v8886_v50 = vcombine.high %v8868_v39, %v8882_v49  ;;  %v9037_v17 = vld [vmem:[%s15119_s7 + $0x228] sm:$0xff] }
 0x854   : > { %v12597_v39 = vpack.c.bf16 %v9035_v43, %v9034_v29  ;;  %v9093_v29 = vld [vmem:[%s15119_s7 + $0x3e8] sm:$0xff] }
 0x855   : > { %v9831_v30 = vrot.slane %v8883_v26, 9  ;;  %v9832_v37 = vrot.slane %v8884_v2, 9  ;;  %v9833_v51 = vrot.slane %v8885_v11, 9  ;;  %v9834_v38 = vrot.slane %v8886_v50, 9 }
 0x857   : > { %v8903_v62 = vmax.f32 %v8883_v26, %v9831_v30  ;;  %v8904_v33 = vmax.f32 %v8884_v2, %v9832_v37  ;;  %v8905_v25 = vmax.f32 %v8885_v11, %v9833_v51  ;;  %v8906_v63 = vmax.f32 %v8886_v50, %v9834_v38  ;;  %v9068_v2 = vld [vmem:[%s15119_s7 + $0x320] sm:$0xff]  ;;  %v9069_v11 = vld [vmem:[%s15119_s7 + $0x328] sm:$0xff]  ;;  %v9054_v50 = vld [vmem:[%s15119_s7 + $0x2b0] sm:$0xff] }
 0x858   : > { %v12631_v26 = vpack.c.bf16 %v9085_v59, %v9084_v4  ;;  %v9086_v30 = vld [vmem:[%s15119_s7 + $0x3b0] sm:$0xff]  ;;  %v9087_v37 = vld [vmem:[%s15119_s7 + $0x3b8] sm:$0xff]  ;;  %v12601_v51 = vpack.c.bf16 %v9037_v17, %v9036_v48  ;;  %v12633_v38 = vpack.c.bf16 %v9069_v11, %v9068_v2  ;;  %v9077_v4 = vld [vmem:[%s15119_s7 + $0x368] sm:$0xff] }
 0x859   : > { %v8911_v40 = vrot.slane %v8903_v62, 4  ;;  %v8912_v53 = vrot.slane %v8904_v33, 4  ;;  %v8913_v55 = vrot.slane %v8905_v25, 4  ;;  %v8914_v15 = vrot.slane %v8906_v63, 4  ;;  %v9062_v59 = vld [vmem:[%s15119_s7 + $0x2f0] sm:$0xff]  ;;  %v9079_v2 = vld [vmem:[%s15119_s7 + $0x378] sm:$0xff] }
 0x85b   : > { %v8919_v32 = vmax.f32 %v8903_v62, %v8911_v40  ;;  %v8920_v42 = vmax.f32 %v8904_v33, %v8912_v53  ;;  %v8921_v44 = vmax.f32 %v8905_v25, %v8913_v55  ;;  %v8922_v52 = vmax.f32 %v8906_v63, %v8914_v15  ;;  %v9038_v62 = vld [vmem:[%s15119_s7 + $0x230] sm:$0xff]  ;;  %v9039_v33 = vld [vmem:[%s15119_s7 + $0x238] sm:$0xff]  ;;  %v9056_v40 = vld [vmem:[%s15119_s7 + $0x2c0] sm:$0xff] }
 0x85c   : > { %v12603_v25 = vpack.c.bf16 %v9055_v36, %v9054_v50  ;;  %v12635_v63 = vpack.c.bf16 %v9087_v37, %v9086_v30  ;;  %v9057_v53 = vld [vmem:[%s15119_s7 + $0x2c8] sm:$0xff]  ;;  %v9088_v55 = vld [vmem:[%s15119_s7 + $0x3c0] sm:$0xff] }
 0x85d   : > { %v8930_v34 = vrot.slane %v8919_v32, %v8929_v31  ;;  %v8944_v21 = vrot.slane %v8920_v42, %v8929_v31  ;;  %v8954_v18 = vrot.slane %v8921_v44, %v8929_v31  ;;  %v8964_v16 = vrot.slane %v8922_v52, %v8929_v31  ;;  %v9071_v31 = vld [vmem:[%s15119_s7 + $0x338] sm:$0xff]  ;;  %v9089_v15 = vld [vmem:[%s15119_s7 + $0x3c8] sm:$0xff]  ;;  %v9040_v44 = vld [vmem:[%s15119_s7 + $0x240] sm:$0xff] }
 0x85e   : > { %v12605_v32 = vpack.c.bf16 %v9039_v33, %v9038_v62  ;;  %v12637_v42 = vpack.c.bf16 %v9071_v31, %v9070_v0  ;;  %v9041_v52 = vld [vmem:[%s15119_s7 + $0x248] sm:$0xff]  ;;  %v12607_v20 = vpack.c.bf16 %v9057_v53, %v9056_v40  ;;  %v9418_v37 = vld [vmem:[%s15121_s9] sm:$0xff]  ;;  %v13358_v62 = vmov 0.0|0.0   ;;  %v9425_v31 = vld [vmem:[%s15121_s9 + $0x38] sm:$0xff] }
 0x85f   : > { %8936 = vst.msk [vmem:[#allocation4] sm:$0x3] %vm8934_vm14, %v8930_v34  ;;  %8946 = vst.msk [vmem:[#allocation4 + $0x2] sm:$0x3] %vm8934_vm14, %v8944_v21  ;;  %v12639_v34 = vpack.c.bf16 %v9089_v15, %v9088_v55  ;;  %v9072_v21 = vld [vmem:[%s15119_s7 + $0x340] sm:$0xff]  ;;  %v12609_v13 = vpack.c.bf16 %v9041_v52, %v9040_v44  ;;  %v15176_v40 = vmov 0.0  }
 0x860   : > { %8956 = vst.msk [vmem:[#allocation4 + $0x4] sm:$0x3] %vm8934_vm14, %v8954_v18  ;;  %8966 = vst.msk [vmem:[#allocation4 + $0x6] sm:$0x3] %vm8934_vm14, %v8964_v16  ;;  %v9073_v18 = vld [vmem:[%s15119_s7 + $0x348] sm:$0xff]  ;;  %v9058_v16 = vld [vmem:[%s15119_s7 + $0x2d0] sm:$0xff] }
 0x861   : > { %v9422_v33 = vld [vmem:[%s15121_s9 + $0x20] sm:$0xff] }
 0x867   : > { %v14858_v60 = vld [vmem:[#allocation4] sm:$0xff] }
 0x868   : > { %v9105_v19 = vrot.slane %v14858_v60, %v14124_v12  ;;  %v9113_v35 = vrot.slane %v14858_v60, %v14127_v24  ;;  %v9101_v28 = vrot.slane %v14858_v60, %v14116_v8  ;;  %v9109_v56 = vrot.slane %v14858_v60, %v14121_v10  ;;  %v9066_v12 = vld [vmem:[%s15119_s7 + $0x310] sm:$0xff]  ;;  %v9067_v24 = vld [vmem:[%s15119_s7 + $0x318] sm:$0xff]  ;;  %v9052_v8 = vld [vmem:[%s15119_s7 + $0x2a0] sm:$0xff] }
 0x869   : > { %v12595_v10 = vpack.c.bf16 %v9051_v47, %v9050_v45  ;;  %v9121_v1 = vrot.slane %v14858_v60, %v15174_v41  ;;  %v9129_v27 = vrot.slane %v14858_v60, %v15175_v23  ;;  %v12629_v58 = vpack.c.bf16 %v9067_v24, %v9066_v12  ;;  %v9042_v47 = vld [vmem:[%s15119_s7 + $0x250] sm:$0xff]  ;;  %v9044_v24 = vld [vmem:[%s15119_s7 + $0x260] sm:$0xff]  ;;  %v9063_v41 = vld [vmem:[%s15119_s7 + $0x2f8] sm:$0xff] }
 0x86a   : > { %9202 = vmatprep.mubr.f32.mxu0 %v9105_v19  ;;  %9272 = vmatprep.mubr.f32.mxu1 %v9113_v35  ;;  %v12599_v49 = vpack.c.bf16 %v9053_v6, %v9052_v8  ;;  %v12641_v45 = vpack.c.bf16 %v9073_v18, %v9072_v21  ;;  %v9075_v19 = vld [vmem:[%s15119_s7 + $0x358] sm:$0xff]  ;;  %v9060_v35 = vld [vmem:[%s15119_s7 + $0x2e0] sm:$0xff]  ;;  %v9045_v8 = vld [vmem:[%s15119_s7 + $0x268] sm:$0xff]  ;;  %v12619_v48 = vpack.c.bf16 %v9063_v41, %v9062_v59 }
 0x86b   : > { %9203 = vmatmul.mubr.f32.vlgmr.msra.gmra.mrb[22].mxu0 %v9101_v28  ;;  %9273 = vmatmul.mubr.f32.vlgmr.msra.gmra.mrb[22].mxu1 %v9109_v56  ;;  %v9061_v28 = vld [vmem:[%s15119_s7 + $0x2e8] sm:$0xff]  ;;  %v9092_v56 = vld [vmem:[%s15119_s7 + $0x3e0] sm:$0xff]  ;;  %v12645_v12 = vpack.c.bf16 %v9075_v19, %v9074_v14  ;;  %v9095_v23 = vld [vmem:[%s15119_s7 + $0x3f8] sm:$0xff]  ;;  %v9117_v36 = vrot.slane %v14858_v60, %v14173_v46  ;;  %v9125_v30 = vrot.slane %v14858_v60, %v14178_v5 }
 0x86c   : > { %12594 = vmatpush3.bf16.msra.mxu0 %v12593_v22  ;;  %12626 = vmatpush3.bf16.msra.mxu1 %v12625_v54  ;;  %v9043_v22 = vld [vmem:[%s15119_s7 + $0x258] sm:$0xff]  ;;  %v12611_v54 = vpack.c.bf16 %v9059_v3, %v9058_v16  ;;  %v9076_v6 = vld [vmem:[%s15119_s7 + $0x360] sm:$0xff] }
 0x86d   : > { %9342 = vmatprep.mubr.f32.mxu0 %v9121_v1  ;;  %9412 = vmatprep.mubr.f32.mxu1 %v9129_v27  ;;  %v12613_v43 = vpack.c.bf16 %v9043_v22, %v9042_v47  ;;  %v9094_v1 = vld [vmem:[%s15119_s7 + $0x3f0] sm:$0xff]  ;;  %v12617_v27 = vpack.c.bf16 %v9045_v8, %v9044_v24  ;;  %v9421_v5 = vld [vmem:[%s15121_s9 + $0x18] sm:$0xff] }
 0x86e   : > { %12596 = vmatprep.subr.bf16.mxu0 %v12595_v10  ;;  %12628 = vmatprep.subr.bf16.mxu1 %v12627_v7  ;;  %v12615_v10 = vpack.c.bf16 %v9061_v28, %v9060_v35  ;;  %v12647_v7 = vpack.c.bf16 %v9093_v29, %v9092_v56  ;;  %v12651_v17 = vpack.c.bf16 %v9095_v23, %v9094_v1  ;;  %v9426_v22 = vld [vmem:[#allocation17] sm:$0x1] }
 0x870   : > { %12598 = vmatpush3.bf16.msra.mxu0 %v12597_v39  ;;  %12630 = vmatpush3.bf16.msra.mxu1 %v12629_v58  ;;  %v12649_v39 = vpack.c.bf16 %v9077_v4, %v9076_v6  ;;  %v9046_v58 = vld [vmem:[%s15119_s7 + $0x270] sm:$0xff] }
 0x871   : > { %12600 = vmatprep.subr.bf16.mxu0 %v12599_v49  ;;  %12632 = vmatprep.subr.bf16.mxu1 %v12631_v26  ;;  %v9047_v49 = vld [vmem:[%s15119_s7 + $0x278] sm:$0xff]  ;;  %v9078_v26 = vld [vmem:[%s15119_s7 + $0x370] sm:$0xff] }
 0x872   : > { %v12621_v11 = vpack.c.bf16 %v9047_v49, %v9046_v58  ;;  %v12653_v50 = vpack.c.bf16 %v9079_v2, %v9078_v26 }
 0x874   : > { %12602 = vmatpush3.bf16.msra.mxu0 %v12601_v51  ;;  %12634 = vmatpush3.bf16.msra.mxu1 %v12633_v38  ;;  %v9419_v51 = vld [vmem:[%s15121_s9 + $0x8] sm:$0xff]  ;;  %v9420_v38 = vld [vmem:[%s15121_s9 + $0x10] sm:$0xff] }
 0x875   : > { %12604 = vmatprep.subr.bf16.mxu0 %v12603_v25  ;;  %12636 = vmatprep.subr.bf16.mxu1 %v12635_v63  ;;  %v12656_v46 = vpack.c.bf16 %v9419_v51, %v9418_v37  ;;  %v12659_v60 = vpack.c.bf16 %v9421_v5, %v9420_v38  ;;  %v9423_v25 = vld [vmem:[%s15121_s9 + $0x28] sm:$0xff]  ;;  %v9424_v63 = vld [vmem:[%s15121_s9 + $0x30] sm:$0xff] }
 0x876   : > { %v12662_v0 = vpack.c.bf16 %v9423_v25, %v9422_v33  ;;  %v12665_v53 = vpack.c.bf16 %v9425_v31, %v9424_v63 }
 0x878   : > { %12606 = vmatpush3.bf16.msra.mxu0 %v12605_v32  ;;  %12638 = vmatpush3.bf16.msra.mxu1 %v12637_v42  ;;  %v9096_v32 = vld [vmem:[#allocation16] sm:$0x1] }
 0x879   : > { %12608 = vmatprep.subr.bf16.mxu0 %v12607_v20  ;;  %12640 = vmatprep.subr.bf16.mxu1 %v12639_v34 }
 0x87c   : > { %12610 = vmatpush3.bf16.msra.mxu0 %v12609_v13  ;;  %12642 = vmatpush3.bf16.msra.mxu1 %v12641_v45 }
 0x87d   : > { %12612 = vmatprep.subr.bf16.mxu0 %v12611_v54  ;;  %12644 = vmatprep.subr.bf16.mxu1 %v12643_v61 }
 0x880   : > { %12614 = vmatpush3.bf16.msra.mxu0 %v12613_v43  ;;  %12646 = vmatpush3.bf16.msra.mxu1 %v12645_v12 }
 0x881   : > { %12616 = vmatprep.subr.bf16.mxu0 %v12615_v10  ;;  %12648 = vmatprep.subr.bf16.mxu1 %v12647_v7 }
 0x884   : > { %12618 = vmatpush3.bf16.msra.mxu0 %v12617_v27  ;;  %12650 = vmatpush3.bf16.msra.mxu1 %v12649_v39 }
 0x885   : > { %12620 = vmatprep.subr.bf16.mxu0 %v12619_v48  ;;  %12652 = vmatprep.subr.bf16.mxu1 %v12651_v17 }
 0x888   : > { %12622 = vmatpush3.bf16.msra.mxu0 %v12621_v11  ;;  %12654 = vmatpush3.bf16.msra.mxu1 %v12653_v50 }
 0x889   : > { %12655 = vmatprep.subr.bf16.mxu0 %v13358_v62 }
 0x88b   : > { %9343 = vmatmul.mubr.f32.vlgmr.msra.gmra.mrb[24].mxu0 %v9117_v36  ;;  %9413 = vmatmul.mubr.f32.vlgmr.msra.gmra.mrb[24].mxu1 %v9125_v30 }
 0x88c   : > { %12657 = vmatpush3.bf16.msra.mxu0 %v12656_v46  ;;  %10004 = vmatprep.mubr.msk.f32.mxu0 %vm13359_vm15, %v15176_v40 }
 0x88d   : > { %12658 = vmatprep.subr.bf16.mxu0 %v13358_v62 }
 0x890   : > { %12660 = vmatpush3.bf16.msra.mxu0 %v12659_v60 }
 0x891   : > { %12661 = vmatprep.subr.bf16.mxu0 %v13358_v62 }
 0x894   : > { %12663 = vmatpush3.bf16.msra.mxu0 %v12662_v0 }
 0x895   : > { %12664 = vmatprep.subr.bf16.mxu0 %v13358_v62 }
 0x898   : > { %12666 = vmatpush3.bf16.msra.mxu0 %v12665_v53 }
 0x93e   : > { %v9871_v55 = vpop.f32.mrb[22].mxu0  ;;  %v9906_v15 = vpop.f32.mrb[22].mxu1 }
 0x93f   : > { %v9872_v42 = vpop.f32.mrb[23].mxu0  ;;  %v9907_v44 = vpop.f32.mrb[23].mxu1 }
 0x940   : > { %v9873_v52 = vadd.f32 %v9872_v42, %v9871_v55  ;;  %v9908_v20 = vadd.f32 %v9907_v44, %v9906_v15 }
 0x942   : > { %v9205_v34 = vadd.f32 %v9873_v52, %v9096_v32 }
 0x944   : > { %v9275_v21 = vadd.f32 %v9908_v20, %v9205_v34 }
 0x95e   : > { %v9941_v18 = vpop.f32.mrb[24].mxu0  ;;  %v9976_v16 = vpop.f32.mrb[24].mxu1 }
 0x95f   : > { %v9942_v3 = vpop.f32.mrb[25].mxu0  ;;  %v9977_v9 = vpop.f32.mrb[25].mxu1 }
 0x960   : > { %v9943_v57 = vadd.f32 %v9942_v3, %v9941_v18  ;;  %v9978_v13 = vadd.f32 %v9977_v9, %v9976_v16 }
 0x962   : > { %v9345_v45 = vadd.f32 %v9943_v57, %v9275_v21 }
 0x964   : > { %v9415_v47 = vadd.f32 %v9978_v13, %v9345_v45 }
 0x966   : > { %10005 = vmatmul.mubr.msk.f32.vlgmr.msra.gmra.mrb[26].mxu0 %vm9427_vm0, %v9415_v47 }
 0xa39   : > { %v9497_v54 = vpop.f32.mrb[26].mxu0 }
 0xa3a   : > { %v9498_v61 = vadd.f32 %v9497_v54, %v9426_v22  ;;  %v10006_v14 = vpop.f32.mrb[27].mxu0 }
 0xa3c   : > { %9502 = vst.msk [vmem:[%s485_s23] sm:$0x1] %vm9501_vm1, %v9498_v61 }
 0xa3d   : > { %13271 = shalt.err (!%p13268_p9)
}
 0xa3e   : > { %s13272_s12 = scalar_lea.hbm %s15070_s14, 16  ;;  %s13276_s19 = scalar_lea.hbm %s15123_s11, 32 }
 0xa3f   : > { %p13273_p12 = scmp.ne.s32.totalorder %s15070_s14, %s13272_s12  ;;  %p13277_p3 = scmp.lt.u32.totalorder %s15070_s14, %s15123_s11 }
 0xa40   : > { %p13278_p4 = scmp.lt.u32.totalorder %s13276_s19, %s13272_s12  ;;  %p13280_p8 = scmp.lt.u32.totalorder %s13272_s12, %s15070_s14 }
 0xa41   : > { %p13274_p10 = pnand %p13273_p12, %p15177_p11 }
 0xa42   : > { %p13279_p7 = por %p13278_p4, %p13277_p3 }
 0xa43   : > { %p13275_p2 = pneg %p13274_p10 }
 0xa44   : > { %p13281_p13 = por %p13280_p8, %p13279_p7 }
 0xa46   : > { %p13282_p1 = pnand %p13281_p13, %p13275_p2 }
 0xa48   : > { %13285 = shalt.err (!%p13282_p1)
}
 0xa49   : > { %12916 = dma.vmem_to_hbm [thread:$0]  (%p15177_p11), %s15072_s16, 16, %s15070_s14, %s9504_s22  }
 0xa4a PF: > { %s15178_s4 = sld [smem:[#allocation26_spill]]  ;;  %s15179_s1 = sld [smem:[#allocation30_spill]] }
 0xa4b   : > { %p12963_p0 = scmp.ge.s32.totalorder %s13340_s20, 2 }
 0xa50   : > { %s9528_s6 = sand.u32 1, %s15178_s4   ;;  %p15180_p6 = scmp.ne.s32.totalorder %s15179_s1, 0 }
 0xa51   : > { %s9529_s28 = scalar_lea.sflag [#allocation7], %s9528_s6 }
 0xa52   : > { %p12944_p5 = pnand %p12963_p0, %p15180_p6 }
 0xa54   : > { %13323 = dma.done.wait (!%p12944_p5), %s9529_s28, 16  }
 0xa55   : > { %13325 = vsyncadd (!%p12944_p5), %s9529_s28, 4294967280  ;;  %s15181_s20 = sld [smem:[#allocation28_spill]]  ;;  %s15182_s23 = sld [smem:[#allocation27_spill]] }
 0xa56   : > { %s15183_s19 = sld [smem:[#allocation29_spill]]  ;;  %s15184_s17 = smov %s13332_s18 }
 0xa5b   : > { %p26_p9 = scmp.ge.s32.totalorder %s15181_s20, 4   ;;  %s15185_s18 = smov %s15182_s23 }
 0xa5d   :  { %28 = sbr.rel (!%p26_p9) target bundleno = 13 (0xd), region = 144 }
 0xa64   :  { %9533 = vsyncpa [#allocation6], 1 }
 0xa65   :  { %9535 = vsyncpa [#allocation6 + $0x1], 1 }
 0xa66   :  { %9536 = vsyncpa [#allocation9], 1 }
 0xa67   :  { %9537 = vsyncpa [#allocation12], 1 }
 0xa68   :  { %9538 = vsyncpa [#allocation15], 1 }
 0xa69   :  { %9539 = vsyncpa [#allocation18], 1 }
 0xa6a   :  { %9540 = vsyncpa [#allocation7], 1 }
 0xa6b   :  { %9542 = vsyncpa [#allocation7 + $0x1], 1 }

</bundles_post_ra>
